<compile_context>
chip_gen: v7x
topology: tpu7x:2x2x1
jax: 0.10.0
libtpu: 0.0.40
codegen_flags: <defaults>
</compile_context>

<pallas_src>
import jax
import jax.numpy as jnp
import numpy as np
from jax.experimental import pallas as pl
from jax.experimental.pallas import tpu as pltpu

_BN_EPS = 1e-5


def _round_up(x, m):
    return (x + m - 1) // m * m


def _cdiv(a, b):
    return (a + b - 1) // b


def _vmem_limit_bytes():
    """Generation-aware VMEM budget: ~3/4 of physical VMEM, conservatively capped."""
    cap = 64 * 1024 * 1024
    try:
        info = pltpu.get_tpu_info()
        cap = int(getattr(info, "vmem_capacity_bytes", cap) or cap)
    except Exception:
        pass
    return max(16 * 1024 * 1024, min(cap * 3 // 4, 96 * 1024 * 1024))


# -----------------------------------------------------------------------------
# Pass 1: fused 3x3 conv (9 shifted matmuls into a VMEM accumulator) + masked
#         per-tile BN partial statistics.
# -----------------------------------------------------------------------------
def _make_conv_kernel(tap_offsets, TM):
    def kernel(mask_ref, x_ref, w_ref, y_ref, s_ref, acc_ref):
        base = pl.program_id(1) * TM
        for t, off in enumerate(tap_offsets):      # static unroll: 9 MXU pushes
            start = base + off
            if off % 8 == 0:
                start = pl.multiple_of(start, 8)   # sublane-aligned taps
            contrib = jnp.dot(x_ref[pl.ds(start, TM), :], w_ref[t],
                              preferred_element_type=jnp.float32)
            if t == 0:
                acc_ref[...] = contrib             # seed: no zeros init
            else:
                acc_ref[...] += contrib            # ref-accumulate
        acc = acc_ref[...]
        y_ref[...] = acc.astype(y_ref.dtype)
        # Partial BN stats over valid (interior) pixels only.  Use where(), not
        # multiply, so garbage in masked rows (possibly uninitialized halo data
        # for layer 2) can never poison the sums.
        valid = mask_ref[...] > 0.0
        am = jnp.where(valid, acc, 0.0)
        s0 = jnp.sum(am, axis=0, keepdims=True)
        s1 = jnp.sum(am * am, axis=0, keepdims=True)
        s_ref[...] = jnp.concatenate(
            [s0, s1, jnp.zeros((6, s0.shape[1]), jnp.float32)], axis=0)

    return kernel


# -----------------------------------------------------------------------------
# Pass 2: BN scale/shift (+ optional identity residual) + ReLU + zeroing of the
#         pad rows / pad columns so the output is directly the next conv input.
# -----------------------------------------------------------------------------
def _make_apply_kernel(with_residual):
    def kernel(*refs):
        if with_residual:
            mask_ref, y_ref, sc_ref, sh_ref, res_ref, emb_ref, o_ref = refs
        else:
            mask_ref, y_ref, sc_ref, sh_ref, o_ref = refs
        valid = mask_ref[...] > 0.0
        y = y_ref[...].astype(jnp.float32) * sc_ref[...] + sh_ref[...]
        if with_residual:
            # Lane-expand the narrow-channel identity shortcut on the idle MXU:
            # emb is a (C, Cpad) identity-embedding matrix, so this adds
            # exactly `res` to the first C output channels (and 0 elsewhere).
            y = y + jnp.dot(res_ref[...], emb_ref[...],
                            preferred_element_type=jnp.float32)
        y = jnp.maximum(y, 0.0)
        o_ref[...] = jnp.where(valid, y, 0.0).astype(o_ref.dtype)

    return kernel


# -----------------------------------------------------------------------------
# pallas_call wrappers
# -----------------------------------------------------------------------------
def _conv_bn_stats(x_e, w9, mask, *, geo, out_dtype):
    N, GR, TM, OFFI, Wpp, Le, Cpad = (geo[k] for k in
                                      ("N", "GR", "TM", "OFFI", "Wpp", "Le", "Cpad"))
    Cin = x_e.shape[-1]
    base_blk = OFFI // TM
    tap_offsets = [OFFI + (kh - 1) * Wpp + (kw - 1)
                   for kh in range(3) for kw in range(3)]
    M1 = GR * TM
    itm_in = jnp.dtype(x_e.dtype).itemsize
    itm_out = jnp.dtype(out_dtype).itemsize
    cost = pl.CostEstimate(
        flops=2 * N * M1 * 9 * Cin * Cpad,
        transcendentals=0,
        bytes_accessed=int(N * Le * Cin * itm_in + 9 * Cin * Cpad * itm_in
                           + N * M1 * Cpad * itm_out + N * GR * 8 * Cpad * 4
                           + mask.size * 4))
    return pl.pallas_call(
        _make_conv_kernel(tap_offsets, TM),
        out_shape=(jax.ShapeDtypeStruct((N, Le, Cpad), out_dtype),
                   jax.ShapeDtypeStruct((N, GR * 8, Cpad), jnp.float32)),
        grid=(N, GR),
        in_specs=[
            pl.BlockSpec((TM, 1), lambda n, r: (r + 1, 0)),
            pl.BlockSpec((None, Le, Cin), lambda n, r: (n, 0, 0)),   # resident
            pl.BlockSpec((9, Cin, Cpad), lambda n, r: (0, 0, 0)),    # resident
        ],
        out_specs=(
            pl.BlockSpec((None, TM, Cpad), lambda n, r: (n, r + base_blk, 0)),
            pl.BlockSpec((None, 8, Cpad), lambda n, r: (n, r, 0)),
        ),
        scratch_shapes=[pltpu.VMEM((TM, Cpad), jnp.float32)],
        compiler_params=pltpu.CompilerParams(
            dimension_semantics=("parallel", "parallel"),
            vmem_limit_bytes=geo["vmem_limit"]),
        cost_estimate=cost,
    )(mask, x_e, w9)


def _bn_apply(conv_out, scale, shift, mask, residual, emb, *, geo, out_dtype,
              extended_out):
    N, GR, TM, OFFI, Le, Cpad = (geo[k] for k in
                                 ("N", "GR", "TM", "OFFI", "Le", "Cpad"))
    base_blk = OFFI // TM
    with_res = residual is not None
    if extended_out:
        # Also cover one tile of pad rows above/below the image so the output
        # can be consumed directly as the next conv's extended input.
        grid_r = GR + 2
        blk = lambda n, r: (n, r + base_blk - 1, 0)
        mask_blk = lambda n, r: (r, 0)
        out_shape = jax.ShapeDtypeStruct((N, Le, Cpad), out_dtype)
        out_spec = pl.BlockSpec((None, TM, Cpad), blk)
    else:
        grid_r = GR
        blk = lambda n, r: (n, r + base_blk, 0)
        mask_blk = lambda n, r: (r + 1, 0)
        out_shape = jax.ShapeDtypeStruct((N, GR * TM, Cpad), out_dtype)
        out_spec = pl.BlockSpec((None, TM, Cpad), lambda n, r: (n, r, 0))

    in_arrays = [mask, conv_out, scale, shift]
    in_specs = [
        pl.BlockSpec((TM, 1), mask_blk),
        pl.BlockSpec((None, TM, Cpad), blk),
        pl.BlockSpec((1, Cpad), lambda n, r: (0, 0)),
        pl.BlockSpec((1, Cpad), lambda n, r: (0, 0)),
    ]
    if with_res:
        C = residual.shape[-1]
        in_arrays += [residual, emb]
        in_specs += [pl.BlockSpec((None, TM, C), blk),
                     pl.BlockSpec((C, Cpad), lambda n, r: (0, 0))]

    rows = grid_r * TM
    bytes_io = sum(int(a.size) * jnp.dtype(a.dtype).itemsize for a in in_arrays)
    cost = pl.CostEstimate(
        flops=int(N * rows * Cpad *
                  (4 + (2 * residual.shape[-1] if with_res else 0))),
        transcendentals=0,
        bytes_accessed=int(bytes_io + N * rows * Cpad *
                           jnp.dtype(out_dtype).itemsize))
    return pl.pallas_call(
        _make_apply_kernel(with_res),
        out_shape=out_shape,
        grid=(N, grid_r),
        in_specs=in_specs,
        out_specs=out_spec,
        compiler_params=pltpu.CompilerParams(
            dimension_semantics=("parallel", "parallel"),
            vmem_limit_bytes=geo["vmem_limit"]),
        cost_estimate=cost,
    )(*in_arrays)


def _bn_scale_shift(stats, gamma_p, beta_p, count, Cpad):
    st = stats.reshape(-1, 8, Cpad)
    tot0 = jnp.sum(st[:, 0, :], axis=0)
    tot1 = jnp.sum(st[:, 1, :], axis=0)
    mean = tot0 / count
    # NOTE: E[x^2] - mean^2 in f32 is fine at these problem sizes; for very
    # large N*H*W switch to a shifted / Welford-style combination.
    var = jnp.maximum(tot1 / count - mean * mean, 0.0)
    inv = jax.lax.rsqrt(var + _BN_EPS)
    scale = gamma_p * inv
    shift = beta_p - mean * scale
    return scale.reshape(1, Cpad), shift.reshape(1, Cpad)


# -----------------------------------------------------------------------------
# Parameters + forward wrapper
# -----------------------------------------------------------------------------
def init_params(key, in_channels, out_channels):
    assert in_channels == out_channels, "identity shortcut requires in == out"
    ks = jax.random.split(key, 8)
    return {
        "w1": 0.1 * jax.random.normal(ks[0], (3, 3, in_channels, out_channels), jnp.float32),
        "b1": 0.05 * jax.random.normal(ks[1], (out_channels,), jnp.float32),
        "w2": 0.1 * jax.random.normal(ks[2], (3, 3, out_channels, out_channels), jnp.float32),
        "b2": 0.05 * jax.random.normal(ks[3], (out_channels,), jnp.float32),
        "g1": 1.0 + 0.1 * jax.random.normal(ks[4], (out_channels,), jnp.float32),
        "be1": 0.05 * jax.random.normal(ks[5], (out_channels,), jnp.float32),
        "g2": 1.0 + 0.1 * jax.random.normal(ks[6], (out_channels,), jnp.float32),
        "be2": 0.05 * jax.random.normal(ks[7], (out_channels,), jnp.float32),
    }


def residual_forward(x_nchw, params, compute_dtype=jnp.bfloat16):
    x = jnp.transpose(x_nchw, (0, 2, 3, 1)).astype(jnp.float32)  # NCHW -> NHWC
    N, H, W, C = x.shape
    Cout = params["w1"].shape[-1]
    assert C == Cout, "identity shortcut requires in_channels == out_channels"
    Cpad = _round_up(max(Cout, 128), 128)

    # ---- geometry: 8-aligned row pitch, bounded row tiles, extended layout --
    Wpp = _round_up(W + 2, 8)            # padded-row pitch (sublane aligned)
    M1 = H * Wpp                         # conv-output rows per image (interior)
    Hr = 1                               # image rows per tile (divides H)
    for d in range(1, H + 1):
        if H % d == 0 and d * Wpp <= 1024:
            Hr = d
    TM = Hr * Wpp                        # row tile (multiple of Wpp and of 8)
    GR = H // Hr                         # row tiles per image
    OFFI = TM * _cdiv(2 * Wpp + 1, TM)   # interior start row (multiple of TM)
    Le = OFFI + M1 + TM + 8              # extended-layout row count
    geo = dict(N=N, GR=GR, TM=TM, OFFI=OFFI, Wpp=Wpp, Le=Le, Cpad=Cpad,
               vmem_limit=_vmem_limit_bytes())
    count = N * H * W

    # ---- parameters ---------------------------------------------------------
    # Conv weights -> (9, Cin, Cpad), tap major.  Conv biases b1/b2 are dropped
    # (exactly cancelled by training-mode BatchNorm mean subtraction).
    w1 = jnp.pad(params["w1"], ((0, 0), (0, 0), (0, 0), (0, Cpad - Cout)))
    w1 = w1.reshape(9, C, Cpad).astype(compute_dtype)
    w2 = jnp.pad(params["w2"], ((0, 0), (0, 0), (0, Cpad - Cout), (0, Cpad - Cout)))
    w2 = w2.reshape(9, Cpad, Cpad).astype(compute_dtype)
    g1 = jnp.pad(params["g1"].astype(jnp.float32), (0, Cpad - Cout))
    be1 = jnp.pad(params["be1"].astype(jnp.float32), (0, Cpad - Cout))
    g2 = jnp.pad(params["g2"].astype(jnp.float32), (0, Cpad - Cout))
    be2 = jnp.pad(params["be2"].astype(jnp.float32), (0, Cpad - Cout))
    emb = jnp.eye(C, Cpad, dtype=compute_dtype)  # identity lane-expansion

    # ---- precomputed pad-column mask, tiled along with the row tiles --------
    pw = np.arange(M1) % Wpp
    col_mask = ((pw >= 1) & (pw <= W)).astype(np.float32).reshape(M1, 1)
    mask = jnp.asarray(np.concatenate(
        [np.zeros((TM, 1), np.float32), col_mask, np.zeros((TM, 1), np.float32)],
        axis=0))

    # ---- layer-1 conv input in the extended row layout -----------------------
    x_pad = jnp.pad(x, ((0, 0), (1, 1), (1, Wpp - W - 1), (0, 0)))
    x_flat = x_pad.reshape(N, (H + 2) * Wpp, C)
    x_e1 = jnp.pad(x_flat, ((0, 0), (OFFI - Wpp, Le - (OFFI + M1 + Wpp)), (0, 0)))
    x_e1 = x_e1.astype(compute_dtype)

    # ---- layer 1: relu(BN1(conv1(x))) written straight into the extended
    #      layout that conv2 consumes (no XLA pad between the layers) ---------
    conv1, st1 = _conv_bn_stats(x_e1, w1, mask, geo=geo, out_dtype=compute_dtype)
    sc1, sh1 = _bn_scale_shift(st1, g1, be1, count, Cpad)
    y1_e = _bn_apply(conv1, sc1, sh1, mask, None, None, geo=geo,
                     out_dtype=compute_dtype, extended_out=True)

    # ---- layer 2: relu(BN2(conv2(y1)) + x) -----------------------------------
    conv2, st2 = _conv_bn_stats(y1_e, w2, mask, geo=geo, out_dtype=compute_dtype)
    sc2, sh2 = _bn_scale_shift(st2, g2, be2, count, Cpad)
    out = _bn_apply(conv2, sc2, sh2, mask, x_e1, emb, geo=geo,
                    out_dtype=jnp.float32, extended_out=False)

    out = out.reshape(N, H, Wpp, Cpad)[:, :, 1:1 + W, :Cout]
    return jnp.transpose(out, (0, 3, 1, 2))  # back to NCHW


# -----------------------------------------------------------------------------
# Pure-JAX reference (mirrors the PyTorch forward, training-mode BN)
# -----------------------------------------------------------------------------
def _reference(x_nchw, params):
    x = jnp.transpose(x_nchw, (0, 2, 3, 1))

    def conv(x, w_hwio, b):
        y = jax.lax.conv_general_dilated(
            x, w_hwio, window_strides=(1, 1), padding="SAME",
            dimension_numbers=("NHWC", "HWIO", "NHWC"))
        return y + b.reshape(1, 1, 1, -1)

    def bn(y, g, be):
        m = jnp.mean(y, axis=(0, 1, 2), keepdims=True)
        v = jnp.mean(jnp.square(y - m), axis=(0, 1, 2), keepdims=True)
        return (y - m) * jax.lax.rsqrt(v + _BN_EPS) * g.reshape(1, 1, 1, -1) \
            + be.reshape(1, 1, 1, -1)

    y = jax.nn.relu(bn(conv(x, params["w1"], params["b1"]), params["g1"], params["be1"]))
    y = bn(conv(y, params["w2"], params["b2"]), params["g2"], params["be2"])
    out = jax.nn.relu(y + x)
    return jnp.transpose(out, (0, 3, 1, 2))


if __name__ == "__main__":
    key = jax.random.PRNGKey(0)
    N, C, H, W = 2, 4, 16, 16  # in_channels == out_channels (default Residual path)
    kx, kp = jax.random.split(key)
    x = jax.random.normal(kx, (N, C, H, W), jnp.float32)
    params = init_params(kp, C, C)

    fwd = jax.jit(residual_forward, static_argnames=("compute_dtype",))
    ref = jax.block_until_ready(_reference(x, params))

    # float32 matmul operands + f32 intermediates: tight check.
    out_f32 = jax.block_until_ready(fwd(x, params, compute_dtype=jnp.float32))
    assert out_f32.shape == (N, C, H, W), out_f32.shape
    err32 = float(jnp.max(jnp.abs(out_f32 - ref)))
    if not bool(jnp.allclose(out_f32, ref, atol=2e-3, rtol=2e-3)):
        raise AssertionError(f"Pallas residual block (f32) mismatch, max|err|={err32}")

    # bfloat16 operands + bf16 intermediates (default): looser tolerance.
    out_bf16 = jax.block_until_ready(fwd(x, params, compute_dtype=jnp.bfloat16))
    err16 = float(jnp.max(jnp.abs(out_bf16 - ref)))
    if not bool(jnp.allclose(out_bf16, ref, atol=1e-1, rtol=5e-2)):
        raise AssertionError(f"Pallas residual block (bf16) mismatch, max|err|={err16}")

    print("KERNEL_OK")
</pallas_src>

<mosaic_0001>
module attributes {stable_mosaic.version = 11 : i64} {
  func.func @kernel(%arg0: i32, %arg1: i32, %arg2: memref<384x1xf32, #tpu.memory_space<vmem>>, %arg3: memref<1x1160x4xf32, #tpu.memory_space<vmem>>, %arg4: memref<9x4x128xf32, #tpu.memory_space<vmem>>, %arg5: memref<1x384x128xf32, #tpu.memory_space<vmem>>, %arg6: memref<1x8x128xf32, #tpu.memory_space<vmem>>, %arg7: memref<384x128xf32, #tpu.memory_space<vmem>>) attributes {dimension_semantics = [#tpu.dimension_semantics<parallel>, #tpu.dimension_semantics<parallel>], iteration_bounds = array<i64: 2, 1>, scalar_prefetch = 0 : i64, scratch_operands = 1 : i64, tpu.core_type = #tpu.core_type<tc>, window_params = [{transform_indices = @transform_0, window_bounds = array<i64: 384, 1>}, {transform_indices = @transform_1, window_bounds = array<i64: 1, 1160, 4>}, {pipeline_mode = #tpu.pipeline_mode<synchronous>, transform_indices = @transform_2, window_bounds = array<i64: 9, 4, 128>}, {transform_indices = @transform_3, window_bounds = array<i64: 1, 384, 128>}, {transform_indices = @transform_4, window_bounds = array<i64: 1, 8, 128>}]} {
    %c384_i32 = arith.constant 384 : i32
    %0 = arith.muli %arg1, %c384_i32 : i32
    %c359_i32 = arith.constant 359 : i32
    %1 = arith.addi %0, %c359_i32 : i32
    %c0 = arith.constant 0 : index
    %2 = arith.index_cast %1 : i32 to index
    %c0_0 = arith.constant 0 : index
    %3 = vector.load %arg3[%c0, %2, %c0_0] : memref<1x1160x4xf32, #tpu.memory_space<vmem>>, vector<1x384x4xf32>
    %4 = vector.shape_cast %3 : vector<1x384x4xf32> to vector<384x4xf32>
    %c0_1 = arith.constant 0 : index
    %c0_2 = arith.constant 0 : index
    %c0_3 = arith.constant 0 : index
    %5 = vector.load %arg4[%c0_1, %c0_2, %c0_3] : memref<9x4x128xf32, #tpu.memory_space<vmem>>, vector<1x4x128xf32>
    %6 = vector.shape_cast %5 : vector<1x4x128xf32> to vector<4x128xf32>
    %cst = arith.constant dense<0.000000e+00> : vector<384x128xf32>
    %7 = tpu.matmul %4, %6, %cst {dimension_numbers = #tpu.dot_dimension_numbers<[1], [0], [0], [1], [0, 0, 1, 1], [], []>} : vector<384x4xf32>, vector<4x128xf32>, vector<384x128xf32> -> vector<384x128xf32>
    %c0_4 = arith.constant 0 : index
    %c0_5 = arith.constant 0 : index
    %8 = vector.load %arg7[%c0_4, %c0_5] : memref<384x128xf32, #tpu.memory_space<vmem>>, vector<384x128xf32>
    tpu.vector_store %arg7[%c0_4, %c0_5], %7 {strides = array<i32>} : memref<384x128xf32, #tpu.memory_space<vmem>>, vector<384x128xf32>,
    %c360_i32 = arith.constant 360 : i32
    %9 = arith.addi %0, %c360_i32 : i32
    %10 = tpu.assume_multiple %9, 8 : i32
    %c0_6 = arith.constant 0 : index
    %11 = arith.index_cast %10 : i32 to index
    %c0_7 = arith.constant 0 : index
    %12 = vector.load %arg3[%c0_6, %11, %c0_7] : memref<1x1160x4xf32, #tpu.memory_space<vmem>>, vector<1x384x4xf32>
    %13 = vector.shape_cast %12 : vector<1x384x4xf32> to vector<384x4xf32>
    %c1 = arith.constant 1 : index
    %c0_8 = arith.constant 0 : index
    %c0_9 = arith.constant 0 : index
    %14 = vector.load %arg4[%c1, %c0_8, %c0_9] : memref<9x4x128xf32, #tpu.memory_space<vmem>>, vector<1x4x128xf32>
    %15 = vector.shape_cast %14 : vector<1x4x128xf32> to vector<4x128xf32>
    %cst_10 = arith.constant dense<0.000000e+00> : vector<384x128xf32>
    %16 = tpu.matmul %13, %15, %cst_10 {dimension_numbers = #tpu.dot_dimension_numbers<[1], [0], [0], [1], [0, 0, 1, 1], [], []>} : vector<384x4xf32>, vector<4x128xf32>, vector<384x128xf32> -> vector<384x128xf32>
    %c0_11 = arith.constant 0 : index
    %c0_12 = arith.constant 0 : index
    %17 = vector.load %arg7[%c0_11, %c0_12] : memref<384x128xf32, #tpu.memory_space<vmem>>, vector<384x128xf32>
    %18 = arith.addf %17, %16 : vector<384x128xf32>
    %c0_13 = arith.constant 0 : index
    %c0_14 = arith.constant 0 : index
    %19 = vector.load %arg7[%c0_13, %c0_14] : memref<384x128xf32, #tpu.memory_space<vmem>>, vector<384x128xf32>
    tpu.vector_store %arg7[%c0_13, %c0_14], %18 {strides = array<i32>} : memref<384x128xf32, #tpu.memory_space<vmem>>, vector<384x128xf32>,
    %c361_i32 = arith.constant 361 : i32
    %20 = arith.addi %0, %c361_i32 : i32
    %c0_15 = arith.constant 0 : index
    %21 = arith.index_cast %20 : i32 to index
    %c0_16 = arith.constant 0 : index
    %22 = vector.load %arg3[%c0_15, %21, %c0_16] : memref<1x1160x4xf32, #tpu.memory_space<vmem>>, vector<1x384x4xf32>
    %23 = vector.shape_cast %22 : vector<1x384x4xf32> to vector<384x4xf32>
    %c2 = arith.constant 2 : index
    %c0_17 = arith.constant 0 : index
    %c0_18 = arith.constant 0 : index
    %24 = vector.load %arg4[%c2, %c0_17, %c0_18] : memref<9x4x128xf32, #tpu.memory_space<vmem>>, vector<1x4x128xf32>
    %25 = vector.shape_cast %24 : vector<1x4x128xf32> to vector<4x128xf32>
    %cst_19 = arith.constant dense<0.000000e+00> : vector<384x128xf32>
    %26 = tpu.matmul %23, %25, %cst_19 {dimension_numbers = #tpu.dot_dimension_numbers<[1], [0], [0], [1], [0, 0, 1, 1], [], []>} : vector<384x4xf32>, vector<4x128xf32>, vector<384x128xf32> -> vector<384x128xf32>
    %c0_20 = arith.constant 0 : index
    %c0_21 = arith.constant 0 : index
    %27 = vector.load %arg7[%c0_20, %c0_21] : memref<384x128xf32, #tpu.memory_space<vmem>>, vector<384x128xf32>
    %28 = arith.addf %27, %26 : vector<384x128xf32>
    %c0_22 = arith.constant 0 : index
    %c0_23 = arith.constant 0 : index
    %29 = vector.load %arg7[%c0_22, %c0_23] : memref<384x128xf32, #tpu.memory_space<vmem>>, vector<384x128xf32>
    tpu.vector_store %arg7[%c0_22, %c0_23], %28 {strides = array<i32>} : memref<384x128xf32, #tpu.memory_space<vmem>>, vector<384x128xf32>,
    %c383_i32 = arith.constant 383 : i32
    %30 = arith.addi %0, %c383_i32 : i32
    %c0_24 = arith.constant 0 : index
    %31 = arith.index_cast %30 : i32 to index
    %c0_25 = arith.constant 0 : index
    %32 = vector.load %arg3[%c0_24, %31, %c0_25] : memref<1x1160x4xf32, #tpu.memory_space<vmem>>, vector<1x384x4xf32>
    %33 = vector.shape_cast %32 : vector<1x384x4xf32> to vector<384x4xf32>
    %c3 = arith.constant 3 : index
    %c0_26 = arith.constant 0 : index
    %c0_27 = arith.constant 0 : index
    %34 = vector.load %arg4[%c3, %c0_26, %c0_27] : memref<9x4x128xf32, #tpu.memory_space<vmem>>, vector<1x4x128xf32>
    %35 = vector.shape_cast %34 : vector<1x4x128xf32> to vector<4x128xf32>
    %cst_28 = arith.constant dense<0.000000e+00> : vector<384x128xf32>
    %36 = tpu.matmul %33, %35, %cst_28 {dimension_numbers = #tpu.dot_dimension_numbers<[1], [0], [0], [1], [0, 0, 1, 1], [], []>} : vector<384x4xf32>, vector<4x128xf32>, vector<384x128xf32> -> vector<384x128xf32>
    %c0_29 = arith.constant 0 : index
    %c0_30 = arith.constant 0 : index
    %37 = vector.load %arg7[%c0_29, %c0_30] : memref<384x128xf32, #tpu.memory_space<vmem>>, vector<384x128xf32>
    %38 = arith.addf %37, %36 : vector<384x128xf32>
    %c0_31 = arith.constant 0 : index
    %c0_32 = arith.constant 0 : index
    %39 = vector.load %arg7[%c0_31, %c0_32] : memref<384x128xf32, #tpu.memory_space<vmem>>, vector<384x128xf32>
    tpu.vector_store %arg7[%c0_31, %c0_32], %38 {strides = array<i32>} : memref<384x128xf32, #tpu.memory_space<vmem>>, vector<384x128xf32>,
    %c384_i32_33 = arith.constant 384 : i32
    %40 = arith.addi %0, %c384_i32_33 : i32
    %41 = tpu.assume_multiple %40, 8 : i32
    %c0_34 = arith.constant 0 : index
    %42 = arith.index_cast %41 : i32 to index
    %c0_35 = arith.constant 0 : index
    %43 = vector.load %arg3[%c0_34, %42, %c0_35] : memref<1x1160x4xf32, #tpu.memory_space<vmem>>, vector<1x384x4xf32>
    %44 = vector.shape_cast %43 : vector<1x384x4xf32> to vector<384x4xf32>
    %c4 = arith.constant 4 : index
    %c0_36 = arith.constant 0 : index
    %c0_37 = arith.constant 0 : index
    %45 = vector.load %arg4[%c4, %c0_36, %c0_37] : memref<9x4x128xf32, #tpu.memory_space<vmem>>, vector<1x4x128xf32>
    %46 = vector.shape_cast %45 : vector<1x4x128xf32> to vector<4x128xf32>
    %cst_38 = arith.constant dense<0.000000e+00> : vector<384x128xf32>
    %47 = tpu.matmul %44, %46, %cst_38 {dimension_numbers = #tpu.dot_dimension_numbers<[1], [0], [0], [1], [0, 0, 1, 1], [], []>} : vector<384x4xf32>, vector<4x128xf32>, vector<384x128xf32> -> vector<384x128xf32>
    %c0_39 = arith.constant 0 : index
    %c0_40 = arith.constant 0 : index
    %48 = vector.load %arg7[%c0_39, %c0_40] : memref<384x128xf32, #tpu.memory_space<vmem>>, vector<384x128xf32>
    %49 = arith.addf %48, %47 : vector<384x128xf32>
    %c0_41 = arith.constant 0 : index
    %c0_42 = arith.constant 0 : index
    %50 = vector.load %arg7[%c0_41, %c0_42] : memref<384x128xf32, #tpu.memory_space<vmem>>, vector<384x128xf32>
    tpu.vector_store %arg7[%c0_41, %c0_42], %49 {strides = array<i32>} : memref<384x128xf32, #tpu.memory_space<vmem>>, vector<384x128xf32>,
    %c385_i32 = arith.constant 385 : i32
    %51 = arith.addi %0, %c385_i32 : i32
    %c0_43 = arith.constant 0 : index
    %52 = arith.index_cast %51 : i32 to index
    %c0_44 = arith.constant 0 : index
    %53 = vector.load %arg3[%c0_43, %52, %c0_44] : memref<1x1160x4xf32, #tpu.memory_space<vmem>>, vector<1x384x4xf32>
    %54 = vector.shape_cast %53 : vector<1x384x4xf32> to vector<384x4xf32>
    %c5 = arith.constant 5 : index
    %c0_45 = arith.constant 0 : index
    %c0_46 = arith.constant 0 : index
    %55 = vector.load %arg4[%c5, %c0_45, %c0_46] : memref<9x4x128xf32, #tpu.memory_space<vmem>>, vector<1x4x128xf32>
    %56 = vector.shape_cast %55 : vector<1x4x128xf32> to vector<4x128xf32>
    %cst_47 = arith.constant dense<0.000000e+00> : vector<384x128xf32>
    %57 = tpu.matmul %54, %56, %cst_47 {dimension_numbers = #tpu.dot_dimension_numbers<[1], [0], [0], [1], [0, 0, 1, 1], [], []>} : vector<384x4xf32>, vector<4x128xf32>, vector<384x128xf32> -> vector<384x128xf32>
    %c0_48 = arith.constant 0 : index
    %c0_49 = arith.constant 0 : index
    %58 = vector.load %arg7[%c0_48, %c0_49] : memref<384x128xf32, #tpu.memory_space<vmem>>, vector<384x128xf32>
    %59 = arith.addf %58, %57 : vector<384x128xf32>
    %c0_50 = arith.constant 0 : index
    %c0_51 = arith.constant 0 : index
    %60 = vector.load %arg7[%c0_50, %c0_51] : memref<384x128xf32, #tpu.memory_space<vmem>>, vector<384x128xf32>
    tpu.vector_store %arg7[%c0_50, %c0_51], %59 {strides = array<i32>} : memref<384x128xf32, #tpu.memory_space<vmem>>, vector<384x128xf32>,
    %c407_i32 = arith.constant 407 : i32
    %61 = arith.addi %0, %c407_i32 : i32
    %c0_52 = arith.constant 0 : index
    %62 = arith.index_cast %61 : i32 to index
    %c0_53 = arith.constant 0 : index
    %63 = vector.load %arg3[%c0_52, %62, %c0_53] : memref<1x1160x4xf32, #tpu.memory_space<vmem>>, vector<1x384x4xf32>
    %64 = vector.shape_cast %63 : vector<1x384x4xf32> to vector<384x4xf32>
    %c6 = arith.constant 6 : index
    %c0_54 = arith.constant 0 : index
    %c0_55 = arith.constant 0 : index
    %65 = vector.load %arg4[%c6, %c0_54, %c0_55] : memref<9x4x128xf32, #tpu.memory_space<vmem>>, vector<1x4x128xf32>
    %66 = vector.shape_cast %65 : vector<1x4x128xf32> to vector<4x128xf32>
    %cst_56 = arith.constant dense<0.000000e+00> : vector<384x128xf32>
    %67 = tpu.matmul %64, %66, %cst_56 {dimension_numbers = #tpu.dot_dimension_numbers<[1], [0], [0], [1], [0, 0, 1, 1], [], []>} : vector<384x4xf32>, vector<4x128xf32>, vector<384x128xf32> -> vector<384x128xf32>
    %c0_57 = arith.constant 0 : index
    %c0_58 = arith.constant 0 : index
    %68 = vector.load %arg7[%c0_57, %c0_58] : memref<384x128xf32, #tpu.memory_space<vmem>>, vector<384x128xf32>
    %69 = arith.addf %68, %67 : vector<384x128xf32>
    %c0_59 = arith.constant 0 : index
    %c0_60 = arith.constant 0 : index
    %70 = vector.load %arg7[%c0_59, %c0_60] : memref<384x128xf32, #tpu.memory_space<vmem>>, vector<384x128xf32>
    tpu.vector_store %arg7[%c0_59, %c0_60], %69 {strides = array<i32>} : memref<384x128xf32, #tpu.memory_space<vmem>>, vector<384x128xf32>,
    %c408_i32 = arith.constant 408 : i32
    %71 = arith.addi %0, %c408_i32 : i32
    %72 = tpu.assume_multiple %71, 8 : i32
    %c0_61 = arith.constant 0 : index
    %73 = arith.index_cast %72 : i32 to index
    %c0_62 = arith.constant 0 : index
    %74 = vector.load %arg3[%c0_61, %73, %c0_62] : memref<1x1160x4xf32, #tpu.memory_space<vmem>>, vector<1x384x4xf32>
    %75 = vector.shape_cast %74 : vector<1x384x4xf32> to vector<384x4xf32>
    %c7 = arith.constant 7 : index
    %c0_63 = arith.constant 0 : index
    %c0_64 = arith.constant 0 : index
    %76 = vector.load %arg4[%c7, %c0_63, %c0_64] : memref<9x4x128xf32, #tpu.memory_space<vmem>>, vector<1x4x128xf32>
    %77 = vector.shape_cast %76 : vector<1x4x128xf32> to vector<4x128xf32>
    %cst_65 = arith.constant dense<0.000000e+00> : vector<384x128xf32>
    %78 = tpu.matmul %75, %77, %cst_65 {dimension_numbers = #tpu.dot_dimension_numbers<[1], [0], [0], [1], [0, 0, 1, 1], [], []>} : vector<384x4xf32>, vector<4x128xf32>, vector<384x128xf32> -> vector<384x128xf32>
    %c0_66 = arith.constant 0 : index
    %c0_67 = arith.constant 0 : index
    %79 = vector.load %arg7[%c0_66, %c0_67] : memref<384x128xf32, #tpu.memory_space<vmem>>, vector<384x128xf32>
    %80 = arith.addf %79, %78 : vector<384x128xf32>
    %c0_68 = arith.constant 0 : index
    %c0_69 = arith.constant 0 : index
    %81 = vector.load %arg7[%c0_68, %c0_69] : memref<384x128xf32, #tpu.memory_space<vmem>>, vector<384x128xf32>
    tpu.vector_store %arg7[%c0_68, %c0_69], %80 {strides = array<i32>} : memref<384x128xf32, #tpu.memory_space<vmem>>, vector<384x128xf32>,
    %c409_i32 = arith.constant 409 : i32
    %82 = arith.addi %0, %c409_i32 : i32
    %c0_70 = arith.constant 0 : index
    %83 = arith.index_cast %82 : i32 to index
    %c0_71 = arith.constant 0 : index
    %84 = vector.load %arg3[%c0_70, %83, %c0_71] : memref<1x1160x4xf32, #tpu.memory_space<vmem>>, vector<1x384x4xf32>
    %85 = vector.shape_cast %84 : vector<1x384x4xf32> to vector<384x4xf32>
    %c8 = arith.constant 8 : index
    %c0_72 = arith.constant 0 : index
    %c0_73 = arith.constant 0 : index
    %86 = vector.load %arg4[%c8, %c0_72, %c0_73] : memref<9x4x128xf32, #tpu.memory_space<vmem>>, vector<1x4x128xf32>
    %87 = vector.shape_cast %86 : vector<1x4x128xf32> to vector<4x128xf32>
    %cst_74 = arith.constant dense<0.000000e+00> : vector<384x128xf32>
    %88 = tpu.matmul %85, %87, %cst_74 {dimension_numbers = #tpu.dot_dimension_numbers<[1], [0], [0], [1], [0, 0, 1, 1], [], []>} : vector<384x4xf32>, vector<4x128xf32>, vector<384x128xf32> -> vector<384x128xf32>
    %c0_75 = arith.constant 0 : index
    %c0_76 = arith.constant 0 : index
    %89 = vector.load %arg7[%c0_75, %c0_76] : memref<384x128xf32, #tpu.memory_space<vmem>>, vector<384x128xf32>
    %90 = arith.addf %89, %88 : vector<384x128xf32>
    %c0_77 = arith.constant 0 : index
    %c0_78 = arith.constant 0 : index
    %91 = vector.load %arg7[%c0_77, %c0_78] : memref<384x128xf32, #tpu.memory_space<vmem>>, vector<384x128xf32>
    tpu.vector_store %arg7[%c0_77, %c0_78], %90 {strides = array<i32>} : memref<384x128xf32, #tpu.memory_space<vmem>>, vector<384x128xf32>,
    %c0_79 = arith.constant 0 : index
    %c0_80 = arith.constant 0 : index
    %92 = vector.load %arg7[%c0_79, %c0_80] : memref<384x128xf32, #tpu.memory_space<vmem>>, vector<384x128xf32>
    %c0_81 = arith.constant 0 : index
    %c0_82 = arith.constant 0 : index
    %c0_83 = arith.constant 0 : index
    %93 = vector.load %arg5[%c0_81, %c0_82, %c0_83] : memref<1x384x128xf32, #tpu.memory_space<vmem>>, vector<1x384x128xf32>
    %94 = vector.shape_cast %93 : vector<1x384x128xf32> to vector<384x128xf32>
    %95 = vector.shape_cast %92 : vector<384x128xf32> to vector<1x384x128xf32>
    tpu.vector_store %arg5[%c0_81, %c0_82, %c0_83], %95 {strides = array<i32>} : memref<1x384x128xf32, #tpu.memory_space<vmem>>, vector<1x384x128xf32>,
    %c0_84 = arith.constant 0 : index
    %c0_85 = arith.constant 0 : index
    %96 = vector.load %arg2[%c0_84, %c0_85] : memref<384x1xf32, #tpu.memory_space<vmem>>, vector<384x1xf32>
    %cst_86 = arith.constant 0.000000e+00 : f32
    %97 = vector.broadcast %cst_86 : f32 to vector<384x1xf32>
    %98 = arith.cmpf ogt, %96, %97 : vector<384x1xf32>
    %cst_87 = arith.constant 0.000000e+00 : f32
    %99 = vector.shape_cast %98 : vector<384x1xi1> to vector<384x1xi1>
    %100 = vector.broadcast %99 : vector<384x1xi1> to vector<384x128xi1>
    %101 = vector.broadcast %cst_87 : f32 to vector<384x128xf32>
    %102 = arith.select %100, %92, %101 : vector<384x128xi1>, vector<384x128xf32>
    %cst_88 = arith.constant dense<0.000000e+00> : vector<128xf32>
    %103 = vector.multi_reduction <add>, %102, %cst_88 [0] : vector<384x128xf32> to vector<128xf32>
    %104 = vector.shape_cast %103 : vector<128xf32> to vector<1x128xf32>
    %105 = arith.mulf %102, %102 : vector<384x128xf32>
    %cst_89 = arith.constant dense<0.000000e+00> : vector<128xf32>
    %106 = vector.multi_reduction <add>, %105, %cst_89 [0] : vector<384x128xf32> to vector<128xf32>
    %107 = vector.shape_cast %106 : vector<128xf32> to vector<1x128xf32>
    %cst_90 = arith.constant 0.000000e+00 : f32
    %108 = vector.broadcast %cst_90 : f32 to vector<6x128xf32>
    %109 = tpu.concatenate %104, %107, %108 in 0 : vector<1x128xf32>, vector<1x128xf32>, vector<6x128xf32> -> vector<8x128xf32>
    %c0_91 = arith.constant 0 : index
    %c0_92 = arith.constant 0 : index
    %c0_93 = arith.constant 0 : index
    %110 = vector.load %arg6[%c0_91, %c0_92, %c0_93] : memref<1x8x128xf32, #tpu.memory_space<vmem>>, vector<1x8x128xf32>
    %111 = vector.shape_cast %110 : vector<1x8x128xf32> to vector<8x128xf32>
    %112 = vector.shape_cast %109 : vector<8x128xf32> to vector<1x8x128xf32>
    tpu.vector_store %arg6[%c0_91, %c0_92, %c0_93], %112 {strides = array<i32>} : memref<1x8x128xf32, #tpu.memory_space<vmem>>, vector<1x8x128xf32>,
    return
  }
  func.func @transform_0(%arg0: i32, %arg1: i32) -> (i32, i32) {
    %c1_i32 = arith.constant 1 : i32
    %0 = arith.addi %arg1, %c1_i32 : i32
    %c0_i32 = arith.constant 0 : i32
    %c0_i32_0 = arith.constant 0 : i32
    return %0, %c0_i32 : i32, i32
  }
  func.func @transform_1(%arg0: i32, %arg1: i32) -> (i32, i32, i32) {
    %c0_i32 = arith.constant 0 : i32
    %c0_i32_0 = arith.constant 0 : i32
    %c0_i32_1 = arith.constant 0 : i32
    return %arg0, %c0_i32, %c0_i32_0 : i32, i32, i32
  }
  func.func @transform_2(%arg0: i32, %arg1: i32) -> (i32, i32, i32) {
    %c0_i32 = arith.constant 0 : i32
    %c0_i32_0 = arith.constant 0 : i32
    %c0_i32_1 = arith.constant 0 : i32
    %c0_i32_2 = arith.constant 0 : i32
    return %c0_i32, %c0_i32_0, %c0_i32_1 : i32, i32, i32
  }
  func.func @transform_3(%arg0: i32, %arg1: i32) -> (i32, i32, i32) {
    %c1_i32 = arith.constant 1 : i32
    %0 = arith.addi %arg1, %c1_i32 : i32
    %c0_i32 = arith.constant 0 : i32
    %c0_i32_0 = arith.constant 0 : i32
    return %arg0, %0, %c0_i32 : i32, i32, i32
  }
  func.func @transform_4(%arg0: i32, %arg1: i32) -> (i32, i32, i32) {
    %c0_i32 = arith.constant 0 : i32
    %c0_i32_0 = arith.constant 0 : i32
    return %arg0, %arg1, %c0_i32 : i32, i32, i32
  }
}

module attributes {stable_mosaic.version = 11 : i64} {
  func.func @kernel(%arg0: i32, %arg1: i32, %arg2: memref<384x1xf32, #tpu.memory_space<vmem>>, %arg3: memref<1x384x128xf32, #tpu.memory_space<vmem>>, %arg4: memref<1x128xf32, #tpu.memory_space<vmem>>, %arg5: memref<1x128xf32, #tpu.memory_space<vmem>>, %arg6: memref<1x384x128xf32, #tpu.memory_space<vmem>>) attributes {dimension_semantics = [#tpu.dimension_semantics<parallel>, #tpu.dimension_semantics<parallel>], iteration_bounds = array<i64: 2, 3>, scalar_prefetch = 0 : i64, scratch_operands = 0 : i64, tpu.core_type = #tpu.core_type<tc>, window_params = [{transform_indices = @transform_0, window_bounds = array<i64: 384, 1>}, {transform_indices = @transform_1, window_bounds = array<i64: 1, 384, 128>}, {pipeline_mode = #tpu.pipeline_mode<synchronous>, transform_indices = @transform_2, window_bounds = array<i64: 1, 128>}, {pipeline_mode = #tpu.pipeline_mode<synchronous>, transform_indices = @transform_3, window_bounds = array<i64: 1, 128>}, {transform_indices = @transform_4, window_bounds = array<i64: 1, 384, 128>}]} {
    %c0 = arith.constant 0 : index
    %c0_0 = arith.constant 0 : index
    %0 = vector.load %arg2[%c0, %c0_0] : memref<384x1xf32, #tpu.memory_space<vmem>>, vector<384x1xf32>
    %cst = arith.constant 0.000000e+00 : f32
    %1 = vector.broadcast %cst : f32 to vector<384x1xf32>
    %2 = arith.cmpf ogt, %0, %1 : vector<384x1xf32>
    %c0_1 = arith.constant 0 : index
    %c0_2 = arith.constant 0 : index
    %c0_3 = arith.constant 0 : index
    %3 = vector.load %arg3[%c0_1, %c0_2, %c0_3] : memref<1x384x128xf32, #tpu.memory_space<vmem>>, vector<1x384x128xf32>
    %4 = vector.shape_cast %3 : vector<1x384x128xf32> to vector<384x128xf32>
    %c0_4 = arith.constant 0 : index
    %c0_5 = arith.constant 0 : index
    %5 = vector.load %arg4[%c0_4, %c0_5] : memref<1x128xf32, #tpu.memory_space<vmem>>, vector<1x128xf32>
    %6 = vector.broadcast %5 : vector<1x128xf32> to vector<384x128xf32>
    %7 = arith.mulf %4, %6 : vector<384x128xf32>
    %c0_6 = arith.constant 0 : index
    %c0_7 = arith.constant 0 : index
    %8 = vector.load %arg5[%c0_6, %c0_7] : memref<1x128xf32, #tpu.memory_space<vmem>>, vector<1x128xf32>
    %9 = vector.broadcast %8 : vector<1x128xf32> to vector<384x128xf32>
    %10 = arith.addf %7, %9 : vector<384x128xf32>
    %cst_8 = arith.constant 0.000000e+00 : f32
    %11 = vector.broadcast %cst_8 : f32 to vector<384x128xf32>
    %12 = arith.maximumf %10, %11 : vector<384x128xf32>
    %cst_9 = arith.constant 0.000000e+00 : f32
    %13 = vector.shape_cast %2 : vector<384x1xi1> to vector<384x1xi1>
    %14 = vector.broadcast %13 : vector<384x1xi1> to vector<384x128xi1>
    %15 = vector.broadcast %cst_9 : f32 to vector<384x128xf32>
    %16 = arith.select %14, %12, %15 : vector<384x128xi1>, vector<384x128xf32>
    %c0_10 = arith.constant 0 : index
    %c0_11 = arith.constant 0 : index
    %c0_12 = arith.constant 0 : index
    %17 = vector.load %arg6[%c0_10, %c0_11, %c0_12] : memref<1x384x128xf32, #tpu.memory_space<vmem>>, vector<1x384x128xf32>
    %18 = vector.shape_cast %17 : vector<1x384x128xf32> to vector<384x128xf32>
    %19 = vector.shape_cast %16 : vector<384x128xf32> to vector<1x384x128xf32>
    tpu.vector_store %arg6[%c0_10, %c0_11, %c0_12], %19 {strides = array<i32>} : memref<1x384x128xf32, #tpu.memory_space<vmem>>, vector<1x384x128xf32>,
    return
  }
  func.func @transform_0(%arg0: i32, %arg1: i32) -> (i32, i32) {
    %c0_i32 = arith.constant 0 : i32
    %c0_i32_0 = arith.constant 0 : i32
    return %arg1, %c0_i32 : i32, i32
  }
  func.func @transform_1(%arg0: i32, %arg1: i32) -> (i32, i32, i32) {
    %c1_i32 = arith.constant 1 : i32
    %0 = arith.addi %arg1, %c1_i32 : i32
    %c1_i32_0 = arith.constant 1 : i32
    %1 = arith.subi %0, %c1_i32_0 : i32
    %c0_i32 = arith.constant 0 : i32
    %c0_i32_1 = arith.constant 0 : i32
    return %arg0, %1, %c0_i32 : i32, i32, i32
  }
  func.func @transform_2(%arg0: i32, %arg1: i32) -> (i32, i32) {
    %c0_i32 = arith.constant 0 : i32
    %c0_i32_0 = arith.constant 0 : i32
    %c0_i32_1 = arith.constant 0 : i32
    return %c0_i32, %c0_i32_0 : i32, i32
  }
  func.func @transform_3(%arg0: i32, %arg1: i32) -> (i32, i32) {
    %c0_i32 = arith.constant 0 : i32
    %c0_i32_0 = arith.constant 0 : i32
    %c0_i32_1 = arith.constant 0 : i32
    return %c0_i32, %c0_i32_0 : i32, i32
  }
  func.func @transform_4(%arg0: i32, %arg1: i32) -> (i32, i32, i32) {
    %c1_i32 = arith.constant 1 : i32
    %0 = arith.addi %arg1, %c1_i32 : i32
    %c1_i32_0 = arith.constant 1 : i32
    %1 = arith.subi %0, %c1_i32_0 : i32
    %c0_i32 = arith.constant 0 : i32
    %c0_i32_1 = arith.constant 0 : i32
    return %arg0, %1, %c0_i32 : i32, i32, i32
  }
}

module attributes {stable_mosaic.version = 11 : i64} {
  func.func @kernel(%arg0: i32, %arg1: i32, %arg2: memref<384x1xf32, #tpu.memory_space<vmem>>, %arg3: memref<1x1160x128xf32, #tpu.memory_space<vmem>>, %arg4: memref<9x128x128xf32, #tpu.memory_space<vmem>>, %arg5: memref<1x384x128xf32, #tpu.memory_space<vmem>>, %arg6: memref<1x8x128xf32, #tpu.memory_space<vmem>>, %arg7: memref<384x128xf32, #tpu.memory_space<vmem>>) attributes {dimension_semantics = [#tpu.dimension_semantics<parallel>, #tpu.dimension_semantics<parallel>], iteration_bounds = array<i64: 2, 1>, scalar_prefetch = 0 : i64, scratch_operands = 1 : i64, tpu.core_type = #tpu.core_type<tc>, window_params = [{transform_indices = @transform_0, window_bounds = array<i64: 384, 1>}, {transform_indices = @transform_1, window_bounds = array<i64: 1, 1160, 128>}, {pipeline_mode = #tpu.pipeline_mode<synchronous>, transform_indices = @transform_2, window_bounds = array<i64: 9, 128, 128>}, {transform_indices = @transform_3, window_bounds = array<i64: 1, 384, 128>}, {transform_indices = @transform_4, window_bounds = array<i64: 1, 8, 128>}]} {
    %c384_i32 = arith.constant 384 : i32
    %0 = arith.muli %arg1, %c384_i32 : i32
    %c359_i32 = arith.constant 359 : i32
    %1 = arith.addi %0, %c359_i32 : i32
    %c0 = arith.constant 0 : index
    %2 = arith.index_cast %1 : i32 to index
    %c0_0 = arith.constant 0 : index
    %3 = vector.load %arg3[%c0, %2, %c0_0] : memref<1x1160x128xf32, #tpu.memory_space<vmem>>, vector<1x384x128xf32>
    %4 = vector.shape_cast %3 : vector<1x384x128xf32> to vector<384x128xf32>
    %c0_1 = arith.constant 0 : index
    %c0_2 = arith.constant 0 : index
    %c0_3 = arith.constant 0 : index
    %5 = vector.load %arg4[%c0_1, %c0_2, %c0_3] : memref<9x128x128xf32, #tpu.memory_space<vmem>>, vector<1x128x128xf32>
    %6 = vector.shape_cast %5 : vector<1x128x128xf32> to vector<128x128xf32>
    %cst = arith.constant dense<0.000000e+00> : vector<384x128xf32>
    %7 = tpu.matmul %4, %6, %cst {dimension_numbers = #tpu.dot_dimension_numbers<[1], [0], [0], [1], [0, 0, 1, 1], [], []>} : vector<384x128xf32>, vector<128x128xf32>, vector<384x128xf32> -> vector<384x128xf32>
    %c0_4 = arith.constant 0 : index
    %c0_5 = arith.constant 0 : index
    %8 = vector.load %arg7[%c0_4, %c0_5] : memref<384x128xf32, #tpu.memory_space<vmem>>, vector<384x128xf32>
    tpu.vector_store %arg7[%c0_4, %c0_5], %7 {strides = array<i32>} : memref<384x128xf32, #tpu.memory_space<vmem>>, vector<384x128xf32>,
    %c360_i32 = arith.constant 360 : i32
    %9 = arith.addi %0, %c360_i32 : i32
    %10 = tpu.assume_multiple %9, 8 : i32
    %c0_6 = arith.constant 0 : index
    %11 = arith.index_cast %10 : i32 to index
    %c0_7 = arith.constant 0 : index
    %12 = vector.load %arg3[%c0_6, %11, %c0_7] : memref<1x1160x128xf32, #tpu.memory_space<vmem>>, vector<1x384x128xf32>
    %13 = vector.shape_cast %12 : vector<1x384x128xf32> to vector<384x128xf32>
    %c1 = arith.constant 1 : index
    %c0_8 = arith.constant 0 : index
    %c0_9 = arith.constant 0 : index
    %14 = vector.load %arg4[%c1, %c0_8, %c0_9] : memref<9x128x128xf32, #tpu.memory_space<vmem>>, vector<1x128x128xf32>
    %15 = vector.shape_cast %14 : vector<1x128x128xf32> to vector<128x128xf32>
    %cst_10 = arith.constant dense<0.000000e+00> : vector<384x128xf32>
    %16 = tpu.matmul %13, %15, %cst_10 {dimension_numbers = #tpu.dot_dimension_numbers<[1], [0], [0], [1], [0, 0, 1, 1], [], []>} : vector<384x128xf32>, vector<128x128xf32>, vector<384x128xf32> -> vector<384x128xf32>
    %c0_11 = arith.constant 0 : index
    %c0_12 = arith.constant 0 : index
    %17 = vector.load %arg7[%c0_11, %c0_12] : memref<384x128xf32, #tpu.memory_space<vmem>>, vector<384x128xf32>
    %18 = arith.addf %17, %16 : vector<384x128xf32>
    %c0_13 = arith.constant 0 : index
    %c0_14 = arith.constant 0 : index
    %19 = vector.load %arg7[%c0_13, %c0_14] : memref<384x128xf32, #tpu.memory_space<vmem>>, vector<384x128xf32>
    tpu.vector_store %arg7[%c0_13, %c0_14], %18 {strides = array<i32>} : memref<384x128xf32, #tpu.memory_space<vmem>>, vector<384x128xf32>,
    %c361_i32 = arith.constant 361 : i32
    %20 = arith.addi %0, %c361_i32 : i32
    %c0_15 = arith.constant 0 : index
    %21 = arith.index_cast %20 : i32 to index
    %c0_16 = arith.constant 0 : index
    %22 = vector.load %arg3[%c0_15, %21, %c0_16] : memref<1x1160x128xf32, #tpu.memory_space<vmem>>, vector<1x384x128xf32>
    %23 = vector.shape_cast %22 : vector<1x384x128xf32> to vector<384x128xf32>
    %c2 = arith.constant 2 : index
    %c0_17 = arith.constant 0 : index
    %c0_18 = arith.constant 0 : index
    %24 = vector.load %arg4[%c2, %c0_17, %c0_18] : memref<9x128x128xf32, #tpu.memory_space<vmem>>, vector<1x128x128xf32>
    %25 = vector.shape_cast %24 : vector<1x128x128xf32> to vector<128x128xf32>
    %cst_19 = arith.constant dense<0.000000e+00> : vector<384x128xf32>
    %26 = tpu.matmul %23, %25, %cst_19 {dimension_numbers = #tpu.dot_dimension_numbers<[1], [0], [0], [1], [0, 0, 1, 1], [], []>} : vector<384x128xf32>, vector<128x128xf32>, vector<384x128xf32> -> vector<384x128xf32>
    %c0_20 = arith.constant 0 : index
    %c0_21 = arith.constant 0 : index
    %27 = vector.load %arg7[%c0_20, %c0_21] : memref<384x128xf32, #tpu.memory_space<vmem>>, vector<384x128xf32>
    %28 = arith.addf %27, %26 : vector<384x128xf32>
    %c0_22 = arith.constant 0 : index
    %c0_23 = arith.constant 0 : index
    %29 = vector.load %arg7[%c0_22, %c0_23] : memref<384x128xf32, #tpu.memory_space<vmem>>, vector<384x128xf32>
    tpu.vector_store %arg7[%c0_22, %c0_23], %28 {strides = array<i32>} : memref<384x128xf32, #tpu.memory_space<vmem>>, vector<384x128xf32>,
    %c383_i32 = arith.constant 383 : i32
    %30 = arith.addi %0, %c383_i32 : i32
    %c0_24 = arith.constant 0 : index
    %31 = arith.index_cast %30 : i32 to index
    %c0_25 = arith.constant 0 : index
    %32 = vector.load %arg3[%c0_24, %31, %c0_25] : memref<1x1160x128xf32, #tpu.memory_space<vmem>>, vector<1x384x128xf32>
    %33 = vector.shape_cast %32 : vector<1x384x128xf32> to vector<384x128xf32>
    %c3 = arith.constant 3 : index
    %c0_26 = arith.constant 0 : index
    %c0_27 = arith.constant 0 : index
    %34 = vector.load %arg4[%c3, %c0_26, %c0_27] : memref<9x128x128xf32, #tpu.memory_space<vmem>>, vector<1x128x128xf32>
    %35 = vector.shape_cast %34 : vector<1x128x128xf32> to vector<128x128xf32>
    %cst_28 = arith.constant dense<0.000000e+00> : vector<384x128xf32>
    %36 = tpu.matmul %33, %35, %cst_28 {dimension_numbers = #tpu.dot_dimension_numbers<[1], [0], [0], [1], [0, 0, 1, 1], [], []>} : vector<384x128xf32>, vector<128x128xf32>, vector<384x128xf32> -> vector<384x128xf32>
    %c0_29 = arith.constant 0 : index
    %c0_30 = arith.constant 0 : index
    %37 = vector.load %arg7[%c0_29, %c0_30] : memref<384x128xf32, #tpu.memory_space<vmem>>, vector<384x128xf32>
    %38 = arith.addf %37, %36 : vector<384x128xf32>
    %c0_31 = arith.constant 0 : index
    %c0_32 = arith.constant 0 : index
    %39 = vector.load %arg7[%c0_31, %c0_32] : memref<384x128xf32, #tpu.memory_space<vmem>>, vector<384x128xf32>
    tpu.vector_store %arg7[%c0_31, %c0_32], %38 {strides = array<i32>} : memref<384x128xf32, #tpu.memory_space<vmem>>, vector<384x128xf32>,
    %c384_i32_33 = arith.constant 384 : i32
    %40 = arith.addi %0, %c384_i32_33 : i32
    %41 = tpu.assume_multiple %40, 8 : i32
    %c0_34 = arith.constant 0 : index
    %42 = arith.index_cast %41 : i32 to index
    %c0_35 = arith.constant 0 : index
    %43 = vector.load %arg3[%c0_34, %42, %c0_35] : memref<1x1160x128xf32, #tpu.memory_space<vmem>>, vector<1x384x128xf32>
    %44 = vector.shape_cast %43 : vector<1x384x128xf32> to vector<384x128xf32>
    %c4 = arith.constant 4 : index
    %c0_36 = arith.constant 0 : index
    %c0_37 = arith.constant 0 : index
    %45 = vector.load %arg4[%c4, %c0_36, %c0_37] : memref<9x128x128xf32, #tpu.memory_space<vmem>>, vector<1x128x128xf32>
    %46 = vector.shape_cast %45 : vector<1x128x128xf32> to vector<128x128xf32>
    %cst_38 = arith.constant dense<0.000000e+00> : vector<384x128xf32>
    %47 = tpu.matmul %44, %46, %cst_38 {dimension_numbers = #tpu.dot_dimension_numbers<[1], [0], [0], [1], [0, 0, 1, 1], [], []>} : vector<384x128xf32>, vector<128x128xf32>, vector<384x128xf32> -> vector<384x128xf32>
    %c0_39 = arith.constant 0 : index
    %c0_40 = arith.constant 0 : index
    %48 = vector.load %arg7[%c0_39, %c0_40] : memref<384x128xf32, #tpu.memory_space<vmem>>, vector<384x128xf32>
    %49 = arith.addf %48, %47 : vector<384x128xf32>
    %c0_41 = arith.constant 0 : index
    %c0_42 = arith.constant 0 : index
    %50 = vector.load %arg7[%c0_41, %c0_42] : memref<384x128xf32, #tpu.memory_space<vmem>>, vector<384x128xf32>
    tpu.vector_store %arg7[%c0_41, %c0_42], %49 {strides = array<i32>} : memref<384x128xf32, #tpu.memory_space<vmem>>, vector<384x128xf32>,
    %c385_i32 = arith.constant 385 : i32
    %51 = arith.addi %0, %c385_i32 : i32
    %c0_43 = arith.constant 0 : index
    %52 = arith.index_cast %51 : i32 to index
    %c0_44 = arith.constant 0 : index
    %53 = vector.load %arg3[%c0_43, %52, %c0_44] : memref<1x1160x128xf32, #tpu.memory_space<vmem>>, vector<1x384x128xf32>
    %54 = vector.shape_cast %53 : vector<1x384x128xf32> to vector<384x128xf32>
    %c5 = arith.constant 5 : index
    %c0_45 = arith.constant 0 : index
    %c0_46 = arith.constant 0 : index
    %55 = vector.load %arg4[%c5, %c0_45, %c0_46] : memref<9x128x128xf32, #tpu.memory_space<vmem>>, vector<1x128x128xf32>
    %56 = vector.shape_cast %55 : vector<1x128x128xf32> to vector<128x128xf32>
    %cst_47 = arith.constant dense<0.000000e+00> : vector<384x128xf32>
    %57 = tpu.matmul %54, %56, %cst_47 {dimension_numbers = #tpu.dot_dimension_numbers<[1], [0], [0], [1], [0, 0, 1, 1], [], []>} : vector<384x128xf32>, vector<128x128xf32>, vector<384x128xf32> -> vector<384x128xf32>
    %c0_48 = arith.constant 0 : index
    %c0_49 = arith.constant 0 : index
    %58 = vector.load %arg7[%c0_48, %c0_49] : memref<384x128xf32, #tpu.memory_space<vmem>>, vector<384x128xf32>
    %59 = arith.addf %58, %57 : vector<384x128xf32>
    %c0_50 = arith.constant 0 : index
    %c0_51 = arith.constant 0 : index
    %60 = vector.load %arg7[%c0_50, %c0_51] : memref<384x128xf32, #tpu.memory_space<vmem>>, vector<384x128xf32>
    tpu.vector_store %arg7[%c0_50, %c0_51], %59 {strides = array<i32>} : memref<384x128xf32, #tpu.memory_space<vmem>>, vector<384x128xf32>,
    %c407_i32 = arith.constant 407 : i32
    %61 = arith.addi %0, %c407_i32 : i32
    %c0_52 = arith.constant 0 : index
    %62 = arith.index_cast %61 : i32 to index
    %c0_53 = arith.constant 0 : index
    %63 = vector.load %arg3[%c0_52, %62, %c0_53] : memref<1x1160x128xf32, #tpu.memory_space<vmem>>, vector<1x384x128xf32>
    %64 = vector.shape_cast %63 : vector<1x384x128xf32> to vector<384x128xf32>
    %c6 = arith.constant 6 : index
    %c0_54 = arith.constant 0 : index
    %c0_55 = arith.constant 0 : index
    %65 = vector.load %arg4[%c6, %c0_54, %c0_55] : memref<9x128x128xf32, #tpu.memory_space<vmem>>, vector<1x128x128xf32>
    %66 = vector.shape_cast %65 : vector<1x128x128xf32> to vector<128x128xf32>
    %cst_56 = arith.constant dense<0.000000e+00> : vector<384x128xf32>
    %67 = tpu.matmul %64, %66, %cst_56 {dimension_numbers = #tpu.dot_dimension_numbers<[1], [0], [0], [1], [0, 0, 1, 1], [], []>} : vector<384x128xf32>, vector<128x128xf32>, vector<384x128xf32> -> vector<384x128xf32>
    %c0_57 = arith.constant 0 : index
    %c0_58 = arith.constant 0 : index
    %68 = vector.load %arg7[%c0_57, %c0_58] : memref<384x128xf32, #tpu.memory_space<vmem>>, vector<384x128xf32>
    %69 = arith.addf %68, %67 : vector<384x128xf32>
    %c0_59 = arith.constant 0 : index
    %c0_60 = arith.constant 0 : index
    %70 = vector.load %arg7[%c0_59, %c0_60] : memref<384x128xf32, #tpu.memory_space<vmem>>, vector<384x128xf32>
    tpu.vector_store %arg7[%c0_59, %c0_60], %69 {strides = array<i32>} : memref<384x128xf32, #tpu.memory_space<vmem>>, vector<384x128xf32>,
    %c408_i32 = arith.constant 408 : i32
    %71 = arith.addi %0, %c408_i32 : i32
    %72 = tpu.assume_multiple %71, 8 : i32
    %c0_61 = arith.constant 0 : index
    %73 = arith.index_cast %72 : i32 to index
    %c0_62 = arith.constant 0 : index
    %74 = vector.load %arg3[%c0_61, %73, %c0_62] : memref<1x1160x128xf32, #tpu.memory_space<vmem>>, vector<1x384x128xf32>
    %75 = vector.shape_cast %74 : vector<1x384x128xf32> to vector<384x128xf32>
    %c7 = arith.constant 7 : index
    %c0_63 = arith.constant 0 : index
    %c0_64 = arith.constant 0 : index
    %76 = vector.load %arg4[%c7, %c0_63, %c0_64] : memref<9x128x128xf32, #tpu.memory_space<vmem>>, vector<1x128x128xf32>
    %77 = vector.shape_cast %76 : vector<1x128x128xf32> to vector<128x128xf32>
    %cst_65 = arith.constant dense<0.000000e+00> : vector<384x128xf32>
    %78 = tpu.matmul %75, %77, %cst_65 {dimension_numbers = #tpu.dot_dimension_numbers<[1], [0], [0], [1], [0, 0, 1, 1], [], []>} : vector<384x128xf32>, vector<128x128xf32>, vector<384x128xf32> -> vector<384x128xf32>
    %c0_66 = arith.constant 0 : index
    %c0_67 = arith.constant 0 : index
    %79 = vector.load %arg7[%c0_66, %c0_67] : memref<384x128xf32, #tpu.memory_space<vmem>>, vector<384x128xf32>
    %80 = arith.addf %79, %78 : vector<384x128xf32>
    %c0_68 = arith.constant 0 : index
    %c0_69 = arith.constant 0 : index
    %81 = vector.load %arg7[%c0_68, %c0_69] : memref<384x128xf32, #tpu.memory_space<vmem>>, vector<384x128xf32>
    tpu.vector_store %arg7[%c0_68, %c0_69], %80 {strides = array<i32>} : memref<384x128xf32, #tpu.memory_space<vmem>>, vector<384x128xf32>,
    %c409_i32 = arith.constant 409 : i32
    %82 = arith.addi %0, %c409_i32 : i32
    %c0_70 = arith.constant 0 : index
    %83 = arith.index_cast %82 : i32 to index
    %c0_71 = arith.constant 0 : index
    %84 = vector.load %arg3[%c0_70, %83, %c0_71] : memref<1x1160x128xf32, #tpu.memory_space<vmem>>, vector<1x384x128xf32>
    %85 = vector.shape_cast %84 : vector<1x384x128xf32> to vector<384x128xf32>
    %c8 = arith.constant 8 : index
    %c0_72 = arith.constant 0 : index
    %c0_73 = arith.constant 0 : index
    %86 = vector.load %arg4[%c8, %c0_72, %c0_73] : memref<9x128x128xf32, #tpu.memory_space<vmem>>, vector<1x128x128xf32>
    %87 = vector.shape_cast %86 : vector<1x128x128xf32> to vector<128x128xf32>
    %cst_74 = arith.constant dense<0.000000e+00> : vector<384x128xf32>
    %88 = tpu.matmul %85, %87, %cst_74 {dimension_numbers = #tpu.dot_dimension_numbers<[1], [0], [0], [1], [0, 0, 1, 1], [], []>} : vector<384x128xf32>, vector<128x128xf32>, vector<384x128xf32> -> vector<384x128xf32>
    %c0_75 = arith.constant 0 : index
    %c0_76 = arith.constant 0 : index
    %89 = vector.load %arg7[%c0_75, %c0_76] : memref<384x128xf32, #tpu.memory_space<vmem>>, vector<384x128xf32>
    %90 = arith.addf %89, %88 : vector<384x128xf32>
    %c0_77 = arith.constant 0 : index
    %c0_78 = arith.constant 0 : index
    %91 = vector.load %arg7[%c0_77, %c0_78] : memref<384x128xf32, #tpu.memory_space<vmem>>, vector<384x128xf32>
    tpu.vector_store %arg7[%c0_77, %c0_78], %90 {strides = array<i32>} : memref<384x128xf32, #tpu.memory_space<vmem>>, vector<384x128xf32>,
    %c0_79 = arith.constant 0 : index
    %c0_80 = arith.constant 0 : index
    %92 = vector.load %arg7[%c0_79, %c0_80] : memref<384x128xf32, #tpu.memory_space<vmem>>, vector<384x128xf32>
    %c0_81 = arith.constant 0 : index
    %c0_82 = arith.constant 0 : index
    %c0_83 = arith.constant 0 : index
    %93 = vector.load %arg5[%c0_81, %c0_82, %c0_83] : memref<1x384x128xf32, #tpu.memory_space<vmem>>, vector<1x384x128xf32>
    %94 = vector.shape_cast %93 : vector<1x384x128xf32> to vector<384x128xf32>
    %95 = vector.shape_cast %92 : vector<384x128xf32> to vector<1x384x128xf32>
    tpu.vector_store %arg5[%c0_81, %c0_82, %c0_83], %95 {strides = array<i32>} : memref<1x384x128xf32, #tpu.memory_space<vmem>>, vector<1x384x128xf32>,
    %c0_84 = arith.constant 0 : index
    %c0_85 = arith.constant 0 : index
    %96 = vector.load %arg2[%c0_84, %c0_85] : memref<384x1xf32, #tpu.memory_space<vmem>>, vector<384x1xf32>
    %cst_86 = arith.constant 0.000000e+00 : f32
    %97 = vector.broadcast %cst_86 : f32 to vector<384x1xf32>
    %98 = arith.cmpf ogt, %96, %97 : vector<384x1xf32>
    %cst_87 = arith.constant 0.000000e+00 : f32
    %99 = vector.shape_cast %98 : vector<384x1xi1> to vector<384x1xi1>
    %100 = vector.broadcast %99 : vector<384x1xi1> to vector<384x128xi1>
    %101 = vector.broadcast %cst_87 : f32 to vector<384x128xf32>
    %102 = arith.select %100, %92, %101 : vector<384x128xi1>, vector<384x128xf32>
    %cst_88 = arith.constant dense<0.000000e+00> : vector<128xf32>
    %103 = vector.multi_reduction <add>, %102, %cst_88 [0] : vector<384x128xf32> to vector<128xf32>
    %104 = vector.shape_cast %103 : vector<128xf32> to vector<1x128xf32>
    %105 = arith.mulf %102, %102 : vector<384x128xf32>
    %cst_89 = arith.constant dense<0.000000e+00> : vector<128xf32>
    %106 = vector.multi_reduction <add>, %105, %cst_89 [0] : vector<384x128xf32> to vector<128xf32>
    %107 = vector.shape_cast %106 : vector<128xf32> to vector<1x128xf32>
    %cst_90 = arith.constant 0.000000e+00 : f32
    %108 = vector.broadcast %cst_90 : f32 to vector<6x128xf32>
    %109 = tpu.concatenate %104, %107, %108 in 0 : vector<1x128xf32>, vector<1x128xf32>, vector<6x128xf32> -> vector<8x128xf32>
    %c0_91 = arith.constant 0 : index
    %c0_92 = arith.constant 0 : index
    %c0_93 = arith.constant 0 : index
    %110 = vector.load %arg6[%c0_91, %c0_92, %c0_93] : memref<1x8x128xf32, #tpu.memory_space<vmem>>, vector<1x8x128xf32>
    %111 = vector.shape_cast %110 : vector<1x8x128xf32> to vector<8x128xf32>
    %112 = vector.shape_cast %109 : vector<8x128xf32> to vector<1x8x128xf32>
    tpu.vector_store %arg6[%c0_91, %c0_92, %c0_93], %112 {strides = array<i32>} : memref<1x8x128xf32, #tpu.memory_space<vmem>>, vector<1x8x128xf32>,
    return
  }
  func.func @transform_0(%arg0: i32, %arg1: i32) -> (i32, i32) {
    %c1_i32 = arith.constant 1 : i32
    %0 = arith.addi %arg1, %c1_i32 : i32
    %c0_i32 = arith.constant 0 : i32
    %c0_i32_0 = arith.constant 0 : i32
    return %0, %c0_i32 : i32, i32
  }
  func.func @transform_1(%arg0: i32, %arg1: i32) -> (i32, i32, i32) {
    %c0_i32 = arith.constant 0 : i32
    %c0_i32_0 = arith.constant 0 : i32
    %c0_i32_1 = arith.constant 0 : i32
    return %arg0, %c0_i32, %c0_i32_0 : i32, i32, i32
  }
  func.func @transform_2(%arg0: i32, %arg1: i32) -> (i32, i32, i32) {
    %c0_i32 = arith.constant 0 : i32
    %c0_i32_0 = arith.constant 0 : i32
    %c0_i32_1 = arith.constant 0 : i32
    %c0_i32_2 = arith.constant 0 : i32
    return %c0_i32, %c0_i32_0, %c0_i32_1 : i32, i32, i32
  }
  func.func @transform_3(%arg0: i32, %arg1: i32) -> (i32, i32, i32) {
    %c1_i32 = arith.constant 1 : i32
    %0 = arith.addi %arg1, %c1_i32 : i32
    %c0_i32 = arith.constant 0 : i32
    %c0_i32_0 = arith.constant 0 : i32
    return %arg0, %0, %c0_i32 : i32, i32, i32
  }
  func.func @transform_4(%arg0: i32, %arg1: i32) -> (i32, i32, i32) {
    %c0_i32 = arith.constant 0 : i32
    %c0_i32_0 = arith.constant 0 : i32
    return %arg0, %arg1, %c0_i32 : i32, i32, i32
  }
}

module attributes {stable_mosaic.version = 11 : i64} {
  func.func @kernel(%arg0: i32, %arg1: i32, %arg2: memref<384x1xf32, #tpu.memory_space<vmem>>, %arg3: memref<1x384x128xf32, #tpu.memory_space<vmem>>, %arg4: memref<1x128xf32, #tpu.memory_space<vmem>>, %arg5: memref<1x128xf32, #tpu.memory_space<vmem>>, %arg6: memref<1x384x4xf32, #tpu.memory_space<vmem>>, %arg7: memref<4x128xf32, #tpu.memory_space<vmem>>, %arg8: memref<1x384x128xf32, #tpu.memory_space<vmem>>) attributes {dimension_semantics = [#tpu.dimension_semantics<parallel>, #tpu.dimension_semantics<parallel>], iteration_bounds = array<i64: 2, 1>, scalar_prefetch = 0 : i64, scratch_operands = 0 : i64, tpu.core_type = #tpu.core_type<tc>, window_params = [{transform_indices = @transform_0, window_bounds = array<i64: 384, 1>}, {transform_indices = @transform_1, window_bounds = array<i64: 1, 384, 128>}, {pipeline_mode = #tpu.pipeline_mode<synchronous>, transform_indices = @transform_2, window_bounds = array<i64: 1, 128>}, {pipeline_mode = #tpu.pipeline_mode<synchronous>, transform_indices = @transform_3, window_bounds = array<i64: 1, 128>}, {transform_indices = @transform_4, window_bounds = array<i64: 1, 384, 4>}, {pipeline_mode = #tpu.pipeline_mode<synchronous>, transform_indices = @transform_5, window_bounds = array<i64: 4, 128>}, {transform_indices = @transform_6, window_bounds = array<i64: 1, 384, 128>}]} {
    %c0 = arith.constant 0 : index
    %c0_0 = arith.constant 0 : index
    %0 = vector.load %arg2[%c0, %c0_0] : memref<384x1xf32, #tpu.memory_space<vmem>>, vector<384x1xf32>
    %cst = arith.constant 0.000000e+00 : f32
    %1 = vector.broadcast %cst : f32 to vector<384x1xf32>
    %2 = arith.cmpf ogt, %0, %1 : vector<384x1xf32>
    %c0_1 = arith.constant 0 : index
    %c0_2 = arith.constant 0 : index
    %c0_3 = arith.constant 0 : index
    %3 = vector.load %arg3[%c0_1, %c0_2, %c0_3] : memref<1x384x128xf32, #tpu.memory_space<vmem>>, vector<1x384x128xf32>
    %4 = vector.shape_cast %3 : vector<1x384x128xf32> to vector<384x128xf32>
    %c0_4 = arith.constant 0 : index
    %c0_5 = arith.constant 0 : index
    %5 = vector.load %arg4[%c0_4, %c0_5] : memref<1x128xf32, #tpu.memory_space<vmem>>, vector<1x128xf32>
    %6 = vector.broadcast %5 : vector<1x128xf32> to vector<384x128xf32>
    %7 = arith.mulf %4, %6 : vector<384x128xf32>
    %c0_6 = arith.constant 0 : index
    %c0_7 = arith.constant 0 : index
    %8 = vector.load %arg5[%c0_6, %c0_7] : memref<1x128xf32, #tpu.memory_space<vmem>>, vector<1x128xf32>
    %9 = vector.broadcast %8 : vector<1x128xf32> to vector<384x128xf32>
    %10 = arith.addf %7, %9 : vector<384x128xf32>
    %c0_8 = arith.constant 0 : index
    %c0_9 = arith.constant 0 : index
    %c0_10 = arith.constant 0 : index
    %11 = vector.load %arg6[%c0_8, %c0_9, %c0_10] : memref<1x384x4xf32, #tpu.memory_space<vmem>>, vector<1x384x4xf32>
    %12 = vector.shape_cast %11 : vector<1x384x4xf32> to vector<384x4xf32>
    %c0_11 = arith.constant 0 : index
    %c0_12 = arith.constant 0 : index
    %13 = vector.load %arg7[%c0_11, %c0_12] : memref<4x128xf32, #tpu.memory_space<vmem>>, vector<4x128xf32>
    %cst_13 = arith.constant dense<0.000000e+00> : vector<384x128xf32>
    %14 = tpu.matmul %12, %13, %cst_13 {dimension_numbers = #tpu.dot_dimension_numbers<[1], [0], [0], [1], [0, 0, 1, 1], [], []>} : vector<384x4xf32>, vector<4x128xf32>, vector<384x128xf32> -> vector<384x128xf32>
    %15 = arith.addf %10, %14 : vector<384x128xf32>
    %cst_14 = arith.constant 0.000000e+00 : f32
    %16 = vector.broadcast %cst_14 : f32 to vector<384x128xf32>
    %17 = arith.maximumf %15, %16 : vector<384x128xf32>
    %cst_15 = arith.constant 0.000000e+00 : f32
    %18 = vector.shape_cast %2 : vector<384x1xi1> to vector<384x1xi1>
    %19 = vector.broadcast %18 : vector<384x1xi1> to vector<384x128xi1>
    %20 = vector.broadcast %cst_15 : f32 to vector<384x128xf32>
    %21 = arith.select %19, %17, %20 : vector<384x128xi1>, vector<384x128xf32>
    %c0_16 = arith.constant 0 : index
    %c0_17 = arith.constant 0 : index
    %c0_18 = arith.constant 0 : index
    %22 = vector.load %arg8[%c0_16, %c0_17, %c0_18] : memref<1x384x128xf32, #tpu.memory_space<vmem>>, vector<1x384x128xf32>
    %23 = vector.shape_cast %22 : vector<1x384x128xf32> to vector<384x128xf32>
    %24 = vector.shape_cast %21 : vector<384x128xf32> to vector<1x384x128xf32>
    tpu.vector_store %arg8[%c0_16, %c0_17, %c0_18], %24 {strides = array<i32>} : memref<1x384x128xf32, #tpu.memory_space<vmem>>, vector<1x384x128xf32>,
    return
  }
  func.func @transform_0(%arg0: i32, %arg1: i32) -> (i32, i32) {
    %c1_i32 = arith.constant 1 : i32
    %0 = arith.addi %arg1, %c1_i32 : i32
    %c0_i32 = arith.constant 0 : i32
    %c0_i32_0 = arith.constant 0 : i32
    return %0, %c0_i32 : i32, i32
  }
  func.func @transform_1(%arg0: i32, %arg1: i32) -> (i32, i32, i32) {
    %c1_i32 = arith.constant 1 : i32
    %0 = arith.addi %arg1, %c1_i32 : i32
    %c0_i32 = arith.constant 0 : i32
    %c0_i32_0 = arith.constant 0 : i32
    return %arg0, %0, %c0_i32 : i32, i32, i32
  }
  func.func @transform_2(%arg0: i32, %arg1: i32) -> (i32, i32) {
    %c0_i32 = arith.constant 0 : i32
    %c0_i32_0 = arith.constant 0 : i32
    %c0_i32_1 = arith.constant 0 : i32
    return %c0_i32, %c0_i32_0 : i32, i32
  }
  func.func @transform_3(%arg0: i32, %arg1: i32) -> (i32, i32) {
    %c0_i32 = arith.constant 0 : i32
    %c0_i32_0 = arith.constant 0 : i32
    %c0_i32_1 = arith.constant 0 : i32
    return %c0_i32, %c0_i32_0 : i32, i32
  }
  func.func @transform_4(%arg0: i32, %arg1: i32) -> (i32, i32, i32) {
    %c1_i32 = arith.constant 1 : i32
    %0 = arith.addi %arg1, %c1_i32 : i32
    %c0_i32 = arith.constant 0 : i32
    %c0_i32_0 = arith.constant 0 : i32
    return %arg0, %0, %c0_i32 : i32, i32, i32
  }
  func.func @transform_5(%arg0: i32, %arg1: i32) -> (i32, i32) {
    %c0_i32 = arith.constant 0 : i32
    %c0_i32_0 = arith.constant 0 : i32
    %c0_i32_1 = arith.constant 0 : i32
    return %c0_i32, %c0_i32_0 : i32, i32
  }
  func.func @transform_6(%arg0: i32, %arg1: i32) -> (i32, i32, i32) {
    %c0_i32 = arith.constant 0 : i32
    %c0_i32_0 = arith.constant 0 : i32
    return %arg0, %arg1, %c0_i32 : i32, i32, i32
  }
}

</mosaic_0001>

<bundles_post_ra>
// kernel: residual_forward.5
= control target key start
LH: loop header
LB: loop body
LE: loop exit
PB: predicated region body
PF: predicated region fallthrough
CT: control target
= control target key end

     0   :  { %s1644_s15 = smov 0   ;;  %s1646_s16 = smov 0   ;;  %s2299_s0 = inlined_call_operand.vmem [shape: f32[1152,1], index: 0, kind: input, shape index: {}]   ;;  %s2300_s1 = inlined_call_operand.vmem [shape: f32[2,1160,128], index: 1, kind: input, shape index: {}]   ;;  %s2301_s2 = inlined_call_operand.vmem [shape: f32[1,128], index: 2, kind: input, shape index: {}]   ;;  %s2302_s3 = inlined_call_operand.vmem [shape: f32[1,128], index: 3, kind: input, shape index: {}]   ;;  %s2303_s4 = inlined_call_operand.vmem [shape: f32[2,1160,128], index: 4, kind: output, shape index: {}]  }
   0x1   :  { %s1648_s17 = smov 0   ;;  %s1650_s18 = smov 0  }
   0x2   :  { %s1652_s19 = smov 0   ;;  %s1654_s20 = smov 0  }
   0x3   :  { %s1656_s21 = smov 0  }
   0x4 LB: > { %s23_s22 = sadd.s32 1, %s1576_s19  ;;  %s26_s23 = sadd.s32 1, %s1580_s20  ;;  %s1584_s21 = sphi %s1656_s21, %s14_s21   ;;  %s1580_s20 = sphi %s1654_s20, %s2315_s20   ;;  %s1576_s19 = sphi %s1652_s19, %s2314_s19   ;;  %s1572_s18 = sphi %s1650_s18, %s2313_s18   ;;  %s1568_s17 = sphi %s1648_s17, %s2312_s17   ;;  %s1564_s16 = sphi %s1646_s16, %s2311_s16   ;;  %s1560_s15 = sphi %s1644_s15, %s2310_s15  }
   0x5   : > { %p24_p0 = scmp.ge.s32.totalorder %s23_s22, 3  ;;  %s1346_s24 = sadd.s32 4294967295, %s1584_s21  }
   0x6   : > { %p141_p1 = scmp.ne.s32.totalorder %s1564_s16, %s1560_s15  ;;  %p142_p2 = scmp.eq.s32.totalorder %s1346_s24, 5 }
   0x7   : > { %s2317_s22 = smov (%p24_p0, %s23_s22), 0  ;;  %s2319_s23 = smov (!%p24_p0, %s26_s23), %s1580_s20 }
   0x8   : > { %s127_s25 = ssub.s32 %s1576_s19, %s2317_s22  ;;  %p28_p3 = scmp.ge.s32.totalorder %s2319_s23, 2 }
   0x9   : > { %p1350_p4 = scmp.ge.s32.totalorder %s1584_s21, 1  ;;  %p1688_p5 = por %p142_p2, %p141_p1 }
   0xa   : > { %p202_p6 = scmp.lt.s32.totalorder %s1584_s21, 7  ;;  %s2321_s23 = smov (%p28_p3, %s2319_s23), 0 }
   0xb   : > { %s126_s27 = ssub.s32 %s1580_s20, %s2321_s23  ;;  %s131_s29 = sadd.s32 1, %s1564_s16 }
   0xc   : > { %p203_p7 = pnand %p1350_p4, %p202_p6  ;;  %s128_s28 = sor.u32 %s127_s25, %s126_s27 }
   0xd   : > { %p129_p8 = scmp.eq.s32.totalorder %s128_s28, 0  ;;  %s1701_s5 = smul.u32 (!%p203_p7), 48, %s1568_s17  ;;  %v1618_v0 = vmov (!%p203_p7), 0  }
   0xe   : > { %206 = sbr.rel (%p203_p7) target bundleno = 327 (0x147), region = 36  ;;  %1493 = vset.pattern.permute.xlu1 (!%p203_p7), %v1618_v0  ;;  %1492 = vset.pattern.permute.xlu0 (!%p203_p7), %v1618_v0  ;;  %p251_p10 = scmp.lt.s32.totalorder (!%p203_p7), %s1572_s18, 1 }
   0xf   : > { %s1699_s30 = scalar_select %p129_p8, %s1564_s16, %s131_s29  }
  0x10   : > { %p241_p9 = scmp.lt.s32.totalorder (!%p203_p7), %s1701_s5, 143  ;;  %p253_p11 = scmp.lt.s32.totalorder (!%p203_p7), %s1701_s5, 144 }
  0x11   : > { %s237_s8 = sand.u32 (!%p203_p7), 1, %s1560_s15  }
  0x12   : > { %s1367_s9 = smul.u32 (!%p203_p7), 384, %s237_s8 }
  0x14   : > { %s1978_s15 = scalar_lea.vmem (!%p203_p7), [#allocation2], %s1367_s9  }
  0x15   : > { %s242_s6 = scalar_select %p241_p9, %s1701_s5, 143 }
  0x16   : > { %s252_s11 = scalar_select %p251_p10, %s1572_s18, 1 }
  0x17   : > { %s1351_s7 = sshll.u32 %s242_s6, 3 }
  0x18   : > { %s1710_s10 = scalar_lea.vmem %s2299_s0, %s1351_s7  ;;  %s1368_s13 = smul.u32 145, %s252_s11 }
  0x19   : > { %v271_v1 = vld [vmem:[%s1710_s10 + $0x10] sm:$0xff]  ;;  %v269_v2 = vld [vmem:[%s1710_s10] sm:$0xff]  ;;  %v272_v3 = vld [vmem:[%s1710_s10 + $0x18] sm:$0xff]  ;;  %s254_s12 = scalar_select %p253_p11, %s1701_s5, 144 }
  0x1a   : > { %vm319_vm0 = vcmp.gt.f32.partialorder %v271_v1, 0.0  ;;  %vm317_vm1 = vcmp.gt.f32.partialorder %v269_v2, 0.0  ;;  %vm320_vm2 = vcmp.gt.f32.partialorder %v272_v3, 0.0  ;;  %v270_v4 = vld [vmem:[%s1710_s10 + $0x8] sm:$0xff]  ;;  %v273_v8 = vld [vmem:[%s1710_s10 + $0x20] sm:$0xff]  ;;  %v276_v11 = vld [vmem:[%s1710_s10 + $0x38] sm:$0xff] }
  0x1b   : > { %v573_v5 = vsel %vm319_vm0, 1, %v1618_v0  ;;  %v571_v6 = vsel %vm317_vm1, 1, %v1618_v0  ;;  %vm318_vm3 = vcmp.gt.f32.partialorder %v270_v4, 0.0  ;;  %v274_v7 = vld [vmem:[%s1710_s10 + $0x28] sm:$0xff]  ;;  %v574_v9 = vsel %vm320_vm2, 1, %v1618_v0  ;;  %v275_v12 = vld [vmem:[%s1710_s10 + $0x30] sm:$0xff]  ;;  %s256_s14 = sadd.s32 %s1368_s13, %s254_s12 }
  0x1c   : > { %626 = vperm.xlu1 %1493, %v573_v5   ;;  %620 = vperm.xlu0 %1492, %v571_v6   ;;  %v572_v10 = vsel %vm318_vm3, 1, %v1618_v0  ;;  %vm322_vm4 = vcmp.gt.f32.partialorder %v274_v7, 0.0  ;;  %vm321_vm5 = vcmp.gt.f32.partialorder %v273_v8, 0.0  ;;  %vm324_vm6 = vcmp.gt.f32.partialorder %v276_v11, 0.0  ;;  %v278_v15 = vld [vmem:[%s1710_s10 + $0x48] sm:$0xff]  ;;  %v277_v16 = vld [vmem:[%s1710_s10 + $0x40] sm:$0xff] }
  0x1d   : > { %v576_v13 = vsel %vm322_vm4, 1, %v1618_v0  ;;  %v575_v14 = vsel %vm321_vm5, 1, %v1618_v0  ;;  %vm323_vm7 = vcmp.gt.f32.partialorder %v275_v12, 0.0  ;;  %v280_v17 = vld [vmem:[%s1710_s10 + $0x58] sm:$0xff]  ;;  %v279_v18 = vld [vmem:[%s1710_s10 + $0x50] sm:$0xff]  ;;  %v282_v19 = vld [vmem:[%s1710_s10 + $0x68] sm:$0xff] }
  0x1e   : > { %v281_v20 = vld [vmem:[%s1710_s10 + $0x60] sm:$0xff]  ;;  %v578_v21 = vsel %vm324_vm6, 1, %v1618_v0  ;;  %v577_v22 = vsel %vm323_vm7, 1, %v1618_v0  ;;  %vm326_vm8 = vcmp.gt.f32.partialorder %v278_v15, 0.0  ;;  %vm325_vm9 = vcmp.gt.f32.partialorder %v277_v16, 0.0  ;;  %v302_v24 = vld [vmem:[%s1710_s10 + $0x108] sm:$0xff] }
  0x1f   : > { %vm328_vm10 = vcmp.gt.f32.partialorder %v280_v17, 0.0  ;;  %vm327_vm11 = vcmp.gt.f32.partialorder %v279_v18, 0.0  ;;  %vm330_vm12 = vcmp.gt.f32.partialorder %v282_v19, 0.0  ;;  %vm329_vm13 = vcmp.gt.f32.partialorder %v281_v20, 0.0  ;;  %v301_v25 = vld [vmem:[%s1710_s10 + $0x100] sm:$0xff]  ;;  %v304_v30 = vld [vmem:[%s1710_s10 + $0x118] sm:$0xff] }
  0x20   : > { %629 = vperm.xlu1 %1493, %v574_v9   ;;  %623 = vperm.xlu0 %1492, %v572_v10   ;;  %v580_v23 = vsel %vm326_vm8, 1, %v1618_v0  ;;  %v579_v26 = vsel %vm325_vm9, 1, %v1618_v0  ;;  %v582_v27 = vsel %vm328_vm10, 1, %v1618_v0  ;;  %v581_v28 = vsel %vm327_vm11, 1, %v1618_v0  ;;  %v303_v31 = vld [vmem:[%s1710_s10 + $0x110] sm:$0xff]  ;;  %v306_v33 = vld [vmem:[%s1710_s10 + $0x128] sm:$0xff] }
  0x21   : > { %v584_v29 = vsel %vm330_vm12, 1, %v1618_v0  ;;  %v583_v32 = vsel %vm329_vm13, 1, %v1618_v0  ;;  %vm350_vm14 = vcmp.gt.f32.partialorder %v302_v24, 0.0  ;;  %vm349_vm15 = vcmp.gt.f32.partialorder %v301_v25, 0.0  ;;  %v305_v34 = vld [vmem:[%s1710_s10 + $0x120] sm:$0xff]  ;;  %v308_v38 = vld [vmem:[%s1710_s10 + $0x138] sm:$0xff] }
  0x22   : > { %vm352_vm0 = vcmp.gt.f32.partialorder %v304_v30, 0.0  ;;  %v1747_v35 = vsel %vm350_vm14, 1, %v1618_v0  ;;  %v1750_v36 = vsel %vm349_vm15, 1, %v1618_v0  ;;  %vm351_vm1 = vcmp.gt.f32.partialorder %v303_v31, 0.0  ;;  %v307_v39 = vld [vmem:[%s1710_s10 + $0x130] sm:$0xff]  ;;  %v310_v41 = vld [vmem:[%s1710_s10 + $0x148] sm:$0xff] }
  0x23   : > { %v1753_v37 = vsel %vm352_vm0, 1, %v1618_v0  ;;  %v1758_v40 = vsel %vm351_vm1, 1, %v1618_v0  ;;  %vm354_vm2 = vcmp.gt.f32.partialorder %v306_v33, 0.0  ;;  %vm353_vm3 = vcmp.gt.f32.partialorder %v305_v34, 0.0  ;;  %v309_v42 = vld [vmem:[%s1710_s10 + $0x140] sm:$0xff]  ;;  %v284_v43 = vld [vmem:[%s1710_s10 + $0x78] sm:$0xff] }
  0x24   : > { %635 = vperm.xlu1 %1493, %v576_v13   ;;  %632 = vperm.xlu0 %1492, %v575_v14   ;;  %vm356_vm4 = vcmp.gt.f32.partialorder %v308_v38, 0.0  ;;  %v283_v44 = vld [vmem:[%s1710_s10 + $0x70] sm:$0xff]  ;;  %v1765_v45 = vsel %vm354_vm2, 1, %v1618_v0  ;;  %v1768_v46 = vsel %vm353_vm3, 1, %v1618_v0  ;;  %vm355_vm5 = vcmp.gt.f32.partialorder %v307_v39, 0.0  ;;  %v312_v48 = vld [vmem:[%s1710_s10 + $0x158] sm:$0xff] }
  0x25   : > { %v1771_v47 = vsel %vm356_vm4, 1, %v1618_v0  ;;  %v311_v49 = vld [vmem:[%s1710_s10 + $0x150] sm:$0xff]  ;;  %v1776_v50 = vsel %vm355_vm5, 1, %v1618_v0  ;;  %vm358_vm6 = vcmp.gt.f32.partialorder %v310_v41, 0.0  ;;  %vm357_vm7 = vcmp.gt.f32.partialorder %v309_v42, 0.0  ;;  %v314_v51 = vld [vmem:[%s1710_s10 + $0x168] sm:$0xff] }
  0x26   : > { %vm360_vm8 = vcmp.gt.f32.partialorder %v312_v48, 0.0  ;;  %v313_v52 = vld [vmem:[%s1710_s10 + $0x160] sm:$0xff]  ;;  %v1781_v53 = vsel %vm358_vm6, 1, %v1618_v0  ;;  %v1784_v54 = vsel %vm357_vm7, 1, %v1618_v0  ;;  %vm359_vm9 = vcmp.gt.f32.partialorder %v311_v49, 0.0  ;;  %v316_v56 = vld [vmem:[%s1710_s10 + $0x178] sm:$0xff] }
  0x27   : > { %v1787_v55 = vsel %vm360_vm8, 1, %v1618_v0  ;;  %v315_v57 = vld [vmem:[%s1710_s10 + $0x170] sm:$0xff]  ;;  %v1792_v58 = vsel %vm359_vm9, 1, %v1618_v0  ;;  %vm362_vm10 = vcmp.gt.f32.partialorder %v314_v51, 0.0  ;;  %vm361_vm11 = vcmp.gt.f32.partialorder %v313_v52, 0.0  ;;  %v286_v63 = vld [vmem:[%s1710_s10 + $0x88] sm:$0xff] }
  0x28   : > { %641 = vperm.xlu1 %1493, %v578_v21   ;;  %638 = vperm.xlu0 %1492, %v577_v22   ;;  %vm364_vm12 = vcmp.gt.f32.partialorder %v316_v56, 0.0  ;;  %v1795_v59 = vsel %vm362_vm10, 1, %v1618_v0  ;;  %v1798_v60 = vsel %vm361_vm11, 1, %v1618_v0  ;;  %vm363_vm13 = vcmp.gt.f32.partialorder %v315_v57, 0.0  ;;  %v285_v1 = vld [vmem:[%s1710_s10 + $0x80] sm:$0xff]  ;;  %v288_v4 = vld [vmem:[%s1710_s10 + $0x98] sm:$0xff] }
  0x29   : > { %v1801_v61 = vsel %vm364_vm12, 1, %v1618_v0  ;;  %vm332_vm14 = vcmp.gt.f32.partialorder %v284_v43, 0.0  ;;  %vm331_vm15 = vcmp.gt.f32.partialorder %v283_v44, 0.0  ;;  %v1804_v62 = vsel %vm363_vm13, 1, %v1618_v0  ;;  %v287_v5 = vld [vmem:[%s1710_s10 + $0x90] sm:$0xff]  ;;  %v290_v8 = vld [vmem:[%s1710_s10 + $0xa8] sm:$0xff] }
  0x2a   : > { %v586_v2 = vsel %vm332_vm14, 1, %v1618_v0  ;;  %v585_v3 = vsel %vm331_vm15, 1, %v1618_v0  ;;  %vm334_vm0 = vcmp.gt.f32.partialorder %v286_v63, 0.0  ;;  %vm333_vm1 = vcmp.gt.f32.partialorder %v285_v1, 0.0  ;;  %v289_v9 = vld [vmem:[%s1710_s10 + $0xa0] sm:$0xff]  ;;  %v292_v12 = vld [vmem:[%s1710_s10 + $0xb8] sm:$0xff] }
  0x2b   : > { %v588_v6 = vsel %vm334_vm0, 1, %v1618_v0  ;;  %v587_v7 = vsel %vm333_vm1, 1, %v1618_v0  ;;  %vm336_vm2 = vcmp.gt.f32.partialorder %v288_v4, 0.0  ;;  %vm335_vm3 = vcmp.gt.f32.partialorder %v287_v5, 0.0  ;;  %v291_v13 = vld [vmem:[%s1710_s10 + $0xb0] sm:$0xff]  ;;  %v294_v16 = vld [vmem:[%s1710_s10 + $0xc8] sm:$0xff] }
  0x2c   : > { %647 = vperm.xlu1 %1493, %v580_v23   ;;  %644 = vperm.xlu0 %1492, %v579_v26   ;;  %v590_v10 = vsel %vm336_vm2, 1, %v1618_v0  ;;  %v589_v11 = vsel %vm335_vm3, 1, %v1618_v0  ;;  %vm338_vm4 = vcmp.gt.f32.partialorder %v290_v8, 0.0  ;;  %vm337_vm5 = vcmp.gt.f32.partialorder %v289_v9, 0.0  ;;  %v293_v17 = vld [vmem:[%s1710_s10 + $0xc0] sm:$0xff]  ;;  %v296_v20 = vld [vmem:[%s1710_s10 + $0xd8] sm:$0xff] }
  0x2d   : > { %v592_v14 = vsel %vm338_vm4, 1, %v1618_v0  ;;  %v591_v15 = vsel %vm337_vm5, 1, %v1618_v0  ;;  %vm340_vm6 = vcmp.gt.f32.partialorder %v292_v12, 0.0  ;;  %vm339_vm7 = vcmp.gt.f32.partialorder %v291_v13, 0.0  ;;  %v295_v21 = vld [vmem:[%s1710_s10 + $0xd0] sm:$0xff]  ;;  %v298_v24 = vld [vmem:[%s1710_s10 + $0xe8] sm:$0xff] }
  0x2e   : > { %v594_v18 = vsel %vm340_vm6, 1, %v1618_v0  ;;  %v593_v19 = vsel %vm339_vm7, 1, %v1618_v0  ;;  %vm342_vm8 = vcmp.gt.f32.partialorder %v294_v16, 0.0  ;;  %vm341_vm9 = vcmp.gt.f32.partialorder %v293_v17, 0.0  ;;  %v297_v25 = vld [vmem:[%s1710_s10 + $0xe0] sm:$0xff]  ;;  %s1352_s17 = sshll.u32 %s256_s14, 3 }
  0x2f   : > { %v596_v22 = vsel %vm342_vm8, 1, %v1618_v0  ;;  %v595_v23 = vsel %vm341_vm9, 1, %v1618_v0  ;;  %vm344_vm10 = vcmp.gt.f32.partialorder %v296_v20, 0.0  ;;  %vm343_vm11 = vcmp.gt.f32.partialorder %v295_v21, 0.0  ;;  %s1847_s27 = scalar_lea.vmem %s2300_s1, %s1352_s17  ;;  %v1852_v34 = vld [vmem:[%s2301_s2] ss:$0 sm:$0xff] }
  0x30   : > { %653 = vperm.xlu1 %1493, %v582_v27   ;;  %650 = vperm.xlu0 %1492, %v581_v28   ;;  %v598_v26 = vsel %vm344_vm10, 1, %v1618_v0  ;;  %v597_v27 = vsel %vm343_vm11, 1, %v1618_v0  ;;  %vm346_vm12 = vcmp.gt.f32.partialorder %v298_v24, 0.0  ;;  %vm345_vm13 = vcmp.gt.f32.partialorder %v297_v25, 0.0  ;;  %v300_v28 = vld [vmem:[%s1710_s10 + $0xf8] sm:$0xff]  ;;  %v398_v38 = vld [vmem:[%s1847_s27 + $0x108] sm:$0xff] }
  0x31   : > { %v600_v30 = vsel %vm346_vm12, 1, %v1618_v0  ;;  %v599_v31 = vsel %vm345_vm13, 1, %v1618_v0  ;;  %vm348_vm14 = vcmp.gt.f32.partialorder %v300_v28, 0.0  ;;  %v397_v39 = vld [vmem:[%s1847_s27 + $0x100] sm:$0xff]  ;;  %v453_v41 = vmul.f32 %v1852_v34, %v398_v38  ;;  %v400_v48 = vld [vmem:[%s1847_s27 + $0x118] sm:$0xff]  ;;  %v399_v49 = vld [vmem:[%s1847_s27 + $0x110] sm:$0xff] }
  0x32   : > { %v1861_v42 = vld [vmem:[%s2302_s3] ss:$0 sm:$0xff]  ;;  %v455_v51 = vmul.f32 %v1852_v34, %v400_v48  ;;  %v454_v52 = vmul.f32 %v1852_v34, %v399_v49  ;;  %v402_v63 = vld [vmem:[%s1847_s27 + $0x128] sm:$0xff]  ;;  %v404_v4 = vld [vmem:[%s1847_s27 + $0x138] sm:$0xff]  ;;  %s1369_s11 = smul.u32 (%p1688_p5), 145, %s1572_s18 }
  0x33   : > { %v1864_v43 = vadd.f32 %v1861_v42, %v453_v41  ;;  %v401_v1 = vld [vmem:[%s1847_s27 + $0x120] sm:$0xff]  ;;  %v403_v5 = vld [vmem:[%s1847_s27 + $0x130] sm:$0xff]  ;;  %v406_v8 = vld [vmem:[%s1847_s27 + $0x148] sm:$0xff] }
  0x34   : > { %659 = vperm.xlu1 %1493, %v584_v29   ;;  %656 = vperm.xlu0 %1492, %v583_v32   ;;  %v299_v29 = vld [vmem:[%s1710_s10 + $0xf0] sm:$0xff]  ;;  %v602_v32 = vsel %vm348_vm14, 1, %v1618_v0  ;;  %v1876_v56 = vadd.f32 %v1861_v42, %v455_v51  ;;  %v1879_v57 = vadd.f32 %v1861_v42, %v454_v52  ;;  %v405_v9 = vld [vmem:[%s1847_s27 + $0x140] sm:$0xff]  ;;  %v408_v12 = vld [vmem:[%s1847_s27 + $0x158] sm:$0xff]  ;;  %s915_s10 = ssub.s32 (%p1688_p5), 145, %s1701_s5  ;;  %s921_s12 = sadd.s32 (%p1688_p5), %s1369_s11, %s1701_s5 }
  0x35   : > { %vm347_vm15 = vcmp.gt.f32.partialorder %v299_v29, 0.0  ;;  %v407_v13 = vld [vmem:[%s1847_s27 + $0x150] sm:$0xff]  ;;  %v410_v16 = vld [vmem:[%s1847_s27 + $0x168] sm:$0xff]  ;;  %v409_v17 = vld [vmem:[%s1847_s27 + $0x160] sm:$0xff]  ;;  %p916_p12 = scmp.lt.s32.totalorder (%p1688_p5), %s915_s10, 48  ;;  %s1357_s13 = sshll.u32 (%p1688_p5), %s921_s12, 3 }
  0x36   : > { %v601_v33 = vsel %vm347_vm15, 1, %v1618_v0  ;;  %v452_v0 = vmul.f32 %v1852_v34, %v397_v39  ;;  %v412_v20 = vld [vmem:[%s1847_s27 + $0x178] sm:$0xff]  ;;  %v411_v21 = vld [vmem:[%s1847_s27 + $0x170] sm:$0xff]  ;;  %v365_v25 = vld [vmem:[%s1847_s27] sm:$0xff]  ;;  %s2129_s25 = scalar_lea.vmem (%p1688_p5), %s2303_s4, %s1357_s13  }
  0x37   : > { %v367_v24 = vld [vmem:[%s1847_s27 + $0x10] sm:$0xff]  ;;  %v370_v28 = vld [vmem:[%s1847_s27 + $0x28] sm:$0xff]  ;;  %v372_v38 = vld [vmem:[%s1847_s27 + $0x38] sm:$0xff] }
  0x38   : > { %665 = vperm.xlu1 %1493, %v586_v2   ;;  %662 = vperm.xlu0 %1492, %v585_v3   ;;  %v1867_v44 = vadd.f32 %v1861_v42, %v452_v0  ;;  %v457_v2 = vmul.f32 %v1852_v34, %v402_v63  ;;  %v456_v3 = vmul.f32 %v1852_v34, %v401_v1  ;;  %v371_v49 = vld [vmem:[%s1847_s27 + $0x30] sm:$0xff] }
  0x39   : > { %v427_v1 = vmul.f32 %v1852_v34, %v372_v38 }
  0x3c   : > { %671 = vperm.xlu1 %1493, %v588_v6   ;;  %668 = vperm.xlu0 %1492, %v587_v7   ;;  %v459_v6 = vmul.f32 %v1852_v34, %v404_v4  ;;  %v458_v7 = vmul.f32 %v1852_v34, %v403_v5 }
  0x40   : > { %677 = vperm.xlu1 %1493, %v590_v10   ;;  %674 = vperm.xlu0 %1492, %v589_v11   ;;  %v461_v10 = vmul.f32 %v1852_v34, %v406_v8  ;;  %v460_v11 = vmul.f32 %v1852_v34, %v405_v9  ;;  %v374_v8 = vld [vmem:[%s1847_s27 + $0x48] sm:$0xff]  ;;  %v373_v9 = vld [vmem:[%s1847_s27 + $0x40] sm:$0xff] }
  0x44   : > { %683 = vperm.xlu1 %1493, %v592_v14   ;;  %680 = vperm.xlu0 %1492, %v591_v15   ;;  %v463_v14 = vmul.f32 %v1852_v34, %v408_v12  ;;  %v462_v15 = vmul.f32 %v1852_v34, %v407_v13  ;;  %v482_v13 = vadd.f32 %v1861_v42, %v427_v1 }
  0x48   : > { %689 = vperm.xlu1 %1493, %v594_v18   ;;  %686 = vperm.xlu0 %1492, %v593_v19   ;;  %v465_v18 = vmul.f32 %v1852_v34, %v410_v16  ;;  %v464_v19 = vmul.f32 %v1852_v34, %v409_v17  ;;  %v376_v16 = vld [vmem:[%s1847_s27 + $0x58] sm:$0xff] }
  0x4c   : > { %695 = vperm.xlu1 %1493, %v596_v22   ;;  %692 = vperm.xlu0 %1492, %v595_v23   ;;  %v467_v22 = vmul.f32 %v1852_v34, %v412_v20  ;;  %v466_v23 = vmul.f32 %v1852_v34, %v411_v21  ;;  %v428_v20 = vmul.f32 %v1852_v34, %v373_v9  ;;  %v375_v21 = vld [vmem:[%s1847_s27 + $0x50] sm:$0xff] }
  0x50   : > { %701 = vperm.xlu1 %1493, %v598_v26   ;;  %698 = vperm.xlu0 %1492, %v597_v27   ;;  %v422_v26 = vmul.f32 %v1852_v34, %v367_v24  ;;  %v368_v27 = vld [vmem:[%s1847_s27 + $0x18] sm:$0xff]  ;;  %v530_v24 = vmax.f32 %v482_v13, 0.0 }
  0x52   : > { %v477_v29 = vadd.f32 %v1861_v42, %v422_v26 }
  0x54   : > { %707 = vperm.xlu1 %1493, %v600_v30   ;;  %704 = vperm.xlu0 %1492, %v599_v31   ;;  %v369_v31 = vld [vmem:[%s1847_s27 + $0x20] sm:$0xff]  ;;  %v525_v39 = vmax.f32 %v477_v29, 0.0 }
  0x58   : > { %713 = vperm.xlu1 %1493, %v602_v32   ;;  %710 = vperm.xlu0 %1492, %v601_v33   ;;  %v425_v32 = vmul.f32 %v1852_v34, %v370_v28  ;;  %v424_v33 = vmul.f32 %v1852_v34, %v369_v31 }
  0x5a   : > { %v480_v63 = vadd.f32 %v1861_v42, %v425_v32 }
  0x5c   : > { %719 = vperm.xlu1 %1493, %v1747_v35   ;;  %716 = vperm.xlu0 %1492, %v1750_v36   ;;  %v1888_v35 = vadd.f32 %v1861_v42, %v457_v2  ;;  %v1891_v36 = vadd.f32 %v1861_v42, %v456_v3  ;;  %v479_v2 = vadd.f32 %v1861_v42, %v424_v33  ;;  %v528_v12 = vmax.f32 %v480_v63, 0.0 }
  0x5d   : > { %v426_v3 = vmul.f32 %v1852_v34, %v371_v49 }
  0x60   : > { %725 = vperm.xlu1 %1493, %v1753_v37   ;;  %722 = vperm.xlu0 %1492, %v1758_v40   ;;  %v1900_v37 = vadd.f32 %v1861_v42, %v459_v6  ;;  %v1903_v40 = vadd.f32 %v1861_v42, %v458_v7 }
  0x64   : > { %731 = vperm.xlu1 %1493, %v1765_v45   ;;  %728 = vperm.xlu0 %1492, %v1768_v46   ;;  %v1912_v45 = vadd.f32 %v1861_v42, %v461_v10  ;;  %v1915_v46 = vadd.f32 %v1861_v42, %v460_v11 }
  0x68   : > { %737 = vperm.xlu1 %1493, %v1771_v47   ;;  %734 = vperm.xlu0 %1492, %v1776_v50   ;;  %v1924_v47 = vadd.f32 %v1861_v42, %v463_v14  ;;  %v1927_v50 = vadd.f32 %v1861_v42, %v462_v15  ;;  %v527_v14 = vmax.f32 %v479_v2, 0.0  ;;  %v481_v15 = vadd.f32 %v1861_v42, %v426_v3 }
  0x6a   : > { %v529_v26 = vmax.f32 %v481_v15, 0.0 }
  0x6c   : > { %743 = vperm.xlu1 %1493, %v1781_v53   ;;  %740 = vperm.xlu0 %1492, %v1784_v54   ;;  %v1936_v53 = vadd.f32 %v1861_v42, %v465_v18  ;;  %v1939_v54 = vadd.f32 %v1861_v42, %v464_v19  ;;  %v429_v19 = vmul.f32 %v1852_v34, %v374_v8 }
  0x70   : > { %749 = vperm.xlu1 %1493, %v1787_v55   ;;  %746 = vperm.xlu0 %1492, %v1792_v58   ;;  %v1948_v55 = vadd.f32 %v1861_v42, %v467_v22  ;;  %v1951_v58 = vadd.f32 %v1861_v42, %v466_v23 }
  0x74   : > { %755 = vperm.xlu1 %1493, %v1795_v59   ;;  %752 = vperm.xlu0 %1492, %v1798_v60   ;;  %v420_v59 = vmul.f32 %v1852_v34, %v365_v25  ;;  %v366_v60 = vld [vmem:[%s1847_s27 + $0x8] sm:$0xff]  ;;  %v431_v25 = vmul.f32 %v1852_v34, %v376_v16 }
  0x76   : > { %v475_v30 = vadd.f32 %v1861_v42, %v420_v59  ;;  %v430_v59 = vmul.f32 %v1852_v34, %v375_v21  ;;  %v486_v38 = vadd.f32 %v1861_v42, %v431_v25 }
  0x78   : > { %761 = vperm.xlu1 %1493, %v1801_v61   ;;  %758 = vperm.xlu0 %1492, %v1804_v62   ;;  %v423_v61 = vmul.f32 %v1852_v34, %v368_v27  ;;  %v421_v62 = vmul.f32 %v1852_v34, %v366_v60  ;;  %v523_v41 = vmax.f32 %v475_v30, 0.0  ;;  %v378_v27 = vld [vmem:[%s1847_s27 + $0x68] sm:$0xff]  ;;  %v377_v60 = vld [vmem:[%s1847_s27 + $0x60] sm:$0xff]  ;;  %v484_v30 = vadd.f32 %v1861_v42, %v429_v19 }
  0x79   : > { %v433_v32 = vmul.f32 %v1852_v34, %v378_v27  ;;  %v432_v33 = vmul.f32 %v1852_v34, %v377_v60 }
  0x7a   : > { %v478_v0 = vadd.f32 %v1861_v42, %v423_v61  ;;  %v476_v48 = vadd.f32 %v1861_v42, %v421_v62  ;;  %v483_v61 = vadd.f32 %v1861_v42, %v428_v20  ;;  %v532_v49 = vmax.f32 %v484_v30, 0.0 }
  0x7b   : > { %v488_v2 = vadd.f32 %v1861_v42, %v433_v32 }
  0x7c   : > { %v526_v6 = vmax.f32 %v478_v0, 0.0  ;;  %v524_v7 = vmax.f32 %v476_v48, 0.0 }
  0x9b   : > { %v627_v51 = vpop.permute.xlu1 %626  ;;  %v621_v52 = vpop.permute.xlu0 %620 }
  0x9c   : > { %vm765_vm0 = vcmp.eq.s32.totalorder %v627_v51, 1  ;;  %vm763_vm1 = vcmp.eq.s32.totalorder %v621_v52, 1  ;;  %v531_v51 = vmax.f32 %v483_v61, 0.0  ;;  %v379_v52 = vld [vmem:[%s1847_s27 + $0x70] sm:$0xff] }
  0x9d   : > { %v813_v4 = vsel %vm765_vm0, %v525_v39, 0.0  ;;  %v811_v5 = vsel %vm763_vm1, %v523_v41, 0.0  ;;  %v485_v39 = vadd.f32 %v1861_v42, %v430_v59  ;;  %v380_v41 = vld [vmem:[%s1847_s27 + $0x78] sm:$0xff]  ;;  %v434_v9 = vmul.f32 %v1852_v34, %v379_v52 }
  0x9e   : > { %861 = vst [vmem:[%s1978_s15 + $0x10] sm:$0xff] %v813_v4  ;;  %859 = vst [vmem:[%s1978_s15] sm:$0xff] %v811_v5  ;;  %v435_v3 = vmul.f32 %v1852_v34, %v380_v41  ;;  %v534_v4 = vmax.f32 %v486_v38, 0.0  ;;  %v487_v5 = vadd.f32 %v1861_v42, %v432_v33 }
  0x9f   : > { %v630_v10 = vpop.permute.xlu1 %629  ;;  %v624_v11 = vpop.permute.xlu0 %623  ;;  %v533_v8 = vmax.f32 %v485_v39, 0.0  ;;  %v489_v21 = vadd.f32 %v1861_v42, %v434_v9 }
  0xa0   : > { %vm766_vm2 = vcmp.eq.s32.totalorder %v630_v10, 1  ;;  %vm764_vm3 = vcmp.eq.s32.totalorder %v624_v11, 1  ;;  %v382_v10 = vld [vmem:[%s1847_s27 + $0x88] sm:$0xff]  ;;  %v381_v11 = vld [vmem:[%s1847_s27 + $0x80] sm:$0xff]  ;;  %v490_v15 = vadd.f32 %v1861_v42, %v435_v3  ;;  %v535_v16 = vmax.f32 %v487_v5, 0.0 }
  0xa1   : > { %v814_v17 = vsel %vm766_vm2, %v526_v6, 0.0  ;;  %v812_v18 = vsel %vm764_vm3, %v524_v7, 0.0 }
  0xa2   : > { %862 = vst [vmem:[%s1978_s15 + $0x18] sm:$0xff] %v814_v17  ;;  %860 = vst [vmem:[%s1978_s15 + $0x8] sm:$0xff] %v812_v18  ;;  %v437_v17 = vmul.f32 %v1852_v34, %v382_v10  ;;  %v384_v18 = vld [vmem:[%s1847_s27 + $0x98] sm:$0xff] }
  0xa3   : > { %v636_v22 = vpop.permute.xlu1 %635  ;;  %v633_v23 = vpop.permute.xlu0 %632  ;;  %v439_v59 = vmul.f32 %v1852_v34, %v384_v18 }
  0xa4   : > { %vm768_vm4 = vcmp.eq.s32.totalorder %v636_v22, 1  ;;  %vm767_vm5 = vcmp.eq.s32.totalorder %v633_v23, 1  ;;  %v436_v22 = vmul.f32 %v1852_v34, %v381_v11  ;;  %v383_v23 = vld [vmem:[%s1847_s27 + $0x90] sm:$0xff]  ;;  %v492_v27 = vadd.f32 %v1861_v42, %v437_v17 }
  0xa5   : > { %v816_v28 = vsel %vm768_vm4, %v528_v12, 0.0  ;;  %v815_v29 = vsel %vm767_vm5, %v527_v14, 0.0  ;;  %v536_v14 = vmax.f32 %v488_v2, 0.0  ;;  %v438_v60 = vmul.f32 %v1852_v34, %v383_v23 }
  0xa6   : > { %864 = vst [vmem:[%s1978_s15 + $0x28] sm:$0xff] %v816_v28  ;;  %863 = vst [vmem:[%s1978_s15 + $0x20] sm:$0xff] %v815_v29  ;;  %v386_v28 = vld [vmem:[%s1847_s27 + $0xa8] sm:$0xff]  ;;  %v385_v29 = vld [vmem:[%s1847_s27 + $0xa0] sm:$0xff]  ;;  %v494_v41 = vadd.f32 %v1861_v42, %v439_v59 }
  0xa7   : > { %v642_v62 = vpop.permute.xlu1 %641  ;;  %v639_v31 = vpop.permute.xlu0 %638  ;;  %v441_v38 = vmul.f32 %v1852_v34, %v386_v28  ;;  %v440_v39 = vmul.f32 %v1852_v34, %v385_v29 }
  0xa8   : > { %vm770_vm6 = vcmp.eq.s32.totalorder %v642_v62, 1  ;;  %vm769_vm7 = vcmp.eq.s32.totalorder %v639_v31, 1  ;;  %v537_v62 = vmax.f32 %v489_v21, 0.0  ;;  %v491_v31 = vadd.f32 %v1861_v42, %v436_v22  ;;  %v391_v21 = vld [vmem:[%s1847_s27 + $0xd0] sm:$0xff] }
  0xa9   : > { %v818_v0 = vsel %vm770_vm6, %v530_v24, 0.0  ;;  %v817_v48 = vsel %vm769_vm7, %v529_v26, 0.0  ;;  %v538_v26 = vmax.f32 %v490_v15, 0.0  ;;  %v495_v5 = vadd.f32 %v1861_v42, %v440_v39 }
  0xaa   : > { %866 = vst [vmem:[%s1978_s15 + $0x38] sm:$0xff] %v818_v0  ;;  %865 = vst [vmem:[%s1978_s15 + $0x30] sm:$0xff] %v817_v48  ;;  %v493_v0 = vadd.f32 %v1861_v42, %v438_v60  ;;  %v539_v52 = vmax.f32 %v491_v31, 0.0  ;;  %v542_v10 = vmax.f32 %v494_v41, 0.0  ;;  %v446_v60 = vmul.f32 %v1852_v34, %v391_v21 }
  0xab   : > { %v648_v63 = vpop.permute.xlu1 %647  ;;  %v645_v1 = vpop.permute.xlu0 %644  ;;  %v543_v17 = vmax.f32 %v495_v5, 0.0 }
  0xac   : > { %vm772_vm8 = vcmp.eq.s32.totalorder %v648_v63, 1  ;;  %vm771_vm9 = vcmp.eq.s32.totalorder %v645_v1, 1  ;;  %v388_v63 = vld [vmem:[%s1847_s27 + $0xb8] sm:$0xff]  ;;  %v387_v1 = vld [vmem:[%s1847_s27 + $0xb0] sm:$0xff]  ;;  %v541_v11 = vmax.f32 %v493_v0, 0.0  ;;  %v501_v0 = vadd.f32 %v1861_v42, %v446_v60 }
  0xad   : > { %v820_v6 = vsel %vm772_vm8, %v532_v49, 0.0  ;;  %v819_v7 = vsel %vm771_vm9, %v531_v51, 0.0  ;;  %v540_v51 = vmax.f32 %v492_v27, 0.0 }
  0xae   : > { %868 = vst [vmem:[%s1978_s15 + $0x48] sm:$0xff] %v820_v6  ;;  %867 = vst [vmem:[%s1978_s15 + $0x40] sm:$0xff] %v819_v7  ;;  %v443_v6 = vmul.f32 %v1852_v34, %v388_v63  ;;  %v442_v7 = vmul.f32 %v1852_v34, %v387_v1 }
  0xaf   : > { %v654_v12 = vpop.permute.xlu1 %653  ;;  %v651_v13 = vpop.permute.xlu0 %650 }
  0xb0   : > { %vm774_vm10 = vcmp.eq.s32.totalorder %v654_v12, 1  ;;  %vm773_vm11 = vcmp.eq.s32.totalorder %v651_v13, 1  ;;  %v390_v12 = vld [vmem:[%s1847_s27 + $0xc8] sm:$0xff]  ;;  %v389_v13 = vld [vmem:[%s1847_s27 + $0xc0] sm:$0xff]  ;;  %v498_v18 = vadd.f32 %v1861_v42, %v443_v6 }
  0xb1   : > { %v822_v19 = vsel %vm774_vm10, %v534_v4, 0.0  ;;  %v821_v20 = vsel %vm773_vm11, %v533_v8, 0.0  ;;  %v496_v4 = vadd.f32 %v1861_v42, %v441_v38 }
  0xb2   : > { %870 = vst [vmem:[%s1978_s15 + $0x58] sm:$0xff] %v822_v19  ;;  %869 = vst [vmem:[%s1978_s15 + $0x50] sm:$0xff] %v821_v20  ;;  %v497_v19 = vadd.f32 %v1861_v42, %v442_v7  ;;  %v392_v20 = vld [vmem:[%s1847_s27 + $0xd8] sm:$0xff]  ;;  %v546_v28 = vmax.f32 %v498_v18, 0.0  ;;  %v549_v7 = vmax.f32 %v501_v0, 0.0  ;;  %v559_v0 = vmax.f32 %v1891_v36, 0.0 }
  0xb3   : > { %v660_v24 = vpop.permute.xlu1 %659  ;;  %v657_v25 = vpop.permute.xlu0 %656  ;;  %v447_v27 = vmul.f32 %v1852_v34, %v392_v20 }
  0xb4   : > { %vm776_vm12 = vcmp.eq.s32.totalorder %v660_v24, 1  ;;  %vm775_vm13 = vcmp.eq.s32.totalorder %v657_v25, 1  ;;  %v445_v24 = vmul.f32 %v1852_v34, %v390_v12  ;;  %v444_v25 = vmul.f32 %v1852_v34, %v389_v13 }
  0xb5   : > { %v824_v30 = vsel %vm776_vm12, %v536_v14, 0.0  ;;  %v823_v61 = vsel %vm775_vm13, %v535_v16, 0.0  ;;  %v544_v16 = vmax.f32 %v496_v4, 0.0  ;;  %v545_v29 = vmax.f32 %v497_v19, 0.0 }
  0xb6   : > { %872 = vst [vmem:[%s1978_s15 + $0x68] sm:$0xff] %v824_v30  ;;  %871 = vst [vmem:[%s1978_s15 + $0x60] sm:$0xff] %v823_v61  ;;  %v499_v31 = vadd.f32 %v1861_v42, %v444_v25  ;;  %v502_v41 = vadd.f32 %v1861_v42, %v447_v27 }
  0xb7   : > { %v666_v32 = vpop.permute.xlu1 %665  ;;  %v663_v33 = vpop.permute.xlu0 %662 }
  0xb8   : > { %vm778_vm14 = vcmp.eq.s32.totalorder %v666_v32, 1  ;;  %vm777_vm15 = vcmp.eq.s32.totalorder %v663_v33, 1  ;;  %v394_v32 = vld [vmem:[%s1847_s27 + $0xe8] sm:$0xff]  ;;  %v393_v33 = vld [vmem:[%s1847_s27 + $0xe0] sm:$0xff]  ;;  %v547_v1 = vmax.f32 %v499_v31, 0.0  ;;  %v550_v6 = vmax.f32 %v502_v41, 0.0 }
  0xb9   : > { %v826_v48 = vsel %vm778_vm14, %v538_v26, 0.0  ;;  %v825_v49 = vsel %vm777_vm15, %v537_v62, 0.0  ;;  %v500_v62 = vadd.f32 %v1861_v42, %v445_v24  ;;  %v560_v41 = vmax.f32 %v1888_v35, 0.0 }
  0xba   : > { %874 = vst [vmem:[%s1978_s15 + $0x78] sm:$0xff] %v826_v48  ;;  %873 = vst [vmem:[%s1978_s15 + $0x70] sm:$0xff] %v825_v49  ;;  %v449_v48 = vmul.f32 %v1852_v34, %v394_v32  ;;  %v448_v49 = vmul.f32 %v1852_v34, %v393_v33  ;;  %v558_v32 = vmax.f32 %v1876_v56, 0.0  ;;  %v557_v33 = vmax.f32 %v1879_v57, 0.0 }
  0xbb   : > { %v672_v2 = vpop.permute.xlu1 %671  ;;  %v669_v3 = vpop.permute.xlu0 %668  ;;  %v548_v63 = vmax.f32 %v500_v62, 0.0 }
  0xbc   : > { %vm780_vm0 = vcmp.eq.s32.totalorder %v672_v2, 1  ;;  %vm779_vm1 = vcmp.eq.s32.totalorder %v669_v3, 1  ;;  %v396_v2 = vld [vmem:[%s1847_s27 + $0xf8] sm:$0xff]  ;;  %v395_v3 = vld [vmem:[%s1847_s27 + $0xf0] sm:$0xff] }
  0xbd   : > { %v828_v8 = vsel %vm780_vm0, %v540_v51, 0.0  ;;  %v827_v9 = vsel %vm779_vm1, %v539_v52, 0.0  ;;  %v451_v12 = vmul.f32 %v1852_v34, %v396_v2  ;;  %v450_v13 = vmul.f32 %v1852_v34, %v395_v3 }
  0xbe   : > { %876 = vst [vmem:[%s1978_s15 + $0x88] sm:$0xff] %v828_v8  ;;  %875 = vst [vmem:[%s1978_s15 + $0x80] sm:$0xff] %v827_v9  ;;  %v504_v8 = vadd.f32 %v1861_v42, %v449_v48  ;;  %v503_v9 = vadd.f32 %v1861_v42, %v448_v49  ;;  %v564_v2 = vmax.f32 %v1912_v45, 0.0  ;;  %v563_v3 = vmax.f32 %v1915_v46, 0.0 }
  0xbf   : > { %v678_v14 = vpop.permute.xlu1 %677  ;;  %v675_v15 = vpop.permute.xlu0 %674  ;;  %v506_v20 = vadd.f32 %v1861_v42, %v451_v12  ;;  %v505_v21 = vadd.f32 %v1861_v42, %v450_v13 }
  0xc0   : > { %vm782_vm2 = vcmp.eq.s32.totalorder %v678_v14, 1  ;;  %vm781_vm3 = vcmp.eq.s32.totalorder %v675_v15, 1 }
  0xc1   : > { %v830_v22 = vsel %vm782_vm2, %v542_v10, 0.0  ;;  %v829_v23 = vsel %vm781_vm3, %v541_v11, 0.0  ;;  %v554_v25 = vmax.f32 %v506_v20, 0.0 }
  0xc2   : > { %878 = vst [vmem:[%s1978_s15 + $0x98] sm:$0xff] %v830_v22  ;;  %877 = vst [vmem:[%s1978_s15 + $0x90] sm:$0xff] %v829_v23 }
  0xc3   : > { %v684_v26 = vpop.permute.xlu1 %683  ;;  %v681_v59 = vpop.permute.xlu0 %680 }
  0xc4   : > { %vm784_vm4 = vcmp.eq.s32.totalorder %v684_v26, 1  ;;  %vm783_vm5 = vcmp.eq.s32.totalorder %v681_v59, 1  ;;  %v553_v26 = vmax.f32 %v505_v21, 0.0 }
  0xc5   : > { %v832_v30 = vsel %vm784_vm4, %v544_v16, 0.0  ;;  %v831_v61 = vsel %vm783_vm5, %v543_v17, 0.0  ;;  %v552_v16 = vmax.f32 %v504_v8, 0.0  ;;  %v551_v17 = vmax.f32 %v503_v9, 0.0 }
  0xc6   : > { %880 = vst [vmem:[%s1978_s15 + $0xa8] sm:$0xff] %v832_v30  ;;  %879 = vst [vmem:[%s1978_s15 + $0xa0] sm:$0xff] %v831_v61 }
  0xc7   : > { %v690_v38 = vpop.permute.xlu1 %689  ;;  %v687_v39 = vpop.permute.xlu0 %686 }
  0xc8   : > { %vm786_vm6 = vcmp.eq.s32.totalorder %v690_v38, 1  ;;  %vm785_vm7 = vcmp.eq.s32.totalorder %v687_v39, 1 }
  0xc9   : > { %v834_v51 = vsel %vm786_vm6, %v546_v28, 0.0  ;;  %v833_v52 = vsel %vm785_vm7, %v545_v29, 0.0  ;;  %v556_v28 = vmax.f32 %v1864_v43, 0.0  ;;  %v555_v29 = vmax.f32 %v1867_v44, 0.0 }
  0xca   : > { %882 = vst [vmem:[%s1978_s15 + $0xb8] sm:$0xff] %v834_v51  ;;  %881 = vst [vmem:[%s1978_s15 + $0xb0] sm:$0xff] %v833_v52  ;;  %v562_v51 = vmax.f32 %v1900_v37, 0.0  ;;  %v561_v52 = vmax.f32 %v1903_v40, 0.0 }
  0xcb   : > { %v696_v4 = vpop.permute.xlu1 %695  ;;  %v693_v5 = vpop.permute.xlu0 %692 }
  0xcc   : > { %vm788_vm8 = vcmp.eq.s32.totalorder %v696_v4, 1  ;;  %vm787_vm9 = vcmp.eq.s32.totalorder %v693_v5, 1 }
  0xcd   : > { %v836_v10 = vsel %vm788_vm8, %v548_v63, 0.0  ;;  %v835_v11 = vsel %vm787_vm9, %v547_v1, 0.0 }
  0xce   : > { %884 = vst [vmem:[%s1978_s15 + $0xc8] sm:$0xff] %v836_v10  ;;  %883 = vst [vmem:[%s1978_s15 + $0xc0] sm:$0xff] %v835_v11  ;;  %v568_v10 = vmax.f32 %v1936_v53, 0.0  ;;  %v567_v11 = vmax.f32 %v1939_v54, 0.0 }
  0xcf   : > { %v702_v14 = vpop.permute.xlu1 %701  ;;  %v699_v15 = vpop.permute.xlu0 %698 }
  0xd0   : > { %vm790_vm10 = vcmp.eq.s32.totalorder %v702_v14, 1  ;;  %vm789_vm11 = vcmp.eq.s32.totalorder %v699_v15, 1  ;;  %v570_v14 = vmax.f32 %v1948_v55, 0.0  ;;  %v569_v15 = vmax.f32 %v1951_v58, 0.0 }
  0xd1   : > { %v838_v18 = vsel %vm790_vm10, %v550_v6, 0.0  ;;  %v837_v19 = vsel %vm789_vm11, %v549_v7, 0.0  ;;  %v566_v6 = vmax.f32 %v1924_v47, 0.0  ;;  %v565_v7 = vmax.f32 %v1927_v50, 0.0 }
  0xd2   : > { %886 = vst [vmem:[%s1978_s15 + $0xd8] sm:$0xff] %v838_v18  ;;  %885 = vst [vmem:[%s1978_s15 + $0xd0] sm:$0xff] %v837_v19 }
  0xd3   : > { %v708_v22 = vpop.permute.xlu1 %707  ;;  %v705_v34 = vpop.permute.xlu0 %704 }
  0xd4   : > { %vm792_vm12 = vcmp.eq.s32.totalorder %v708_v22, 1  ;;  %vm791_vm13 = vcmp.eq.s32.totalorder %v705_v34, 1 }
  0xd5   : > { %v840_v23 = vsel %vm792_vm12, %v552_v16, 0.0  ;;  %v839_v24 = vsel %vm791_vm13, %v551_v17, 0.0 }
  0xd6   : > { %888 = vst [vmem:[%s1978_s15 + $0xe8] sm:$0xff] %v840_v23  ;;  %887 = vst [vmem:[%s1978_s15 + $0xe0] sm:$0xff] %v839_v24 }
  0xd7   : > { %v714_v59 = vpop.permute.xlu1 %713  ;;  %v711_v27 = vpop.permute.xlu0 %710 }
  0xd8   : > { %vm794_vm14 = vcmp.eq.s32.totalorder %v714_v59, 1  ;;  %vm793_vm15 = vcmp.eq.s32.totalorder %v711_v27, 1 }
  0xd9   : > { %v842_v42 = vsel %vm794_vm14, %v554_v25, 0.0  ;;  %v841_v60 = vsel %vm793_vm15, %v553_v26, 0.0 }
  0xda   : > { %890 = vst [vmem:[%s1978_s15 + $0xf8] sm:$0xff] %v842_v42  ;;  %889 = vst [vmem:[%s1978_s15 + $0xf0] sm:$0xff] %v841_v60 }
  0xdb   : > { %v720_v30 = vpop.permute.xlu1 %719  ;;  %v717_v61 = vpop.permute.xlu0 %716 }
  0xdc   : > { %vm796_vm0 = vcmp.eq.s32.totalorder %v720_v30, 1  ;;  %vm795_vm1 = vcmp.eq.s32.totalorder %v717_v61, 1 }
  0xdd   : > { %v844_v62 = vsel %vm796_vm0, %v556_v28, 0.0  ;;  %v843_v31 = vsel %vm795_vm1, %v555_v29, 0.0 }
  0xde   : > { %892 = vst [vmem:[%s1978_s15 + $0x108] sm:$0xff] %v844_v62  ;;  %891 = vst [vmem:[%s1978_s15 + $0x100] sm:$0xff] %v843_v31 }
  0xdf   : > { %v726_v38 = vpop.permute.xlu1 %725  ;;  %v723_v43 = vpop.permute.xlu0 %722 }
  0xe0   : > { %vm798_vm2 = vcmp.eq.s32.totalorder %v726_v38, 1  ;;  %vm797_vm3 = vcmp.eq.s32.totalorder %v723_v43, 1 }
  0xe1   : > { %v846_v44 = vsel %vm798_vm2, %v558_v32, 0.0  ;;  %v845_v39 = vsel %vm797_vm3, %v557_v33, 0.0 }
  0xe2   : > { %894 = vst [vmem:[%s1978_s15 + $0x118] sm:$0xff] %v846_v44  ;;  %893 = vst [vmem:[%s1978_s15 + $0x110] sm:$0xff] %v845_v39 }
  0xe3   : > { %v732_v48 = vpop.permute.xlu1 %731  ;;  %v729_v56 = vpop.permute.xlu0 %728 }
  0xe4   : > { %vm800_vm4 = vcmp.eq.s32.totalorder %v732_v48, 1  ;;  %vm799_vm5 = vcmp.eq.s32.totalorder %v729_v56, 1 }
  0xe5   : > { %v848_v57 = vsel %vm800_vm4, %v560_v41, 0.0  ;;  %v847_v49 = vsel %vm799_vm5, %v559_v0, 0.0 }
  0xe6   : > { %896 = vst [vmem:[%s1978_s15 + $0x128] sm:$0xff] %v848_v57  ;;  %895 = vst [vmem:[%s1978_s15 + $0x120] sm:$0xff] %v847_v49 }
  0xe7   : > { %v738_v63 = vpop.permute.xlu1 %737  ;;  %v735_v35 = vpop.permute.xlu0 %734 }
  0xe8   : > { %vm802_vm6 = vcmp.eq.s32.totalorder %v738_v63, 1  ;;  %vm801_vm7 = vcmp.eq.s32.totalorder %v735_v35, 1 }
  0xe9   : > { %v850_v36 = vsel %vm802_vm6, %v562_v51, 0.0  ;;  %v849_v1 = vsel %vm801_vm7, %v561_v52, 0.0 }
  0xea   : > { %898 = vst [vmem:[%s1978_s15 + $0x138] sm:$0xff] %v850_v36  ;;  %897 = vst [vmem:[%s1978_s15 + $0x130] sm:$0xff] %v849_v1 }
  0xeb   : > { %v744_v4 = vpop.permute.xlu1 %743  ;;  %v741_v37 = vpop.permute.xlu0 %740 }
  0xec   : > { %vm804_vm8 = vcmp.eq.s32.totalorder %v744_v4, 1  ;;  %vm803_vm9 = vcmp.eq.s32.totalorder %v741_v37, 1 }
  0xed   : > { %v852_v40 = vsel %vm804_vm8, %v564_v2, 0.0  ;;  %v851_v5 = vsel %vm803_vm9, %v563_v3, 0.0 }
  0xee   : > { %900 = vst [vmem:[%s1978_s15 + $0x148] sm:$0xff] %v852_v40  ;;  %899 = vst [vmem:[%s1978_s15 + $0x140] sm:$0xff] %v851_v5 }
  0xef   : > { %v750_v8 = vpop.permute.xlu1 %749  ;;  %v747_v45 = vpop.permute.xlu0 %746 }
  0xf0   : > { %vm806_vm10 = vcmp.eq.s32.totalorder %v750_v8, 1  ;;  %vm805_vm11 = vcmp.eq.s32.totalorder %v747_v45, 1 }
  0xf1   : > { %v854_v46 = vsel %vm806_vm10, %v566_v6, 0.0  ;;  %v853_v9 = vsel %vm805_vm11, %v565_v7, 0.0 }
  0xf2   : > { %902 = vst [vmem:[%s1978_s15 + $0x158] sm:$0xff] %v854_v46  ;;  %901 = vst [vmem:[%s1978_s15 + $0x150] sm:$0xff] %v853_v9 }
  0xf3   : > { %v756_v12 = vpop.permute.xlu1 %755  ;;  %v753_v47 = vpop.permute.xlu0 %752 }
  0xf4   : > { %vm808_vm12 = vcmp.eq.s32.totalorder %v756_v12, 1  ;;  %vm807_vm13 = vcmp.eq.s32.totalorder %v753_v47, 1  ;;  %913 = sbr.rel (!%p1688_p5) target bundleno = 327 (0x147), region = 40 }
  0xf5   : > { %v856_v50 = vsel %vm808_vm12, %v568_v10, 0.0  ;;  %v855_v13 = vsel %vm807_vm13, %v567_v11, 0.0 }
  0xf6   : > { %904 = vst [vmem:[%s1978_s15 + $0x168] sm:$0xff] %v856_v50  ;;  %903 = vst [vmem:[%s1978_s15 + $0x160] sm:$0xff] %v855_v13 }
  0xf7   : > { %v762_v16 = vpop.permute.xlu1 %761  ;;  %v759_v53 = vpop.permute.xlu0 %758 }
  0xf8   : > { %vm810_vm14 = vcmp.eq.s32.totalorder %v762_v16, 1  ;;  %vm809_vm15 = vcmp.eq.s32.totalorder %v759_v53, 1 }
  0xf9   : > { %v858_v54 = vsel %vm810_vm14, %v570_v14, 0.0  ;;  %v857_v17 = vsel %vm809_vm15, %v569_v15, 0.0 }
  0xfa   : > { %906 = vst [vmem:[%s1978_s15 + $0x178] sm:$0xff] %v858_v54  ;;  %905 = vst [vmem:[%s1978_s15 + $0x170] sm:$0xff] %v857_v17 }
  0xfb   : > { %s2323_s10 = smov (!%p916_p12, %s915_s10), 48 }
  0xfc   : > { %s1355_s14 = sshll.u32 %s2323_s10, 7 }
  0xfd   : > { %p1358_p13 = scmp.eq.s32.totalorder %s1355_s14, 0 }
  0xfe   : > { %1494 = sdivrem.u32 (!%p1358_p13), %s2323_s10, 48 }
  0xff   : > { %926 = sbr.rel (%p1358_p13) target bundleno = 327 (0x147), region = 44 }
 0x107   : > { %s2132_s26 = spop.drf %1494 }
 0x108   : > { %p1359_p0 = scmp.le.s32.totalorder %s2132_s26, 0 }
 0x109   : > { %s2305_s18 = smov (!%p1359_p0), %s2129_s25  ;;  %s2306_s5 = smov (!%p1359_p0), %s1978_s15 }
 0x10a   : > { %1285 = sbr.rel (%p1359_p0) target bundleno = 298 (0x12a), region = 123  ;;  %s2141_s27 = smov (!%p1359_p0), 0  }
 0x10b   : > { %s2143_s28 = smov (!%p1359_p0), 0  }
 0x111 LB: >> { %v1084_v55 = vld [vmem:[%s1592_s5] sm:$0xff]  ;;  %v1086_v58 = vld [vmem:[%s1592_s5 + $0x8] sm:$0xff]  ;;  %v1088_v18 = vld [vmem:[%s1592_s5 + $0x10] sm:$0xff]  ;;  %s1180_s29 = sadd.s32 1, %s1596_s27  ;;  %s1078_s28 = sadd.s32 1, %s1600_s28   ;;  %s1600_s28 = sphi %s2143_s28, %s1078_s28   ;;  %s1596_s27 = sphi %s2141_s27, %s2309_s27   ;;  %s1592_s5 = sphi %s2306_s5, %s2308_s5   ;;  %s1588_s18 = sphi %s2305_s18, %s2307_s18  }
 0x112   : >> { %1085 = vst [vmem:[%s1588_s18] sm:$0xff] %v1084_v55  ;;  %1087 = vst [vmem:[%s1588_s18 + $0x8] sm:$0xff] %v1086_v58  ;;  %v1090_v19 = vld [vmem:[%s1592_s5 + $0x18] sm:$0xff]  ;;  %v1092_v20 = vld [vmem:[%s1592_s5 + $0x20] sm:$0xff]  ;;  %p1181_p1 = scmp.ge.s32.totalorder %s1180_s29, %s2132_s26  ;;  %p1077_p2 = scmp.ge.s32.totalorder %s1078_s28, %s2132_s26 }
 0x113   : >> { %1089 = vst [vmem:[%s1588_s18 + $0x10] sm:$0xff] %v1088_v18  ;;  %v1094_v21 = vld [vmem:[%s1592_s5 + $0x28] sm:$0xff]  ;;  %1091 = vst [vmem:[%s1588_s18 + $0x18] sm:$0xff] %v1090_v19  ;;  %v1096_v22 = vld [vmem:[%s1592_s5 + $0x30] sm:$0xff] }
 0x114   : >> { %1093 = vst [vmem:[%s1588_s18 + $0x20] sm:$0xff] %v1092_v20  ;;  %1095 = vst [vmem:[%s1588_s18 + $0x28] sm:$0xff] %v1094_v21  ;;  %v1098_v34 = vld [vmem:[%s1592_s5 + $0x38] sm:$0xff]  ;;  %v1100_v23 = vld [vmem:[%s1592_s5 + $0x40] sm:$0xff]  ;;  %s2325_s29 = smov (%p1181_p1, %s1180_s29), 0 }
 0x115   : >> { %1097 = vst [vmem:[%s1588_s18 + $0x30] sm:$0xff] %v1096_v22  ;;  %1099 = vst [vmem:[%s1588_s18 + $0x38] sm:$0xff] %v1098_v34  ;;  %v1102_v24 = vld [vmem:[%s1592_s5 + $0x48] sm:$0xff]  ;;  %v1104_v25 = vld [vmem:[%s1592_s5 + $0x50] sm:$0xff]  ;;  %s1183_s6 = smul.u32 384, %s2325_s29  ;;  %s2309_s27 = smov %s2325_s29 }
 0x116   : >> { %1101 = vst [vmem:[%s1588_s18 + $0x40] sm:$0xff] %v1100_v23  ;;  %v1106_v26 = vld [vmem:[%s1592_s5 + $0x58] sm:$0xff]  ;;  %1103 = vst [vmem:[%s1588_s18 + $0x48] sm:$0xff] %v1102_v24  ;;  %v1108_v59 = vld [vmem:[%s1592_s5 + $0x60] sm:$0xff] }
 0x117   : >> { %1105 = vst [vmem:[%s1588_s18 + $0x50] sm:$0xff] %v1104_v25  ;;  %1107 = vst [vmem:[%s1588_s18 + $0x58] sm:$0xff] %v1106_v26  ;;  %v1110_v27 = vld [vmem:[%s1592_s5 + $0x68] sm:$0xff]  ;;  %v1112_v42 = vld [vmem:[%s1592_s5 + $0x70] sm:$0xff]  ;;  %s2205_s7 = scalar_lea.vmem %s1978_s15, %s1183_s6 [#allocation2]   ;;  %s2208_s8 = scalar_lea.vmem %s2129_s25, %s1183_s6  }
 0x118   : >> { %1109 = vst [vmem:[%s1588_s18 + $0x60] sm:$0xff] %v1108_v59  ;;  %1111 = vst [vmem:[%s1588_s18 + $0x68] sm:$0xff] %v1110_v27  ;;  %v1114_v60 = vld [vmem:[%s1592_s5 + $0x78] sm:$0xff]  ;;  %v1116_v28 = vld [vmem:[%s1592_s5 + $0x80] sm:$0xff] }
 0x119   : >> { %1113 = vst [vmem:[%s1588_s18 + $0x70] sm:$0xff] %v1112_v42  ;;  %v1118_v29 = vld [vmem:[%s1592_s5 + $0x88] sm:$0xff]  ;;  %1115 = vst [vmem:[%s1588_s18 + $0x78] sm:$0xff] %v1114_v60  ;;  %v1120_v30 = vld [vmem:[%s1592_s5 + $0x90] sm:$0xff] }
 0x11a   : >> { %1117 = vst [vmem:[%s1588_s18 + $0x80] sm:$0xff] %v1116_v28  ;;  %1119 = vst [vmem:[%s1588_s18 + $0x88] sm:$0xff] %v1118_v29  ;;  %v1122_v61 = vld [vmem:[%s1592_s5 + $0x98] sm:$0xff]  ;;  %v1124_v62 = vld [vmem:[%s1592_s5 + $0xa0] sm:$0xff] }
 0x11b   : >> { %1121 = vst [vmem:[%s1588_s18 + $0x90] sm:$0xff] %v1120_v30  ;;  %1123 = vst [vmem:[%s1588_s18 + $0x98] sm:$0xff] %v1122_v61  ;;  %v1126_v31 = vld [vmem:[%s1592_s5 + $0xa8] sm:$0xff]  ;;  %v1128_v32 = vld [vmem:[%s1592_s5 + $0xb0] sm:$0xff] }
 0x11c   : >> { %1125 = vst [vmem:[%s1588_s18 + $0xa0] sm:$0xff] %v1124_v62  ;;  %v1130_v33 = vld [vmem:[%s1592_s5 + $0xb8] sm:$0xff]  ;;  %1127 = vst [vmem:[%s1588_s18 + $0xa8] sm:$0xff] %v1126_v31  ;;  %v1132_v38 = vld [vmem:[%s1592_s5 + $0xc0] sm:$0xff] }
 0x11d   : >> { %1129 = vst [vmem:[%s1588_s18 + $0xb0] sm:$0xff] %v1128_v32  ;;  %1131 = vst [vmem:[%s1588_s18 + $0xb8] sm:$0xff] %v1130_v33  ;;  %v1134_v43 = vld [vmem:[%s1592_s5 + $0xc8] sm:$0xff]  ;;  %v1136_v44 = vld [vmem:[%s1592_s5 + $0xd0] sm:$0xff] }
 0x11e   : >> { %1133 = vst [vmem:[%s1588_s18 + $0xc0] sm:$0xff] %v1132_v38  ;;  %1135 = vst [vmem:[%s1588_s18 + $0xc8] sm:$0xff] %v1134_v43  ;;  %v1138_v39 = vld [vmem:[%s1592_s5 + $0xd8] sm:$0xff]  ;;  %v1140_v41 = vld [vmem:[%s1592_s5 + $0xe0] sm:$0xff] }
 0x11f   : >> { %1137 = vst [vmem:[%s1588_s18 + $0xd0] sm:$0xff] %v1136_v44  ;;  %v1142_v0 = vld [vmem:[%s1592_s5 + $0xe8] sm:$0xff]  ;;  %1139 = vst [vmem:[%s1588_s18 + $0xd8] sm:$0xff] %v1138_v39  ;;  %v1144_v48 = vld [vmem:[%s1592_s5 + $0xf0] sm:$0xff] }
 0x120   : >> { %1141 = vst [vmem:[%s1588_s18 + $0xe0] sm:$0xff] %v1140_v41  ;;  %1143 = vst [vmem:[%s1588_s18 + $0xe8] sm:$0xff] %v1142_v0  ;;  %v1146_v56 = vld [vmem:[%s1592_s5 + $0xf8] sm:$0xff]  ;;  %v1148_v57 = vld [vmem:[%s1592_s5 + $0x100] sm:$0xff] }
 0x121   : >> { %1145 = vst [vmem:[%s1588_s18 + $0xf0] sm:$0xff] %v1144_v48  ;;  %1147 = vst [vmem:[%s1588_s18 + $0xf8] sm:$0xff] %v1146_v56  ;;  %v1150_v49 = vld [vmem:[%s1592_s5 + $0x108] sm:$0xff]  ;;  %v1152_v51 = vld [vmem:[%s1592_s5 + $0x110] sm:$0xff] }
 0x122   : >> { %1149 = vst [vmem:[%s1588_s18 + $0x100] sm:$0xff] %v1148_v57  ;;  %v1154_v52 = vld [vmem:[%s1592_s5 + $0x118] sm:$0xff]  ;;  %1151 = vst [vmem:[%s1588_s18 + $0x108] sm:$0xff] %v1150_v49  ;;  %v1156_v63 = vld [vmem:[%s1592_s5 + $0x120] sm:$0xff] }
 0x123   : >> { %1153 = vst [vmem:[%s1588_s18 + $0x110] sm:$0xff] %v1152_v51  ;;  %1155 = vst [vmem:[%s1588_s18 + $0x118] sm:$0xff] %v1154_v52  ;;  %v1158_v35 = vld [vmem:[%s1592_s5 + $0x128] sm:$0xff]  ;;  %v1160_v36 = vld [vmem:[%s1592_s5 + $0x130] sm:$0xff]  ;;  %1080 = sbr.rel (!%p1077_p2) target bundleno = 273 (0x111), region = 129 }
 0x124   : >> { %1157 = vst [vmem:[%s1588_s18 + $0x120] sm:$0xff] %v1156_v63  ;;  %1159 = vst [vmem:[%s1588_s18 + $0x128] sm:$0xff] %v1158_v35  ;;  %v1162_v1 = vld [vmem:[%s1592_s5 + $0x138] sm:$0xff]  ;;  %v1164_v2 = vld [vmem:[%s1592_s5 + $0x140] sm:$0xff] }
 0x125   : >> { %1161 = vst [vmem:[%s1588_s18 + $0x130] sm:$0xff] %v1160_v36  ;;  %v1166_v3 = vld [vmem:[%s1592_s5 + $0x148] sm:$0xff]  ;;  %1163 = vst [vmem:[%s1588_s18 + $0x138] sm:$0xff] %v1162_v1  ;;  %v1168_v4 = vld [vmem:[%s1592_s5 + $0x150] sm:$0xff] }
 0x126   : >> { %1165 = vst [vmem:[%s1588_s18 + $0x140] sm:$0xff] %v1164_v2  ;;  %1167 = vst [vmem:[%s1588_s18 + $0x148] sm:$0xff] %v1166_v3  ;;  %v1170_v37 = vld [vmem:[%s1592_s5 + $0x158] sm:$0xff]  ;;  %v1172_v40 = vld [vmem:[%s1592_s5 + $0x160] sm:$0xff] }
 0x127   : >> { %1169 = vst [vmem:[%s1588_s18 + $0x150] sm:$0xff] %v1168_v4  ;;  %1171 = vst [vmem:[%s1588_s18 + $0x158] sm:$0xff] %v1170_v37  ;;  %v1174_v5 = vld [vmem:[%s1592_s5 + $0x168] sm:$0xff]  ;;  %v1176_v6 = vld [vmem:[%s1592_s5 + $0x170] sm:$0xff] }
 0x128   : >> { %1173 = vst [vmem:[%s1588_s18 + $0x160] sm:$0xff] %v1172_v40  ;;  %v1178_v7 = vld [vmem:[%s1592_s5 + $0x178] sm:$0xff]  ;;  %1175 = vst [vmem:[%s1588_s18 + $0x168] sm:$0xff] %v1174_v5  ;;  %s2308_s5 = smov %s2205_s7 }
 0x129   : >> { %1177 = vst [vmem:[%s1588_s18 + $0x170] sm:$0xff] %v1176_v6  ;;  %1179 = vst [vmem:[%s1588_s18 + $0x178] sm:$0xff] %v1178_v7  ;;  %s2307_s18 = smov %s2208_s8 }
 0x12a PF: > { %1496 = sdivrem.u32 %s2323_s10, 48 }
 0x12b   : > { %s1360_s9 = smul.u32 384, %s2132_s26 }
 0x12d   : > { %s1191_s11 = scalar_lea.vmem %s1978_s15, %s1360_s9 [#allocation2]   ;;  %s1193_s12 = scalar_lea.vmem %s2129_s25, %s1360_s9  }
 0x133   : > { %s1497_s13 = spop.drf %1496 }
 0x134   : > { %p1362_p3 = scmp.le.s32.totalorder %s1497_s13, 0 }
 0x135   : > { %s1602_s14 = smov (!%p1362_p3), %s1193_s12   ;;  %s1606_s17 = smov (!%p1362_p3), %s1191_s11  }
 0x136   : > { %1299 = sbr.rel (%p1362_p3) target bundleno = 327 (0x147), region = 134  ;;  %s1610_s24 = smov (!%p1362_p3), 0  }
 0x137   : > { %s1614_s6 = smov (!%p1362_p3), 0  }
 0x13d LB: >> { %v1203_v8 = vld [vmem:[%s1608_s17] sm:$0xff]  ;;  %s1205_s18 = sadd.s32 1, %s1612_s24  ;;  %s1197_s6 = sadd.s32 1, %s1616_s6   ;;  %s1616_s6 = sphi %s1614_s6, %s1197_s6   ;;  %s1612_s24 = sphi %s1610_s24, %s1611_s24   ;;  %s1608_s17 = sphi %s1606_s17, %s1210_s17   ;;  %s1604_s14 = sphi %s1602_s14, %s1211_s14  }
 0x13e   : >> { %1204 = vst [vmem:[%s1604_s14] sm:$0xff] %v1203_v8  ;;  %p1206_p4 = scmp.ge.s32.totalorder %s1205_s18, %s1497_s13  ;;  %p1196_p5 = scmp.ge.s32.totalorder %s1197_s6, %s1497_s13 }
 0x140   : >> { %s2327_s18 = smov (%p1206_p4, %s1205_s18), 0  ;;  %1199 = sbr.rel (!%p1196_p5) target bundleno = 317 (0x13d), region = 140 }
 0x141   : >> { %s1363_s15 = sshll.u32 %s2327_s18, 3  ;;  %s1611_s24 = smov %s2327_s18  }
 0x142   : >> { %s1210_s17 = scalar_lea.vmem %s1191_s11, %s1363_s15 [#allocation2]   ;;  %s1211_s14 = scalar_lea.vmem %s1193_s12, %s1363_s15  }
 0x147 PF: > { %s14_s21 = sadd.s32 1, %s1584_s21   ;;  %s2310_s15 = smov %s1564_s16 }
 0x148   : > { %p11_p6 = scmp.ge.s32.totalorder %s14_s21, 8   ;;  %s2311_s16 = smov %s1699_s30 }
 0x149   : > { %s2312_s17 = smov %s1576_s19  ;;  %s2313_s18 = smov %s1580_s20 }
 0x14a   : > { %s2314_s19 = smov %s2317_s22  ;;  %s2315_s20 = smov %s2321_s23 }
 0x14b   :  { %13 = sbr.rel (!%p11_p6) target bundleno = 4 (0x4), region = 151 }

// kernel: residual_forward.7
= control target key start
LH: loop header
LB: loop body
LE: loop exit
PB: predicated region body
PF: predicated region fallthrough
CT: control target
= control target key end

     0   :  { %s2048_s21 = smov 0   ;;  %s2050_s22 = smov 0   ;;  %s2919_s0 = inlined_call_operand.vmem [shape: f32[1152,1], index: 0, kind: input, shape index: {}]   ;;  %s2920_s1 = inlined_call_operand.vmem [shape: f32[2,1160,128], index: 1, kind: input, shape index: {}]   ;;  %s2921_s2 = inlined_call_operand.vmem [shape: f32[1,128], index: 2, kind: input, shape index: {}]   ;;  %s2922_s3 = inlined_call_operand.vmem [shape: f32[1,128], index: 3, kind: input, shape index: {}]   ;;  %s2923_s4 = inlined_call_operand.vmem [shape: f32[2,1160,4], index: 4, kind: input, shape index: {}]   ;;  %s2924_s5 = inlined_call_operand.vmem [shape: f32[4,128], index: 5, kind: input, shape index: {}]   ;;  %s2925_s6 = inlined_call_operand.vmem [shape: f32[2,384,128], index: 6, kind: output, shape index: {}]  }
   0x1   :  { %s2052_s23 = smov 0  }
   0x2 LB: > { %s28_s24 = sadd.s32 1, %s2006_s22  ;;  %p1724_p0 = scmp.ge.s32.totalorder %s2010_s23, 1  ;;  %s2010_s23 = sphi %s2052_s23, %s16_s23   ;;  %s2006_s22 = sphi %s2050_s22, %s3003_s22   ;;  %s2002_s21 = sphi %s2048_s21, %s3002_s21  }
   0x3   : > { %p30_p1 = scmp.ge.s32.totalorder %s28_s24, 2  ;;  %p289_p2 = scmp.lt.s32.totalorder %s2010_s23, 3 }
   0x5   : > { %s3005_s24 = smov (%p30_p1, %s28_s24), 0  ;;  %p290_p3 = pnand %p1724_p0, %p289_p2 }
   0x7   : > { %293 = sbr.rel (%p290_p3) target bundleno = 287 (0x11f), region = 44 }
   0xe   : > { %v1730_v0 = vld [vmem:[%s2919_s0 + $0x190] sm:$0xff]  ;;  %v1728_v1 = vld [vmem:[%s2919_s0 + $0x180] sm:$0xff]  ;;  %v1731_v2 = vld [vmem:[%s2919_s0 + $0x198] sm:$0xff]  ;;  %vm858_vm0 = vcmask 1043456   ;;  %p366_p4 = scmp.lt.s32.totalorder %s2002_s21, 1  ;;  %v2012_v3 = vmov 0  }
   0xf   : > { %1987 = vset.pattern.permute.xlu1 %v2012_v3  ;;  %1986 = vset.pattern.permute.xlu0 %v2012_v3  ;;  %vm460_vm1 = vcmp.gt.f32.partialorder %v1730_v0, 0.0  ;;  %vm458_vm2 = vcmp.gt.f32.partialorder %v1728_v1, 0.0  ;;  %vm461_vm3 = vcmp.gt.f32.partialorder %v1731_v2, 0.0  ;;  %v1729_v4 = vld [vmem:[%s2919_s0 + $0x188] sm:$0xff]  ;;  %v712_v5 = vld [vmem:[%s2924_s5] sm:$0xf] }
  0x10   : > { %v1265_v6 = vsel %vm460_vm1, 1, %v2012_v3  ;;  %v1263_v7 = vsel %vm458_vm2, 1, %v2012_v3  ;;  %vm459_vm4 = vcmp.gt.f32.partialorder %v1729_v4, 0.0  ;;  %1882 = vmatprep.subr.msk.mxu0 %vm858_vm0, %v712_v5  ;;  %1956 = vmatprep.subr.msk.mxu1 %vm858_vm0, %v712_v5  ;;  %s3007_s21 = smov (!%p366_p4, %s2002_s21), 1  ;;  %v1733_v8 = vld [vmem:[%s2919_s0 + $0x1a8] sm:$0xff]  ;;  %v1732_v9 = vld [vmem:[%s2919_s0 + $0x1a0] sm:$0xff] }
  0x11   : > { %1318 = vperm.xlu1 %1987, %v1265_v6   ;;  %1312 = vperm.xlu0 %1986, %v1263_v7   ;;  %v1266_v10 = vsel %vm461_vm3, 1, %v2012_v3  ;;  %v1264_v11 = vsel %vm459_vm4, 1, %v2012_v3  ;;  %s1960_s15 = smul.u32 1160, %s3007_s21  ;;  %vm463_vm5 = vcmp.gt.f32.partialorder %v1733_v8, 0.0  ;;  %vm462_vm6 = vcmp.gt.f32.partialorder %v1732_v9, 0.0  ;;  %v1735_v12 = vld [vmem:[%s2919_s0 + $0x1b8] sm:$0xff] }
  0x12   : > { %1883 = vmatpush3.msk.msra.mxu0 %vm858_vm0, %v712_v5  ;;  %1957 = vmatpush3.msk.msra.mxu1 %vm858_vm0, %v712_v5  ;;  %vm713_vm7 = vcmask 31744   ;;  %v1734_v13 = vld [vmem:[%s2919_s0 + $0x1b0] sm:$0xff]  ;;  %v1268_v17 = vsel %vm463_vm5, 1, %v2012_v3  ;;  %v1267_v18 = vsel %vm462_vm6, 1, %v2012_v3  ;;  %vm465_vm8 = vcmp.gt.f32.partialorder %v1735_v12, 0.0  ;;  %v1737_v22 = vld [vmem:[%s2919_s0 + $0x1c8] sm:$0xff] }
  0x13   : > { %s2101_s16 = sadd.s32 384, %s1960_s15  ;;  %vm464_vm9 = vcmp.gt.f32.partialorder %v1734_v13, 0.0  ;;  %v1736_v23 = vld [vmem:[%s2919_s0 + $0x1c0] sm:$0xff]  ;;  %v1270_v26 = vsel %vm465_vm8, 1, %v2012_v3  ;;  %vm467_vm10 = vcmp.gt.f32.partialorder %v1737_v22, 0.0  ;;  %v1739_v30 = vld [vmem:[%s2919_s0 + $0x1d8] sm:$0xff] }
  0x14   : > { %s2113_s27 = scalar_lea.vmem %s2923_s4, %s2101_s16  ;;  %v1269_v27 = vsel %vm464_vm9, 1, %v2012_v3  ;;  %vm466_vm11 = vcmp.gt.f32.partialorder %v1736_v23, 0.0  ;;  %v1738_v31 = vld [vmem:[%s2919_s0 + $0x1d0] sm:$0xff]  ;;  %v1272_v34 = vsel %vm467_vm10, 1, %v2012_v3  ;;  %vm469_vm12 = vcmp.gt.f32.partialorder %v1739_v30, 0.0  ;;  %v1741_v38 = vld [vmem:[%s2919_s0 + $0x1e8] sm:$0xff]  ;;  %s2427_s12 = scalar_lea.vmem %s2920_s1, %s2101_s16 }
  0x15   : > { %1321 = vperm.xlu1 %1987, %v1266_v10   ;;  %1315 = vperm.xlu0 %1986, %v1264_v11   ;;  %v664_v14 = vld [vmem:[%s2113_s27] sm:$0xff]  ;;  %v665_v16 = vld [vmem:[%s2113_s27 + $0x8] sm:$0xff]  ;;  %v666_v20 = vld [vmem:[%s2113_s27 + $0x10] sm:$0xff]  ;;  %v1271_v35 = vsel %vm466_vm11, 1, %v2012_v3  ;;  %vm468_vm13 = vcmp.gt.f32.partialorder %v1738_v31, 0.0  ;;  %v1274_v42 = vsel %vm469_vm12, 1, %v2012_v3 }
  0x16   : > { %v688_v15 = vld [vmem:[%s2113_s27 + $0xc0] sm:$0xff]  ;;  %1884 = vmatprep.mubr.msk.f32.mxu0 %vm713_vm7, %v664_v14  ;;  %v689_v19 = vld [vmem:[%s2113_s27 + $0xc8] sm:$0xff]  ;;  %v690_v21 = vld [vmem:[%s2113_s27 + $0xd0] sm:$0xff]  ;;  %v1273_v43 = vsel %vm468_vm13, 1, %v2012_v3  ;;  %vm471_vm14 = vcmp.gt.f32.partialorder %v1741_v38, 0.0  ;;  %s1959_s15 = smul.u32 384, %s3007_s21 }
  0x17   : > { %1920 = vmatprep.mubr.msk.f32.mxu1 %vm713_vm7, %v688_v15  ;;  %1885 = vmatmul.mubr.msk.f32.vlgmr.msra.gmra.mrb[0].mxu0 %vm713_vm7, %v665_v16  ;;  %v667_v24 = vld [vmem:[%s2113_s27 + $0x18] sm:$0xff]  ;;  %v668_v28 = vld [vmem:[%s2113_s27 + $0x20] sm:$0xff]  ;;  %v669_v32 = vld [vmem:[%s2113_s27 + $0x28] sm:$0xff]  ;;  %v1276_v50 = vsel %vm471_vm14, 1, %v2012_v3 }
  0x18   : > { %1921 = vmatmul.mubr.msk.f32.vlgmr.msra.gmra.mrb[0].mxu1 %vm713_vm7, %v689_v19  ;;  %v691_v25 = vld [vmem:[%s2113_s27 + $0xd8] sm:$0xff]  ;;  %1887 = vmatprep.mubr.msk.f32.mxu0 %vm713_vm7, %v666_v20  ;;  %v692_v29 = vld [vmem:[%s2113_s27 + $0xe0] sm:$0xff]  ;;  %v693_v33 = vld [vmem:[%s2113_s27 + $0xe8] sm:$0xff]  ;;  %s2701_s18 = scalar_lea.vmem %s2925_s6, %s1959_s15 }
  0x19   : > { %1327 = vperm.xlu1 %1987, %v1268_v17   ;;  %1324 = vperm.xlu0 %1986, %v1267_v18   ;;  %v670_v36 = vld [vmem:[%s2113_s27 + $0x30] sm:$0xff]  ;;  %v1740_v39 = vld [vmem:[%s2919_s0 + $0x1e0] sm:$0xff]  ;;  %v671_v40 = vld [vmem:[%s2113_s27 + $0x38] sm:$0xff] }
  0x1a   : > { %1923 = vmatprep.mubr.msk.f32.mxu1 %vm713_vm7, %v690_v21  ;;  %v694_v37 = vld [vmem:[%s2113_s27 + $0xf0] sm:$0xff]  ;;  %v695_v41 = vld [vmem:[%s2113_s27 + $0xf8] sm:$0xff]  ;;  %v672_v44 = vld [vmem:[%s2113_s27 + $0x40] sm:$0xff]  ;;  %vm470_vm15 = vcmp.gt.f32.partialorder %v1740_v39, 0.0 }
  0x1b   : > { %1888 = vmatmul.mubr.msk.f32.gmra.mrb[2].mxu0 %vm713_vm7, %v667_v24  ;;  %v696_v45 = vld [vmem:[%s2113_s27 + $0x100] sm:$0xff]  ;;  %v1743_v46 = vld [vmem:[%s2919_s0 + $0x1f8] sm:$0xff]  ;;  %v1742_v47 = vld [vmem:[%s2919_s0 + $0x1f0] sm:$0xff]  ;;  %v1275_v51 = vsel %vm470_vm15, 1, %v2012_v3 }
  0x1c   : > { %1924 = vmatmul.mubr.msk.f32.gmra.mrb[2].mxu1 %vm713_vm7, %v691_v25  ;;  %1890 = vmatprep.mubr.msk.f32.mxu0 %vm713_vm7, %v668_v28  ;;  %v673_v48 = vld [vmem:[%s2113_s27 + $0x48] sm:$0xff]  ;;  %v674_v52 = vld [vmem:[%s2113_s27 + $0x50] sm:$0xff]  ;;  %vm473_vm0 = vcmp.gt.f32.partialorder %v1743_v46, 0.0  ;;  %vm472_vm1 = vcmp.gt.f32.partialorder %v1742_v47, 0.0  ;;  %v1744_v55 = vld [vmem:[%s2919_s0 + $0x200] sm:$0xff] }
  0x1d   : > { %1333 = vperm.xlu1 %1987, %v1270_v26   ;;  %1330 = vperm.xlu0 %1986, %v1269_v27   ;;  %v697_v49 = vld [vmem:[%s2113_s27 + $0x108] sm:$0xff]  ;;  %v698_v53 = vld [vmem:[%s2113_s27 + $0x110] sm:$0xff]  ;;  %v675_v56 = vld [vmem:[%s2113_s27 + $0x58] sm:$0xff]  ;;  %v1278_v58 = vsel %vm473_vm0, 1, %v2012_v3  ;;  %v1277_v59 = vsel %vm472_vm1, 1, %v2012_v3  ;;  %vm474_vm3 = vcmp.gt.f32.partialorder %v1744_v55, 0.0 }
  0x1e   : > { %1926 = vmatprep.mubr.msk.f32.mxu1 %vm713_vm7, %v692_v29  ;;  %v1745_v54 = vld [vmem:[%s2919_s0 + $0x208] sm:$0xff]  ;;  %v699_v57 = vld [vmem:[%s2113_s27 + $0x118] sm:$0xff]  ;;  %v676_v60 = vld [vmem:[%s2113_s27 + $0x60] sm:$0xff]  ;;  %v1279_v4 = vsel %vm474_vm3, 1, %v2012_v3 }
  0x1f   : > { %1891 = vmatmul.mubr.msk.f32.gmra.mrb[4].mxu0 %vm713_vm7, %v669_v32  ;;  %v700_v61 = vld [vmem:[%s2113_s27 + $0x120] sm:$0xff]  ;;  %vm475_vm2 = vcmp.gt.f32.partialorder %v1745_v54, 0.0  ;;  %v1747_v62 = vld [vmem:[%s2919_s0 + $0x218] sm:$0xff]  ;;  %v1746_v63 = vld [vmem:[%s2919_s0 + $0x210] sm:$0xff] }
  0x20   : > { %1927 = vmatmul.mubr.msk.f32.gmra.mrb[4].mxu1 %vm713_vm7, %v693_v33  ;;  %1893 = vmatprep.mubr.msk.f32.mxu0 %vm713_vm7, %v670_v36  ;;  %v677_v0 = vld [vmem:[%s2113_s27 + $0x68] sm:$0xff]  ;;  %v1280_v2 = vsel %vm475_vm2, 1, %v2012_v3  ;;  %v678_v5 = vld [vmem:[%s2113_s27 + $0x70] sm:$0xff]  ;;  %vm477_vm4 = vcmp.gt.f32.partialorder %v1747_v62, 0.0  ;;  %vm476_vm5 = vcmp.gt.f32.partialorder %v1746_v63, 0.0  ;;  %v1748_v8 = vld [vmem:[%s2919_s0 + $0x220] sm:$0xff] }
  0x21   : > { %1339 = vperm.xlu1 %1987, %v1272_v34   ;;  %1336 = vperm.xlu0 %1986, %v1271_v35   ;;  %v701_v1 = vld [vmem:[%s2113_s27 + $0x128] sm:$0xff]  ;;  %v702_v6 = vld [vmem:[%s2113_s27 + $0x130] sm:$0xff]  ;;  %v679_v9 = vld [vmem:[%s2113_s27 + $0x78] sm:$0xff]  ;;  %v1282_v11 = vsel %vm477_vm4, 1, %v2012_v3  ;;  %v1281_v12 = vsel %vm476_vm5, 1, %v2012_v3  ;;  %vm478_vm8 = vcmp.gt.f32.partialorder %v1748_v8, 0.0 }
  0x22   : > { %1929 = vmatprep.mubr.msk.f32.mxu1 %vm713_vm7, %v694_v37  ;;  %v1749_v7 = vld [vmem:[%s2919_s0 + $0x228] sm:$0xff]  ;;  %v703_v10 = vld [vmem:[%s2113_s27 + $0x138] sm:$0xff]  ;;  %v680_v13 = vld [vmem:[%s2113_s27 + $0x80] sm:$0xff]  ;;  %v1283_v20 = vsel %vm478_vm8, 1, %v2012_v3 }
  0x23   : > { %1894 = vmatmul.mubr.msk.f32.gmra.mrb[6].mxu0 %vm713_vm7, %v671_v40  ;;  %v704_v14 = vld [vmem:[%s2113_s27 + $0x140] sm:$0xff]  ;;  %vm479_vm6 = vcmp.gt.f32.partialorder %v1749_v7, 0.0  ;;  %v1751_v15 = vld [vmem:[%s2919_s0 + $0x238] sm:$0xff]  ;;  %v1750_v16 = vld [vmem:[%s2919_s0 + $0x230] sm:$0xff] }
  0x24   : > { %1930 = vmatmul.mubr.msk.f32.gmra.mrb[6].mxu1 %vm713_vm7, %v695_v41  ;;  %1896 = vmatprep.mubr.msk.f32.mxu0 %vm713_vm7, %v672_v44  ;;  %v681_v17 = vld [vmem:[%s2113_s27 + $0x88] sm:$0xff]  ;;  %v1284_v19 = vsel %vm479_vm6, 1, %v2012_v3  ;;  %v682_v21 = vld [vmem:[%s2113_s27 + $0x90] sm:$0xff]  ;;  %vm481_vm9 = vcmp.gt.f32.partialorder %v1751_v15, 0.0  ;;  %vm480_vm10 = vcmp.gt.f32.partialorder %v1750_v16, 0.0  ;;  %v1752_v24 = vld [vmem:[%s2919_s0 + $0x240] sm:$0xff] }
  0x25   : > { %1345 = vperm.xlu1 %1987, %v1274_v42   ;;  %1342 = vperm.xlu0 %1986, %v1273_v43   ;;  %v705_v18 = vld [vmem:[%s2113_s27 + $0x148] sm:$0xff]  ;;  %v706_v22 = vld [vmem:[%s2113_s27 + $0x150] sm:$0xff]  ;;  %v683_v25 = vld [vmem:[%s2113_s27 + $0x98] sm:$0xff]  ;;  %v1286_v27 = vsel %vm481_vm9, 1, %v2012_v3  ;;  %v1285_v28 = vsel %vm480_vm10, 1, %v2012_v3  ;;  %vm482_vm12 = vcmp.gt.f32.partialorder %v1752_v24, 0.0 }
  0x26   : > { %1932 = vmatprep.mubr.msk.f32.mxu1 %vm713_vm7, %v696_v45  ;;  %v1753_v23 = vld [vmem:[%s2919_s0 + $0x248] sm:$0xff]  ;;  %v707_v26 = vld [vmem:[%s2113_s27 + $0x158] sm:$0xff]  ;;  %v684_v29 = vld [vmem:[%s2113_s27 + $0xa0] sm:$0xff]  ;;  %v1287_v36 = vsel %vm482_vm12, 1, %v2012_v3 }
  0x27   : > { %1897 = vmatmul.mubr.msk.f32.gmra.mrb[8].mxu0 %vm713_vm7, %v673_v48  ;;  %v708_v30 = vld [vmem:[%s2113_s27 + $0x160] sm:$0xff]  ;;  %vm483_vm11 = vcmp.gt.f32.partialorder %v1753_v23, 0.0  ;;  %v1755_v31 = vld [vmem:[%s2919_s0 + $0x258] sm:$0xff]  ;;  %v1754_v32 = vld [vmem:[%s2919_s0 + $0x250] sm:$0xff] }
  0x28   : > { %1933 = vmatmul.mubr.msk.f32.gmra.mrb[8].mxu1 %vm713_vm7, %v697_v49  ;;  %1899 = vmatprep.mubr.msk.f32.mxu0 %vm713_vm7, %v674_v52  ;;  %v685_v33 = vld [vmem:[%s2113_s27 + $0xa8] sm:$0xff]  ;;  %v1288_v35 = vsel %vm483_vm11, 1, %v2012_v3  ;;  %v686_v37 = vld [vmem:[%s2113_s27 + $0xb0] sm:$0xff]  ;;  %vm485_vm13 = vcmp.gt.f32.partialorder %v1755_v31, 0.0  ;;  %vm484_vm14 = vcmp.gt.f32.partialorder %v1754_v32, 0.0  ;;  %v1756_v40 = vld [vmem:[%s2919_s0 + $0x260] sm:$0xff] }
  0x29   : > { %1351 = vperm.xlu1 %1987, %v1276_v50   ;;  %1348 = vperm.xlu0 %1986, %v1275_v51   ;;  %v709_v34 = vld [vmem:[%s2113_s27 + $0x168] sm:$0xff]  ;;  %v710_v38 = vld [vmem:[%s2113_s27 + $0x170] sm:$0xff]  ;;  %v687_v41 = vld [vmem:[%s2113_s27 + $0xb8] sm:$0xff]  ;;  %v1290_v43 = vsel %vm485_vm13, 1, %v2012_v3  ;;  %v1289_v44 = vsel %vm484_vm14, 1, %v2012_v3  ;;  %vm486_vm0 = vcmp.gt.f32.partialorder %v1756_v40, 0.0 }
  0x2a   : > { %1935 = vmatprep.mubr.msk.f32.mxu1 %vm713_vm7, %v698_v53  ;;  %v1757_v39 = vld [vmem:[%s2919_s0 + $0x268] sm:$0xff]  ;;  %v711_v42 = vld [vmem:[%s2113_s27 + $0x178] sm:$0xff]  ;;  %v1758_v46 = vld [vmem:[%s2919_s0 + $0x270] sm:$0xff]  ;;  %v1291_v48 = vsel %vm486_vm0, 1, %v2012_v3 }
  0x2b   : > { %1900 = vmatmul.mubr.msk.f32.gmra.mrb[10].mxu0 %vm713_vm7, %v675_v56  ;;  %vm487_vm15 = vcmp.gt.f32.partialorder %v1757_v39, 0.0  ;;  %v1759_v45 = vld [vmem:[%s2919_s0 + $0x278] sm:$0xff]  ;;  %vm488_vm2 = vcmp.gt.f32.partialorder %v1758_v46, 0.0  ;;  %v1761_v49 = vld [vmem:[%s2919_s0 + $0x288] sm:$0xff]  ;;  %v1760_v50 = vld [vmem:[%s2919_s0 + $0x280] sm:$0xff] }
  0x2c   : > { %1936 = vmatmul.mubr.msk.f32.gmra.mrb[10].mxu1 %vm713_vm7, %v699_v57  ;;  %1902 = vmatprep.mubr.msk.f32.mxu0 %vm713_vm7, %v676_v60  ;;  %v1292_v47 = vsel %vm487_vm15, 1, %v2012_v3  ;;  %vm489_vm1 = vcmp.gt.f32.partialorder %v1759_v45, 0.0  ;;  %v1293_v52 = vsel %vm488_vm2, 1, %v2012_v3  ;;  %vm490_vm3 = vcmp.gt.f32.partialorder %v1760_v50, 0.0  ;;  %v1763_v53 = vld [vmem:[%s2919_s0 + $0x298] sm:$0xff]  ;;  %v1762_v54 = vld [vmem:[%s2919_s0 + $0x290] sm:$0xff] }
  0x2d   : > { %1357 = vperm.xlu1 %1987, %v1278_v58   ;;  %1354 = vperm.xlu0 %1986, %v1277_v59   ;;  %v1294_v51 = vsel %vm489_vm1, 1, %v2012_v3  ;;  %v1295_v56 = vsel %vm490_vm3, 1, %v2012_v3  ;;  %vm493_vm4 = vcmp.gt.f32.partialorder %v1763_v53, 0.0  ;;  %vm492_vm5 = vcmp.gt.f32.partialorder %v1762_v54, 0.0  ;;  %v1765_v57 = vld [vmem:[%s2919_s0 + $0x2a8] sm:$0xff]  ;;  %v1764_v58 = vld [vmem:[%s2919_s0 + $0x2a0] sm:$0xff] }
  0x2e   : > { %1938 = vmatprep.mubr.msk.f32.mxu1 %vm713_vm7, %v700_v61  ;;  %v1298_v59 = vsel %vm493_vm4, 1, %v2012_v3  ;;  %v1297_v60 = vsel %vm492_vm5, 1, %v2012_v3  ;;  %vm495_vm6 = vcmp.gt.f32.partialorder %v1765_v57, 0.0  ;;  %vm494_vm8 = vcmp.gt.f32.partialorder %v1764_v58, 0.0  ;;  %v1767_v61 = vld [vmem:[%s2919_s0 + $0x2b8] sm:$0xff]  ;;  %v1766_v62 = vld [vmem:[%s2919_s0 + $0x2b0] sm:$0xff] }
  0x2f   : > { %1903 = vmatmul.mubr.msk.f32.gmra.mrb[12].mxu0 %vm713_vm7, %v677_v0  ;;  %v1300_v63 = vsel %vm495_vm6, 1, %v2012_v3  ;;  %v1299_v0 = vsel %vm494_vm8, 1, %v2012_v3  ;;  %vm497_vm9 = vcmp.gt.f32.partialorder %v1767_v61, 0.0  ;;  %vm496_vm10 = vcmp.gt.f32.partialorder %v1766_v62, 0.0  ;;  %v1770_v7 = vld [vmem:[%s2919_s0 + $0x2d0] sm:$0xff]  ;;  %v507_v45 = vld [vmem:[%s2427_s12 + $0x8] sm:$0xff] }
  0x30   : > { %1939 = vmatmul.mubr.msk.f32.gmra.mrb[12].mxu1 %vm713_vm7, %v701_v1  ;;  %1905 = vmatprep.mubr.msk.f32.mxu0 %vm713_vm7, %v678_v5  ;;  %v1769_v1 = vld [vmem:[%s2919_s0 + $0x2c8] sm:$0xff]  ;;  %v1301_v5 = vsel %vm496_vm10, 1, %v2012_v3  ;;  %vm500_vm14 = vcmp.gt.f32.partialorder %v1770_v7, 0.0  ;;  %v1774_v15 = vld [vmem:[%s2919_s0 + $0x2f0] sm:$0xff]  ;;  %v2437_v46 = vld [vmem:[%s2921_s2] ss:$0 sm:$0xff] }
  0x31   : > { %1363 = vperm.xlu1 %1987, %v1280_v2   ;;  %1360 = vperm.xlu0 %1986, %v1279_v4   ;;  %v1768_v2 = vld [vmem:[%s2919_s0 + $0x2c0] sm:$0xff]  ;;  %v1302_v4 = vsel %vm497_vm9, 1, %v2012_v3  ;;  %vm499_vm11 = vcmp.gt.f32.partialorder %v1769_v1, 0.0  ;;  %vm504_vm2 = vcmp.gt.f32.partialorder %v1774_v15, 0.0  ;;  %v509_v50 = vld [vmem:[%s2427_s12 + $0x18] sm:$0xff]  ;;  %v532_v53 = vld [vmem:[%s2427_s12 + $0xd0] sm:$0xff] }
  0x32   : > { %1941 = vmatprep.mubr.msk.f32.mxu1 %vm713_vm7, %v702_v6  ;;  %vm498_vm12 = vcmp.gt.f32.partialorder %v1768_v2, 0.0  ;;  %v1771_v6 = vld [vmem:[%s2919_s0 + $0x2d8] sm:$0xff]  ;;  %v1304_v8 = vsel %vm499_vm11, 1, %v2012_v3  ;;  %v2458_v61 = vld [vmem:[%s2922_s3] ss:$0 sm:$0xff]  ;;  %v587_v2 = vmul.f32 %v2437_v46, %v532_v53 }
  0x33   : > { %1906 = vmatmul.mubr.msk.f32.gmra.mrb[14].mxu0 %vm713_vm7, %v679_v9  ;;  %v1303_v9 = vsel %vm498_vm12, 1, %v2012_v3  ;;  %vm501_vm13 = vcmp.gt.f32.partialorder %v1771_v6, 0.0 }
  0x34   : > { %1942 = vmatmul.mubr.msk.f32.gmra.mrb[14].mxu1 %vm713_vm7, %v703_v10  ;;  %1908 = vmatprep.mubr.msk.f32.mxu0 %vm713_vm7, %v680_v13  ;;  %v1773_v10 = vld [vmem:[%s2919_s0 + $0x2e8] sm:$0xff]  ;;  %v1305_v13 = vsel %vm500_vm14, 1, %v2012_v3 }
  0x35   : > { %1369 = vperm.xlu1 %1987, %v1282_v11   ;;  %1366 = vperm.xlu0 %1986, %v1281_v12   ;;  %v1772_v11 = vld [vmem:[%s2919_s0 + $0x2e0] sm:$0xff]  ;;  %v1306_v12 = vsel %vm501_vm13, 1, %v2012_v3  ;;  %vm503_vm15 = vcmp.gt.f32.partialorder %v1773_v10, 0.0 }
  0x36   : > { %1944 = vmatprep.mubr.msk.f32.mxu1 %vm713_vm7, %v704_v14  ;;  %vm502_vm0 = vcmp.gt.f32.partialorder %v1772_v11, 0.0  ;;  %v1775_v14 = vld [vmem:[%s2919_s0 + $0x2f8] sm:$0xff]  ;;  %v1308_v16 = vsel %vm503_vm15, 1, %v2012_v3 }
  0x37   : > { %1909 = vmatmul.mubr.msk.f32.gmra.mrb[16].mxu0 %vm713_vm7, %v681_v17  ;;  %v1307_v17 = vsel %vm502_vm0, 1, %v2012_v3  ;;  %vm505_vm1 = vcmp.gt.f32.partialorder %v1775_v14, 0.0  ;;  %v536_v14 = vld [vmem:[%s2427_s12 + $0xf0] sm:$0xff] }
  0x38   : > { %1945 = vmatmul.mubr.msk.f32.gmra.mrb[16].mxu1 %vm713_vm7, %v705_v18  ;;  %1911 = vmatprep.mubr.msk.f32.mxu0 %vm713_vm7, %v682_v21  ;;  %v1310_v18 = vsel %vm505_vm1, 1, %v2012_v3 }
  0x39   : > { %1375 = vperm.xlu1 %1987, %v1284_v19   ;;  %1372 = vperm.xlu0 %1986, %v1283_v20   ;;  %v1309_v19 = vsel %vm504_vm2, 1, %v2012_v3 }
  0x3a   : > { %1947 = vmatprep.mubr.msk.f32.mxu1 %vm713_vm7, %v706_v22 }
  0x3b   : > { %1912 = vmatmul.mubr.msk.f32.gmra.mrb[18].mxu0 %vm713_vm7, %v683_v25 }
  0x3c   : > { %1948 = vmatmul.mubr.msk.f32.gmra.mrb[18].mxu1 %vm713_vm7, %v707_v26  ;;  %1914 = vmatprep.mubr.msk.f32.mxu0 %vm713_vm7, %v684_v29 }
  0x3d   : > { %1381 = vperm.xlu1 %1987, %v1286_v27   ;;  %1378 = vperm.xlu0 %1986, %v1285_v28  }
  0x3e   : > { %1950 = vmatprep.mubr.msk.f32.mxu1 %vm713_vm7, %v708_v30 }
  0x3f   : > { %1915 = vmatmul.mubr.msk.f32.gmra.mrb[20].mxu0 %vm713_vm7, %v685_v33 }
  0x40   : > { %1951 = vmatmul.mubr.msk.f32.gmra.mrb[20].mxu1 %vm713_vm7, %v709_v34  ;;  %1917 = vmatprep.mubr.msk.f32.mxu0 %vm713_vm7, %v686_v37 }
  0x41   : > { %1387 = vperm.xlu1 %1987, %v1288_v35   ;;  %1384 = vperm.xlu0 %1986, %v1287_v36  }
  0x42   : > { %1953 = vmatprep.mubr.msk.f32.mxu1 %vm713_vm7, %v710_v38 }
  0x43   : > { %1918 = vmatmul.mubr.msk.f32.gmra.mrb[22].mxu0 %vm713_vm7, %v687_v41 }
  0x44   : > { %1954 = vmatmul.mubr.msk.f32.gmra.mrb[22].mxu1 %vm713_vm7, %v711_v42  ;;  %vm491_vm7 = vcmp.gt.f32.partialorder %v1761_v49, 0.0  ;;  %v530_v49 = vld [vmem:[%s2427_s12 + $0xc0] sm:$0xff] }
  0x45   : > { %1393 = vperm.xlu1 %1987, %v1290_v43   ;;  %1390 = vperm.xlu0 %1986, %v1289_v44   ;;  %v1296_v55 = vsel %vm491_vm7, 1, %v2012_v3  ;;  %v585_v62 = vmul.f32 %v2437_v46, %v530_v49 }
  0x47   : > { %v2483_v15 = vadd.f32 %v2458_v61, %v585_v62 }
  0x49   : > { %1399 = vperm.xlu1 %1987, %v1292_v47   ;;  %1396 = vperm.xlu0 %1986, %v1291_v48   ;;  %v531_v47 = vld [vmem:[%s2427_s12 + $0xc8] sm:$0xff]  ;;  %v506_v48 = vld [vmem:[%s2427_s12] sm:$0xff] }
  0x4a   : > { %v586_v57 = vmul.f32 %v2437_v46, %v531_v47  ;;  %v561_v58 = vmul.f32 %v2437_v46, %v506_v48  ;;  %v514_v47 = vld [vmem:[%s2427_s12 + $0x40] sm:$0xff] }
  0x4c   : > { %v2474_v10 = vadd.f32 %v2458_v61, %v586_v57  ;;  %v2477_v11 = vadd.f32 %v2458_v61, %v561_v58  ;;  %v517_v57 = vld [vmem:[%s2427_s12 + $0x58] sm:$0xff] }
  0x4d   : > { %1405 = vperm.xlu1 %1987, %v1294_v51   ;;  %1402 = vperm.xlu0 %1986, %v1293_v52   ;;  %v533_v51 = vld [vmem:[%s2427_s12 + $0xd8] sm:$0xff]  ;;  %v508_v52 = vld [vmem:[%s2427_s12 + $0x10] sm:$0xff] }
  0x4e   : > { %v563_v1 = vmul.f32 %v2437_v46, %v508_v52  ;;  %v2504_v52 = vadd.f32 %v2458_v61, %v587_v2  ;;  %v591_v2 = vmul.f32 %v2437_v46, %v536_v14 }
  0x51   : > { %1411 = vperm.xlu1 %1987, %v1296_v55   ;;  %1408 = vperm.xlu0 %1986, %v1295_v56   ;;  %v562_v56 = vmul.f32 %v2437_v46, %v507_v45  ;;  %v539_v45 = vld [vmem:[%s2427_s12 + $0x108] sm:$0xff] }
  0x55   : > { %1417 = vperm.xlu1 %1987, %v1298_v59   ;;  %1414 = vperm.xlu0 %1986, %v1297_v60   ;;  %v511_v59 = vld [vmem:[%s2427_s12 + $0x28] sm:$0xff] }
  0x56   : > { %v535_v60 = vld [vmem:[%s2427_s12 + $0xe8] sm:$0xff]  ;;  %v566_v6 = vmul.f32 %v2437_v46, %v511_v59 }
  0x57   : > { %v590_v7 = vmul.f32 %v2437_v46, %v535_v60 }
  0x58   : > { %v2510_v58 = vadd.f32 %v2458_v61, %v566_v6  ;;  %v569_v6 = vmul.f32 %v2437_v46, %v514_v47 }
  0x59   : > { %1423 = vperm.xlu1 %1987, %v1300_v63   ;;  %1420 = vperm.xlu0 %1986, %v1299_v0   ;;  %v564_v63 = vmul.f32 %v2437_v46, %v509_v50  ;;  %v588_v0 = vmul.f32 %v2437_v46, %v533_v51  ;;  %v2501_v51 = vadd.f32 %v2458_v61, %v563_v1  ;;  %v540_v1 = vld [vmem:[%s2427_s12 + $0x110] sm:$0xff] }
  0x5a   : > { %v2513_v59 = vadd.f32 %v2458_v61, %v590_v7  ;;  %v543_v7 = vld [vmem:[%s2427_s12 + $0x128] sm:$0xff]  ;;  %v595_v47 = vmul.f32 %v2437_v46, %v540_v1 }
  0x5b   : > { %v2498_v50 = vadd.f32 %v2458_v61, %v588_v0  ;;  %v516_v0 = vld [vmem:[%s2427_s12 + $0x50] sm:$0xff] }
  0x5d   : > { %1429 = vperm.xlu1 %1987, %v1302_v4   ;;  %1426 = vperm.xlu0 %1986, %v1301_v5   ;;  %v510_v4 = vld [vmem:[%s2427_s12 + $0x20] sm:$0xff] }
  0x5e   : > { %v534_v5 = vld [vmem:[%s2427_s12 + $0xe0] sm:$0xff] }
  0x61   : > { %1435 = vperm.xlu1 %1987, %v1304_v8   ;;  %1432 = vperm.xlu0 %1986, %v1303_v9   ;;  %v513_v8 = vld [vmem:[%s2427_s12 + $0x38] sm:$0xff]  ;;  %v2471_v9 = vadd.f32 %v2458_v61, %v562_v56  ;;  %v538_v56 = vld [vmem:[%s2427_s12 + $0x100] sm:$0xff] }
  0x62   : > { %v568_v53 = vmul.f32 %v2437_v46, %v513_v8  ;;  %v519_v8 = vld [vmem:[%s2427_s12 + $0x68] sm:$0xff] }
  0x64   : > { %v2535_v14 = vadd.f32 %v2458_v61, %v568_v53  ;;  %v574_v53 = vmul.f32 %v2437_v46, %v519_v8  ;;  %v2565_v8 = vadd.f32 %v2458_v61, %v569_v6  ;;  %v547_v6 = vld [vmem:[%s2427_s12 + $0x148] sm:$0xff] }
  0x65   : > { %1441 = vperm.xlu1 %1987, %v1306_v12   ;;  %1438 = vperm.xlu0 %1986, %v1305_v13   ;;  %v537_v12 = vld [vmem:[%s2427_s12 + $0xf8] sm:$0xff]  ;;  %v512_v13 = vld [vmem:[%s2427_s12 + $0x30] sm:$0xff] }
  0x66   : > { %v592_v60 = vmul.f32 %v2437_v46, %v537_v12  ;;  %v567_v62 = vmul.f32 %v2437_v46, %v512_v13 }
  0x69   : > { %1447 = vperm.xlu1 %1987, %v1308_v16   ;;  %1444 = vperm.xlu0 %1986, %v1307_v17   ;;  %v2486_v16 = vadd.f32 %v2458_v61, %v564_v63  ;;  %v565_v17 = vmul.f32 %v2437_v46, %v510_v4  ;;  %v541_v63 = vld [vmem:[%s2427_s12 + $0x118] sm:$0xff] }
  0x6b   : > { %v2527_v12 = vadd.f32 %v2458_v61, %v565_v17  ;;  %v518_v17 = vld [vmem:[%s2427_s12 + $0x60] sm:$0xff] }
  0x6d   : > { %1453 = vperm.xlu1 %1987, %v1310_v18   ;;  %1450 = vperm.xlu0 %1986, %v1309_v19   ;;  %v589_v18 = vmul.f32 %v2437_v46, %v534_v5  ;;  %v515_v19 = vld [vmem:[%s2427_s12 + $0x48] sm:$0xff]  ;;  %v594_v5 = vmul.f32 %v2437_v46, %v539_v45  ;;  %v571_v45 = vmul.f32 %v2437_v46, %v516_v0 }
  0x6e   : > { %v570_v4 = vmul.f32 %v2437_v46, %v515_v19  ;;  %v596_v19 = vmul.f32 %v2437_v46, %v541_v63  ;;  %v521_v63 = vld [vmem:[%s2427_s12 + $0x78] sm:$0xff] }
  0x6f   : > { %v2530_v13 = vadd.f32 %v2458_v61, %v589_v18  ;;  %v2543_v18 = vadd.f32 %v2458_v61, %v592_v60 }
  0x70   : > { %v2559_v60 = vadd.f32 %v2458_v61, %v570_v4  ;;  %v573_v4 = vmul.f32 %v2437_v46, %v518_v17  ;;  %v546_v17 = vld [vmem:[%s2427_s12 + $0x140] sm:$0xff] }
  0x90   : > { %v2375_v20 = vpop.permute.xlu1 %1318  ;;  %v2377_v21 = vpop.permute.xlu0 %1312 }
  0x91   : > { %vm1455_vm7 = vcmp.eq.s32.totalorder %v2377_v21, 1  ;;  %vm1457_vm3 = vcmp.eq.s32.totalorder %v2375_v20, 1 }
  0x94   : > { %v2379_v22 = vpop.permute.xlu1 %1321  ;;  %v2381_v23 = vpop.permute.xlu0 %1315 }
  0x95   : > { %vm1458_vm4 = vcmp.eq.s32.totalorder %v2379_v22, 1  ;;  %vm1456_vm5 = vcmp.eq.s32.totalorder %v2381_v23, 1 }
  0x98   : > { %v2383_v24 = vpop.permute.xlu1 %1327  ;;  %v2385_v25 = vpop.permute.xlu0 %1324 }
  0x99   : > { %vm1460_vm11 = vcmp.eq.s32.totalorder %v2383_v24, 1  ;;  %vm1459_vm12 = vcmp.eq.s32.totalorder %v2385_v25, 1 }
  0x9c   : > { %v2387_v26 = vpop.permute.xlu1 %1333  ;;  %v2389_v27 = vpop.permute.xlu0 %1330 }
  0x9d   : > { %vm1462_vm15 = vcmp.eq.s32.totalorder %v2387_v26, 1  ;;  %vm1461_vm0 = vcmp.eq.s32.totalorder %v2389_v27, 1 }
  0xa0   : > { %v2391_v28 = vpop.permute.xlu1 %1339  ;;  %v2393_v3 = vpop.permute.xlu0 %1336 }
  0xa4   : > { %v2395_v29 = vpop.permute.xlu1 %1345  ;;  %v2397_v30 = vpop.permute.xlu0 %1342 }
  0xa5   : > { %2936 = vst [vmem:[#allocation2_spill] sm:$0xff] %v2395_v29  ;;  %2937 = vst [vmem:[#allocation3_spill] sm:$0xff] %v2397_v30  ;;  %v549_v29 = vld [vmem:[%s2427_s12 + $0x158] sm:$0xff] }
  0xa8   : > { %v2399_v31 = vpop.permute.xlu1 %1351  ;;  %v2401_v32 = vpop.permute.xlu0 %1348 }
  0xa9   : > { %2938 = vst [vmem:[#allocation4_spill] sm:$0xff] %v2399_v31  ;;  %2939 = vst [vmem:[#allocation5_spill] sm:$0xff] %v2401_v32  ;;  %v2585_v32 = vadd.f32 %v2458_v61, %v571_v45  ;;  %v525_v31 = vld [vmem:[%s2427_s12 + $0x98] sm:$0xff] }
  0xab   : > { %2952 = vst [vmem:[#allocation18_spill] sm:$0xff] %v2585_v32  ;;  %v524_v32 = vld [vmem:[%s2427_s12 + $0x90] sm:$0xff] }
  0xac   : > { %v2403_v33 = vpop.permute.xlu1 %1357  ;;  %v2405_v34 = vpop.permute.xlu0 %1354 }
  0xad   : > { %2940 = vst [vmem:[#allocation6_spill] sm:$0xff] %v2403_v33  ;;  %2941 = vst [vmem:[#allocation7_spill] sm:$0xff] %v2405_v34  ;;  %v522_v34 = vld [vmem:[%s2427_s12 + $0x80] sm:$0xff]  ;;  %v2582_v33 = vadd.f32 %v2458_v61, %v596_v19 }
  0xaf   : > { %2951 = vst [vmem:[#allocation17_spill] sm:$0xff] %v2582_v33  ;;  %v548_v33 = vld [vmem:[%s2427_s12 + $0x150] sm:$0xff] }
  0xb0   : > { %v2407_v35 = vpop.permute.xlu1 %1363  ;;  %v2409_v36 = vpop.permute.xlu0 %1360 }
  0xb1   : > { %2942 = vst [vmem:[#allocation8_spill] sm:$0xff] %v2407_v35  ;;  %2943 = vst [vmem:[#allocation9_spill] sm:$0xff] %v2409_v36  ;;  %v523_v35 = vld [vmem:[%s2427_s12 + $0x88] sm:$0xff] }
  0xb4   : > { %v2411_v37 = vpop.permute.xlu1 %1369  ;;  %v2413_v38 = vpop.permute.xlu0 %1366 }
  0xb5   : > { %2944 = vst [vmem:[#allocation10_spill] sm:$0xff] %v2411_v37  ;;  %2945 = vst [vmem:[#allocation11_spill] sm:$0xff] %v2413_v38  ;;  %v520_v38 = vld [vmem:[%s2427_s12 + $0x70] sm:$0xff] }
  0xb6   : > { %v544_v37 = vld [vmem:[%s2427_s12 + $0x130] sm:$0xff]  ;;  %v575_v45 = vmul.f32 %v2437_v46, %v520_v38 }
  0xb8   : > { %v2415_v39 = vpop.permute.xlu1 %1375  ;;  %v2417_v40 = vpop.permute.xlu0 %1372 }
  0xb9   : > { %2946 = vst [vmem:[#allocation12_spill] sm:$0xff] %v2415_v39  ;;  %2947 = vst [vmem:[#allocation13_spill] sm:$0xff] %v2417_v40  ;;  %v542_v40 = vld [vmem:[%s2427_s12 + $0x120] sm:$0xff]  ;;  %v2556_v39 = vadd.f32 %v2458_v61, %v591_v2 }
  0xbc   : > { %v2419_v41 = vpop.permute.xlu1 %1381  ;;  %v2421_v42 = vpop.permute.xlu0 %1378 }
  0xbd   : > { %2948 = vst [vmem:[#allocation14_spill] sm:$0xff] %v2419_v41  ;;  %2949 = vst [vmem:[#allocation15_spill] sm:$0xff] %v2421_v42  ;;  %v593_v42 = vmul.f32 %v2437_v46, %v538_v56  ;;  %v572_v41 = vmul.f32 %v2437_v46, %v517_v57  ;;  %v2546_v56 = vadd.f32 %v2458_v61, %v567_v62 }
  0xbe   : > { %v598_v57 = vmul.f32 %v2437_v46, %v543_v7  ;;  %v2562_v62 = vadd.f32 %v2458_v61, %v594_v5  ;;  %v545_v7 = vld [vmem:[%s2427_s12 + $0x138] sm:$0xff]  ;;  %v597_v5 = vmul.f32 %v2437_v46, %v542_v40  ;;  %v2594_v40 = vadd.f32 %v2458_v61, %v574_v53 }
  0xbf   : > { %v2571_v36 = vadd.f32 %v2458_v61, %v593_v42  ;;  %v2574_v2 = vadd.f32 %v2458_v61, %v572_v41  ;;  %v2588_v41 = vadd.f32 %v2458_v61, %v595_v47  ;;  %v576_v42 = vmul.f32 %v2437_v46, %v521_v63 }
  0xc0   : > { %v2429_v43 = vpop.permute.xlu1 %1387  ;;  %v2431_v44 = vpop.permute.xlu0 %1384  ;;  %2954 = vst [vmem:[#allocation20_spill] sm:$0xff] %v2594_v40  ;;  %v2597_v30 = vadd.f32 %v2458_v61, %v598_v57  ;;  %v600_v19 = vmul.f32 %v2437_v46, %v545_v7  ;;  %v599_v47 = vmul.f32 %v2437_v46, %v544_v37  ;;  %v578_v63 = vmul.f32 %v2437_v46, %v523_v35  ;;  %v527_v40 = vld [vmem:[%s2427_s12 + $0xa8] sm:$0xff] }
  0xc1   : > { %2950 = vst [vmem:[#allocation16_spill] sm:$0xff] %v2574_v2  ;;  %2953 = vst [vmem:[#allocation19_spill] sm:$0xff] %v2588_v41  ;;  %v602_v41 = vmul.f32 %v2437_v46, %v547_v6  ;;  %v577_v53 = vmul.f32 %v2437_v46, %v522_v34  ;;  %v551_v57 = vld [vmem:[%s2427_s12 + $0x168] sm:$0xff]  ;;  %v2614_v38 = vadd.f32 %v2458_v61, %v597_v5  ;;  %vm1480_vm6 = vcmp.eq.s32.totalorder %v2429_v43, 1 }
  0xc2   : > { %2955 = vst [vmem:[#allocation21_spill] sm:$0xff] %v2597_v30  ;;  %v2611_v30 = vadd.f32 %v2458_v61, %v573_v4  ;;  %v601_v7 = vmul.f32 %v2437_v46, %v546_v17  ;;  %v580_v37 = vmul.f32 %v2437_v46, %v525_v31  ;;  %v2623_v34 = vadd.f32 %v2458_v61, %v576_v42 }
  0xc3   : > { %2957 = vst [vmem:[#allocation23_spill] sm:$0xff] %v2614_v38  ;;  %v604_v6 = vmul.f32 %v2437_v46, %v549_v29  ;;  %v579_v4 = vmul.f32 %v2437_v46, %v524_v32  ;;  %v603_v5 = vmul.f32 %v2437_v46, %v548_v33  ;;  %v526_v38 = vld [vmem:[%s2427_s12 + $0xa0] sm:$0xff]  ;;  %v2631_v31 = vadd.f32 %v2458_v61, %v600_v19 }
  0xc4   : > { %v2446_v54 = vpop.permute.xlu1 %1393  ;;  %v2448_v55 = vpop.permute.xlu0 %1390  ;;  %2956 = vst [vmem:[#allocation22_spill] sm:$0xff] %v2611_v30  ;;  %v550_v30 = vld [vmem:[%s2427_s12 + $0x160] sm:$0xff]  ;;  %v2634_v17 = vadd.f32 %v2458_v61, %v575_v45  ;;  %v606_v42 = vmul.f32 %v2437_v46, %v551_v57  ;;  %v2639_v29 = vadd.f32 %v2458_v61, %v599_v47  ;;  %v2642_v32 = vadd.f32 %v2458_v61, %v578_v63  ;;  %v529_v45 = vld [vmem:[%s2427_s12 + $0xb8] sm:$0xff] }
  0xc5   : > { %v2645_v33 = vadd.f32 %v2458_v61, %v602_v41  ;;  %v2648_v19 = vadd.f32 %v2458_v61, %v577_v53  ;;  %v2656_v57 = vadd.f32 %v2458_v61, %v580_v37  ;;  %v581_v47 = vmul.f32 %v2437_v46, %v526_v38 }
  0xc6   : > { %2959 = vst [vmem:[#allocation25_spill] sm:$0xff] %v2634_v17  ;;  %2960 = vst [vmem:[#allocation26_spill] sm:$0xff] %v2639_v29  ;;  %v553_v17 = vld [vmem:[%s2427_s12 + $0x178] sm:$0xff]  ;;  %v605_v29 = vmul.f32 %v2437_v46, %v550_v30  ;;  %v2663_v41 = vadd.f32 %v2458_v61, %v604_v6  ;;  %v2666_v63 = vadd.f32 %v2458_v61, %v579_v4  ;;  %vm1479_vm8 = vcmp.eq.s32.totalorder %v2431_v44, 1 }
  0xc7   : > { %2961 = vst [vmem:[#allocation27_spill] sm:$0xff] %v2648_v19  ;;  %2963 = vst [vmem:[#allocation29_spill] sm:$0xff] %v2656_v57  ;;  %v2669_v53 = vadd.f32 %v2458_v61, %v603_v5  ;;  %v2677_v30 = vadd.f32 %v2458_v61, %v606_v42  ;;  %v584_v19 = vmul.f32 %v2437_v46, %v529_v45  ;;  %vm1482_vm9 = vcmp.eq.s32.totalorder %v2446_v54, 1 }
  0xc8   : > { %v2493_v48 = vpop.permute.xlu1 %1399  ;;  %v2495_v49 = vpop.permute.xlu0 %1396  ;;  %2964 = vst [vmem:[#allocation30_spill] sm:$0xff] %v2666_v63  ;;  %v608_v6 = vmul.f32 %v2437_v46, %v553_v17  ;;  %v2691_v45 = vadd.f32 %v2458_v61, %v581_v47  ;;  %v2694_v17 = vadd.f32 %v2458_v61, %v605_v29  ;;  %vm1481_vm10 = vcmp.eq.s32.totalorder %v2448_v55, 1 }
  0xc9   : > { %2965 = vst [vmem:[#allocation31_spill] sm:$0xff] %v2669_v53  ;;  %2967 = vst [vmem:[#allocation33_spill] sm:$0xff] %v2677_v30  ;;  %vm1484_vm13 = vcmp.eq.s32.totalorder %v2493_v48, 1  ;;  %vm1483_vm14 = vcmp.eq.s32.totalorder %v2495_v49, 1 }
  0xcc   : > { %v2551_v0 = vpop.permute.xlu1 %1405  ;;  %v2553_v1 = vpop.permute.xlu0 %1402 }
  0xcd   : > { %vm1486_vm1 = vcmp.eq.s32.totalorder %v2551_v0, 1  ;;  %vm1485_vm2 = vcmp.eq.s32.totalorder %v2553_v1, 1 }
  0xd0   : > { %v2618_v2 = vpop.permute.xlu1 %1411  ;;  %v2620_v35 = vpop.permute.xlu0 %1408 }
  0xd1   : > { %2958 = vst [vmem:[#allocation24_spill] sm:$0xff] %v2620_v35  ;;  %v582_v35 = vmul.f32 %v2437_v46, %v527_v40  ;;  %v2653_v40 = vadd.f32 %v2458_v61, %v601_v7  ;;  %v528_v7 = vld [vmem:[%s2427_s12 + $0xb0] sm:$0xff] }
  0xd2   : > { %v583_v53 = vmul.f32 %v2437_v46, %v528_v7 }
  0xd3   : > { %2962 = vst [vmem:[#allocation28_spill] sm:$0xff] %v2653_v40  ;;  %v552_v40 = vld [vmem:[%s2427_s12 + $0x170] sm:$0xff]  ;;  %v2674_v38 = vadd.f32 %v2458_v61, %v582_v35 }
  0xd4   : > { %v2684_v4 = vpop.permute.xlu1 %1417  ;;  %v2686_v5 = vpop.permute.xlu0 %1414  ;;  %v607_v63 = vmul.f32 %v2437_v46, %v552_v40  ;;  %v2708_v46 = vadd.f32 %v2458_v61, %v584_v19  ;;  %v2711_v40 = vadd.f32 %v2458_v61, %v608_v6 }
  0xd5   : > { %2966 = vst [vmem:[#allocation32_spill] sm:$0xff] %v2674_v38 }
  0xd6   : > { %2968 = vst [vmem:[#allocation34_spill] sm:$0xff] %v2711_v40 }
  0xd8   : > { %v2721_v40 = vpop.permute.xlu1 %1423  ;;  %v2723_v23 = vpop.permute.xlu0 %1420  ;;  %v2969_v26 = vld [vmem:[#allocation24_spill] sm:$0xff] }
  0xea   : > { %v1886_v37 = vpop.f32.mrb[0].mxu0 }
  0xeb   : > { %v1922_v57 = vpop.f32.mrb[0].mxu1  ;;  %v1168_v35 = vadd.f32 %v1886_v37, %v2471_v9  ;;  %v928_v42 = vpop.f32.mrb[1].mxu0 }
  0xec   : > { %v1192_v38 = vadd.f32 %v1922_v57, %v2474_v10  ;;  %v1048_v30 = vpop.f32.mrb[1].mxu1  ;;  %v1167_v57 = vadd.f32 %v928_v42, %v2477_v11 }
  0xed   : > { %v1216_v9 = vmax.f32 %v1168_v35, 0.0  ;;  %v1191_v47 = vadd.f32 %v1048_v30, %v2483_v15 }
  0xee   : > { %v1240_v10 = vmax.f32 %v1192_v38, 0.0  ;;  %v1889_v29 = vpop.f32.mrb[2].mxu0  ;;  %v1215_v35 = vmax.f32 %v1167_v57, 0.0  ;;  %v2730_v57 = vadd.f32 %v2458_v61, %v583_v53 }
  0xef   : > { %v1925_v7 = vpop.f32.mrb[2].mxu1  ;;  %v1504_v37 = vsel %vm1456_vm5, %v1216_v9, 0.0  ;;  %v1239_v11 = vmax.f32 %v1191_v47, 0.0  ;;  %v938_v15 = vpop.f32.mrb[3].mxu0  ;;  %v1170_v30 = vadd.f32 %v1889_v29, %v2486_v16  ;;  %v2733_v16 = vadd.f32 %v2458_v61, %v607_v63 }
  0xf0   : > { %v1528_v38 = vsel %vm1480_vm6, %v1240_v10, 0.0  ;;  %v1058_v43 = vpop.f32.mrb[3].mxu1  ;;  %1552 = vst [vmem:[%s2701_s18 + $0x8] sm:$0xff] %v1504_v37  ;;  %v1194_v19 = vadd.f32 %v1925_v7, %v2498_v50  ;;  %v1169_v42 = vadd.f32 %v938_v15, %v2501_v51  ;;  %v1503_v9 = vsel %vm1455_vm7, %v1215_v35, 0.0 }
  0xf1   : > { %1576 = vst [vmem:[%s2701_s18 + $0xc8] sm:$0xff] %v1528_v38  ;;  %v1193_v6 = vadd.f32 %v1058_v43, %v2504_v52  ;;  %v1527_v10 = vsel %vm1479_vm8, %v1239_v11, 0.0  ;;  %1551 = vst [vmem:[%s2701_s18] sm:$0xff] %v1503_v9  ;;  %v1218_v50 = vmax.f32 %v1170_v30, 0.0  ;;  %v2765_v9 = vpop.permute.xlu0 %1426  ;;  %vm1464_vm7 = vcmp.eq.s32.totalorder %v2391_v28, 1 }
  0xf2   : > { %1575 = vst [vmem:[%s2701_s18 + $0xc0] sm:$0xff] %v1527_v10  ;;  %v1242_v51 = vmax.f32 %v1194_v19, 0.0  ;;  %v1217_v52 = vmax.f32 %v1169_v42, 0.0  ;;  %v1892_v21 = vpop.f32.mrb[4].mxu0  ;;  %vm1487_vm5 = vcmp.eq.s32.totalorder %v2969_v26, 1 }
  0xf3   : > { %v1241_v47 = vmax.f32 %v1193_v6, 0.0  ;;  %v1928_v29 = vpop.f32.mrb[4].mxu1  ;;  %v1172_v44 = vadd.f32 %v1892_v21, %v2510_v58  ;;  %v948_v63 = vpop.f32.mrb[5].mxu0  ;;  %v1506_v7 = vsel %vm1458_vm4, %v1218_v50, 0.0  ;;  %vm1488_vm4 = vcmp.eq.s32.totalorder %v2618_v2, 1 }
  0xf4   : > { %v1196_v61 = vadd.f32 %v1928_v29, %v2513_v59  ;;  %v1068_v53 = vpop.f32.mrb[5].mxu1  ;;  %v1530_v37 = vsel %vm1482_vm9, %v1242_v51, 0.0  ;;  %v1505_v38 = vsel %vm1457_vm3, %v1217_v52, 0.0  ;;  %1554 = vst [vmem:[%s2701_s18 + $0x18] sm:$0xff] %v1506_v7  ;;  %v1171_v58 = vadd.f32 %v948_v63, %v2527_v12  ;;  %v2763_v6 = vpop.permute.xlu1 %1429 }
  0xf5   : > { %v1529_v35 = vsel %vm1481_vm10, %v1241_v47, 0.0  ;;  %1578 = vst [vmem:[%s2701_s18 + $0xd8] sm:$0xff] %v1530_v37  ;;  %1553 = vst [vmem:[%s2701_s18 + $0x10] sm:$0xff] %v1505_v38  ;;  %v1220_v54 = vmax.f32 %v1172_v44, 0.0  ;;  %v1195_v59 = vadd.f32 %v1068_v53, %v2530_v13  ;;  %vm1463_vm3 = vcmp.eq.s32.totalorder %v2393_v3, 1  ;;  %v2976_v3 = vld [vmem:[#allocation20_spill] sm:$0xff] }
  0xf6   : > { %1577 = vst [vmem:[%s2701_s18 + $0xd0] sm:$0xff] %v1529_v35  ;;  %v1244_v55 = vmax.f32 %v1196_v61, 0.0  ;;  %v1895_v20 = vpop.f32.mrb[6].mxu0  ;;  %v1219_v43 = vmax.f32 %v1171_v58, 0.0  ;;  %vm1490_vm9 = vcmp.eq.s32.totalorder %v2684_v4, 1  ;;  %vm1489_vm10 = vcmp.eq.s32.totalorder %v2686_v5, 1 }
  0xf7   : > { %v1931_v22 = vpop.f32.mrb[6].mxu1  ;;  %v1508_v11 = vsel %vm1460_vm11, %v1220_v54, 0.0  ;;  %v1243_v30 = vmax.f32 %v1195_v59, 0.0  ;;  %v958_v19 = vpop.f32.mrb[7].mxu0  ;;  %v1174_v24 = vadd.f32 %v1895_v20, %v2535_v14  ;;  %v2972_v59 = vld [vmem:[#allocation18_spill] sm:$0xff]  ;;  %v2973_v20 = vld [vmem:[#allocation19_spill] sm:$0xff] }
  0xf8   : > { %v1532_v15 = vsel %vm1484_vm13, %v1244_v55, 0.0  ;;  %v1078_v12 = vpop.f32.mrb[7].mxu1  ;;  %1556 = vst [vmem:[%s2701_s18 + $0x28] sm:$0xff] %v1508_v11  ;;  %v1198_v13 = vadd.f32 %v1931_v22, %v2543_v18  ;;  %v1173_v48 = vadd.f32 %v958_v19, %v2546_v56  ;;  %v1507_v10 = vsel %vm1459_vm12, %v1219_v43, 0.0  ;;  %v2971_v55 = vld [vmem:[#allocation17_spill] sm:$0xff]  ;;  %v2974_v11 = vld [vmem:[#allocation2_spill] sm:$0xff]  ;;  %v2799_v43 = vpop.permute.xlu1 %1435 }
  0xf9   : > { %1580 = vst [vmem:[%s2701_s18 + $0xe8] sm:$0xff] %v1532_v15  ;;  %v1197_v42 = vadd.f32 %v1078_v12, %v2556_v39  ;;  %v1531_v14 = vsel %vm1483_vm14, %v1243_v30, 0.0  ;;  %1555 = vst [vmem:[%s2701_s18 + $0x20] sm:$0xff] %v1507_v10  ;;  %v1222_v18 = vmax.f32 %v1174_v24, 0.0  ;;  %vm1466_vm6 = vcmp.eq.s32.totalorder %v2974_v11, 1  ;;  %v2975_v15 = vld [vmem:[#allocation3_spill] sm:$0xff]  ;;  %v2801_v30 = vpop.permute.xlu0 %1432 }
  0xfa   : > { %1579 = vst [vmem:[%s2701_s18 + $0xe0] sm:$0xff] %v1531_v14  ;;  %v1246_v56 = vmax.f32 %v1198_v13, 0.0  ;;  %v1221_v39 = vmax.f32 %v1173_v48, 0.0  ;;  %v1898_v51 = vpop.f32.mrb[8].mxu0  ;;  %vm1465_vm8 = vcmp.eq.s32.totalorder %v2975_v15, 1  ;;  %vm1492_vm13 = vcmp.eq.s32.totalorder %v2721_v40, 1 }
  0xfb   : > { %v1245_v50 = vmax.f32 %v1197_v42, 0.0  ;;  %v1934_v52 = vpop.f32.mrb[8].mxu1  ;;  %v1176_v25 = vadd.f32 %v1898_v51, %v2559_v60  ;;  %v968_v47 = vpop.f32.mrb[9].mxu0  ;;  %v1510_v29 = vsel %vm1462_vm15, %v1222_v18, 0.0  ;;  %vm1491_vm14 = vcmp.eq.s32.totalorder %v2723_v23, 1 }
  0xfc   : > { %v1200_v49 = vadd.f32 %v1934_v52, %v2562_v62  ;;  %v1088_v21 = vpop.f32.mrb[9].mxu1  ;;  %v1534_v44 = vsel %vm1486_vm1, %v1246_v56, 0.0  ;;  %v1509_v61 = vsel %vm1461_vm0, %v1221_v39, 0.0  ;;  %1558 = vst [vmem:[%s2701_s18 + $0x38] sm:$0xff] %v1510_v29  ;;  %v1175_v60 = vadd.f32 %v968_v47, %v2565_v8  ;;  %v2977_v56 = vld [vmem:[#allocation21_spill] sm:$0xff] }
  0xfd   : > { %v1533_v63 = vsel %vm1485_vm2, %v1245_v50, 0.0  ;;  %1582 = vst [vmem:[%s2701_s18 + $0xf8] sm:$0xff] %v1534_v44  ;;  %1557 = vst [vmem:[%s2701_s18 + $0x30] sm:$0xff] %v1509_v61  ;;  %v1224_v0 = vmax.f32 %v1176_v25, 0.0  ;;  %v1199_v62 = vadd.f32 %v1088_v21, %v2571_v36  ;;  %v2970_v36 = vld [vmem:[#allocation16_spill] sm:$0xff]  ;;  %v2978_v21 = vld [vmem:[#allocation22_spill] sm:$0xff] }
  0xfe   : > { %1581 = vst [vmem:[%s2701_s18 + $0xf0] sm:$0xff] %v1533_v63  ;;  %v1248_v1 = vmax.f32 %v1200_v49, 0.0  ;;  %v1901_v27 = vpop.f32.mrb[10].mxu0  ;;  %v1223_v38 = vmax.f32 %v1175_v60, 0.0  ;;  %v2979_v44 = vld [vmem:[#allocation23_spill] sm:$0xff]  ;;  %v2980_v63 = vld [vmem:[#allocation4_spill] sm:$0xff] }
  0xff   : > { %v1937_v53 = vpop.f32.mrb[10].mxu1  ;;  %v1512_v7 = vsel %vm1464_vm7, %v1224_v0, 0.0  ;;  %v1247_v35 = vmax.f32 %v1199_v62, 0.0  ;;  %v978_v54 = vpop.f32.mrb[11].mxu0  ;;  %v1178_v28 = vadd.f32 %v1901_v27, %v2970_v36  ;;  %vm1468_vm11 = vcmp.eq.s32.totalorder %v2980_v63, 1  ;;  %v2981_v0 = vld [vmem:[#allocation5_spill] sm:$0xff] }
 0x100   : > { %v1536_v37 = vsel %vm1488_vm4, %v1248_v1, 0.0  ;;  %v1098_v8 = vpop.f32.mrb[11].mxu1  ;;  %1560 = vst [vmem:[%s2701_s18 + $0x48] sm:$0xff] %v1512_v7  ;;  %v1202_v58 = vadd.f32 %v1937_v53, %v2971_v55  ;;  %v1177_v2 = vadd.f32 %v978_v54, %v2972_v59  ;;  %v1511_v19 = vsel %vm1463_vm3, %v1223_v38, 0.0  ;;  %v2982_v54 = vld [vmem:[#allocation25_spill] sm:$0xff]  ;;  %v2985_v55 = vld [vmem:[#allocation7_spill] sm:$0xff]  ;;  %v2837_v59 = vpop.permute.xlu0 %1438 }
 0x101   : > { %1584 = vst [vmem:[%s2701_s18 + $0x108] sm:$0xff] %v1536_v37  ;;  %v1201_v22 = vadd.f32 %v1098_v8, %v2973_v20  ;;  %v1535_v12 = vsel %vm1487_vm5, %v1247_v35, 0.0  ;;  %1559 = vst [vmem:[%s2701_s18 + $0x40] sm:$0xff] %v1511_v19  ;;  %v1226_v24 = vmax.f32 %v1178_v28, 0.0  ;;  %vm1467_vm12 = vcmp.eq.s32.totalorder %v2981_v0, 1  ;;  %v2983_v8 = vld [vmem:[#allocation26_spill] sm:$0xff] }
 0x102   : > { %1583 = vst [vmem:[%s2701_s18 + $0x100] sm:$0xff] %v1535_v12  ;;  %v1250_v13 = vmax.f32 %v1202_v58, 0.0  ;;  %v1225_v48 = vmax.f32 %v1177_v2, 0.0  ;;  %v1904_v10 = vpop.f32.mrb[12].mxu0  ;;  %v2984_v28 = vld [vmem:[#allocation6_spill] sm:$0xff]  ;;  %vm1469_vm0 = vcmp.eq.s32.totalorder %v2985_v55, 1  ;;  %v2835_v58 = vpop.permute.xlu1 %1441 }
 0x103   : > { %v1249_v42 = vmax.f32 %v1201_v22, 0.0  ;;  %v1940_v14 = vpop.f32.mrb[12].mxu1  ;;  %v1180_v18 = vadd.f32 %v1904_v10, %v2976_v3  ;;  %v988_v50 = vpop.f32.mrb[13].mxu0  ;;  %v1514_v52 = vsel %vm1466_vm6, %v1226_v24, 0.0  ;;  %vm1470_vm15 = vcmp.eq.s32.totalorder %v2984_v28, 1  ;;  %v2987_v3 = vld [vmem:[#allocation28_spill] sm:$0xff] }
 0x104   : > { %v1204_v39 = vadd.f32 %v1940_v14, %v2977_v56  ;;  %v1108_v51 = vpop.f32.mrb[13].mxu1  ;;  %v1538_v25 = vsel %vm1490_vm9, %v1250_v13, 0.0  ;;  %v1513_v49 = vsel %vm1465_vm8, %v1225_v48, 0.0  ;;  %1562 = vst [vmem:[%s2701_s18 + $0x58] sm:$0xff] %v1514_v52  ;;  %v1179_v29 = vadd.f32 %v988_v50, %v2978_v21  ;;  %v2988_v56 = vld [vmem:[#allocation8_spill] sm:$0xff]  ;;  %v2990_v21 = vld [vmem:[#allocation29_spill] sm:$0xff] }
 0x105   : > { %v1537_v47 = vsel %vm1489_vm10, %v1249_v42, 0.0  ;;  %1586 = vst [vmem:[%s2701_s18 + $0x118] sm:$0xff] %v1538_v25  ;;  %1561 = vst [vmem:[%s2701_s18 + $0x50] sm:$0xff] %v1513_v49  ;;  %v1228_v4 = vmax.f32 %v1180_v18, 0.0  ;;  %v1203_v61 = vadd.f32 %v1108_v51, %v2979_v44  ;;  %vm1494_vm1 = vcmp.eq.s32.totalorder %v2763_v6, 1  ;;  %v2992_v63 = vld [vmem:[#allocation31_spill] sm:$0xff] }
 0x106   : > { %1585 = vst [vmem:[%s2701_s18 + $0x110] sm:$0xff] %v1537_v47  ;;  %v1252_v5 = vmax.f32 %v1204_v39, 0.0  ;;  %v1907_v1 = vpop.f32.mrb[14].mxu0  ;;  %v1227_v27 = vmax.f32 %v1179_v29, 0.0  ;;  %vm1493_vm2 = vcmp.eq.s32.totalorder %v2765_v9, 1  ;;  %vm1472_vm7 = vcmp.eq.s32.totalorder %v2988_v56, 1 }
 0x107   : > { %v1943_v60 = vpop.f32.mrb[14].mxu1  ;;  %v1516_v62 = vsel %vm1468_vm11, %v1228_v4, 0.0  ;;  %v1251_v53 = vmax.f32 %v1203_v61, 0.0  ;;  %v998_v7 = vpop.f32.mrb[15].mxu0  ;;  %v1182_v38 = vadd.f32 %v1907_v1, %v2623_v34  ;;  %v2989_v39 = vld [vmem:[#allocation9_spill] sm:$0xff]  ;;  %vm1496_vm4 = vcmp.eq.s32.totalorder %v2799_v43, 1 }
 0x108   : > { %v1540_v26 = vsel %vm1492_vm13, %v1252_v5, 0.0  ;;  %v1118_v37 = vpop.f32.mrb[15].mxu1  ;;  %1564 = vst [vmem:[%s2701_s18 + $0x68] sm:$0xff] %v1516_v62  ;;  %v1206_v35 = vadd.f32 %v1943_v60, %v2631_v31  ;;  %v1181_v40 = vadd.f32 %v998_v7, %v2982_v54  ;;  %v1515_v2 = vsel %vm1467_vm12, %v1227_v27, 0.0  ;;  %v2991_v61 = vld [vmem:[#allocation30_spill] sm:$0xff]  ;;  %v2994_v60 = vld [vmem:[#allocation11_spill] sm:$0xff]  ;;  %v1448_v62 = vpop.permute.xlu1 %1447 }
 0x109   : > { %1588 = vst [vmem:[%s2701_s18 + $0x128] sm:$0xff] %v1540_v26  ;;  %v1205_v36 = vadd.f32 %v1118_v37, %v2983_v8  ;;  %v1539_v34 = vsel %vm1491_vm14, %v1251_v53, 0.0  ;;  %1563 = vst [vmem:[%s2701_s18 + $0x60] sm:$0xff] %v1515_v2  ;;  %v1230_v31 = vmax.f32 %v1182_v38, 0.0  ;;  %vm1471_vm3 = vcmp.eq.s32.totalorder %v2989_v39, 1  ;;  %v2993_v1 = vld [vmem:[#allocation10_spill] sm:$0xff]  ;;  %v1445_v26 = vpop.permute.xlu0 %1444 }
 0x10a   : > { %1587 = vst [vmem:[%s2701_s18 + $0x120] sm:$0xff] %v1539_v34  ;;  %v1254_v20 = vmax.f32 %v1206_v35, 0.0  ;;  %v1229_v22 = vmax.f32 %v1181_v40, 0.0  ;;  %v1910_v15 = vpop.f32.mrb[16].mxu0  ;;  %vm1495_vm5 = vcmp.eq.s32.totalorder %v2801_v30, 1  ;;  %vm1474_vm6 = vcmp.eq.s32.totalorder %v2993_v1, 1 }
 0x10b   : > { %v1253_v11 = vmax.f32 %v1205_v36, 0.0  ;;  %v1946_v19 = vpop.f32.mrb[16].mxu1  ;;  %v1184_v12 = vadd.f32 %v1910_v15, %v2642_v32  ;;  %v1008_v24 = vpop.f32.mrb[17].mxu0  ;;  %v1518_v48 = vsel %vm1470_vm15, %v1230_v31, 0.0  ;;  %v2986_v32 = vld [vmem:[#allocation27_spill] sm:$0xff]  ;;  %vm1473_vm8 = vcmp.eq.s32.totalorder %v2994_v60, 1 }
 0x10c   : > { %v1208_v23 = vadd.f32 %v1946_v19, %v2645_v33  ;;  %v1128_v13 = vpop.f32.mrb[17].mxu1  ;;  %v1542_v42 = vsel %vm1494_vm1, %v1254_v20, 0.0  ;;  %v1517_v10 = vsel %vm1469_vm0, %v1229_v22, 0.0  ;;  %1566 = vst [vmem:[%s2701_s18 + $0x78] sm:$0xff] %v1518_v48  ;;  %v1183_v33 = vadd.f32 %v1008_v24, %v2986_v32  ;;  %v2995_v40 = vld [vmem:[#allocation32_spill] sm:$0xff]  ;;  %v2996_v30 = vld [vmem:[#allocation33_spill] sm:$0xff] }
 0x10d   : > { %v1541_v14 = vsel %vm1493_vm2, %v1253_v11, 0.0  ;;  %1590 = vst [vmem:[%s2701_s18 + $0x138] sm:$0xff] %v1542_v42  ;;  %1565 = vst [vmem:[%s2701_s18 + $0x70] sm:$0xff] %v1517_v10  ;;  %v1232_v6 = vmax.f32 %v1184_v12, 0.0  ;;  %v1207_v18 = vadd.f32 %v1128_v13, %v2987_v3  ;;  %vm1498_vm9 = vcmp.eq.s32.totalorder %v2835_v58, 1  ;;  %v2997_v15 = vld [vmem:[#allocation12_spill] sm:$0xff] }
 0x10e   : > { %1589 = vst [vmem:[%s2701_s18 + $0x130] sm:$0xff] %v1541_v14  ;;  %v1256_v9 = vmax.f32 %v1208_v23, 0.0  ;;  %v1913_v50 = vpop.f32.mrb[18].mxu0  ;;  %v1231_v49 = vmax.f32 %v1183_v33, 0.0  ;;  %vm1497_vm10 = vcmp.eq.s32.totalorder %v2837_v59, 1  ;;  %vm1476_vm11 = vcmp.eq.s32.totalorder %v2997_v15, 1  ;;  %v1454_v14 = vpop.permute.xlu1 %1453 }
 0x10f   : > { %v1949_v51 = vpop.f32.mrb[18].mxu1  ;;  %v1520_v52 = vsel %vm1472_vm7, %v1232_v6, 0.0  ;;  %v1255_v47 = vmax.f32 %v1207_v18, 0.0  ;;  %v1018_v4 = vpop.f32.mrb[19].mxu0  ;;  %v1186_v29 = vadd.f32 %v1913_v50, %v2990_v21  ;;  %v2998_v19 = vld [vmem:[#allocation13_spill] sm:$0xff]  ;;  %vm1500_vm13 = vcmp.eq.s32.totalorder %v1448_v62, 1 }
 0x110   : > { %v1544_v25 = vsel %vm1496_vm4, %v1256_v9, 0.0  ;;  %v1138_v5 = vpop.f32.mrb[19].mxu1  ;;  %1568 = vst [vmem:[%s2701_s18 + $0x88] sm:$0xff] %v1520_v52  ;;  %v1210_v44 = vadd.f32 %v1949_v51, %v2663_v41  ;;  %v1185_v43 = vadd.f32 %v1018_v4, %v2991_v61  ;;  %v1519_v27 = vsel %vm1471_vm3, %v1231_v49, 0.0  ;;  %v1451_v6 = vpop.permute.xlu0 %1450  ;;  %v2999_v9 = vld [vmem:[#allocation34_spill] sm:$0xff] }
 0x111   : > { %1592 = vst [vmem:[%s2701_s18 + $0x148] sm:$0xff] %v1544_v25  ;;  %v1209_v0 = vadd.f32 %v1138_v5, %v2992_v63  ;;  %v1543_v53 = vsel %vm1495_vm5, %v1255_v47, 0.0  ;;  %1567 = vst [vmem:[%s2701_s18 + $0x80] sm:$0xff] %v1519_v27  ;;  %v1234_v7 = vmax.f32 %v1186_v29, 0.0  ;;  %vm1475_vm12 = vcmp.eq.s32.totalorder %v2998_v19, 1  ;;  %v3000_v52 = vld [vmem:[#allocation14_spill] sm:$0xff] }
 0x112   : > { %1591 = vst [vmem:[%s2701_s18 + $0x140] sm:$0xff] %v1543_v53  ;;  %v1258_v41 = vmax.f32 %v1210_v44, 0.0  ;;  %v1233_v37 = vmax.f32 %v1185_v43, 0.0  ;;  %v1916_v35 = vpop.f32.mrb[20].mxu0  ;;  %vm1499_vm14 = vcmp.eq.s32.totalorder %v1445_v26, 1  ;;  %vm1478_vm15 = vcmp.eq.s32.totalorder %v3000_v52, 1 }
 0x113   : > { %v1257_v38 = vmax.f32 %v1209_v0, 0.0  ;;  %v1952_v54 = vpop.f32.mrb[20].mxu1  ;;  %v1188_v8 = vadd.f32 %v1916_v35, %v2995_v40  ;;  %v1028_v28 = vpop.f32.mrb[21].mxu0  ;;  %v1522_v2 = vsel %vm1474_vm6, %v1234_v7, 0.0  ;;  %vm1502_vm1 = vcmp.eq.s32.totalorder %v1454_v14, 1 }
 0x114   : > { %v1212_v36 = vadd.f32 %v1952_v54, %v2996_v30  ;;  %v1148_v55 = vpop.f32.mrb[21].mxu1  ;;  %v1546_v34 = vsel %vm1498_vm9, %v1258_v41, 0.0  ;;  %v1521_v31 = vsel %vm1473_vm8, %v1233_v37, 0.0  ;;  %1570 = vst [vmem:[%s2701_s18 + $0x98] sm:$0xff] %v1522_v2  ;;  %v1187_v22 = vadd.f32 %v1028_v28, %v2691_v45 }
 0x115   : > { %v1545_v20 = vsel %vm1497_vm10, %v1257_v38, 0.0  ;;  %1594 = vst [vmem:[%s2701_s18 + $0x158] sm:$0xff] %v1546_v34  ;;  %1569 = vst [vmem:[%s2701_s18 + $0x90] sm:$0xff] %v1521_v31  ;;  %v1236_v58 = vmax.f32 %v1188_v8, 0.0  ;;  %v1211_v11 = vadd.f32 %v1148_v55, %v2694_v17  ;;  %vm1501_vm2 = vcmp.eq.s32.totalorder %v1451_v6, 1 }
 0x116   : > { %1593 = vst [vmem:[%s2701_s18 + $0x150] sm:$0xff] %v1545_v20  ;;  %v1260_v59 = vmax.f32 %v1212_v36, 0.0  ;;  %v1919_v12 = vpop.f32.mrb[22].mxu0  ;;  %v1235_v48 = vmax.f32 %v1187_v22, 0.0 }
 0x117   : > { %v1955_v23 = vpop.f32.mrb[22].mxu1  ;;  %v1524_v24 = vsel %vm1476_vm11, %v1236_v58, 0.0  ;;  %v1259_v42 = vmax.f32 %v1211_v11, 0.0  ;;  %v1038_v10 = vpop.f32.mrb[23].mxu0  ;;  %v1190_v17 = vadd.f32 %v1919_v12, %v2708_v46 }
 0x118   : > { %v1548_v13 = vsel %vm1500_vm13, %v1260_v59, 0.0  ;;  %v1158_v45 = vpop.f32.mrb[23].mxu1  ;;  %1572 = vst [vmem:[%s2701_s18 + $0xa8] sm:$0xff] %v1524_v24  ;;  %v1214_v32 = vadd.f32 %v1955_v23, %v2999_v9  ;;  %v1189_v33 = vadd.f32 %v1038_v10, %v2730_v57  ;;  %v1523_v18 = vsel %vm1475_vm12, %v1235_v48, 0.0  ;;  %v3001_v57 = vld [vmem:[#allocation15_spill] sm:$0xff] }
 0x119   : > { %1596 = vst [vmem:[%s2701_s18 + $0x168] sm:$0xff] %v1548_v13  ;;  %v1213_v3 = vadd.f32 %v1158_v45, %v2733_v16  ;;  %v1547_v56 = vsel %vm1499_vm14, %v1259_v42, 0.0  ;;  %1571 = vst [vmem:[%s2701_s18 + $0xa0] sm:$0xff] %v1523_v18  ;;  %v1238_v39 = vmax.f32 %v1190_v17, 0.0  ;;  %vm1477_vm0 = vcmp.eq.s32.totalorder %v3001_v57, 1 }
 0x11a   : > { %1595 = vst [vmem:[%s2701_s18 + $0x160] sm:$0xff] %v1547_v56  ;;  %v1262_v50 = vmax.f32 %v1214_v32, 0.0  ;;  %v1237_v46 = vmax.f32 %v1189_v33, 0.0 }
 0x11b   : > { %v1261_v51 = vmax.f32 %v1213_v3, 0.0  ;;  %v1526_v16 = vsel %vm1478_vm15, %v1238_v39, 0.0 }
 0x11c   : > { %v1550_v25 = vsel %vm1502_vm1, %v1262_v50, 0.0  ;;  %v1525_v49 = vsel %vm1477_vm0, %v1237_v46, 0.0  ;;  %1574 = vst [vmem:[%s2701_s18 + $0xb8] sm:$0xff] %v1526_v16 }
 0x11d   : > { %v1549_v47 = vsel %vm1501_vm2, %v1261_v51, 0.0  ;;  %1598 = vst [vmem:[%s2701_s18 + $0x178] sm:$0xff] %v1550_v25  ;;  %1573 = vst [vmem:[%s2701_s18 + $0xb0] sm:$0xff] %v1525_v49 }
 0x11e   : > { %1597 = vst [vmem:[%s2701_s18 + $0x170] sm:$0xff] %v1549_v47 }
 0x11f PF: > { %s16_s23 = sadd.s32 1, %s2010_s23   ;;  %s3002_s21 = smov %s2006_s22 }
 0x120   : > { %p13_p5 = scmp.ge.s32.totalorder %s16_s23, 4   ;;  %s3003_s22 = smov %s3005_s24 }
 0x122   :  { %15 = sbr.rel (!%p13_p5) target bundleno = 2 (0x2), region = 80 }

// kernel: residual_forward.6
= control target key start
LH: loop header
LB: loop body
LE: loop exit
PB: predicated region body
PF: predicated region fallthrough
CT: control target
= control target key end

     0   :  { %s8952_s15 = smov 0   ;;  %s8954_s16 = smov 0   ;;  %s10909_s0 = inlined_call_operand.vmem [shape: f32[1152,1], index: 0, kind: input, shape index: {}]   ;;  %s10910_s1 = inlined_call_operand.vmem [shape: f32[2,1160,128], index: 1, kind: input, shape index: {}]   ;;  %s10911_s2 = inlined_call_operand.vmem [shape: f32[9,128,128], index: 2, kind: input, shape index: {}]   ;;  %s10912_s3 = inlined_call_operand.vmem [shape: f32[2,1160,128], index: 3, kind: output, shape index: {0}]   ;;  %s10913_s4 = inlined_call_operand.vmem [shape: f32[2,8,128], index: 4, kind: output, shape index: {1}]  }
   0x1   :  { %s8956_s17 = smov 0   ;;  %s8958_s18 = smov 0  }
   0x2   :  { %s8960_s19 = smov 0  }
   0x3 LB: > { %s5958_s20 = sadd.s32 4294967295, %s8916_s19   ;;  %s27_s21 = sadd.s32 1, %s8912_s18  ;;  %s8916_s19 = sphi %s8960_s19, %s15_s19   ;;  %s8912_s18 = sphi %s8958_s18, %s11069_s18   ;;  %s8908_s17 = sphi %s8956_s17, %s11068_s17   ;;  %s8904_s16 = sphi %s8954_s16, %s11067_s16   ;;  %s8900_s15 = sphi %s8952_s15, %s11066_s15  }
   0x4   : > { %p29_p0 = scmp.ge.s32.totalorder %s27_s21, 2  ;;  %s113_s22 = sadd.s32 1, %s8904_s16 }
   0x5   : > { %p123_p1 = scmp.ne.s32.totalorder %s8904_s16, %s8900_s15  ;;  %p124_p2 = scmp.eq.s32.totalorder %s5958_s20, 1 }
   0x6   : > { %s11071_s21 = smov (%p29_p0, %s27_s21), 0  ;;  %p5963_p4 = scmp.ge.s32.totalorder %s8916_s19, 1 }
   0x7   : > { %p8984_p3 = por %p124_p2, %p123_p1  ;;  %s108_s24 = ssub.s32 %s8912_s18, %s11071_s21 }
   0x8   : > { %p198_p5 = scmp.lt.s32.totalorder %s8916_s19, 3  ;;  %p111_p6 = scmp.eq.s32.totalorder %s108_s24, 0 }
   0xa   : > { %p199_p7 = pnand %p5963_p4, %p198_p5 }
   0xb   : > { %s8993_s25 = scalar_select %p111_p6, %s8904_s16, %s113_s22  }
   0xc   : > { %202 = sbr.rel (%p199_p7) target bundleno = 745 (0x2e9), region = 32 }
  0x13   : > { %v313_v0 = vld [vmem:[%s10911_s2] sm:$0xff]  ;;  %v314_v1 = vld [vmem:[%s10911_s2 + $0x8] sm:$0xff]  ;;  %p244_p8 = scmp.lt.s32.totalorder %s8908_s17, 1  ;;  %v315_v5 = vld [vmem:[%s10911_s2 + $0x10] sm:$0xff]  ;;  %s10783_s12 = smov (%p8984_p3), 0  }
  0x14   : > { %v6254_v2 = vld [vmem:[%s10911_s2 + $0x200] sm:$0xff]  ;;  %v8097_v3 = vpack.c.bf16 %v314_v1, %v313_v0  ;;  %v6255_v4 = vld [vmem:[%s10911_s2 + $0x208] sm:$0xff]  ;;  %v316_v6 = vld [vmem:[%s10911_s2 + $0x18] sm:$0xff] }
  0x15   : > { %v9014_v7 = vpack.c.bf16 %v6255_v4, %v6254_v2  ;;  %v8101_v8 = vpack.c.bf16 %v316_v6, %v315_v5  ;;  %v6256_v9 = vld [vmem:[%s10911_s2 + $0x210] sm:$0xff]  ;;  %v6257_v10 = vld [vmem:[%s10911_s2 + $0x218] sm:$0xff]  ;;  %v317_v11 = vld [vmem:[%s10911_s2 + $0x20] sm:$0xff]  ;;  %s9026_s26 = scalar_select %p244_p8, %s8908_s17, 1 }
  0x16   : > { %8098 = vmatprep.subr.bf16.mxu1 %v8097_v3  ;;  %v9028_v12 = vpack.c.bf16 %v6257_v10, %v6256_v9  ;;  %v318_v13 = vld [vmem:[%s10911_s2 + $0x28] sm:$0xff]  ;;  %v6258_v14 = vld [vmem:[%s10911_s2 + $0x220] sm:$0xff]  ;;  %v319_v18 = vld [vmem:[%s10911_s2 + $0x30] sm:$0xff] }
  0x17   : > { %10970 = vst [vmem:[#allocation4_spill] sm:$0xff] %v9014_v7  ;;  %v6259_v15 = vld [vmem:[%s10911_s2 + $0x228] sm:$0xff]  ;;  %8226 = vmatprep.subr.bf16.mxu0 %v9014_v7  ;;  %8100 = vmatpush3.bf16.msra.mxu1 %v8097_v3  ;;  %s8786_s7 = smul.u32 1160, %s9026_s26  ;;  %v8105_v16 = vpack.c.bf16 %v318_v13, %v317_v11  ;;  %v320_v19 = vld [vmem:[%s10911_s2 + $0x38] sm:$0xff]  ;;  %v6260_v20 = vld [vmem:[%s10911_s2 + $0x230] sm:$0xff] }
  0x18   : > { %10971 = vst [vmem:[#allocation5_spill] sm:$0xff] %v9028_v12  ;;  %8228 = vmatpush3.bf16.msra.mxu0 %v9014_v7  ;;  %8102 = vmatprep.subr.bf16.mxu1 %v8101_v8  ;;  %v9043_v17 = vpack.c.bf16 %v6259_v15, %v6258_v14  ;;  %v6261_v21 = vld [vmem:[%s10911_s2 + $0x238] sm:$0xff]  ;;  %v8109_v22 = vpack.c.bf16 %v320_v19, %v319_v18  ;;  %v321_v24 = vld [vmem:[%s10911_s2 + $0x40] sm:$0xff]  ;;  %v322_v25 = vld [vmem:[%s10911_s2 + $0x48] sm:$0xff] }
  0x19   : > { %8230 = vmatprep.subr.bf16.mxu0 %v9028_v12  ;;  %s9060_s27 = scalar_lea.vmem %s10910_s1, %s8786_s7  ;;  %v9064_v23 = vpack.c.bf16 %v6261_v21, %v6260_v20  ;;  %v6262_v27 = vld [vmem:[%s10911_s2 + $0x240] sm:$0xff]  ;;  %v6263_v28 = vld [vmem:[%s10911_s2 + $0x248] sm:$0xff]  ;;  %v8113_v30 = vpack.c.bf16 %v322_v25, %v321_v24  ;;  %v323_v32 = vld [vmem:[%s10911_s2 + $0x50] sm:$0xff]  ;;  %s6574_s7 = smul.u32 (%p8984_p3), 1160, %s8908_s17 }
  0x1a   : > { %10972 = vst [vmem:[#allocation6_spill] sm:$0xff] %v9043_v17  ;;  %v5966_v26 = vld [vmem:[%s9060_s27 + $0x167] sm:$0xff]  ;;  %v9085_v31 = vpack.c.bf16 %v6263_v28, %v6262_v27  ;;  %v324_v33 = vld [vmem:[%s10911_s2 + $0x58] sm:$0xff]  ;;  %v6264_v34 = vld [vmem:[%s10911_s2 + $0x250] sm:$0xff] }
  0x1b   : > { %8104 = vmatpush3.bf16.msra.mxu1 %v8101_v8  ;;  %10973 = vst [vmem:[#allocation7_spill] sm:$0xff] %v9064_v23  ;;  %7193 = vmatprep.mubr.f32.mxu1 %v5966_v26  ;;  %v9080_v29 = vld [vmem:[%s9060_s27 + $0x180] sm:$0xff]  ;;  %v6265_v35 = vld [vmem:[%s10911_s2 + $0x258] sm:$0xff]  ;;  %v8117_v36 = vpack.c.bf16 %v324_v33, %v323_v32  ;;  %v326_v39 = vld [vmem:[%s10911_s2 + $0x68] sm:$0xff] }
  0x1c   : > { %8232 = vmatpush3.bf16.msra.mxu0 %v9028_v12  ;;  %8106 = vmatprep.subr.bf16.mxu1 %v8105_v16  ;;  %10974 = vst [vmem:[#allocation8_spill] sm:$0xff] %v9085_v31  ;;  %v9101_v37 = vpack.c.bf16 %v6265_v35, %v6264_v34  ;;  %v325_v38 = vld [vmem:[%s10911_s2 + $0x60] sm:$0xff]  ;;  %v6267_v41 = vld [vmem:[%s10911_s2 + $0x268] sm:$0xff]  ;;  %v327_v44 = vld [vmem:[%s10911_s2 + $0x70] sm:$0xff] }
  0x1d   : > { %8234 = vmatprep.subr.bf16.mxu0 %v9043_v17  ;;  %7609 = vmatprep.mubr.f32.mxu0 %v9080_v29  ;;  %v6266_v40 = vld [vmem:[%s10911_s2 + $0x260] sm:$0xff]  ;;  %v8121_v42 = vpack.c.bf16 %v326_v39, %v325_v38  ;;  %v328_v45 = vld [vmem:[%s10911_s2 + $0x78] sm:$0xff]  ;;  %v6268_v46 = vld [vmem:[%s10911_s2 + $0x270] sm:$0xff] }
  0x1e   : > { %10975 = vst [vmem:[#allocation9_spill] sm:$0xff] %v9101_v37  ;;  %v9117_v43 = vpack.c.bf16 %v6267_v41, %v6266_v40  ;;  %v6269_v47 = vld [vmem:[%s10911_s2 + $0x278] sm:$0xff]  ;;  %v8125_v48 = vpack.c.bf16 %v328_v45, %v327_v44  ;;  %v6062_v50 = vld [vmem:[%s10911_s2 + $0x80] sm:$0xff]  ;;  %v6063_v51 = vld [vmem:[%s10911_s2 + $0x88] sm:$0xff] }
  0x1f   : > { %8108 = vmatpush3.bf16.msra.mxu1 %v8105_v16  ;;  %v9133_v49 = vpack.c.bf16 %v6269_v47, %v6268_v46  ;;  %v6318_v52 = vld [vmem:[%s10911_s2 + $0x280] sm:$0xff]  ;;  %v6319_v53 = vld [vmem:[%s10911_s2 + $0x288] sm:$0xff]  ;;  %v8129_v54 = vpack.c.bf16 %v6063_v51, %v6062_v50  ;;  %v6320_v56 = vld [vmem:[%s10911_s2 + $0x290] sm:$0xff] }
  0x20   : > { %8236 = vmatpush3.bf16.msra.mxu0 %v9043_v17  ;;  %8110 = vmatprep.subr.bf16.mxu1 %v8109_v22  ;;  %10976 = vst [vmem:[#allocation10_spill] sm:$0xff] %v9117_v43  ;;  %v8257_v55 = vpack.c.bf16 %v6319_v53, %v6318_v52  ;;  %v6321_v57 = vld [vmem:[%s10911_s2 + $0x298] sm:$0xff]  ;;  %v5967_v58 = vld [vmem:[%s9060_s27 + $0x16f] sm:$0xff]  ;;  %v6322_v2 = vld [vmem:[%s10911_s2 + $0x2a0] sm:$0xff] }
  0x21   : > { %8238 = vmatprep.subr.bf16.mxu0 %v9064_v23  ;;  %10977 = vst [vmem:[#allocation11_spill] sm:$0xff] %v9133_v49  ;;  %v6064_v59 = vld [vmem:[%s10911_s2 + $0x90] sm:$0xff]  ;;  %v6065_v60 = vld [vmem:[%s10911_s2 + $0x98] sm:$0xff]  ;;  %v9164_v61 = vld [vmem:[%s9060_s27 + $0x188] sm:$0xff]  ;;  %v8261_v63 = vpack.c.bf16 %v6321_v57, %v6320_v56 }
  0x22   : > { %v5968_v62 = vld [vmem:[%s9060_s27 + $0x177] sm:$0xff]  ;;  %v8133_v1 = vpack.c.bf16 %v6065_v60, %v6064_v59  ;;  %v6323_v3 = vld [vmem:[%s10911_s2 + $0x2a8] sm:$0xff]  ;;  %v5969_v4 = vld [vmem:[%s9060_s27 + $0x17f] sm:$0xff] }
  0x23   : > { %8112 = vmatpush3.bf16.msra.mxu1 %v8109_v22  ;;  %v9168_v0 = vld [vmem:[%s9060_s27 + $0x190] sm:$0xff]  ;;  %v6066_v5 = vld [vmem:[%s10911_s2 + $0xa0] sm:$0xff]  ;;  %v6067_v6 = vld [vmem:[%s10911_s2 + $0xa8] sm:$0xff]  ;;  %v8265_v11 = vpack.c.bf16 %v6323_v3, %v6322_v2 }
  0x24   : > { %8240 = vmatpush3.bf16.msra.mxu0 %v9064_v23  ;;  %8114 = vmatprep.subr.bf16.mxu1 %v8113_v30  ;;  %v9185_v8 = vld [vmem:[%s9060_s27 + $0x198] sm:$0xff]  ;;  %v5970_v9 = vld [vmem:[%s9060_s27 + $0x187] sm:$0xff]  ;;  %v6324_v13 = vld [vmem:[%s10911_s2 + $0x2b0] sm:$0xff]  ;;  %v8137_v15 = vpack.c.bf16 %v6067_v6, %v6066_v5 }
  0x25   : > { %8242 = vmatprep.subr.bf16.mxu0 %v9085_v31  ;;  %v9190_v10 = vld [vmem:[%s9060_s27 + $0x1a0] sm:$0xff]  ;;  %v6325_v14 = vld [vmem:[%s10911_s2 + $0x2b8] sm:$0xff]  ;;  %v5971_v16 = vld [vmem:[%s9060_s27 + $0x18f] sm:$0xff] }
  0x26   : > { %v6068_v18 = vld [vmem:[%s10911_s2 + $0xb0] sm:$0xff]  ;;  %v6069_v19 = vld [vmem:[%s10911_s2 + $0xb8] sm:$0xff]  ;;  %v9208_v20 = vld [vmem:[%s9060_s27 + $0x1a8] sm:$0xff]  ;;  %v8269_v24 = vpack.c.bf16 %v6325_v14, %v6324_v13 }
  0x27   : > { %8116 = vmatpush3.bf16.msra.mxu1 %v8113_v30  ;;  %v9211_v21 = vld [vmem:[%s9060_s27 + $0x197] sm:$0xff]  ;;  %v6326_v25 = vld [vmem:[%s10911_s2 + $0x2c0] sm:$0xff]  ;;  %v6327_v26 = vld [vmem:[%s10911_s2 + $0x2c8] sm:$0xff]  ;;  %v8141_v27 = vpack.c.bf16 %v6069_v19, %v6068_v18 }
  0x28   : > { %8244 = vmatpush3.bf16.msra.mxu0 %v9085_v31  ;;  %8118 = vmatprep.subr.bf16.mxu1 %v8117_v36  ;;  %v9214_v22 = vld [vmem:[%s9060_s27 + $0x1b0] sm:$0xff]  ;;  %v9225_v28 = vld [vmem:[%s9060_s27 + $0x19f] sm:$0xff]  ;;  %v6071_v32 = vld [vmem:[%s10911_s2 + $0xc8] sm:$0xff] }
  0x29   : > { %8246 = vmatprep.subr.bf16.mxu0 %v9101_v37  ;;  %v6070_v30 = vld [vmem:[%s10911_s2 + $0xc0] sm:$0xff]  ;;  %v9235_v33 = vld [vmem:[%s9060_s27 + $0x1b8] sm:$0xff]  ;;  %v6328_v38 = vld [vmem:[%s10911_s2 + $0x2d0] sm:$0xff] }
  0x2a   : > { %v9238_v34 = vld [vmem:[%s9060_s27 + $0x1a7] sm:$0xff]  ;;  %v6329_v39 = vld [vmem:[%s10911_s2 + $0x2d8] sm:$0xff]  ;;  %v8145_v40 = vpack.c.bf16 %v6071_v32, %v6070_v30  ;;  %v9253_v41 = vld [vmem:[%s9060_s27 + $0x1af] sm:$0xff] }
  0x2b   : > { %8120 = vmatpush3.bf16.msra.mxu1 %v8117_v36  ;;  %v9241_v35 = vld [vmem:[%s9060_s27 + $0x1c0] sm:$0xff]  ;;  %v8273_v36 = vpack.c.bf16 %v6327_v26, %v6326_v25  ;;  %v6073_v44 = vld [vmem:[%s10911_s2 + $0xd8] sm:$0xff]  ;;  %v9263_v45 = vld [vmem:[%s9060_s27 + $0x1c8] sm:$0xff] }
  0x2c   : > { %8248 = vmatpush3.bf16.msra.mxu0 %v9101_v37  ;;  %8122 = vmatprep.subr.bf16.mxu1 %v8121_v42  ;;  %v9266_v46 = vld [vmem:[%s9060_s27 + $0x1b7] sm:$0xff]  ;;  %v6330_v50 = vld [vmem:[%s10911_s2 + $0x2e0] sm:$0xff]  ;;  %v6331_v51 = vld [vmem:[%s10911_s2 + $0x2e8] sm:$0xff] }
  0x2d   : > { %8250 = vmatprep.subr.bf16.mxu0 %v9117_v43  ;;  %v9269_v47 = vld [vmem:[%s9060_s27 + $0x1d0] sm:$0xff]  ;;  %v9281_v53 = vld [vmem:[%s9060_s27 + $0x1bf] sm:$0xff]  ;;  %v9294_v57 = vld [vmem:[%s9060_s27 + $0x1c7] sm:$0xff]  ;;  %v8281_v59 = vpack.c.bf16 %v6331_v51, %v6330_v50 }
  0x2e   : > { %v9291_v56 = vld [vmem:[%s9060_s27 + $0x1d8] sm:$0xff]  ;;  %v6332_v60 = vld [vmem:[%s10911_s2 + $0x2f0] sm:$0xff]  ;;  %v6383_v13 = vld [vmem:[%s10911_s2 + $0x308] sm:$0xff] }
  0x2f   : > { %8124 = vmatpush3.bf16.msra.mxu1 %v8121_v42  ;;  %v6072_v42 = vld [vmem:[%s10911_s2 + $0xd0] sm:$0xff]  ;;  %v6077_v3 = vld [vmem:[%s10911_s2 + $0xf8] sm:$0xff]  ;;  %v6127_v18 = vld [vmem:[%s10911_s2 + $0x108] sm:$0xff] }
  0x30   : > { %8252 = vmatpush3.bf16.msra.mxu0 %v9117_v43  ;;  %8126 = vmatprep.subr.bf16.mxu1 %v8125_v48  ;;  %v8149_v52 = vpack.c.bf16 %v6073_v44, %v6072_v42  ;;  %v6076_v2 = vld [vmem:[%s10911_s2 + $0xf0] sm:$0xff]  ;;  %v9347_v19 = vld [vmem:[%s9060_s27 + $0x1f8] sm:$0xff]  ;;  %v9353_v25 = vld [vmem:[%s9060_s27 + $0x200] sm:$0xff] }
  0x31   : > { %8254 = vmatprep.subr.bf16.mxu0 %v9133_v49  ;;  %v9322_v5 = vld [vmem:[%s9060_s27 + $0x1d7] sm:$0xff]  ;;  %v8157_v14 = vpack.c.bf16 %v6077_v3, %v6076_v2  ;;  %v9361_v30 = vld [vmem:[%s9060_s27 + $0x1ef] sm:$0xff]  ;;  %v9385_v42 = vld [vmem:[%s9060_s27 + $0x207] sm:$0xff] }
  0x32   : > { %v9325_v6 = vld [vmem:[%s9060_s27 + $0x1f0] sm:$0xff]  ;;  %v9365_v32 = vld [vmem:[%s9060_s27 + $0x208] sm:$0xff]  ;;  %v9388_v44 = vld [vmem:[%s9060_s27 + $0x220] sm:$0xff] }
  0x33   : > { %8128 = vmatpush3.bf16.msra.mxu1 %v8125_v48  ;;  %v8277_v48 = vpack.c.bf16 %v6329_v39, %v6328_v38  ;;  %v9371_v38 = vld [vmem:[%s9060_s27 + $0x210] sm:$0xff]  ;;  %v9378_v39 = vld [vmem:[%s9060_s27 + $0x1ff] sm:$0xff]  ;;  %v9398_v50 = vld [vmem:[%s9060_s27 + $0x228] sm:$0xff] }
  0x34   : > { %8256 = vmatpush3.bf16.msra.mxu0 %v9133_v49  ;;  %8130 = vmatprep.subr.bf16.mxu1 %v8129_v54  ;;  %v9401_v51 = vld [vmem:[%s9060_s27 + $0x217] sm:$0xff]  ;;  %v9432_v2 = vld [vmem:[%s9060_s27 + $0x22f] sm:$0xff]  ;;  %v9464_v49 = vld [vmem:[%s9060_s27 + $0x1a1] sm:$0xff] }
  0x35   : > { %8258 = vmatprep.subr.bf16.mxu0 %v8257_v55  ;;  %v9436_v3 = vld [vmem:[%s9060_s27 + $0x189] sm:$0xff]  ;;  %10982 = vst [vmem:[#allocation16_spill] sm:$0xff] %v9464_v49  ;;  %v9486_v23 = vld [vmem:[%s9060_s27 + $0x1b1] sm:$0xff]  ;;  %v6390_v12 = vld [vmem:[%s10911_s2 + $0x340] sm:$0xff] }
  0x36   : > { %7194 = vmatmul.mubr.f32.vlgmr.msra.gmra.mrb[0].mxu1 %v5967_v58  ;;  %v9297_v58 = vld [vmem:[%s9060_s27 + $0x1e0] sm:$0xff]  ;;  %10979 = vst [vmem:[#allocation13_spill] sm:$0xff] %v9436_v3  ;;  %v6388_v37 = vld [vmem:[%s10911_s2 + $0x330] sm:$0xff]  ;;  %10984 = vst [vmem:[#allocation18_spill] sm:$0xff] %v9486_v23 }
  0x37   : > { %7610 = vmatmul.mubr.f32.vlgmr.msra.gmra.mrb[0].mxu0 %v9164_v61  ;;  %8132 = vmatpush3.bf16.msra.mxu1 %v8129_v54  ;;  %v6074_v54 = vld [vmem:[%s10911_s2 + $0xe0] sm:$0xff]  ;;  %v9476_v31 = vld [vmem:[%s9060_s27 + $0x24f] sm:$0xff] }
  0x38   : > { %8260 = vmatpush3.bf16.msra.mxu0 %v8257_v55  ;;  %7196 = vmatprep.mubr.f32.mxu1 %v5968_v62  ;;  %v6075_v55 = vld [vmem:[%s10911_s2 + $0xe8] sm:$0xff]  ;;  %v6333_v62 = vld [vmem:[%s10911_s2 + $0x2f8] sm:$0xff] }
  0x39   : > { %7612 = vmatprep.mubr.f32.mxu0 %v9168_v0  ;;  %8262 = vmatprep.subr.bf16.mxu0 %v8261_v63  ;;  %v6391_v7 = vld [vmem:[%s10911_s2 + $0x348] sm:$0xff] }
  0x3a   : > { %7197 = vmatmul.mubr.f32.gmra.mrb[2].mxu1 %v5969_v4  ;;  %8134 = vmatprep.subr.bf16.mxu1 %v8133_v1  ;;  %v9319_v4 = vld [vmem:[%s9060_s27 + $0x1e8] sm:$0xff] }
  0x3b   : > { %7613 = vmatmul.mubr.f32.gmra.mrb[2].mxu0 %v9185_v8  ;;  %7199 = vmatprep.mubr.f32.mxu1 %v5970_v9  ;;  %v8285_v9 = vpack.c.bf16 %v6333_v62, %v6332_v60  ;;  %v9420_v60 = vld [vmem:[%s9060_s27 + $0x181] sm:$0xff]  ;;  %v6384_v62 = vld [vmem:[%s10911_s2 + $0x310] sm:$0xff] }
  0x3c   : > { %7615 = vmatprep.mubr.f32.mxu0 %v9190_v10  ;;  %8264 = vmatpush3.bf16.msra.mxu0 %v8261_v63  ;;  %v8153_v63 = vpack.c.bf16 %v6075_v55, %v6074_v54  ;;  %v9410_v54 = vld [vmem:[%s9060_s27 + $0x21f] sm:$0xff]  ;;  %10978 = vst [vmem:[#allocation12_spill] sm:$0xff] %v9420_v60 }
  0x3d   : > { %8266 = vmatprep.subr.bf16.mxu0 %v8265_v11  ;;  %8136 = vmatpush3.bf16.msra.mxu1 %v8133_v1  ;;  %v9309_v1 = vld [vmem:[%s9060_s27 + $0x1cf] sm:$0xff]  ;;  %v9414_v55 = vld [vmem:[%s9060_s27 + $0x238] sm:$0xff] }
  0x3e   : > { %7200 = vmatmul.mubr.f32.gmra.mrb[4].mxu1 %v5971_v16  ;;  %8138 = vmatprep.subr.bf16.mxu1 %v8137_v15  ;;  %v6126_v16 = vld [vmem:[%s10911_s2 + $0x100] sm:$0xff] }
  0x3f   : > { %7616 = vmatmul.mubr.f32.gmra.mrb[4].mxu0 %v9208_v20  ;;  %7202 = vmatprep.mubr.f32.mxu1 %v9211_v21 }
  0x40   : > { %7618 = vmatprep.mubr.f32.mxu0 %v9214_v22  ;;  %8268 = vmatpush3.bf16.msra.mxu0 %v8265_v11  ;;  %v6382_v11 = vld [vmem:[%s10911_s2 + $0x300] sm:$0xff] }
  0x41   : > { %8270 = vmatprep.subr.bf16.mxu0 %v8269_v24  ;;  %8140 = vmatpush3.bf16.msra.mxu1 %v8137_v15  ;;  %v9337_v15 = vld [vmem:[%s9060_s27 + $0x1df] sm:$0xff]  ;;  %v8289_v26 = vpack.c.bf16 %v6383_v13, %v6382_v11  ;;  %v9442_v11 = vld [vmem:[%s9060_s27 + $0x191] sm:$0xff] }
  0x42   : > { %7203 = vmatmul.mubr.f32.gmra.mrb[6].mxu1 %v9225_v28  ;;  %8142 = vmatprep.subr.bf16.mxu1 %v8141_v27  ;;  %10980 = vst [vmem:[#allocation14_spill] sm:$0xff] %v9442_v11 }
  0x43   : > { %7619 = vmatmul.mubr.f32.gmra.mrb[6].mxu0 %v9235_v33  ;;  %7205 = vmatprep.mubr.f32.mxu1 %v9238_v34 }
  0x44   : > { %7621 = vmatprep.mubr.f32.mxu0 %v9241_v35  ;;  %8272 = vmatpush3.bf16.msra.mxu0 %v8269_v24  ;;  %v9350_v24 = vld [vmem:[%s9060_s27 + $0x1e7] sm:$0xff] }
  0x45   : > { %8274 = vmatprep.subr.bf16.mxu0 %v8273_v36  ;;  %8144 = vmatpush3.bf16.msra.mxu1 %v8141_v27  ;;  %v9356_v27 = vpack.c.bf16 %v6127_v18, %v6126_v16  ;;  %v6387_v16 = vld [vmem:[%s10911_s2 + $0x328] sm:$0xff]  ;;  %v9454_v18 = vld [vmem:[%s9060_s27 + $0x23f] sm:$0xff] }
  0x46   : > { %7206 = vmatmul.mubr.f32.gmra.mrb[8].mxu1 %v9253_v41  ;;  %8146 = vmatprep.subr.bf16.mxu1 %v8145_v40 }
  0x47   : > { %7622 = vmatmul.mubr.f32.gmra.mrb[8].mxu0 %v9263_v45  ;;  %7208 = vmatprep.mubr.f32.mxu1 %v9266_v46 }
  0x48   : > { %7624 = vmatprep.mubr.f32.mxu0 %v9269_v47  ;;  %8276 = vmatpush3.bf16.msra.mxu0 %v8273_v36  ;;  %v9368_v36 = vld [vmem:[%s9060_s27 + $0x1f7] sm:$0xff] }
  0x49   : > { %8278 = vmatprep.subr.bf16.mxu0 %v8277_v48  ;;  %8148 = vmatpush3.bf16.msra.mxu1 %v8145_v40  ;;  %v9382_v40 = vld [vmem:[%s9060_s27 + $0x218] sm:$0xff] }
  0x4a   : > { %7209 = vmatmul.mubr.f32.gmra.mrb[10].mxu1 %v9281_v53  ;;  %8150 = vmatprep.subr.bf16.mxu1 %v8149_v52 }
  0x4b   : > { %7625 = vmatmul.mubr.f32.gmra.mrb[10].mxu0 %v9291_v56  ;;  %7211 = vmatprep.mubr.f32.mxu1 %v9294_v57 }
  0x4c   : > { %7627 = vmatprep.mubr.f32.mxu0 %v9297_v58  ;;  %8280 = vmatpush3.bf16.msra.mxu0 %v8277_v48  ;;  %v9394_v48 = vld [vmem:[%s9060_s27 + $0x20f] sm:$0xff] }
  0x4d   : > { %8282 = vmatprep.subr.bf16.mxu0 %v8281_v59  ;;  %8152 = vmatpush3.bf16.msra.mxu1 %v8149_v52  ;;  %v9404_v52 = vld [vmem:[%s9060_s27 + $0x230] sm:$0xff] }
  0x4e   : > { %7212 = vmatmul.mubr.f32.gmra.mrb[12].mxu1 %v9309_v1  ;;  %8154 = vmatprep.subr.bf16.mxu1 %v8153_v63 }
  0x4f   : > { %7628 = vmatmul.mubr.f32.gmra.mrb[12].mxu0 %v9319_v4  ;;  %7214 = vmatprep.mubr.f32.mxu1 %v9322_v5 }
  0x50   : > { %7630 = vmatprep.mubr.f32.mxu0 %v9325_v6  ;;  %8284 = vmatpush3.bf16.msra.mxu0 %v8281_v59  ;;  %v9417_v59 = vld [vmem:[%s9060_s27 + $0x227] sm:$0xff] }
  0x51   : > { %8286 = vmatprep.subr.bf16.mxu0 %v8285_v9  ;;  %8156 = vmatpush3.bf16.msra.mxu1 %v8153_v63  ;;  %v6385_v63 = vld [vmem:[%s10911_s2 + $0x318] sm:$0xff] }
  0x52   : > { %7215 = vmatmul.mubr.f32.gmra.mrb[14].mxu1 %v9337_v15  ;;  %8158 = vmatprep.subr.bf16.mxu1 %v8157_v14  ;;  %v8293_v13 = vpack.c.bf16 %v6385_v63, %v6384_v62  ;;  %v9458_v62 = vld [vmem:[%s9060_s27 + $0x199] sm:$0xff]  ;;  %v9461_v63 = vld [vmem:[%s9060_s27 + $0x247] sm:$0xff] }
  0x53   : > { %7631 = vmatmul.mubr.f32.gmra.mrb[14].mxu0 %v9347_v19  ;;  %7217 = vmatprep.mubr.f32.mxu1 %v9350_v24  ;;  %10981 = vst [vmem:[#allocation15_spill] sm:$0xff] %v9458_v62 }
  0x54   : > { %7633 = vmatprep.mubr.f32.mxu0 %v9353_v25  ;;  %8288 = vmatpush3.bf16.msra.mxu0 %v8285_v9  ;;  %v9439_v9 = vld [vmem:[%s9060_s27 + $0x237] sm:$0xff] }
  0x55   : > { %8290 = vmatprep.subr.bf16.mxu0 %v8289_v26  ;;  %8160 = vmatpush3.bf16.msra.mxu1 %v8157_v14  ;;  %v6386_v14 = vld [vmem:[%s10911_s2 + $0x320] sm:$0xff] }
  0x56   : > { %7218 = vmatmul.mubr.f32.gmra.mrb[16].mxu1 %v9361_v30  ;;  %8162 = vmatprep.subr.bf16.mxu1 %v9356_v27  ;;  %v8297_v43 = vpack.c.bf16 %v6387_v16, %v6386_v14  ;;  %v9480_v14 = vld [vmem:[%s9060_s27 + $0x1a9] sm:$0xff]  ;;  %v9483_v16 = vld [vmem:[%s9060_s27 + $0x257] sm:$0xff] }
  0x57   : > { %7634 = vmatmul.mubr.f32.gmra.mrb[16].mxu0 %v9365_v32  ;;  %7220 = vmatprep.mubr.f32.mxu1 %v9368_v36  ;;  %10983 = vst [vmem:[#allocation17_spill] sm:$0xff] %v9480_v14 }
  0x58   : > { %7636 = vmatprep.mubr.f32.mxu0 %v9371_v38 }
  0x5a   : > { %7221 = vmatmul.mubr.f32.gmra.mrb[18].mxu1 %v9378_v39 }
  0x5b   : > { %7637 = vmatmul.mubr.f32.gmra.mrb[18].mxu0 %v9382_v40  ;;  %7223 = vmatprep.mubr.f32.mxu1 %v9385_v42 }
  0x5c   : > { %7639 = vmatprep.mubr.f32.mxu0 %v9388_v44 }
  0x5e   : > { %7224 = vmatmul.mubr.f32.gmra.mrb[20].mxu1 %v9394_v48 }
  0x5f   : > { %7640 = vmatmul.mubr.f32.gmra.mrb[20].mxu0 %v9398_v50  ;;  %7226 = vmatprep.mubr.f32.mxu1 %v9401_v51 }
  0x60   : > { %7642 = vmatprep.mubr.f32.mxu0 %v9404_v52 }
  0x62   : > { %7227 = vmatmul.mubr.f32.gmra.mrb[22].mxu1 %v9410_v54 }
  0x63   : > { %7643 = vmatmul.mubr.f32.gmra.mrb[22].mxu0 %v9414_v55  ;;  %7229 = vmatprep.mubr.f32.mxu1 %v9417_v59 }
  0x64   : > { %7713 = vmatprep.mubr.f32.mxu0 %v9420_v60 }
  0x66   : > { %7230 = vmatmul.mubr.f32.gmra.mrb[24].mxu1 %v9432_v2 }
  0x67   : > { %7714 = vmatmul.mubr.f32.vlgmr.msra.gmra.mrb[0].mxu0 %v9436_v3  ;;  %7232 = vmatprep.mubr.f32.mxu1 %v9439_v9 }
  0x68   : > { %8292 = vmatpush3.bf16.msra.mxu0 %v8289_v26  ;;  %7716 = vmatprep.mubr.f32.mxu0 %v9442_v11  ;;  %v6389_v26 = vld [vmem:[%s10911_s2 + $0x338] sm:$0xff] }
  0x69   : > { %8294 = vmatprep.subr.bf16.mxu0 %v8293_v13  ;;  %v8301_v17 = vpack.c.bf16 %v6389_v26, %v6388_v37  ;;  %v9502_v37 = vld [vmem:[%s9060_s27 + $0x1b9] sm:$0xff]  ;;  %v9505_v26 = vld [vmem:[%s9060_s27 + $0x267] sm:$0xff]  ;;  %v9530_v11 = vld [vmem:[%s9060_s27 + $0x1d1] sm:$0xff] }
  0x6a   : > { %7233 = vmatmul.mubr.f32.gmra.mrb[26].mxu1 %v9454_v18  ;;  %10985 = vst [vmem:[#allocation19_spill] sm:$0xff] %v9502_v37  ;;  %10990 = vst [vmem:[#allocation24_spill] sm:$0xff] %v9530_v11 }
  0x6b   : > { %7717 = vmatmul.mubr.f32.gmra.mrb[2].mxu0 %v9458_v62  ;;  %7235 = vmatprep.mubr.f32.mxu1 %v9461_v63  ;;  %v8305_v62 = vpack.c.bf16 %v6391_v7, %v6390_v12  ;;  %v9524_v7 = vld [vmem:[%s9060_s27 + $0x1c9] sm:$0xff]  ;;  %v9527_v12 = vld [vmem:[%s9060_s27 + $0x277] sm:$0xff] }
  0x6c   : > { %7719 = vmatprep.mubr.f32.mxu0 %v9464_v49  ;;  %8296 = vmatpush3.bf16.msra.mxu0 %v8293_v13  ;;  %v9498_v13 = vld [vmem:[%s9060_s27 + $0x25f] sm:$0xff]  ;;  %10988 = vst [vmem:[#allocation22_spill] sm:$0xff] %v9524_v7  ;;  %10989 = vst [vmem:[#allocation23_spill] sm:$0xff] %v9527_v12 }
  0x6d   : > { %8298 = vmatprep.subr.bf16.mxu0 %v8297_v43  ;;  %v9508_v49 = vld [vmem:[%s9060_s27 + $0x1c1] sm:$0xff] }
  0x6e   : > { %7236 = vmatmul.mubr.f32.gmra.mrb[28].mxu1 %v9476_v31  ;;  %10986 = vst [vmem:[#allocation20_spill] sm:$0xff] %v9508_v49 }
  0x6f   : > { %7720 = vmatmul.mubr.f32.gmra.mrb[4].mxu0 %v9480_v14  ;;  %7238 = vmatprep.mubr.f32.mxu1 %v9483_v16  ;;  %v6392_v14 = vld [vmem:[%s10911_s2 + $0x350] sm:$0xff] }
  0x70   : > { %7722 = vmatprep.mubr.f32.mxu0 %v9486_v23  ;;  %8300 = vmatpush3.bf16.msra.mxu0 %v8297_v43  ;;  %v6393_v23 = vld [vmem:[%s10911_s2 + $0x358] sm:$0xff]  ;;  %v9520_v43 = vld [vmem:[%s9060_s27 + $0x26f] sm:$0xff] }
  0x71   : > { %8302 = vmatprep.subr.bf16.mxu0 %v8301_v17  ;;  %10987 = vst [vmem:[#allocation21_spill] sm:$0xff] %v9520_v43  ;;  %v8309_v3 = vpack.c.bf16 %v6393_v23, %v6392_v14  ;;  %v9546_v23 = vld [vmem:[%s9060_s27 + $0x1d9] sm:$0xff]  ;;  %v9549_v14 = vld [vmem:[%s9060_s27 + $0x287] sm:$0xff] }
  0x72   : > { %7239 = vmatmul.mubr.f32.gmra.mrb[30].mxu1 %v9498_v13  ;;  %10992 = vst [vmem:[#allocation26_spill] sm:$0xff] %v9546_v23  ;;  %10993 = vst [vmem:[#allocation27_spill] sm:$0xff] %v9549_v14 }
  0x73   : > { %7723 = vmatmul.mubr.f32.gmra.mrb[6].mxu0 %v9502_v37  ;;  %7241 = vmatprep.mubr.f32.mxu1 %v9505_v26  ;;  %v6394_v37 = vld [vmem:[%s10911_s2 + $0x360] sm:$0xff] }
  0x74   : > { %7725 = vmatprep.mubr.f32.mxu0 %v9508_v49  ;;  %8304 = vmatpush3.bf16.msra.mxu0 %v8301_v17  ;;  %v6395_v49 = vld [vmem:[%s10911_s2 + $0x368] sm:$0xff]  ;;  %v9542_v17 = vld [vmem:[%s9060_s27 + $0x27f] sm:$0xff] }
  0x75   : > { %8306 = vmatprep.subr.bf16.mxu0 %v8305_v62  ;;  %10991 = vst [vmem:[#allocation25_spill] sm:$0xff] %v9542_v17  ;;  %v8313_v60 = vpack.c.bf16 %v6395_v49, %v6394_v37  ;;  %v9568_v49 = vld [vmem:[%s9060_s27 + $0x1e9] sm:$0xff]  ;;  %v9571_v37 = vld [vmem:[%s9060_s27 + $0x297] sm:$0xff] }
  0x76   : > { %7242 = vmatmul.mubr.f32.gmra.mrb[32].mxu1 %v9520_v43  ;;  %v9552_v43 = vld [vmem:[%s9060_s27 + $0x1e1] sm:$0xff]  ;;  %10996 = vst [vmem:[#allocation30_spill] sm:$0xff] %v9568_v49  ;;  %10997 = vst [vmem:[#allocation31_spill] sm:$0xff] %v9571_v37 }
  0x77   : > { %7726 = vmatmul.mubr.f32.gmra.mrb[8].mxu0 %v9524_v7  ;;  %7244 = vmatprep.mubr.f32.mxu1 %v9527_v12  ;;  %10994 = vst [vmem:[#allocation28_spill] sm:$0xff] %v9552_v43  ;;  %v6396_v7 = vld [vmem:[%s10911_s2 + $0x370] sm:$0xff] }
  0x78   : > { %7728 = vmatprep.mubr.f32.mxu0 %v9530_v11  ;;  %8308 = vmatpush3.bf16.msra.mxu0 %v8305_v62  ;;  %v6397_v11 = vld [vmem:[%s10911_s2 + $0x378] sm:$0xff]  ;;  %v9564_v62 = vld [vmem:[%s9060_s27 + $0x28f] sm:$0xff] }
  0x79   : > { %8310 = vmatprep.subr.bf16.mxu0 %v8309_v3  ;;  %10995 = vst [vmem:[#allocation29_spill] sm:$0xff] %v9564_v62  ;;  %v8317_v12 = vpack.c.bf16 %v6397_v11, %v6396_v7  ;;  %v9590_v11 = vld [vmem:[%s9060_s27 + $0x1f9] sm:$0xff]  ;;  %v9593_v7 = vld [vmem:[%s9060_s27 + $0x2a7] sm:$0xff] }
  0x7a   : > { %7245 = vmatmul.mubr.f32.gmra.mrb[34].mxu1 %v9542_v17  ;;  %v9574_v17 = vld [vmem:[%s9060_s27 + $0x1f1] sm:$0xff]  ;;  %11000 = vst [vmem:[#allocation34_spill] sm:$0xff] %v9590_v11  ;;  %11001 = vst [vmem:[#allocation35_spill] sm:$0xff] %v9593_v7 }
  0x7b   : > { %7729 = vmatmul.mubr.f32.gmra.mrb[10].mxu0 %v9546_v23  ;;  %7247 = vmatprep.mubr.f32.mxu1 %v9549_v14  ;;  %10998 = vst [vmem:[#allocation32_spill] sm:$0xff] %v9574_v17  ;;  %v6446_v23 = vld [vmem:[%s10911_s2 + $0x380] sm:$0xff] }
  0x7c   : > { %7731 = vmatprep.mubr.f32.mxu0 %v9552_v43  ;;  %8312 = vmatpush3.bf16.msra.mxu0 %v8309_v3  ;;  %v6447_v43 = vld [vmem:[%s10911_s2 + $0x388] sm:$0xff]  ;;  %v9586_v3 = vld [vmem:[%s9060_s27 + $0x29f] sm:$0xff] }
  0x7d   : > { %8314 = vmatprep.subr.bf16.mxu0 %v8313_v60  ;;  %10999 = vst [vmem:[#allocation33_spill] sm:$0xff] %v9586_v3  ;;  %v9598_v14 = vpack.c.bf16 %v6447_v43, %v6446_v23  ;;  %v9614_v43 = vld [vmem:[%s9060_s27 + $0x211] sm:$0xff]  ;;  %v9621_v23 = vld [vmem:[%s9060_s27 + $0x2bf] sm:$0xff] }
  0x7e   : > { %7248 = vmatmul.mubr.f32.gmra.mrb[36].mxu1 %v9564_v62  ;;  %v9596_v62 = vld [vmem:[%s9060_s27 + $0x201] sm:$0xff]  ;;  %11006 = vst [vmem:[#allocation40_spill] sm:$0xff] %v9614_v43  ;;  %11007 = vst [vmem:[#allocation41_spill] sm:$0xff] %v9621_v23 }
  0x7f   : > { %7732 = vmatmul.mubr.f32.gmra.mrb[12].mxu0 %v9568_v49  ;;  %7250 = vmatprep.mubr.f32.mxu1 %v9571_v37  ;;  %11002 = vst [vmem:[#allocation36_spill] sm:$0xff] %v9596_v62  ;;  %v9611_v49 = vld [vmem:[%s9060_s27 + $0x2b7] sm:$0xff]  ;;  %v6130_v37 = vld [vmem:[%s10911_s2 + $0x120] sm:$0xff] }
  0x80   : > { %7734 = vmatprep.mubr.f32.mxu0 %v9574_v17  ;;  %8316 = vmatpush3.bf16.msra.mxu0 %v8313_v60  ;;  %v9604_v17 = vld [vmem:[%s9060_s27 + $0x2af] sm:$0xff]  ;;  %11005 = vst [vmem:[#allocation39_spill] sm:$0xff] %v9611_v49 }
  0x81   : > { %8318 = vmatprep.subr.bf16.mxu0 %v8317_v12  ;;  %11003 = vst [vmem:[#allocation37_spill] sm:$0xff] %v9604_v17  ;;  %v9608_v60 = vld [vmem:[%s9060_s27 + $0x209] sm:$0xff] }
  0x82   : > { %7251 = vmatmul.mubr.f32.gmra.mrb[38].mxu1 %v9586_v3  ;;  %11004 = vst [vmem:[#allocation38_spill] sm:$0xff] %v9608_v60 }
  0x83   : > { %7735 = vmatmul.mubr.f32.gmra.mrb[14].mxu0 %v9590_v11  ;;  %7253 = vmatprep.mubr.f32.mxu1 %v9593_v7  ;;  %v9631_v11 = vld [vmem:[%s9060_s27 + $0x221] sm:$0xff]  ;;  %v6016_v7 = vld [vmem:[%s9060_s27 + $0x178] sm:$0xff] }
  0x84   : > { %7737 = vmatprep.mubr.f32.mxu0 %v9596_v62  ;;  %8320 = vmatpush3.bf16.msra.mxu0 %v8317_v12  ;;  %v9625_v62 = vld [vmem:[%s9060_s27 + $0x219] sm:$0xff]  ;;  %v9628_v12 = vld [vmem:[%s9060_s27 + $0x2c7] sm:$0xff]  ;;  %11010 = vst [vmem:[#allocation44_spill] sm:$0xff] %v9631_v11 }
  0x85   : > { %8322 = vmatprep.subr.bf16.mxu0 %v9598_v14  ;;  %11008 = vst [vmem:[#allocation42_spill] sm:$0xff] %v9625_v62  ;;  %11009 = vst [vmem:[#allocation43_spill] sm:$0xff] %v9628_v12 }
  0x86   : > { %7254 = vmatmul.mubr.f32.gmra.mrb[40].mxu1 %v9604_v17  ;;  %v9647_v17 = vld [vmem:[%s9060_s27 + $0x231] sm:$0xff] }
  0x87   : > { %7738 = vmatmul.mubr.f32.gmra.mrb[16].mxu0 %v9608_v60  ;;  %7256 = vmatprep.mubr.f32.mxu1 %v9611_v49  ;;  %v9637_v60 = vld [vmem:[%s9060_s27 + $0x2cf] sm:$0xff]  ;;  %v9644_v49 = vld [vmem:[%s9060_s27 + $0x2d7] sm:$0xff]  ;;  %11014 = vst [vmem:[#allocation48_spill] sm:$0xff] %v9647_v17 }
  0x88   : > { %7740 = vmatprep.mubr.f32.mxu0 %v9614_v43  ;;  %11011 = vst [vmem:[#allocation45_spill] sm:$0xff] %v9637_v60  ;;  %v9641_v43 = vld [vmem:[%s9060_s27 + $0x229] sm:$0xff]  ;;  %11013 = vst [vmem:[#allocation47_spill] sm:$0xff] %v9644_v49 }
  0x89   : > { %11012 = vst [vmem:[#allocation46_spill] sm:$0xff] %v9641_v43 }
  0x8a   : > { %7257 = vmatmul.mubr.f32.gmra.mrb[42].mxu1 %v9621_v23  ;;  %v9661_v23 = vld [vmem:[%s9060_s27 + $0x241] sm:$0xff] }
  0x8b   : > { %7741 = vmatmul.mubr.f32.gmra.mrb[18].mxu0 %v9625_v62  ;;  %7259 = vmatprep.mubr.f32.mxu1 %v9628_v12  ;;  %v9653_v62 = vld [vmem:[%s9060_s27 + $0x2df] sm:$0xff]  ;;  %v6014_v12 = vld [vmem:[%s9060_s27 + $0x168] sm:$0xff] }
  0x8c   : > { %7743 = vmatprep.mubr.f32.mxu0 %v9631_v11  ;;  %11015 = vst [vmem:[#allocation49_spill] sm:$0xff] %v9653_v62  ;;  %v9657_v11 = vld [vmem:[%s9060_s27 + $0x239] sm:$0xff] }
  0x8d   : > { %11016 = vst [vmem:[#allocation50_spill] sm:$0xff] %v9657_v11 }
  0x8e   : > { %7260 = vmatmul.mubr.f32.gmra.mrb[44].mxu1 %v9637_v60  ;;  %v6128_v60 = vld [vmem:[%s10911_s2 + $0x110] sm:$0xff] }
  0x8f   : > { %7744 = vmatmul.mubr.f32.gmra.mrb[20].mxu0 %v9641_v43  ;;  %7262 = vmatprep.mubr.f32.mxu1 %v9644_v49  ;;  %v6129_v43 = vld [vmem:[%s10911_s2 + $0x118] sm:$0xff]  ;;  %v9674_v49 = vld [vmem:[%s9060_s27 + $0x249] sm:$0xff] }
  0x90   : > { %7746 = vmatprep.mubr.f32.mxu0 %v9647_v17  ;;  %v6015_v17 = vld [vmem:[%s9060_s27 + $0x170] sm:$0xff]  ;;  %v8165_v3 = vpack.c.bf16 %v6129_v43, %v6128_v60 }
  0x91   : > { %v6132_v43 = vld [vmem:[%s10911_s2 + $0x130] sm:$0xff] }
  0x92   : > { %7263 = vmatmul.mubr.f32.gmra.mrb[46].mxu1 %v9653_v62  ;;  %v9678_v62 = vld [vmem:[%s9060_s27 + $0x251] sm:$0xff] }
  0x93   : > { %7747 = vmatmul.mubr.f32.gmra.mrb[22].mxu0 %v9657_v11  ;;  %7297 = vmatprep.mubr.f32.mxu1 %v6014_v12  ;;  %v6131_v11 = vld [vmem:[%s10911_s2 + $0x128] sm:$0xff]  ;;  %v9690_v12 = vld [vmem:[%s9060_s27 + $0x259] sm:$0xff] }
  0x94   : > { %7749 = vmatprep.mubr.f32.mxu0 %v9661_v23  ;;  %v8169_v60 = vpack.c.bf16 %v6131_v11, %v6130_v37  ;;  %v6134_v11 = vld [vmem:[%s10911_s2 + $0x140] sm:$0xff] }
  0x96   : > { %7298 = vmatmul.mubr.f32.vlgmr.msra.gmra.mrb[0].mxu1 %v6015_v17  ;;  %v9693_v17 = vld [vmem:[%s9060_s27 + $0x261] sm:$0xff] }
  0x97   : > { %7750 = vmatmul.mubr.f32.gmra.mrb[24].mxu0 %v9674_v49  ;;  %8164 = vmatpush3.bf16.msra.mxu1 %v9356_v27  ;;  %v6133_v27 = vld [vmem:[%s10911_s2 + $0x138] sm:$0xff] }
  0x98   : > { %7300 = vmatprep.mubr.f32.mxu1 %v6016_v7  ;;  %7752 = vmatprep.mubr.f32.mxu0 %v9678_v62  ;;  %v9706_v7 = vld [vmem:[%s9060_s27 + $0x269] sm:$0xff]  ;;  %v8173_v37 = vpack.c.bf16 %v6133_v27, %v6132_v43 }
  0x99   : > { %8166 = vmatprep.subr.bf16.mxu1 %v8165_v3  ;;  %v6136_v27 = vld [vmem:[%s10911_s2 + $0x150] sm:$0xff] }
  0x9a   : > { %7301 = vmatmul.mubr.f32.gmra.mrb[2].mxu1 %v9080_v29  ;;  %v9709_v29 = vld [vmem:[%s9060_s27 + $0x271] sm:$0xff] }
  0x9b   : > { %7753 = vmatmul.mubr.f32.gmra.mrb[26].mxu0 %v9690_v12  ;;  %7303 = vmatprep.mubr.f32.mxu1 %v9164_v61  ;;  %v6135_v61 = vld [vmem:[%s10911_s2 + $0x148] sm:$0xff] }
  0x9c   : > { %7755 = vmatprep.mubr.f32.mxu0 %v9693_v17  ;;  %8168 = vmatpush3.bf16.msra.mxu1 %v8165_v3  ;;  %v9722_v3 = vld [vmem:[%s9060_s27 + $0x279] sm:$0xff]  ;;  %v8177_v43 = vpack.c.bf16 %v6135_v61, %v6134_v11 }
  0x9d   : > { %8170 = vmatprep.subr.bf16.mxu1 %v8169_v60  ;;  %v6138_v61 = vld [vmem:[%s10911_s2 + $0x160] sm:$0xff] }
  0x9e   : > { %7304 = vmatmul.mubr.f32.gmra.mrb[4].mxu1 %v9168_v0  ;;  %v9725_v0 = vld [vmem:[%s9060_s27 + $0x281] sm:$0xff] }
  0x9f   : > { %7756 = vmatmul.mubr.f32.gmra.mrb[28].mxu0 %v9706_v7  ;;  %7306 = vmatprep.mubr.f32.mxu1 %v9185_v8  ;;  %v6137_v8 = vld [vmem:[%s10911_s2 + $0x158] sm:$0xff] }
  0xa0   : > { %7758 = vmatprep.mubr.f32.mxu0 %v9709_v29  ;;  %8172 = vmatpush3.bf16.msra.mxu1 %v8169_v60  ;;  %v9738_v60 = vld [vmem:[%s9060_s27 + $0x289] sm:$0xff]  ;;  %v8181_v11 = vpack.c.bf16 %v6137_v8, %v6136_v27 }
  0xa1   : > { %8174 = vmatprep.subr.bf16.mxu1 %v8173_v37  ;;  %v6140_v8 = vld [vmem:[%s10911_s2 + $0x170] sm:$0xff] }
  0xa2   : > { %7307 = vmatmul.mubr.f32.gmra.mrb[6].mxu1 %v9190_v10  ;;  %v9741_v10 = vld [vmem:[%s9060_s27 + $0x291] sm:$0xff] }
  0xa3   : > { %7759 = vmatmul.mubr.f32.gmra.mrb[30].mxu0 %v9722_v3  ;;  %7309 = vmatprep.mubr.f32.mxu1 %v9208_v20  ;;  %v6139_v20 = vld [vmem:[%s10911_s2 + $0x168] sm:$0xff] }
  0xa4   : > { %7761 = vmatprep.mubr.f32.mxu0 %v9725_v0  ;;  %8176 = vmatpush3.bf16.msra.mxu1 %v8173_v37  ;;  %v9754_v37 = vld [vmem:[%s9060_s27 + $0x299] sm:$0xff]  ;;  %v8185_v27 = vpack.c.bf16 %v6139_v20, %v6138_v61 }
  0xa5   : > { %8178 = vmatprep.subr.bf16.mxu1 %v8177_v43  ;;  %v6190_v20 = vld [vmem:[%s10911_s2 + $0x180] sm:$0xff] }
  0xa6   : > { %7310 = vmatmul.mubr.f32.gmra.mrb[8].mxu1 %v9214_v22  ;;  %v9757_v22 = vld [vmem:[%s9060_s27 + $0x2a1] sm:$0xff] }
  0xa7   : > { %7762 = vmatmul.mubr.f32.gmra.mrb[32].mxu0 %v9738_v60  ;;  %7312 = vmatprep.mubr.f32.mxu1 %v9235_v33  ;;  %v6141_v33 = vld [vmem:[%s10911_s2 + $0x178] sm:$0xff] }
  0xa8   : > { %7764 = vmatprep.mubr.f32.mxu0 %v9741_v10  ;;  %8180 = vmatpush3.bf16.msra.mxu1 %v8177_v43  ;;  %v9770_v43 = vld [vmem:[%s9060_s27 + $0x2a9] sm:$0xff]  ;;  %v8189_v61 = vpack.c.bf16 %v6141_v33, %v6140_v8  ;;  %v6316_v33 = vld [vmem:[%s9060_s27 + $0x2f1] sm:$0xff] }
  0xa9   : > { %8182 = vmatprep.subr.bf16.mxu1 %v8181_v11 }
  0xaa   : > { %7313 = vmatmul.mubr.f32.gmra.mrb[10].mxu1 %v9241_v35  ;;  %v9773_v35 = vld [vmem:[%s9060_s27 + $0x2b1] sm:$0xff] }
  0xab   : > { %7765 = vmatmul.mubr.f32.gmra.mrb[34].mxu0 %v9754_v37  ;;  %7315 = vmatprep.mubr.f32.mxu1 %v9263_v45  ;;  %v6191_v45 = vld [vmem:[%s10911_s2 + $0x188] sm:$0xff] }
  0xac   : > { %7767 = vmatprep.mubr.f32.mxu0 %v9757_v22  ;;  %8184 = vmatpush3.bf16.msra.mxu1 %v8181_v11  ;;  %v9786_v11 = vld [vmem:[%s9060_s27 + $0x2b9] sm:$0xff]  ;;  %v9791_v8 = vpack.c.bf16 %v6191_v45, %v6190_v20  ;;  %v9879_v45 = vld [vmem:[%s9060_s27 + $0x268] sm:$0xff] }
  0xad   : > { %8186 = vmatprep.subr.bf16.mxu1 %v8185_v27  ;;  %v6454_v20 = vld [vmem:[%s10911_s2 + $0x3c0] sm:$0xff] }
  0xae   : > { %7316 = vmatmul.mubr.f32.gmra.mrb[12].mxu1 %v9269_v47  ;;  %v9789_v47 = vld [vmem:[%s9060_s27 + $0x2c1] sm:$0xff] }
  0xaf   : > { %7768 = vmatmul.mubr.f32.gmra.mrb[36].mxu0 %v9770_v43  ;;  %7318 = vmatprep.mubr.f32.mxu1 %v9291_v56  ;;  %v9798_v56 = vld [vmem:[%s9060_s27 + $0x2c9] sm:$0xff] }
  0xb0   : > { %7770 = vmatprep.mubr.f32.mxu0 %v9773_v35  ;;  %8188 = vmatpush3.bf16.msra.mxu1 %v8185_v27  ;;  %v9801_v27 = vld [vmem:[%s9060_s27 + $0x2d1] sm:$0xff] }
  0xb1   : > { %8190 = vmatprep.subr.bf16.mxu1 %v8189_v61 }
  0xb2   : > { %7319 = vmatmul.mubr.f32.gmra.mrb[14].mxu1 %v9297_v58  ;;  %v9809_v58 = vld [vmem:[%s9060_s27 + $0x2d9] sm:$0xff] }
  0xb3   : > { %7771 = vmatmul.mubr.f32.gmra.mrb[38].mxu0 %v9786_v11  ;;  %7321 = vmatprep.mubr.f32.mxu1 %v9319_v4  ;;  %v9812_v4 = vld [vmem:[%s9060_s27 + $0x2e1] sm:$0xff] }
  0xb4   : > { %7773 = vmatprep.mubr.f32.mxu0 %v9789_v47  ;;  %8192 = vmatpush3.bf16.msra.mxu1 %v8189_v61  ;;  %v6452_v61 = vld [vmem:[%s10911_s2 + $0x3b0] sm:$0xff] }
  0xb5   : > { %8194 = vmatprep.subr.bf16.mxu1 %v9791_v8 }
  0xb6   : > { %7322 = vmatmul.mubr.f32.gmra.mrb[16].mxu1 %v9325_v6  ;;  %v6315_v6 = vld [vmem:[%s9060_s27 + $0x2e9] sm:$0xff] }
  0xb7   : > { %7774 = vmatmul.mubr.f32.gmra.mrb[40].mxu0 %v9798_v56  ;;  %7324 = vmatprep.mubr.f32.mxu1 %v9347_v19  ;;  %v6317_v19 = vld [vmem:[%s9060_s27 + $0x2f9] sm:$0xff] }
  0xb8   : > { %7776 = vmatprep.mubr.f32.mxu0 %v9801_v27 }
  0xba   : > { %7325 = vmatmul.mubr.f32.gmra.mrb[18].mxu1 %v9353_v25  ;;  %v6448_v25 = vld [vmem:[%s10911_s2 + $0x390] sm:$0xff] }
  0xbb   : > { %7777 = vmatmul.mubr.f32.gmra.mrb[42].mxu0 %v9809_v58  ;;  %7327 = vmatprep.mubr.f32.mxu1 %v9365_v32  ;;  %v6449_v32 = vld [vmem:[%s10911_s2 + $0x398] sm:$0xff] }
  0xbc   : > { %7779 = vmatprep.mubr.f32.mxu0 %v9812_v4 }
  0xbe   : > { %7328 = vmatmul.mubr.f32.gmra.mrb[20].mxu1 %v9371_v38  ;;  %v8325_v38 = vpack.c.bf16 %v6449_v32, %v6448_v25  ;;  %v6458_v32 = vld [vmem:[%s10911_s2 + $0x3e0] sm:$0xff] }
  0xbf   : > { %7780 = vmatmul.mubr.f32.gmra.mrb[44].mxu0 %v6315_v6  ;;  %7330 = vmatprep.mubr.f32.mxu1 %v9382_v40  ;;  %v6450_v40 = vld [vmem:[%s10911_s2 + $0x3a0] sm:$0xff] }
  0xc0   : > { %7782 = vmatprep.mubr.f32.mxu0 %v6316_v33  ;;  %v6456_v33 = vld [vmem:[%s10911_s2 + $0x3d0] sm:$0xff] }
  0xc2   : > { %7331 = vmatmul.mubr.f32.gmra.mrb[22].mxu1 %v9388_v44  ;;  %v6451_v44 = vld [vmem:[%s10911_s2 + $0x3a8] sm:$0xff] }
  0xc3   : > { %7783 = vmatmul.mubr.f32.gmra.mrb[46].mxu0 %v6317_v19  ;;  %7333 = vmatprep.mubr.f32.mxu1 %v9398_v50  ;;  %v9842_v50 = vld [vmem:[%s9060_s27 + $0x240] sm:$0xff]  ;;  %v9895_v19 = vld [vmem:[%s9060_s27 + $0x278] sm:$0xff] }
  0xc4   : > { %7817 = vmatprep.mubr.f32.mxu0 %v9211_v21  ;;  %v9847_v21 = vld [vmem:[%s9060_s27 + $0x248] sm:$0xff] }
  0xc6   : > { %7334 = vmatmul.mubr.f32.gmra.mrb[24].mxu1 %v9404_v52  ;;  %v8329_v52 = vpack.c.bf16 %v6451_v44, %v6450_v40  ;;  %v6460_v44 = vld [vmem:[%s10911_s2 + $0x3f0] sm:$0xff] }
  0xc7   : > { %7818 = vmatmul.mubr.f32.vlgmr.msra.gmra.mrb[0].mxu0 %v9225_v28  ;;  %7336 = vmatprep.mubr.f32.mxu1 %v9414_v55  ;;  %v6453_v28 = vld [vmem:[%s10911_s2 + $0x3b8] sm:$0xff] }
  0xc8   : > { %8324 = vmatpush3.bf16.msra.mxu0 %v9598_v14  ;;  %7820 = vmatprep.mubr.f32.mxu0 %v9238_v34  ;;  %v9859_v34 = vld [vmem:[%s9060_s27 + $0x250] sm:$0xff]  ;;  %v9863_v55 = vld [vmem:[%s9060_s27 + $0x258] sm:$0xff]  ;;  %v8333_v14 = vpack.c.bf16 %v6453_v28, %v6452_v61  ;;  %v6510_v28 = vld [vmem:[%s10911_s2 + $0x400] sm:$0xff] }
  0xc9   : > { %8326 = vmatprep.subr.bf16.mxu0 %v8325_v38 }
  0xca   : > { %7337 = vmatmul.mubr.f32.gmra.mrb[26].mxu1 %v9842_v50 }
  0xcb   : > { %7821 = vmatmul.mubr.f32.gmra.mrb[2].mxu0 %v9253_v41  ;;  %7339 = vmatprep.mubr.f32.mxu1 %v9847_v21  ;;  %v6455_v41 = vld [vmem:[%s10911_s2 + $0x3c8] sm:$0xff] }
  0xcc   : > { %7823 = vmatprep.mubr.f32.mxu0 %v9266_v46  ;;  %8328 = vmatpush3.bf16.msra.mxu0 %v8325_v38  ;;  %v9875_v46 = vld [vmem:[%s9060_s27 + $0x260] sm:$0xff]  ;;  %v8337_v6 = vpack.c.bf16 %v6455_v41, %v6454_v20  ;;  %v9911_v38 = vld [vmem:[%s9060_s27 + $0x288] sm:$0xff] }
  0xcd   : > { %8330 = vmatprep.subr.bf16.mxu0 %v8329_v52  ;;  %v9966_v41 = vld [vmem:[%s9060_s27 + $0x2c8] sm:$0xff] }
  0xce   : > { %7340 = vmatmul.mubr.f32.gmra.mrb[28].mxu1 %v9859_v34 }
  0xcf   : > { %7824 = vmatmul.mubr.f32.gmra.mrb[4].mxu0 %v9281_v53  ;;  %7342 = vmatprep.mubr.f32.mxu1 %v9863_v55  ;;  %v6457_v53 = vld [vmem:[%s10911_s2 + $0x3d8] sm:$0xff] }
  0xd0   : > { %7826 = vmatprep.mubr.f32.mxu0 %v9294_v57  ;;  %8332 = vmatpush3.bf16.msra.mxu0 %v8329_v52  ;;  %v9891_v57 = vld [vmem:[%s9060_s27 + $0x270] sm:$0xff]  ;;  %v8341_v25 = vpack.c.bf16 %v6457_v53, %v6456_v33  ;;  %v9927_v52 = vld [vmem:[%s9060_s27 + $0x298] sm:$0xff] }
  0xd1   : > { %8334 = vmatprep.subr.bf16.mxu0 %v8333_v14  ;;  %v6080_v33 = vld [vmem:[%s9060_s27 + $0x179] sm:$0xff] }
  0xd2   : > { %7343 = vmatmul.mubr.f32.gmra.mrb[30].mxu1 %v9875_v46 }
  0xd3   : > { %7827 = vmatmul.mubr.f32.gmra.mrb[6].mxu0 %v9309_v1  ;;  %7345 = vmatprep.mubr.f32.mxu1 %v9879_v45  ;;  %v6459_v1 = vld [vmem:[%s10911_s2 + $0x3e8] sm:$0xff] }
  0xd4   : > { %7829 = vmatprep.mubr.f32.mxu0 %v9322_v5  ;;  %8336 = vmatpush3.bf16.msra.mxu0 %v8333_v14  ;;  %v9907_v5 = vld [vmem:[%s9060_s27 + $0x280] sm:$0xff]  ;;  %v8345_v40 = vpack.c.bf16 %v6459_v1, %v6458_v32  ;;  %v9943_v14 = vld [vmem:[%s9060_s27 + $0x2a8] sm:$0xff]  ;;  %v6196_v32 = vld [vmem:[%s10911_s2 + $0x1b0] sm:$0xff] }
  0xd5   : > { %8338 = vmatprep.subr.bf16.mxu0 %v8337_v6  ;;  %v6197_v1 = vld [vmem:[%s10911_s2 + $0x1b8] sm:$0xff] }
  0xd6   : > { %7346 = vmatmul.mubr.f32.gmra.mrb[32].mxu1 %v9891_v57 }
  0xd7   : > { %7830 = vmatmul.mubr.f32.gmra.mrb[8].mxu0 %v9337_v15  ;;  %7348 = vmatprep.mubr.f32.mxu1 %v9895_v19  ;;  %v6461_v15 = vld [vmem:[%s10911_s2 + $0x3f8] sm:$0xff] }
  0xd8   : > { %7832 = vmatprep.mubr.f32.mxu0 %v9350_v24  ;;  %8340 = vmatpush3.bf16.msra.mxu0 %v8337_v6  ;;  %v9923_v24 = vld [vmem:[%s9060_s27 + $0x290] sm:$0xff]  ;;  %v8349_v61 = vpack.c.bf16 %v6461_v15, %v6460_v44  ;;  %v8205_v44 = vpack.c.bf16 %v6197_v1, %v6196_v32  ;;  %v8926_v15 = vmov 0   ;;  %v11026_v1 = vld [vmem:[#allocation29_spill] sm:$0xff] }
  0xd9   : > { %8342 = vmatprep.subr.bf16.mxu0 %v8341_v25  ;;  %v6192_v6 = vld [vmem:[%s10911_s2 + $0x190] sm:$0xff]  ;;  %8860 = vset.pattern.permute.xlu0 %v8926_v15 }
  0xda   : > { %7349 = vmatmul.mubr.f32.gmra.mrb[34].mxu1 %v9907_v5  ;;  %8861 = vset.pattern.permute.xlu1 %v8926_v15 }
  0xdb   : > { %7833 = vmatmul.mubr.f32.gmra.mrb[10].mxu0 %v9361_v30  ;;  %7351 = vmatprep.mubr.f32.mxu1 %v9911_v38  ;;  %v6511_v30 = vld [vmem:[%s10911_s2 + $0x408] sm:$0xff] }
  0xdc   : > { %7835 = vmatprep.mubr.f32.mxu0 %v9368_v36  ;;  %8344 = vmatpush3.bf16.msra.mxu0 %v8341_v25  ;;  %v9939_v36 = vld [vmem:[%s9060_s27 + $0x2a0] sm:$0xff]  ;;  %v9945_v20 = vpack.c.bf16 %v6511_v30, %v6510_v28  ;;  %v6195_v25 = vld [vmem:[%s10911_s2 + $0x1a8] sm:$0xff] }
  0xdd   : > { %8346 = vmatprep.subr.bf16.mxu0 %v8345_v40  ;;  %v6198_v28 = vld [vmem:[%s10911_s2 + $0x1c0] sm:$0xff]  ;;  %v6199_v30 = vld [vmem:[%s10911_s2 + $0x1c8] sm:$0xff] }
  0xde   : > { %7352 = vmatmul.mubr.f32.gmra.mrb[36].mxu1 %v9923_v24 }
  0xdf   : > { %7836 = vmatmul.mubr.f32.gmra.mrb[12].mxu0 %v9378_v39  ;;  %7354 = vmatprep.mubr.f32.mxu1 %v9927_v52  ;;  %v9951_v39 = vld [vmem:[%s9060_s27 + $0x2b0] sm:$0xff] }
  0xe0   : > { %7838 = vmatprep.mubr.f32.mxu0 %v9385_v42  ;;  %8348 = vmatpush3.bf16.msra.mxu0 %v8345_v40  ;;  %v9955_v42 = vld [vmem:[%s9060_s27 + $0x2b8] sm:$0xff]  ;;  %v11018_v40 = vld [vmem:[#allocation21_spill] sm:$0xff] }
  0xe1   : > { %8350 = vmatprep.subr.bf16.mxu0 %v8349_v61 }
  0xe2   : > { %7355 = vmatmul.mubr.f32.gmra.mrb[38].mxu1 %v9939_v36 }
  0xe3   : > { %7839 = vmatmul.mubr.f32.gmra.mrb[14].mxu0 %v9394_v48  ;;  %7357 = vmatprep.mubr.f32.mxu1 %v9943_v14  ;;  %v9962_v48 = vld [vmem:[%s9060_s27 + $0x2c0] sm:$0xff] }
  0xe4   : > { %7841 = vmatprep.mubr.f32.mxu0 %v9401_v51  ;;  %8352 = vmatpush3.bf16.msra.mxu0 %v8349_v61  ;;  %v9972_v51 = vld [vmem:[%s9060_s27 + $0x2d0] sm:$0xff] }
  0xe5   : > { %8354 = vmatprep.subr.bf16.mxu0 %v9945_v20  ;;  %v11021_v61 = vld [vmem:[#allocation14_spill] sm:$0xff] }
  0xe6   : > { %7358 = vmatmul.mubr.f32.gmra.mrb[40].mxu1 %v9951_v39 }
  0xe7   : > { %7842 = vmatmul.mubr.f32.gmra.mrb[16].mxu0 %v9410_v54  ;;  %7360 = vmatprep.mubr.f32.mxu1 %v9955_v42  ;;  %v9976_v54 = vld [vmem:[%s9060_s27 + $0x2d8] sm:$0xff] }
  0xe8   : > { %7844 = vmatprep.mubr.f32.mxu0 %v9417_v59  ;;  %v9982_v59 = vld [vmem:[%s9060_s27 + $0x2e0] sm:$0xff] }
  0xea   : > { %7361 = vmatmul.mubr.f32.gmra.mrb[42].mxu1 %v9962_v48 }
  0xeb   : > { %7845 = vmatmul.mubr.f32.gmra.mrb[18].mxu0 %v9432_v2  ;;  %7363 = vmatprep.mubr.f32.mxu1 %v9966_v41  ;;  %v6078_v2 = vld [vmem:[%s9060_s27 + $0x169] sm:$0xff] }
  0xec   : > { %7847 = vmatprep.mubr.f32.mxu0 %v9439_v9  ;;  %v6193_v9 = vld [vmem:[%s10911_s2 + $0x198] sm:$0xff] }
  0xed   : > { %v8197_v53 = vpack.c.bf16 %v6193_v9, %v6192_v6  ;;  %v11022_v6 = vld [vmem:[#allocation25_spill] sm:$0xff]  ;;  %v11023_v9 = vld [vmem:[#allocation15_spill] sm:$0xff] }
  0xee   : > { %7364 = vmatmul.mubr.f32.gmra.mrb[44].mxu1 %v9972_v51 }
  0xef   : > { %7848 = vmatmul.mubr.f32.gmra.mrb[20].mxu0 %v9454_v18  ;;  %7366 = vmatprep.mubr.f32.mxu1 %v9976_v54  ;;  %v6079_v18 = vld [vmem:[%s9060_s27 + $0x171] sm:$0xff] }
  0xf0   : > { %7850 = vmatprep.mubr.f32.mxu0 %v9461_v63  ;;  %v6194_v63 = vld [vmem:[%s10911_s2 + $0x1a0] sm:$0xff] }
  0xf2   : > { %7367 = vmatmul.mubr.f32.gmra.mrb[46].mxu1 %v9982_v59 }
  0xf3   : > { %7851 = vmatmul.mubr.f32.gmra.mrb[22].mxu0 %v9476_v31  ;;  %7401 = vmatprep.mubr.f32.mxu1 %v6078_v2  ;;  %v8201_v31 = vpack.c.bf16 %v6195_v25, %v6194_v63  ;;  %v8209_v63 = vpack.c.bf16 %v6199_v30, %v6198_v28  ;;  %v11025_v25 = vld [vmem:[#allocation16_spill] sm:$0xff]  ;;  %v11029_v30 = vld [vmem:[#allocation18_spill] sm:$0xff] }
  0xf4   : > { %7853 = vmatprep.mubr.f32.mxu0 %v9483_v16  ;;  %v11017_v16 = vld [vmem:[#allocation12_spill] sm:$0xff] }
  0xf6   : > { %7402 = vmatmul.mubr.f32.vlgmr.msra.gmra.mrb[0].mxu1 %v6079_v18  ;;  %v11024_v18 = vld [vmem:[#allocation27_spill] sm:$0xff] }
  0xf7   : > { %7854 = vmatmul.mubr.f32.gmra.mrb[24].mxu0 %v9498_v13  ;;  %8196 = vmatpush3.bf16.msra.mxu1 %v9791_v8  ;;  %v11019_v13 = vld [vmem:[#allocation13_spill] sm:$0xff]  ;;  %v11020_v8 = vld [vmem:[#allocation23_spill] sm:$0xff] }
  0xf8   : > { %7404 = vmatprep.mubr.f32.mxu1 %v6080_v33  ;;  %7856 = vmatprep.mubr.f32.mxu0 %v9505_v26  ;;  %v6526_v26 = vld [vmem:[%s10909_s0 + $0x180] sm:$0xff]  ;;  %v6528_v33 = vld [vmem:[%s10909_s0 + $0x190] sm:$0xff] }
  0xf9   : > { %8198 = vmatprep.subr.bf16.mxu1 %v8197_v53  ;;  %vm4954_vm0 = vcmp.gt.f32.partialorder %v6526_v26, 0.0  ;;  %vm4956_vm1 = vcmp.gt.f32.partialorder %v6528_v33, 0.0  ;;  %v6529_v26 = vld [vmem:[%s10909_s0 + $0x198] sm:$0xff] }
  0xfa   : > { %7405 = vmatmul.mubr.f32.gmra.mrb[2].mxu1 %v11017_v16  ;;  %v5002_v2 = vsel %vm4954_vm0, 1, %v8926_v15  ;;  %v6200_v16 = vld [vmem:[%s10911_s2 + $0x1d0] sm:$0xff]  ;;  %v5004_v32 = vsel %vm4956_vm1, 1, %v8926_v15  ;;  %vm4957_vm3 = vcmp.gt.f32.partialorder %v6529_v26, 0.0 }
  0xfb   : > { %7857 = vmatmul.mubr.f32.gmra.mrb[26].mxu0 %v11018_v40  ;;  %7407 = vmatprep.mubr.f32.mxu1 %v11019_v13  ;;  %v11027_v40 = vld [vmem:[#allocation17_spill] sm:$0xff] }
  0xfc   : > { %7859 = vmatprep.mubr.f32.mxu0 %v11020_v8  ;;  %8200 = vmatpush3.bf16.msra.mxu1 %v8197_v53  ;;  %v6527_v53 = vld [vmem:[%s10909_s0 + $0x188] sm:$0xff]  ;;  %v11028_v8 = vld [vmem:[#allocation31_spill] sm:$0xff] }
  0xfd   : > { %8202 = vmatprep.subr.bf16.mxu1 %v8201_v31  ;;  %5051 = vperm.xlu0 %8860, %v5002_v2   ;;  %vm4955_vm2 = vcmp.gt.f32.partialorder %v6527_v53, 0.0  ;;  %v6202_v2 = vld [vmem:[%s10911_s2 + $0x1e0] sm:$0xff]  ;;  %v11032_v53 = vld [vmem:[#allocation35_spill] sm:$0xff] }
  0xfe   : > { %7408 = vmatmul.mubr.f32.gmra.mrb[4].mxu1 %v11021_v61  ;;  %v5003_v13 = vsel %vm4955_vm2, 1, %v8926_v15  ;;  %v6530_v61 = vld [vmem:[%s10909_s0 + $0x1a0] sm:$0xff]  ;;  %5057 = vperm.xlu1 %8861, %v5004_v32  }
  0xff   : > { %7860 = vmatmul.mubr.f32.gmra.mrb[28].mxu0 %v11022_v6  ;;  %7410 = vmatprep.mubr.f32.mxu1 %v11023_v9  ;;  %vm4958_vm4 = vcmp.gt.f32.partialorder %v6530_v61, 0.0  ;;  %v5005_v6 = vsel %vm4957_vm3, 1, %v8926_v15  ;;  %v11030_v9 = vld [vmem:[#allocation33_spill] sm:$0xff]  ;;  %v11033_v32 = vld [vmem:[#allocation20_spill] sm:$0xff]  ;;  %v11036_v61 = vld [vmem:[#allocation39_spill] sm:$0xff] }
 0x100   : > { %7862 = vmatprep.mubr.f32.mxu0 %v11024_v18  ;;  %8204 = vmatpush3.bf16.msra.mxu1 %v8201_v31  ;;  %v6201_v31 = vld [vmem:[%s10911_s2 + $0x1d8] sm:$0xff]  ;;  %v5006_v33 = vsel %vm4958_vm4, 1, %v8926_v15 }
 0x101   : > { %8206 = vmatprep.subr.bf16.mxu1 %v8205_v44  ;;  %v8213_v28 = vpack.c.bf16 %v6201_v31, %v6200_v16  ;;  %5054 = vperm.xlu0 %8860, %v5003_v13   ;;  %v11031_v18 = vld [vmem:[#allocation19_spill] sm:$0xff]  ;;  %v6532_v16 = vld [vmem:[%s10909_s0 + $0x1b0] sm:$0xff]  ;;  %v11034_v13 = vld [vmem:[#allocation37_spill] sm:$0xff] }
 0x102   : > { %7411 = vmatmul.mubr.f32.gmra.mrb[6].mxu1 %v11025_v25  ;;  %v6531_v25 = vld [vmem:[%s10909_s0 + $0x1a8] sm:$0xff]  ;;  %5060 = vperm.xlu1 %8861, %v5005_v6   ;;  %vm4960_vm6 = vcmp.gt.f32.partialorder %v6532_v16, 0.0  ;;  %v11037_v6 = vld [vmem:[#allocation24_spill] sm:$0xff]  ;;  %v6536_v16 = vld [vmem:[%s10909_s0 + $0x1d0] sm:$0xff] }
 0x103   : > { %7863 = vmatmul.mubr.f32.gmra.mrb[30].mxu0 %v11026_v1  ;;  %7413 = vmatprep.mubr.f32.mxu1 %v11027_v40  ;;  %vm4959_vm5 = vcmp.gt.f32.partialorder %v6531_v25, 0.0  ;;  %v6204_v1 = vld [vmem:[%s10911_s2 + $0x1f0] sm:$0xff]  ;;  %v5008_v26 = vsel %vm4960_vm6, 1, %v8926_v15  ;;  %v6535_v25 = vld [vmem:[%s10909_s0 + $0x1c8] sm:$0xff]  ;;  %vm4964_vm10 = vcmp.gt.f32.partialorder %v6536_v16, 0.0  ;;  %v11049_v16 = vld [vmem:[#allocation36_spill] sm:$0xff] }
 0x104   : > { %7865 = vmatprep.mubr.f32.mxu0 %v11028_v8  ;;  %8208 = vmatpush3.bf16.msra.mxu1 %v8205_v44  ;;  %v6203_v44 = vld [vmem:[%s10911_s2 + $0x1e8] sm:$0xff]  ;;  %v5007_v40 = vsel %vm4959_vm5, 1, %v8926_v15  ;;  %v11035_v8 = vld [vmem:[#allocation22_spill] sm:$0xff]  ;;  %vm4963_vm9 = vcmp.gt.f32.partialorder %v6535_v25, 0.0 }
 0x105   : > { %8210 = vmatprep.subr.bf16.mxu1 %v8209_v63  ;;  %v8217_v31 = vpack.c.bf16 %v6203_v44, %v6202_v2  ;;  %5063 = vperm.xlu0 %8860, %v5006_v33   ;;  %v6534_v2 = vld [vmem:[%s10909_s0 + $0x1c0] sm:$0xff]  ;;  %v10136_v25 = vld [vmem:[%s9060_s27 + $0x2f7] sm:$0xff] }
 0x106   : > { %7414 = vmatmul.mubr.f32.gmra.mrb[8].mxu1 %v11029_v30  ;;  %v6533_v30 = vld [vmem:[%s10909_s0 + $0x1b8] sm:$0xff]  ;;  %5066 = vperm.xlu1 %8861, %v5007_v40   ;;  %vm4962_vm8 = vcmp.gt.f32.partialorder %v6534_v2, 0.0  ;;  %v5012_v40 = vsel %vm4964_vm10, 1, %v8926_v15  ;;  %v11046_v2 = vld [vmem:[#allocation32_spill] sm:$0xff] }
 0x107   : > { %7866 = vmatmul.mubr.f32.gmra.mrb[32].mxu0 %v11030_v9  ;;  %7416 = vmatprep.mubr.f32.mxu1 %v11031_v18  ;;  %vm4961_vm7 = vcmp.gt.f32.partialorder %v6533_v30, 0.0  ;;  %v11038_v18 = vld [vmem:[#allocation41_spill] sm:$0xff]  ;;  %v5010_v33 = vsel %vm4962_vm8, 1, %v8926_v15  ;;  %v11045_v30 = vld [vmem:[#allocation4_spill] sm:$0xff] }
 0x108   : > { %7868 = vmatprep.mubr.f32.mxu0 %v11032_v53  ;;  %8212 = vmatpush3.bf16.msra.mxu1 %v8209_v63  ;;  %v6205_v63 = vld [vmem:[%s10911_s2 + $0x1f8] sm:$0xff]  ;;  %v5009_v9 = vsel %vm4961_vm7, 1, %v8926_v15 }
 0x109   : > { %8214 = vmatprep.subr.bf16.mxu1 %v8213_v28  ;;  %v8221_v44 = vpack.c.bf16 %v6205_v63, %v6204_v1  ;;  %5069 = vperm.xlu0 %8860, %v5008_v26   ;;  %v11040_v53 = vld [vmem:[#allocation43_spill] sm:$0xff]  ;;  %v5011_v1 = vsel %vm4963_vm9, 1, %v8926_v15  ;;  %v11042_v63 = vld [vmem:[#allocation45_spill] sm:$0xff]  ;;  %v6538_v26 = vld [vmem:[%s10909_s0 + $0x1e0] sm:$0xff] }
 0x10a   : > { %7417 = vmatmul.mubr.f32.gmra.mrb[10].mxu1 %v11033_v32  ;;  %5072 = vperm.xlu1 %8861, %v5009_v9   ;;  %v11041_v32 = vld [vmem:[#allocation28_spill] sm:$0xff]  ;;  %vm4966_vm12 = vcmp.gt.f32.partialorder %v6538_v26, 0.0  ;;  %v11048_v9 = vld [vmem:[#allocation34_spill] sm:$0xff] }
 0x10b   : > { %7869 = vmatmul.mubr.f32.gmra.mrb[34].mxu0 %v11034_v13  ;;  %7419 = vmatprep.mubr.f32.mxu1 %v11035_v8  ;;  %v11044_v13 = vld [vmem:[#allocation47_spill] sm:$0xff]  ;;  %v11051_v26 = vld [vmem:[#allocation40_spill] sm:$0xff] }
 0x10c   : > { %7871 = vmatprep.mubr.f32.mxu0 %v11036_v61  ;;  %8216 = vmatpush3.bf16.msra.mxu1 %v8213_v28  ;;  %v11039_v28 = vld [vmem:[#allocation26_spill] sm:$0xff]  ;;  %v6537_v8 = vld [vmem:[%s10909_s0 + $0x1d8] sm:$0xff]  ;;  %v10117_v61 = vld [vmem:[%s9060_s27 + $0x2e7] sm:$0xff] }
 0x10d   : > { %8218 = vmatprep.subr.bf16.mxu1 %v8217_v31  ;;  %5075 = vperm.xlu0 %8860, %v5010_v33   ;;  %vm4965_vm11 = vcmp.gt.f32.partialorder %v6537_v8, 0.0  ;;  %v6539_v33 = vld [vmem:[%s10909_s0 + $0x1e8] sm:$0xff] }
 0x10e   : > { %7420 = vmatmul.mubr.f32.gmra.mrb[12].mxu1 %v11037_v6  ;;  %5078 = vperm.xlu1 %8861, %v5011_v1   ;;  %v11047_v6 = vld [vmem:[#allocation49_spill] sm:$0xff]  ;;  %vm4967_vm13 = vcmp.gt.f32.partialorder %v6539_v33, 0.0  ;;  %v11050_v1 = vld [vmem:[#allocation38_spill] sm:$0xff] }
 0x10f   : > { %7872 = vmatmul.mubr.f32.gmra.mrb[36].mxu0 %v11038_v18  ;;  %7422 = vmatprep.mubr.f32.mxu1 %v11039_v28  ;;  %v5014_v18 = vsel %vm4966_vm12, 1, %v8926_v15  ;;  %v10127_v28 = vld [vmem:[%s9060_s27 + $0x2ef] sm:$0xff]  ;;  %v6380_v8 = vld [vmem:[%s9060_s27 + $0x307] sm:$0xff] }
 0x110   : > { %7874 = vmatprep.mubr.f32.mxu0 %v11040_v53  ;;  %8220 = vmatpush3.bf16.msra.mxu1 %v8217_v31  ;;  %v11043_v31 = vld [vmem:[#allocation30_spill] sm:$0xff] }
 0x111   : > { %8222 = vmatprep.subr.bf16.mxu1 %v8221_v44  ;;  %5081 = vperm.xlu0 %8860, %v5012_v40   ;;  %v6540_v53 = vld [vmem:[%s10909_s0 + $0x1f0] sm:$0xff]  ;;  %v6541_v40 = vld [vmem:[%s10909_s0 + $0x1f8] sm:$0xff] }
 0x112   : > { %7423 = vmatmul.mubr.f32.gmra.mrb[14].mxu1 %v11041_v32  ;;  %vm4968_vm14 = vcmp.gt.f32.partialorder %v6540_v53, 0.0  ;;  %v5015_v32 = vsel %vm4967_vm13, 1, %v8926_v15  ;;  %vm4969_vm15 = vcmp.gt.f32.partialorder %v6541_v40, 0.0  ;;  %v6544_v33 = vld [vmem:[%s10909_s0 + $0x210] sm:$0xff]  ;;  %v6398_v53 = vld [vmem:[%s9060_s27 + $0x198] sm:$0xff] }
 0x113   : > { %7875 = vmatmul.mubr.f32.gmra.mrb[38].mxu0 %v11042_v63  ;;  %7425 = vmatprep.mubr.f32.mxu1 %v11043_v31  ;;  %v5016_v63 = vsel %vm4968_vm14, 1, %v8926_v15  ;;  %v6379_v31 = vld [vmem:[%s9060_s27 + $0x2ff] sm:$0xff]  ;;  %vm4972_vm2 = vcmp.gt.f32.partialorder %v6544_v33, 0.0 }
 0x114   : > { %7877 = vmatprep.mubr.f32.mxu0 %v11044_v13  ;;  %8224 = vmatpush3.bf16.msra.mxu1 %v8221_v44  ;;  %v5013_v44 = vsel %vm4965_vm11, 1, %v8926_v15  ;;  %v6542_v13 = vld [vmem:[%s10909_s0 + $0x200] sm:$0xff]  ;;  %v5020_v40 = vsel %vm4972_vm2, 1, %v8926_v15 }
 0x115   : > { %8385 = vmatprep.subr.bf16.mxu1 %v11045_v30  ;;  %5084 = vperm.xlu1 %8861, %v5013_v44   ;;  %vm4970_vm0 = vcmp.gt.f32.partialorder %v6542_v13, 0.0  ;;  %v11052_v44 = vld [vmem:[#allocation42_spill] sm:$0xff]  ;;  %v6399_v13 = vld [vmem:[%s9060_s27 + $0x1a0] sm:$0xff] }
 0x116   : > { %7426 = vmatmul.mubr.f32.gmra.mrb[16].mxu1 %v11046_v2  ;;  %5087 = vperm.xlu0 %8860, %v5014_v18   ;;  %v5017_v2 = vsel %vm4969_vm15, 1, %v8926_v15  ;;  %v6543_v18 = vld [vmem:[%s10909_s0 + $0x208] sm:$0xff] }
 0x117   : > { %7878 = vmatmul.mubr.f32.gmra.mrb[40].mxu0 %v11047_v6  ;;  %7428 = vmatprep.mubr.f32.mxu1 %v11048_v9  ;;  %v5018_v6 = vsel %vm4970_vm0, 1, %v8926_v15  ;;  %v6381_v9 = vld [vmem:[%s9060_s27 + $0x30f] sm:$0xff]  ;;  %vm4971_vm1 = vcmp.gt.f32.partialorder %v6543_v18, 0.0 }
 0x118   : > { %7880 = vmatprep.mubr.f32.mxu0 %v10117_v61  ;;  %v6515_v18 = vld [vmem:[%s10911_s2 + $0x428] sm:$0xff] }
 0x119   : > { %5090 = vperm.xlu1 %8861, %v5015_v32   ;;  %v6512_v32 = vld [vmem:[%s10911_s2 + $0x410] sm:$0xff] }
 0x11a   : > { %7429 = vmatmul.mubr.f32.gmra.mrb[18].mxu1 %v11049_v16  ;;  %5093 = vperm.xlu0 %8860, %v5016_v63   ;;  %v11053_v16 = vld [vmem:[#allocation44_spill] sm:$0xff]  ;;  %v5019_v63 = vsel %vm4971_vm1, 1, %v8926_v15 }
 0x11b   : > { %7881 = vmatmul.mubr.f32.gmra.mrb[42].mxu0 %v10127_v28  ;;  %7431 = vmatprep.mubr.f32.mxu1 %v11050_v1  ;;  %v6513_v1 = vld [vmem:[%s10911_s2 + $0x418] sm:$0xff] }
 0x11c   : > { %7883 = vmatprep.mubr.f32.mxu0 %v10136_v25 }
 0x11d   : > { %5096 = vperm.xlu1 %8861, %v5017_v2   ;;  %v6400_v2 = vld [vmem:[%s9060_s27 + $0x1a8] sm:$0xff] }
 0x11e   : > { %7432 = vmatmul.mubr.f32.gmra.mrb[20].mxu1 %v11051_v26  ;;  %5099 = vperm.xlu0 %8860, %v5018_v6   ;;  %v6546_v26 = vld [vmem:[%s10909_s0 + $0x220] sm:$0xff] }
 0x11f   : > { %7884 = vmatmul.mubr.f32.gmra.mrb[44].mxu0 %v6379_v31  ;;  %7434 = vmatprep.mubr.f32.mxu1 %v11052_v44  ;;  %v11054_v31 = vld [vmem:[#allocation46_spill] sm:$0xff]  ;;  %v8357_v44 = vpack.c.bf16 %v6513_v1, %v6512_v32  ;;  %vm4974_vm4 = vcmp.gt.f32.partialorder %v6546_v26, 0.0  ;;  %v11055_v6 = vld [vmem:[#allocation48_spill] sm:$0xff]  ;;  %v6547_v1 = vld [vmem:[%s10909_s0 + $0x228] sm:$0xff] }
 0x120   : > { %7886 = vmatprep.mubr.f32.mxu0 %v6380_v8  ;;  %v6545_v8 = vld [vmem:[%s10909_s0 + $0x218] sm:$0xff]  ;;  %v6401_v32 = vld [vmem:[%s9060_s27 + $0x1b0] sm:$0xff]  ;;  %vm4975_vm5 = vcmp.gt.f32.partialorder %v6547_v1, 0.0 }
 0x121   : > { %5102 = vperm.xlu1 %8861, %v5019_v63   ;;  %vm4973_vm3 = vcmp.gt.f32.partialorder %v6545_v8, 0.0  ;;  %v6548_v63 = vld [vmem:[%s10909_s0 + $0x230] sm:$0xff]  ;;  %v5023_v8 = vsel %vm4975_vm5, 1, %v8926_v15  ;;  %v6406_v1 = vld [vmem:[%s9060_s27 + $0x1d8] sm:$0xff] }
 0x122   : > { %7435 = vmatmul.mubr.f32.gmra.mrb[22].mxu1 %v11053_v16  ;;  %5105 = vperm.xlu0 %8860, %v5020_v40   ;;  %v5021_v33 = vsel %vm4973_vm3, 1, %v8926_v15  ;;  %v5022_v16 = vsel %vm4974_vm4, 1, %v8926_v15  ;;  %vm4976_vm6 = vcmp.gt.f32.partialorder %v6548_v63, 0.0 }
 0x123   : > { %7887 = vmatmul.mubr.f32.gmra.mrb[46].mxu0 %v6381_v9  ;;  %7437 = vmatprep.mubr.f32.mxu1 %v11054_v31  ;;  %v6514_v9 = vld [vmem:[%s10911_s2 + $0x420] sm:$0xff]  ;;  %v6402_v31 = vld [vmem:[%s9060_s27 + $0x1b8] sm:$0xff]  ;;  %v5024_v26 = vsel %vm4976_vm6, 1, %v8926_v15 }
 0x124   : > { %7921 = vmatprep.mubr.f32.mxu0 %v6398_v53  ;;  %v11056_v53 = vld [vmem:[#allocation50_spill] sm:$0xff]  ;;  %v8361_v40 = vpack.c.bf16 %v6515_v18, %v6514_v9  ;;  %v6404_v9 = vld [vmem:[%s9060_s27 + $0x1c8] sm:$0xff] }
 0x125   : > { %5108 = vperm.xlu1 %8861, %v5021_v33  }
 0x126   : > { %7438 = vmatmul.mubr.f32.gmra.mrb[24].mxu1 %v11055_v6  ;;  %5111 = vperm.xlu0 %8860, %v5022_v16   ;;  %v6550_v6 = vld [vmem:[%s10909_s0 + $0x240] sm:$0xff]  ;;  %v6405_v16 = vld [vmem:[%s9060_s27 + $0x1d0] sm:$0xff] }
 0x127   : > { %7922 = vmatmul.mubr.f32.vlgmr.msra.gmra.mrb[0].mxu0 %v6399_v13  ;;  %7440 = vmatprep.mubr.f32.mxu1 %v11056_v53  ;;  %v6517_v13 = vld [vmem:[%s10911_s2 + $0x438] sm:$0xff]  ;;  %vm4978_vm8 = vcmp.gt.f32.partialorder %v6550_v6, 0.0 }
 0x128   : > { %8356 = vmatpush3.bf16.msra.mxu0 %v9945_v20  ;;  %7924 = vmatprep.mubr.f32.mxu0 %v6400_v2  ;;  %v6516_v20 = vld [vmem:[%s10911_s2 + $0x430] sm:$0xff]  ;;  %v6403_v2 = vld [vmem:[%s9060_s27 + $0x1c0] sm:$0xff]  ;;  %v5026_v53 = vsel %vm4978_vm8, 1, %v8926_v15 }
 0x129   : > { %8358 = vmatprep.subr.bf16.mxu0 %v8357_v44  ;;  %v8365_v18 = vpack.c.bf16 %v6517_v13, %v6516_v20  ;;  %5114 = vperm.xlu1 %8861, %v5023_v8   ;;  %v6407_v13 = vld [vmem:[%s9060_s27 + $0x1e0] sm:$0xff] }
 0x12a   : > { %7441 = vmatmul.mubr.f32.gmra.mrb[26].mxu1 %v9661_v23  ;;  %v6549_v23 = vld [vmem:[%s10909_s0 + $0x238] sm:$0xff]  ;;  %5117 = vperm.xlu0 %8860, %v5024_v26   ;;  %v6554_v8 = vld [vmem:[%s10909_s0 + $0x260] sm:$0xff]  ;;  %v6408_v26 = vld [vmem:[%s9060_s27 + $0x1e8] sm:$0xff] }
 0x12b   : > { %7925 = vmatmul.mubr.f32.gmra.mrb[2].mxu0 %v6401_v32  ;;  %7443 = vmatprep.mubr.f32.mxu1 %v9674_v49  ;;  %vm4977_vm7 = vcmp.gt.f32.partialorder %v6549_v23, 0.0  ;;  %v6518_v49 = vld [vmem:[%s10911_s2 + $0x440] sm:$0xff]  ;;  %v6552_v32 = vld [vmem:[%s10909_s0 + $0x250] sm:$0xff]  ;;  %vm4982_vm12 = vcmp.gt.f32.partialorder %v6554_v8, 0.0  ;;  %v6523_v23 = vld [vmem:[%s10911_s2 + $0x468] sm:$0xff] }
 0x12c   : > { %7927 = vmatprep.mubr.f32.mxu0 %v6402_v31  ;;  %8360 = vmatpush3.bf16.msra.mxu0 %v8357_v44  ;;  %v6519_v44 = vld [vmem:[%s10911_s2 + $0x448] sm:$0xff]  ;;  %v5025_v33 = vsel %vm4977_vm7, 1, %v8926_v15  ;;  %vm4980_vm10 = vcmp.gt.f32.partialorder %v6552_v32, 0.0  ;;  %v6521_v31 = vld [vmem:[%s10911_s2 + $0x458] sm:$0xff]  ;;  %v6411_v32 = vld [vmem:[%s9060_s27 + $0x200] sm:$0xff] }
 0x12d   : > { %8362 = vmatprep.subr.bf16.mxu0 %v8361_v40  ;;  %v8369_v63 = vpack.c.bf16 %v6519_v44, %v6518_v49  ;;  %5120 = vperm.xlu1 %8861, %v5025_v33   ;;  %v5028_v20 = vsel %vm4980_vm10, 1, %v8926_v15  ;;  %v6556_v49 = vld [vmem:[%s10909_s0 + $0x270] sm:$0xff]  ;;  %v6410_v44 = vld [vmem:[%s9060_s27 + $0x1f8] sm:$0xff]  ;;  %v6415_v8 = vld [vmem:[%s9060_s27 + $0x220] sm:$0xff] }
 0x12e   : > { %7444 = vmatmul.mubr.f32.gmra.mrb[28].mxu1 %v9678_v62  ;;  %v6551_v62 = vld [vmem:[%s10909_s0 + $0x248] sm:$0xff]  ;;  %5123 = vperm.xlu0 %8860, %v5026_v53   ;;  %vm4984_vm14 = vcmp.gt.f32.partialorder %v6556_v49, 0.0  ;;  %v6525_v53 = vld [vmem:[%s10911_s2 + $0x478] sm:$0xff]  ;;  %v6566_v49 = vld [vmem:[%s10909_s0 + $0x2c0] sm:$0xff] }
 0x12f   : > { %7928 = vmatmul.mubr.f32.gmra.mrb[4].mxu0 %v6403_v2  ;;  %7446 = vmatprep.mubr.f32.mxu1 %v9690_v12  ;;  %vm4979_vm9 = vcmp.gt.f32.partialorder %v6551_v62, 0.0  ;;  %v6520_v12 = vld [vmem:[%s10911_s2 + $0x450] sm:$0xff]  ;;  %v5032_v62 = vsel %vm4984_vm14, 1, %v8926_v15  ;;  %vm4994_vm8 = vcmp.gt.f32.partialorder %v6566_v49, 0.0 }
 0x130   : > { %7930 = vmatprep.mubr.f32.mxu0 %v6404_v9  ;;  %8364 = vmatpush3.bf16.msra.mxu0 %v8361_v40  ;;  %v5027_v40 = vsel %vm4979_vm9, 1, %v8926_v15  ;;  %v8373_v2 = vpack.c.bf16 %v6521_v31, %v6520_v12  ;;  %v5030_v9 = vsel %vm4982_vm12, 1, %v8926_v15  ;;  %v6465_v49 = vld [vmem:[%s9060_s27 + $0x1b1] sm:$0xff] }
 0x131   : > { %8366 = vmatprep.subr.bf16.mxu0 %v8365_v18  ;;  %5126 = vperm.xlu1 %8861, %v5027_v40   ;;  %v6413_v40 = vld [vmem:[%s9060_s27 + $0x210] sm:$0xff] }
 0x132   : > { %7447 = vmatmul.mubr.f32.gmra.mrb[30].mxu1 %v9693_v17  ;;  %v6553_v17 = vld [vmem:[%s10909_s0 + $0x258] sm:$0xff]  ;;  %5129 = vperm.xlu0 %8860, %v5028_v20   ;;  %v6559_v20 = vld [vmem:[%s10909_s0 + $0x288] sm:$0xff] }
 0x133   : > { %7931 = vmatmul.mubr.f32.gmra.mrb[6].mxu0 %v6405_v16  ;;  %7449 = vmatprep.mubr.f32.mxu1 %v9706_v7  ;;  %vm4981_vm11 = vcmp.gt.f32.partialorder %v6553_v17, 0.0  ;;  %v6522_v7 = vld [vmem:[%s10911_s2 + $0x460] sm:$0xff]  ;;  %vm4987_vm1 = vcmp.gt.f32.partialorder %v6559_v20, 0.0 }
 0x134   : > { %7933 = vmatprep.mubr.f32.mxu0 %v6406_v1  ;;  %8368 = vmatpush3.bf16.msra.mxu0 %v8365_v18  ;;  %v5029_v6 = vsel %vm4981_vm11, 1, %v8926_v15  ;;  %v6409_v18 = vld [vmem:[%s9060_s27 + $0x1f0] sm:$0xff]  ;;  %v8377_v33 = vpack.c.bf16 %v6523_v23, %v6522_v7  ;;  %v6558_v1 = vld [vmem:[%s10909_s0 + $0x280] sm:$0xff] }
 0x135   : > { %8370 = vmatprep.subr.bf16.mxu0 %v8369_v63  ;;  %5132 = vperm.xlu1 %8861, %v5029_v6   ;;  %vm4986_vm0 = vcmp.gt.f32.partialorder %v6558_v1, 0.0  ;;  %v6417_v23 = vld [vmem:[%s9060_s27 + $0x230] sm:$0xff]  ;;  %v6563_v6 = vld [vmem:[%s10909_s0 + $0x2a8] sm:$0xff] }
 0x136   : > { %7450 = vmatmul.mubr.f32.gmra.mrb[32].mxu1 %v9709_v29  ;;  %v6555_v29 = vld [vmem:[%s10909_s0 + $0x268] sm:$0xff]  ;;  %5135 = vperm.xlu0 %8860, %v5030_v9   ;;  %v5034_v31 = vsel %vm4986_vm0, 1, %v8926_v15  ;;  %v6564_v9 = vld [vmem:[%s10909_s0 + $0x2b0] sm:$0xff]  ;;  %vm4991_vm5 = vcmp.gt.f32.partialorder %v6563_v6, 0.0  ;;  %v6462_v6 = vld [vmem:[%s9060_s27 + $0x199] sm:$0xff] }
 0x137   : > { %7934 = vmatmul.mubr.f32.gmra.mrb[8].mxu0 %v6407_v13  ;;  %7452 = vmatprep.mubr.f32.mxu1 %v9722_v3  ;;  %vm4983_vm13 = vcmp.gt.f32.partialorder %v6555_v29, 0.0  ;;  %v6524_v3 = vld [vmem:[%s10911_s2 + $0x470] sm:$0xff]  ;;  %v6414_v13 = vld [vmem:[%s9060_s27 + $0x218] sm:$0xff]  ;;  %vm4992_vm6 = vcmp.gt.f32.partialorder %v6564_v9, 0.0  ;;  %v6151_v20 = vld [vmem:[%s9060_s27 + $0x1c7] sm:$0xff] }
 0x138   : > { %7936 = vmatprep.mubr.f32.mxu0 %v6408_v26  ;;  %8372 = vmatpush3.bf16.msra.mxu0 %v8369_v63  ;;  %v5031_v16 = vsel %vm4983_vm13, 1, %v8926_v15  ;;  %v6412_v63 = vld [vmem:[%s9060_s27 + $0x208] sm:$0xff]  ;;  %v8381_v12 = vpack.c.bf16 %v6525_v53, %v6524_v3  ;;  %v6561_v26 = vld [vmem:[%s10909_s0 + $0x298] sm:$0xff] }
 0x139   : > { %8374 = vmatprep.subr.bf16.mxu0 %v8373_v2  ;;  %5138 = vperm.xlu1 %8861, %v5031_v16   ;;  %vm4989_vm3 = vcmp.gt.f32.partialorder %v6561_v26, 0.0  ;;  %v6565_v29 = vld [vmem:[%s10909_s0 + $0x2b8] sm:$0xff]  ;;  %v6144_v53 = vld [vmem:[%s9060_s27 + $0x18f] sm:$0xff]  ;;  %v6163_v26 = vld [vmem:[%s9060_s27 + $0x227] sm:$0xff] }
 0x13a   : > { %7453 = vmatmul.mubr.f32.gmra.mrb[34].mxu1 %v9725_v0  ;;  %v6557_v0 = vld [vmem:[%s10909_s0 + $0x278] sm:$0xff]  ;;  %5141 = vperm.xlu0 %8860, %v5032_v62   ;;  %vm4993_vm7 = vcmp.gt.f32.partialorder %v6565_v29, 0.0  ;;  %v6167_v9 = vld [vmem:[%s9060_s27 + $0x247] sm:$0xff] }
 0x13b   : > { %7937 = vmatmul.mubr.f32.gmra.mrb[10].mxu0 %v6409_v18  ;;  %7455 = vmatprep.mubr.f32.mxu1 %v9738_v60  ;;  %vm4985_vm15 = vcmp.gt.f32.partialorder %v6557_v0, 0.0  ;;  %v6418_v18 = vld [vmem:[%s9060_s27 + $0x238] sm:$0xff]  ;;  %v6572_v0 = vld [vmem:[%s10909_s0 + $0x2f0] sm:$0xff] }
 0x13c   : > { %7939 = vmatprep.mubr.f32.mxu0 %v6410_v44  ;;  %8376 = vmatpush3.bf16.msra.mxu0 %v8373_v2  ;;  %v5033_v60 = vsel %vm4985_vm15, 1, %v8926_v15  ;;  %v6416_v2 = vld [vmem:[%s9060_s27 + $0x228] sm:$0xff]  ;;  %v6142_v44 = vld [vmem:[%s9060_s27 + $0x17f] sm:$0xff]  ;;  %vm5000_vm14 = vcmp.gt.f32.partialorder %v6572_v0, 0.0  ;;  %v6169_v29 = vld [vmem:[%s9060_s27 + $0x257] sm:$0xff] }
 0x13d   : > { %8378 = vmatprep.subr.bf16.mxu0 %v8377_v33  ;;  %5144 = vperm.xlu1 %8861, %v5033_v60   ;;  %v6569_v3 = vld [vmem:[%s10909_s0 + $0x2d8] sm:$0xff]  ;;  %v5048_v1 = vsel %vm5000_vm14, 1, %v8926_v15  ;;  %v11058_v60 = vld [vmem:[#allocation6_spill] sm:$0xff] }
 0x13e   : > { %7456 = vmatmul.mubr.f32.gmra.mrb[36].mxu1 %v9741_v10  ;;  %v6560_v10 = vld [vmem:[%s10909_s0 + $0x290] sm:$0xff]  ;;  %5147 = vperm.xlu0 %8860, %v5034_v31   ;;  %vm4997_vm11 = vcmp.gt.f32.partialorder %v6569_v3, 0.0  ;;  %v6146_v62 = vld [vmem:[%s9060_s27 + $0x19f] sm:$0xff] }
 0x13f   : > { %7940 = vmatmul.mubr.f32.gmra.mrb[12].mxu0 %v6411_v32  ;;  %7458 = vmatprep.mubr.f32.mxu1 %v9754_v37  ;;  %vm4988_vm2 = vcmp.gt.f32.partialorder %v6560_v10, 0.0  ;;  %v5035_v37 = vsel %vm4987_vm1, 1, %v8926_v15  ;;  %v6571_v32 = vld [vmem:[%s10909_s0 + $0x2e8] sm:$0xff]  ;;  %v6150_v31 = vld [vmem:[%s9060_s27 + $0x1bf] sm:$0xff] }
 0x140   : > { %7942 = vmatprep.mubr.f32.mxu0 %v6412_v63  ;;  %8380 = vmatpush3.bf16.msra.mxu0 %v8377_v33  ;;  %v5036_v17 = vsel %vm4988_vm2, 1, %v8926_v15  ;;  %v6567_v33 = vld [vmem:[%s10909_s0 + $0x2c8] sm:$0xff]  ;;  %vm4999_vm13 = vcmp.gt.f32.partialorder %v6571_v32, 0.0  ;;  %v6174_v3 = vld [vmem:[%s9060_s27 + $0x27f] sm:$0xff]  ;;  %v6473_v32 = vld [vmem:[%s9060_s27 + $0x1f1] sm:$0xff] }
 0x141   : > { %8382 = vmatprep.subr.bf16.mxu0 %v8381_v12  ;;  %5150 = vperm.xlu1 %8861, %v5035_v37   ;;  %vm4995_vm9 = vcmp.gt.f32.partialorder %v6567_v33, 0.0  ;;  %v6148_v63 = vld [vmem:[%s9060_s27 + $0x1af] sm:$0xff]  ;;  %v6159_v37 = vld [vmem:[%s9060_s27 + $0x207] sm:$0xff]  ;;  %v6178_v0 = vld [vmem:[%s9060_s27 + $0x29f] sm:$0xff] }
 0x142   : > { %7459 = vmatmul.mubr.f32.gmra.mrb[38].mxu1 %v9757_v22  ;;  %v6562_v22 = vld [vmem:[%s10909_s0 + $0x2a0] sm:$0xff]  ;;  %5153 = vperm.xlu0 %8860, %v5036_v17   ;;  %v11061_v10 = vld [vmem:[#allocation9_spill] sm:$0xff]  ;;  %v6161_v17 = vld [vmem:[%s9060_s27 + $0x217] sm:$0xff] }
 0x143   : > { %7943 = vmatmul.mubr.f32.gmra.mrb[14].mxu0 %v6413_v40  ;;  %7461 = vmatprep.mubr.f32.mxu1 %v9770_v43  ;;  %vm4990_vm4 = vcmp.gt.f32.partialorder %v6562_v22, 0.0  ;;  %v5037_v43 = vsel %vm4989_vm3, 1, %v8926_v15  ;;  %v11059_v40 = vld [vmem:[#allocation7_spill] sm:$0xff]  ;;  %v6164_v22 = vld [vmem:[%s9060_s27 + $0x22f] sm:$0xff]  ;;  %v6467_v33 = vld [vmem:[%s9060_s27 + $0x1c1] sm:$0xff] }
 0x144   : > { %7945 = vmatprep.mubr.f32.mxu0 %v6414_v13  ;;  %8384 = vmatpush3.bf16.msra.mxu0 %v8381_v12  ;;  %v5038_v7 = vsel %vm4990_vm4, 1, %v8926_v15  ;;  %v6573_v12 = vld [vmem:[%s10909_s0 + $0x2f8] sm:$0xff]  ;;  %v11062_v13 = vld [vmem:[#allocation10_spill] sm:$0xff] }
 0x145   : > { %5156 = vperm.xlu1 %8861, %v5037_v43   ;;  %vm5001_vm15 = vcmp.gt.f32.partialorder %v6573_v12, 0.0  ;;  %v6165_v43 = vld [vmem:[%s9060_s27 + $0x237] sm:$0xff] }
 0x146   : > { %7462 = vmatmul.mubr.f32.gmra.mrb[40].mxu1 %v9773_v35  ;;  %5159 = vperm.xlu0 %8860, %v5038_v7   ;;  %v5039_v35 = vsel %vm4991_vm5, 1, %v8926_v15  ;;  %v6445_v7 = vld [vmem:[%s9060_s27 + $0x310] sm:$0xff] }
 0x147   : > { %7946 = vmatmul.mubr.f32.gmra.mrb[16].mxu0 %v6415_v8  ;;  %7464 = vmatprep.mubr.f32.mxu1 %v9786_v11  ;;  %v5040_v11 = vsel %vm4992_vm6, 1, %v8926_v15  ;;  %v10435_v8 = vld [vmem:[%s9060_s27 + $0x2f8] sm:$0xff] }
 0x148   : > { %7948 = vmatprep.mubr.f32.mxu0 %v6416_v2  ;;  %v6444_v2 = vld [vmem:[%s9060_s27 + $0x308] sm:$0xff]  ;;  %v6181_v12 = vld [vmem:[%s9060_s27 + $0x2b7] sm:$0xff] }
 0x149   : > { %5162 = vperm.xlu1 %8861, %v5039_v35   ;;  %v6168_v35 = vld [vmem:[%s9060_s27 + $0x24f] sm:$0xff] }
 0x14a   : > { %7465 = vmatmul.mubr.f32.gmra.mrb[42].mxu1 %v9789_v47  ;;  %5165 = vperm.xlu0 %8860, %v5040_v11   ;;  %v5041_v47 = vsel %vm4993_vm7, 1, %v8926_v15  ;;  %v6464_v11 = vld [vmem:[%s9060_s27 + $0x1a9] sm:$0xff] }
 0x14b   : > { %7949 = vmatmul.mubr.f32.gmra.mrb[18].mxu0 %v6417_v23  ;;  %7467 = vmatprep.mubr.f32.mxu1 %v9798_v56  ;;  %v5042_v56 = vsel %vm4994_vm8, 1, %v8926_v15  ;;  %v6166_v23 = vld [vmem:[%s9060_s27 + $0x23f] sm:$0xff] }
 0x14c   : > { %7951 = vmatprep.mubr.f32.mxu0 %v6418_v18  ;;  %v6463_v18 = vld [vmem:[%s9060_s27 + $0x1a1] sm:$0xff] }
 0x14d   : > { %5168 = vperm.xlu1 %8861, %v5041_v47   ;;  %v6170_v47 = vld [vmem:[%s9060_s27 + $0x25f] sm:$0xff] }
 0x14e   : > { %7468 = vmatmul.mubr.f32.gmra.mrb[44].mxu1 %v9801_v27  ;;  %v6568_v27 = vld [vmem:[%s10909_s0 + $0x2d0] sm:$0xff]  ;;  %5171 = vperm.xlu0 %8860, %v5042_v56   ;;  %v6466_v56 = vld [vmem:[%s9060_s27 + $0x1b9] sm:$0xff] }
 0x14f   : > { %7952 = vmatmul.mubr.f32.gmra.mrb[20].mxu0 %v9842_v50  ;;  %7470 = vmatprep.mubr.f32.mxu1 %v9809_v58  ;;  %vm4996_vm10 = vcmp.gt.f32.partialorder %v6568_v27, 0.0  ;;  %v5043_v58 = vsel %vm4995_vm9, 1, %v8926_v15  ;;  %v6143_v50 = vld [vmem:[%s9060_s27 + $0x187] sm:$0xff]  ;;  %v6172_v27 = vld [vmem:[%s9060_s27 + $0x26f] sm:$0xff] }
 0x150   : > { %7954 = vmatprep.mubr.f32.mxu0 %v9847_v21  ;;  %v5044_v21 = vsel %vm4996_vm10, 1, %v8926_v15 }
 0x151   : > { %5174 = vperm.xlu1 %8861, %v5043_v58   ;;  %v6468_v58 = vld [vmem:[%s9060_s27 + $0x1c9] sm:$0xff] }
 0x152   : > { %7471 = vmatmul.mubr.f32.gmra.mrb[46].mxu1 %v9812_v4  ;;  %v6570_v4 = vld [vmem:[%s10909_s0 + $0x2e0] sm:$0xff]  ;;  %5177 = vperm.xlu0 %8860, %v5044_v21   ;;  %v6469_v21 = vld [vmem:[%s9060_s27 + $0x1d1] sm:$0xff] }
 0x153   : > { %7955 = vmatmul.mubr.f32.gmra.mrb[22].mxu0 %v9859_v34  ;;  %7505 = vmatprep.mubr.f32.mxu1 %v6142_v44  ;;  %vm4998_vm12 = vcmp.gt.f32.partialorder %v6570_v4, 0.0  ;;  %v5045_v34 = vsel %vm4997_vm11, 1, %v8926_v15  ;;  %v6171_v44 = vld [vmem:[%s9060_s27 + $0x267] sm:$0xff]  ;;  %v6470_v4 = vld [vmem:[%s9060_s27 + $0x1d9] sm:$0xff] }
 0x154   : > { %7957 = vmatprep.mubr.f32.mxu0 %v9863_v55  ;;  %v6145_v55 = vld [vmem:[%s9060_s27 + $0x197] sm:$0xff]  ;;  %v5046_v16 = vsel %vm4998_vm12, 1, %v8926_v15 }
 0x155   : > { %5180 = vperm.xlu1 %8861, %v5045_v34   ;;  %v6471_v34 = vld [vmem:[%s9060_s27 + $0x1e1] sm:$0xff] }
 0x156   : > { %7506 = vmatmul.mubr.f32.vlgmr.msra.gmra.mrb[0].mxu1 %v6143_v50  ;;  %5183 = vperm.xlu0 %8860, %v5046_v16   ;;  %v6173_v50 = vld [vmem:[%s9060_s27 + $0x277] sm:$0xff]  ;;  %v6472_v16 = vld [vmem:[%s9060_s27 + $0x1e9] sm:$0xff] }
 0x157   : > { %7958 = vmatmul.mubr.f32.gmra.mrb[24].mxu0 %v9875_v46  ;;  %8393 = vmatpush3.bf16.msra.mxu1 %v11045_v30  ;;  %v11057_v46 = vld [vmem:[#allocation5_spill] sm:$0xff]  ;;  %v5047_v30 = vsel %vm4999_vm13, 1, %v8926_v15 }
 0x158   : > { %7508 = vmatprep.mubr.f32.mxu1 %v6144_v53  ;;  %7960 = vmatprep.mubr.f32.mxu0 %v9879_v45  ;;  %v6147_v45 = vld [vmem:[%s9060_s27 + $0x1a7] sm:$0xff] }
 0x159   : > { %8386 = vmatprep.subr.bf16.mxu1 %v11057_v46  ;;  %5186 = vperm.xlu1 %8861, %v5047_v30   ;;  %v6175_v53 = vld [vmem:[%s9060_s27 + $0x287] sm:$0xff] }
 0x15a   : > { %7509 = vmatmul.mubr.f32.gmra.mrb[2].mxu1 %v6145_v55  ;;  %5189 = vperm.xlu0 %8860, %v5048_v1   ;;  %v6176_v55 = vld [vmem:[%s9060_s27 + $0x28f] sm:$0xff]  ;;  %v6179_v30 = vld [vmem:[%s9060_s27 + $0x2a7] sm:$0xff] }
 0x15b   : > { %7961 = vmatmul.mubr.f32.gmra.mrb[26].mxu0 %v9891_v57  ;;  %7511 = vmatprep.mubr.f32.mxu1 %v6146_v62  ;;  %v5049_v57 = vsel %vm5001_vm15, 1, %v8926_v15  ;;  %v6153_v15 = vld [vmem:[%s9060_s27 + $0x1d7] sm:$0xff]  ;;  %v6180_v1 = vld [vmem:[%s9060_s27 + $0x2af] sm:$0xff] }
 0x15c   : > { %7963 = vmatprep.mubr.f32.mxu0 %v9895_v19  ;;  %8394 = vmatpush3.bf16.msra.mxu1 %v11057_v46  ;;  %v6149_v19 = vld [vmem:[%s9060_s27 + $0x1b7] sm:$0xff] }
 0x15d   : > { %8387 = vmatprep.subr.bf16.mxu1 %v11058_v60  ;;  %5192 = vperm.xlu1 %8861, %v5049_v57   ;;  %v6177_v62 = vld [vmem:[%s9060_s27 + $0x297] sm:$0xff]  ;;  %v6182_v57 = vld [vmem:[%s9060_s27 + $0x2bf] sm:$0xff] }
 0x15e   : > { %7512 = vmatmul.mubr.f32.gmra.mrb[4].mxu1 %v6147_v45  ;;  %v6474_v46 = vld [vmem:[%s9060_s27 + $0x1f9] sm:$0xff]  ;;  %v6475_v45 = vld [vmem:[%s9060_s27 + $0x201] sm:$0xff] }
 0x15f   : > { %7964 = vmatmul.mubr.f32.gmra.mrb[28].mxu0 %v9907_v5  ;;  %7514 = vmatprep.mubr.f32.mxu1 %v6148_v63  ;;  %v6152_v5 = vld [vmem:[%s9060_s27 + $0x1cf] sm:$0xff] }
 0x160   : > { %7966 = vmatprep.mubr.f32.mxu0 %v9911_v38  ;;  %8395 = vmatpush3.bf16.msra.mxu1 %v11058_v60  ;;  %v11060_v38 = vld [vmem:[#allocation8_spill] sm:$0xff]  ;;  %v6476_v63 = vld [vmem:[%s9060_s27 + $0x209] sm:$0xff]  ;;  %v6477_v60 = vld [vmem:[%s9060_s27 + $0x211] sm:$0xff] }
 0x161   : > { %8388 = vmatprep.subr.bf16.mxu1 %v11059_v40 }
 0x162   : > { %7515 = vmatmul.mubr.f32.gmra.mrb[6].mxu1 %v6149_v19  ;;  %v6478_v19 = vld [vmem:[%s9060_s27 + $0x219] sm:$0xff] }
 0x163   : > { %7967 = vmatmul.mubr.f32.gmra.mrb[30].mxu0 %v9923_v24  ;;  %7517 = vmatprep.mubr.f32.mxu1 %v6150_v31  ;;  %v6154_v24 = vld [vmem:[%s9060_s27 + $0x1df] sm:$0xff]  ;;  %v6183_v31 = vld [vmem:[%s9060_s27 + $0x2c7] sm:$0xff] }
 0x164   : > { %7969 = vmatprep.mubr.f32.mxu0 %v9927_v52  ;;  %8396 = vmatpush3.bf16.msra.mxu1 %v11059_v40  ;;  %v6155_v52 = vld [vmem:[%s9060_s27 + $0x1e7] sm:$0xff] }
 0x165   : > { %8389 = vmatprep.subr.bf16.mxu1 %v11060_v38  ;;  %v6479_v40 = vld [vmem:[%s9060_s27 + $0x221] sm:$0xff] }
 0x166   : > { %7518 = vmatmul.mubr.f32.gmra.mrb[8].mxu1 %v6151_v20  ;;  %v6184_v20 = vld [vmem:[%s9060_s27 + $0x2cf] sm:$0xff] }
 0x167   : > { %7970 = vmatmul.mubr.f32.gmra.mrb[32].mxu0 %v9939_v36  ;;  %7520 = vmatprep.mubr.f32.mxu1 %v6152_v5  ;;  %v6156_v36 = vld [vmem:[%s9060_s27 + $0x1ef] sm:$0xff] }
 0x168   : > { %7972 = vmatprep.mubr.f32.mxu0 %v9943_v14  ;;  %8397 = vmatpush3.bf16.msra.mxu1 %v11060_v38  ;;  %v6157_v14 = vld [vmem:[%s9060_s27 + $0x1f7] sm:$0xff]  ;;  %v6480_v5 = vld [vmem:[%s9060_s27 + $0x229] sm:$0xff] }
 0x169   : > { %8390 = vmatprep.subr.bf16.mxu1 %v11061_v10  ;;  %v6185_v38 = vld [vmem:[%s9060_s27 + $0x2d7] sm:$0xff] }
 0x16a   : > { %7521 = vmatmul.mubr.f32.gmra.mrb[10].mxu1 %v6153_v15  ;;  %v6481_v15 = vld [vmem:[%s9060_s27 + $0x231] sm:$0xff] }
 0x16b   : > { %7973 = vmatmul.mubr.f32.gmra.mrb[34].mxu0 %v9951_v39  ;;  %7523 = vmatprep.mubr.f32.mxu1 %v6154_v24  ;;  %v6158_v39 = vld [vmem:[%s9060_s27 + $0x1ff] sm:$0xff] }
 0x16c   : > { %7975 = vmatprep.mubr.f32.mxu0 %v9955_v42  ;;  %8398 = vmatpush3.bf16.msra.mxu1 %v11061_v10  ;;  %v11063_v42 = vld [vmem:[#allocation11_spill] sm:$0xff] }
 0x16d   : > { %8391 = vmatprep.subr.bf16.mxu1 %v11062_v13  ;;  %v6186_v24 = vld [vmem:[%s9060_s27 + $0x2df] sm:$0xff] }
 0x16e   : > { %7524 = vmatmul.mubr.f32.gmra.mrb[12].mxu1 %v6155_v52  ;;  %v6482_v10 = vld [vmem:[%s9060_s27 + $0x239] sm:$0xff]  ;;  %v6483_v52 = vld [vmem:[%s9060_s27 + $0x241] sm:$0xff] }
 0x16f   : > { %7976 = vmatmul.mubr.f32.gmra.mrb[36].mxu0 %v9962_v48  ;;  %7526 = vmatprep.mubr.f32.mxu1 %v6156_v36  ;;  %v6160_v48 = vld [vmem:[%s9060_s27 + $0x20f] sm:$0xff] }
 0x170   : > { %7978 = vmatprep.mubr.f32.mxu0 %v9966_v41  ;;  %8399 = vmatpush3.bf16.msra.mxu1 %v11062_v13  ;;  %v10425_v41 = vld [vmem:[%s9060_s27 + $0x2e8] sm:$0xff]  ;;  %v6485_v13 = vld [vmem:[%s9060_s27 + $0x251] sm:$0xff] }
 0x171   : > { %8392 = vmatprep.subr.bf16.mxu1 %v11063_v42  ;;  %v6484_v36 = vld [vmem:[%s9060_s27 + $0x249] sm:$0xff] }
 0x172   : > { %7527 = vmatmul.mubr.f32.gmra.mrb[14].mxu1 %v6157_v14  ;;  %v6230_v14 = vld [vmem:[%s9060_s27 + $0x240] sm:$0xff] }
 0x173   : > { %7979 = vmatmul.mubr.f32.gmra.mrb[38].mxu0 %v9972_v51  ;;  %7529 = vmatprep.mubr.f32.mxu1 %v6158_v39  ;;  %v10431_v51 = vld [vmem:[%s9060_s27 + $0x2f0] sm:$0xff]  ;;  %v6486_v39 = vld [vmem:[%s9060_s27 + $0x259] sm:$0xff] }
 0x174   : > { %7981 = vmatprep.mubr.f32.mxu0 %v9976_v54  ;;  %8400 = vmatpush3.bf16.msra.mxu1 %v11063_v42  ;;  %v6162_v54 = vld [vmem:[%s9060_s27 + $0x21f] sm:$0xff]  ;;  %v6231_v42 = vld [vmem:[%s9060_s27 + $0x248] sm:$0xff] }
 0x176   : > { %7530 = vmatmul.mubr.f32.gmra.mrb[16].mxu1 %v6159_v37  ;;  %v6487_v37 = vld [vmem:[%s9060_s27 + $0x261] sm:$0xff] }
 0x177   : > { %7982 = vmatmul.mubr.f32.gmra.mrb[40].mxu0 %v9982_v59  ;;  %7532 = vmatprep.mubr.f32.mxu1 %v6160_v48  ;;  %v6443_v59 = vld [vmem:[%s9060_s27 + $0x300] sm:$0xff]  ;;  %v6233_v48 = vld [vmem:[%s9060_s27 + $0x258] sm:$0xff] }
 0x178   : > { %7984 = vmatprep.mubr.f32.mxu0 %v10425_v41 }
 0x17a   : > { %7533 = vmatmul.mubr.f32.gmra.mrb[18].mxu1 %v6161_v17  ;;  %v6489_v17 = vld [vmem:[%s9060_s27 + $0x271] sm:$0xff] }
 0x17b   : > { %7985 = vmatmul.mubr.f32.gmra.mrb[42].mxu0 %v10431_v51  ;;  %7535 = vmatprep.mubr.f32.mxu1 %v6162_v54  ;;  %v6490_v54 = vld [vmem:[%s9060_s27 + $0x279] sm:$0xff] }
 0x17c   : > { %7987 = vmatprep.mubr.f32.mxu0 %v10435_v8 }
 0x17e   : > { %7536 = vmatmul.mubr.f32.gmra.mrb[20].mxu1 %v6163_v26  ;;  %v6235_v26 = vld [vmem:[%s9060_s27 + $0x268] sm:$0xff] }
 0x17f   : > { %7988 = vmatmul.mubr.f32.gmra.mrb[44].mxu0 %v6443_v59  ;;  %7538 = vmatprep.mubr.f32.mxu1 %v6164_v22  ;;  %v6491_v59 = vld [vmem:[%s9060_s27 + $0x281] sm:$0xff]  ;;  %v6236_v22 = vld [vmem:[%s9060_s27 + $0x270] sm:$0xff] }
 0x180   : > { %7990 = vmatprep.mubr.f32.mxu0 %v6444_v2  ;;  %v6492_v2 = vld [vmem:[%s9060_s27 + $0x289] sm:$0xff] }
 0x182   : > { %7539 = vmatmul.mubr.f32.gmra.mrb[22].mxu1 %v6165_v43  ;;  %v6237_v43 = vld [vmem:[%s9060_s27 + $0x278] sm:$0xff] }
 0x183   : > { %7991 = vmatmul.mubr.f32.gmra.mrb[46].mxu0 %v6445_v7  ;;  %7541 = vmatprep.mubr.f32.mxu1 %v6166_v23  ;;  %v6493_v7 = vld [vmem:[%s9060_s27 + $0x291] sm:$0xff]  ;;  %v6238_v23 = vld [vmem:[%s9060_s27 + $0x280] sm:$0xff] }
 0x184   : > { %8025 = vmatprep.mubr.f32.mxu0 %v6462_v6  ;;  %v6494_v6 = vld [vmem:[%s9060_s27 + $0x299] sm:$0xff] }
 0x186   : > { %7542 = vmatmul.mubr.f32.gmra.mrb[24].mxu1 %v6167_v9  ;;  %v6239_v9 = vld [vmem:[%s9060_s27 + $0x288] sm:$0xff] }
 0x187   : > { %8026 = vmatmul.mubr.f32.vlgmr.msra.gmra.mrb[0].mxu0 %v6463_v18  ;;  %7544 = vmatprep.mubr.f32.mxu1 %v6168_v35  ;;  %v6495_v18 = vld [vmem:[%s9060_s27 + $0x2a1] sm:$0xff]  ;;  %v6240_v35 = vld [vmem:[%s9060_s27 + $0x290] sm:$0xff] }
 0x188   : > { %8028 = vmatprep.mubr.f32.mxu0 %v6464_v11  ;;  %v6496_v11 = vld [vmem:[%s9060_s27 + $0x2a9] sm:$0xff] }
 0x18a   : > { %7545 = vmatmul.mubr.f32.gmra.mrb[26].mxu1 %v6169_v29  ;;  %v6241_v29 = vld [vmem:[%s9060_s27 + $0x298] sm:$0xff] }
 0x18b   : > { %8029 = vmatmul.mubr.f32.gmra.mrb[2].mxu0 %v6465_v49  ;;  %7547 = vmatprep.mubr.f32.mxu1 %v6170_v47  ;;  %v6497_v49 = vld [vmem:[%s9060_s27 + $0x2b1] sm:$0xff]  ;;  %v6242_v47 = vld [vmem:[%s9060_s27 + $0x2a0] sm:$0xff] }
 0x18c   : > { %8031 = vmatprep.mubr.f32.mxu0 %v6466_v56  ;;  %v6498_v56 = vld [vmem:[%s9060_s27 + $0x2b9] sm:$0xff] }
 0x18e   : > { %7548 = vmatmul.mubr.f32.gmra.mrb[28].mxu1 %v6171_v44  ;;  %v6243_v44 = vld [vmem:[%s9060_s27 + $0x2a8] sm:$0xff] }
 0x18f   : > { %8032 = vmatmul.mubr.f32.gmra.mrb[4].mxu0 %v6467_v33  ;;  %7550 = vmatprep.mubr.f32.mxu1 %v6172_v27  ;;  %v6499_v33 = vld [vmem:[%s9060_s27 + $0x2c1] sm:$0xff]  ;;  %v6244_v27 = vld [vmem:[%s9060_s27 + $0x2b0] sm:$0xff] }
 0x190   : > { %8034 = vmatprep.mubr.f32.mxu0 %v6468_v58  ;;  %v6500_v58 = vld [vmem:[%s9060_s27 + $0x2c9] sm:$0xff] }
 0x192   : > { %7551 = vmatmul.mubr.f32.gmra.mrb[30].mxu1 %v6173_v50  ;;  %v6245_v50 = vld [vmem:[%s9060_s27 + $0x2b8] sm:$0xff] }
 0x193   : > { %8035 = vmatmul.mubr.f32.gmra.mrb[6].mxu0 %v6469_v21  ;;  %7553 = vmatprep.mubr.f32.mxu1 %v6174_v3  ;;  %v6501_v21 = vld [vmem:[%s9060_s27 + $0x2d1] sm:$0xff]  ;;  %v6246_v3 = vld [vmem:[%s9060_s27 + $0x2c0] sm:$0xff] }
 0x194   : > { %8037 = vmatprep.mubr.f32.mxu0 %v6470_v4  ;;  %v6502_v4 = vld [vmem:[%s9060_s27 + $0x2d9] sm:$0xff] }
 0x196   : > { %7554 = vmatmul.mubr.f32.gmra.mrb[32].mxu1 %v6175_v53  ;;  %v6247_v53 = vld [vmem:[%s9060_s27 + $0x2c8] sm:$0xff] }
 0x197   : > { %8038 = vmatmul.mubr.f32.gmra.mrb[8].mxu0 %v6471_v34  ;;  %7556 = vmatprep.mubr.f32.mxu1 %v6176_v55  ;;  %v6503_v34 = vld [vmem:[%s9060_s27 + $0x2e1] sm:$0xff]  ;;  %v6248_v55 = vld [vmem:[%s9060_s27 + $0x2d0] sm:$0xff] }
 0x198   : > { %8040 = vmatprep.mubr.f32.mxu0 %v6472_v16  ;;  %v6504_v16 = vld [vmem:[%s9060_s27 + $0x2e9] sm:$0xff] }
 0x19a   : > { %7557 = vmatmul.mubr.f32.gmra.mrb[34].mxu1 %v6177_v62  ;;  %v6249_v62 = vld [vmem:[%s9060_s27 + $0x2d8] sm:$0xff] }
 0x19b   : > { %8041 = vmatmul.mubr.f32.gmra.mrb[10].mxu0 %v6473_v32  ;;  %7559 = vmatprep.mubr.f32.mxu1 %v6178_v0  ;;  %v6505_v32 = vld [vmem:[%s9060_s27 + $0x2f1] sm:$0xff]  ;;  %v6250_v0 = vld [vmem:[%s9060_s27 + $0x2e0] sm:$0xff] }
 0x19c   : > { %8043 = vmatprep.mubr.f32.mxu0 %v6474_v46  ;;  %v6506_v46 = vld [vmem:[%s9060_s27 + $0x2f9] sm:$0xff] }
 0x19e   : > { %7560 = vmatmul.mubr.f32.gmra.mrb[36].mxu1 %v6179_v30  ;;  %v6507_v30 = vld [vmem:[%s9060_s27 + $0x301] sm:$0xff] }
 0x19f   : > { %8044 = vmatmul.mubr.f32.gmra.mrb[12].mxu0 %v6475_v45  ;;  %7562 = vmatprep.mubr.f32.mxu1 %v6180_v1  ;;  %v6508_v45 = vld [vmem:[%s9060_s27 + $0x309] sm:$0xff]  ;;  %v6509_v1 = vld [vmem:[%s9060_s27 + $0x311] sm:$0xff] }
 0x1a0   : > { %8046 = vmatprep.mubr.f32.mxu0 %v6476_v63  ;;  %v5052_v63 = vpop.permute.xlu0 %5051 }
 0x1a1   : > { %vm5194_vm1 = vcmp.eq.s32.totalorder %v5052_v63, 1 }
 0x1a2   : > { %7563 = vmatmul.mubr.f32.gmra.mrb[38].mxu1 %v6181_v12 }
 0x1a3   : > { %8047 = vmatmul.mubr.f32.gmra.mrb[14].mxu0 %v6477_v60  ;;  %7565 = vmatprep.mubr.f32.mxu1 %v6182_v57  ;;  %v10541_v57 = vpop.permute.xlu1 %5057 }
 0x1a4   : > { %8049 = vmatprep.mubr.f32.mxu0 %v6478_v19  ;;  %vm5196_vm3 = vcmp.eq.s32.totalorder %v10541_v57, 1 }
 0x1a6   : > { %7566 = vmatmul.mubr.f32.gmra.mrb[40].mxu1 %v6183_v31 }
 0x1a7   : > { %8050 = vmatmul.mubr.f32.gmra.mrb[16].mxu0 %v6479_v40  ;;  %7568 = vmatprep.mubr.f32.mxu1 %v6184_v20  ;;  %v5055_v40 = vpop.permute.xlu0 %5054  ;;  %v5061_v20 = vpop.permute.xlu1 %5060 }
 0x1a8   : > { %8052 = vmatprep.mubr.f32.mxu0 %v6480_v5  ;;  %vm5195_vm0 = vcmp.eq.s32.totalorder %v5055_v40, 1  ;;  %vm5197_vm2 = vcmp.eq.s32.totalorder %v5061_v20, 1 }
 0x1aa   : > { %7569 = vmatmul.mubr.f32.gmra.mrb[42].mxu1 %v6185_v38 }
 0x1ab   : > { %8053 = vmatmul.mubr.f32.gmra.mrb[18].mxu0 %v6481_v15  ;;  %7571 = vmatprep.mubr.f32.mxu1 %v6186_v24  ;;  %v10547_v38 = vpop.permute.xlu0 %5063 }
 0x1ac   : > { %8055 = vmatprep.mubr.f32.mxu0 %v6482_v10  ;;  %vm5198_vm4 = vcmp.eq.s32.totalorder %v10547_v38, 1 }
 0x1ae   : > { %7572 = vmatmul.mubr.f32.gmra.mrb[44].mxu1 %v10117_v61  ;;  %v6232_v61 = vld [vmem:[%s9060_s27 + $0x250] sm:$0xff] }
 0x1af   : > { %8056 = vmatmul.mubr.f32.gmra.mrb[20].mxu0 %v6483_v52  ;;  %7574 = vmatprep.mubr.f32.mxu1 %v10127_v28  ;;  %v6488_v28 = vld [vmem:[%s9060_s27 + $0x269] sm:$0xff]  ;;  %v10559_v52 = vpop.permute.xlu0 %5069 }
 0x1b0   : > { %8058 = vmatprep.mubr.f32.mxu0 %v6484_v36  ;;  %vm5200_vm6 = vcmp.eq.s32.totalorder %v10559_v52, 1 }
 0x1b2   : > { %7575 = vmatmul.mubr.f32.gmra.mrb[46].mxu1 %v10136_v25  ;;  %v6234_v25 = vld [vmem:[%s9060_s27 + $0x260] sm:$0xff]  ;;  %s224_s27 = sand.u32 1, %s8900_s15   ;;  %s5965_s15 = sshll.u32 %s9026_s26, 3 }
 0x1b3   : > { %8059 = vmatmul.mubr.f32.gmra.mrb[22].mxu0 %v6485_v13  ;;  %7645 = vmatprep.mubr.f32.mxu1 %v6230_v14  ;;  %s8785_s28 = smul.u32 384, %s224_s27  ;;  %s261_s6 = scalar_lea.vmem %s10913_s4, %s5965_s15 }
 0x1b4   : > { %8061 = vmatprep.mubr.f32.mxu0 %v6486_v39  ;;  %v10567_v39 = vpop.permute.xlu0 %5075  ;;  %s10776_s26 = scalar_lea.vmem (%p8984_p3), %s10912_s3, %s6574_s7 }
 0x1b5   : > { %s10612_s29 = scalar_lea.vmem [#allocation3], %s8785_s28   ;;  %vm5202_vm8 = vcmp.eq.s32.totalorder %v10567_v39, 1  ;;  %s5847_s10 = scalar_lea.vmem (%p8984_p3), %s10776_s26, 384  }
 0x1b6   : > { %7646 = vmatmul.mubr.f32.vlgmr.msra.gmra.mrb[24].mxu1 %v6231_v42  ;;  %s11064_s11 = smov (%p8984_p3), %s5847_s10 }
 0x1b7   : > { %8062 = vmatmul.mubr.f32.gmra.mrb[24].mxu0 %v6487_v37  ;;  %7648 = vmatprep.mubr.f32.mxu1 %v6232_v61 }
 0x1b8   : > { %8064 = vmatprep.mubr.f32.mxu0 %v6488_v28 }
 0x1ba   : > { %7649 = vmatmul.mubr.f32.gmra.mrb[26].mxu1 %v6233_v48 }
 0x1bb   : > { %8065 = vmatmul.mubr.f32.gmra.mrb[26].mxu0 %v6489_v17  ;;  %7651 = vmatprep.mubr.f32.mxu1 %v6234_v25  ;;  %v10579_v17 = vpop.permute.xlu0 %5081 }
 0x1bc   : > { %8067 = vmatprep.mubr.f32.mxu0 %v6490_v54  ;;  %vm5204_vm10 = vcmp.eq.s32.totalorder %v10579_v17, 1 }
 0x1be   : > { %7652 = vmatmul.mubr.f32.gmra.mrb[28].mxu1 %v6235_v26 }
 0x1bf   : > { %8068 = vmatmul.mubr.f32.gmra.mrb[28].mxu0 %v6491_v59  ;;  %7654 = vmatprep.mubr.f32.mxu1 %v6236_v22  ;;  %v10587_v59 = vpop.permute.xlu0 %5087 }
 0x1c0   : > { %8070 = vmatprep.mubr.f32.mxu0 %v6492_v2  ;;  %vm5206_vm12 = vcmp.eq.s32.totalorder %v10587_v59, 1 }
 0x1c2   : > { %7655 = vmatmul.mubr.f32.gmra.mrb[30].mxu1 %v6237_v43 }
 0x1c3   : > { %8071 = vmatmul.mubr.f32.gmra.mrb[30].mxu0 %v6493_v7  ;;  %7657 = vmatprep.mubr.f32.mxu1 %v6238_v23 }
 0x1c4   : > { %8073 = vmatprep.mubr.f32.mxu0 %v6494_v6  ;;  %v10599_v6 = vpop.permute.xlu0 %5093 }
 0x1c5   : > { %vm5208_vm14 = vcmp.eq.s32.totalorder %v10599_v6, 1 }
 0x1c6   : > { %7658 = vmatmul.mubr.f32.gmra.mrb[32].mxu1 %v6239_v9 }
 0x1c7   : > { %8074 = vmatmul.mubr.f32.gmra.mrb[32].mxu0 %v6495_v18  ;;  %7660 = vmatprep.mubr.f32.mxu1 %v6240_v35 }
 0x1c8   : > { %8076 = vmatprep.mubr.f32.mxu0 %v6496_v11  ;;  %v10608_v11 = vpop.permute.xlu0 %5099 }
 0x1ca   : > { %7661 = vmatmul.mubr.f32.gmra.mrb[34].mxu1 %v6241_v29 }
 0x1cb   : > { %8077 = vmatmul.mubr.f32.gmra.mrb[34].mxu0 %v6497_v49  ;;  %7663 = vmatprep.mubr.f32.mxu1 %v6242_v47 }
 0x1cc   : > { %8079 = vmatprep.mubr.f32.mxu0 %v6498_v56 }
 0x1ce   : > { %7664 = vmatmul.mubr.f32.gmra.mrb[36].mxu1 %v6243_v44 }
 0x1cf   : > { %8080 = vmatmul.mubr.f32.gmra.mrb[36].mxu0 %v6499_v33  ;;  %7666 = vmatprep.mubr.f32.mxu1 %v6244_v27 }
 0x1d0   : > { %8082 = vmatprep.mubr.f32.mxu0 %v6500_v58 }
 0x1d2   : > { %7667 = vmatmul.mubr.f32.gmra.mrb[38].mxu1 %v6245_v50 }
 0x1d3   : > { %8083 = vmatmul.mubr.f32.gmra.mrb[38].mxu0 %v6501_v21  ;;  %7669 = vmatprep.mubr.f32.mxu1 %v6246_v3  ;;  %v10616_v21 = vpop.permute.xlu0 %5105 }
 0x1d4   : > { %8085 = vmatprep.mubr.f32.mxu0 %v6502_v4 }
 0x1d6   : > { %7670 = vmatmul.mubr.f32.gmra.mrb[40].mxu1 %v6247_v53 }
 0x1d7   : > { %8086 = vmatmul.mubr.f32.gmra.mrb[40].mxu0 %v6503_v34  ;;  %7672 = vmatprep.mubr.f32.mxu1 %v6248_v55 }
 0x1d8   : > { %8088 = vmatprep.mubr.f32.mxu0 %v6504_v16 }
 0x1da   : > { %7673 = vmatmul.mubr.f32.gmra.mrb[42].mxu1 %v6249_v62 }
 0x1db   : > { %8089 = vmatmul.mubr.f32.gmra.mrb[42].mxu0 %v6505_v32  ;;  %7675 = vmatprep.mubr.f32.mxu1 %v6250_v0 }
 0x1dc   : > { %8091 = vmatprep.mubr.f32.mxu0 %v6506_v46 }
 0x1de   : > { %7676 = vmatmul.mubr.f32.gmra.mrb[44].mxu1 %v10425_v41 }
 0x1df   : > { %8092 = vmatmul.mubr.f32.gmra.mrb[44].mxu0 %v6507_v30  ;;  %7678 = vmatprep.mubr.f32.mxu1 %v10431_v51 }
 0x1e0   : > { %8094 = vmatprep.mubr.f32.mxu0 %v6508_v45 }
 0x1e2   : > { %7679 = vmatmul.mubr.f32.gmra.mrb[46].mxu1 %v10435_v8  ;;  %v10553_v8 = vpop.permute.xlu1 %5066 }
 0x1e3   : > { %8095 = vmatmul.mubr.f32.gmra.mrb[46].mxu0 %v6509_v1  ;;  %vm5199_vm5 = vcmp.eq.s32.totalorder %v10553_v8, 1 }
 0x1e6   : > { %v10561_v36 = vpop.permute.xlu1 %5072 }
 0x1e7   : > { %vm5201_vm7 = vcmp.eq.s32.totalorder %v10561_v36, 1 }
 0x1ea   : > { %v10573_v61 = vpop.permute.xlu1 %5078 }
 0x1eb   : > { %vm5203_vm9 = vcmp.eq.s32.totalorder %v10573_v61, 1 }
 0x1ee   : > { %v10581_v25 = vpop.permute.xlu1 %5084 }
 0x1ef   : > { %vm5205_vm11 = vcmp.eq.s32.totalorder %v10581_v25, 1 }
 0x1f2   : > { %v10593_v43 = vpop.permute.xlu1 %5090 }
 0x1f3   : > { %vm5207_vm13 = vcmp.eq.s32.totalorder %v10593_v43, 1 }
 0x1f6   : > { %v10602_v9 = vpop.permute.xlu1 %5096 }
 0x1f7   : > { %vm5209_vm15 = vcmp.eq.s32.totalorder %v10602_v9, 1 }
 0x1fa   : > { %v10610_v49 = vpop.permute.xlu1 %5102 }
 0x1fe   : > { %v10619_v16 = vpop.permute.xlu1 %5108 }
 0x229   : > { %v7507_v12 = vpop.f32.mrb[0].mxu1 }
 0x22a   : > { %v1847_v60 = vpop.f32.mrb[1].mxu1 }
 0x22d   : > { %v7510_v19 = vpop.f32.mrb[2].mxu1 }
 0x22e   : > { %v1857_v31 = vpop.f32.mrb[3].mxu1 }
 0x231   : > { %v10543_v5 = vpop.f32.mrb[4].mxu1 }
 0x232   : > { %v10545_v41 = vpop.f32.mrb[5].mxu1 }
 0x235   : > { %v10549_v51 = vpop.f32.mrb[6].mxu1 }
 0x236   : > { %v10551_v15 = vpop.f32.mrb[7].mxu1 }
 0x239   : > { %v10555_v24 = vpop.f32.mrb[8].mxu1 }
 0x23a   : > { %v10557_v10 = vpop.f32.mrb[9].mxu1 }
 0x23d   : > { %v10563_v13 = vpop.f32.mrb[10].mxu1 }
 0x23e   : > { %v10565_v14 = vpop.f32.mrb[11].mxu1 }
 0x241   : > { %v10569_v42 = vpop.f32.mrb[12].mxu1 }
 0x242   : > { %v10571_v37 = vpop.f32.mrb[13].mxu1 }
 0x245   : > { %v10575_v28 = vpop.f32.mrb[14].mxu1 }
 0x246   : > { %v10577_v48 = vpop.f32.mrb[15].mxu1 }
 0x249   : > { %v10583_v54 = vpop.f32.mrb[16].mxu1 }
 0x24a   : > { %v10585_v26 = vpop.f32.mrb[17].mxu1 }
 0x24d   : > { %v10589_v22 = vpop.f32.mrb[18].mxu1 }
 0x24e   : > { %v10591_v2 = vpop.f32.mrb[19].mxu1 }
 0x251   : > { %v10595_v7 = vpop.f32.mrb[20].mxu1 }
 0x252   : > { %v10597_v23 = vpop.f32.mrb[21].mxu1 }
 0x255   : > { %v10604_v18 = vpop.f32.mrb[22].mxu1 }
 0x256   : > { %v10606_v35 = vpop.f32.mrb[23].mxu1 }
 0x25a   : > { %v8027_v29 = vpop.f32.mrb[0].mxu0 }
 0x25b   : > { %v8401_v47 = vadd.f32 %v8027_v29, %v7507_v12  ;;  %v4427_v56 = vpop.f32.mrb[1].mxu0 }
 0x25c   : > { %v8402_v44 = vadd.f32 %v4427_v56, %v1847_v60  ;;  %v10627_v60 = vpop.permute.xlu0 %5111 }
 0x25d   : > { %4859 = vst [vmem:[%s10612_s29 + $0x8] sm:$0xff] %v8401_v47  ;;  %v5243_v33 = vsel %vm5195_vm0, %v8401_v47, 0.0  ;;  %vm5210_vm0 = vcmp.eq.s32.totalorder %v10608_v11, 1 }
 0x25e   : > { %v5344_v27 = vmul.f32 %v5243_v33, %v5243_v33  ;;  %4858 = vst [vmem:[%s10612_s29] sm:$0xff] %v8402_v44  ;;  %v5242_v58 = vsel %vm5194_vm1, %v8402_v44, 0.0  ;;  %v8030_v50 = vpop.f32.mrb[2].mxu0  ;;  %vm5211_vm1 = vcmp.eq.s32.totalorder %v10610_v49, 1 }
 0x25f   : > { %v5290_v3 = vadd.f32 %v5243_v33, %v5242_v58  ;;  %v5343_v4 = vmul.f32 %v5242_v58, %v5242_v58  ;;  %v8403_v53 = vadd.f32 %v8030_v50, %v7510_v19  ;;  %v4437_v34 = vpop.f32.mrb[3].mxu0 }
 0x260   : > { %v8404_v55 = vadd.f32 %v4437_v34, %v1857_v31 }
 0x261   : > { %v5391_v62 = vadd.f32 %v5344_v27, %v5343_v4  ;;  %4861 = vst [vmem:[%s10612_s29 + $0x18] sm:$0xff] %v8403_v53  ;;  %v5245_v32 = vsel %vm5197_vm2, %v8403_v53, 0.0  ;;  %v10639_v53 = vpop.permute.xlu0 %5117  ;;  %vm5212_vm2 = vcmp.eq.s32.totalorder %v10616_v21, 1 }
 0x262   : > { %4860 = vst [vmem:[%s10612_s29 + $0x10] sm:$0xff] %v8404_v55  ;;  %v5244_v0 = vsel %vm5196_vm3, %v8404_v55, 0.0  ;;  %v8033_v46 = vpop.f32.mrb[4].mxu0  ;;  %v5346_v57 = vmul.f32 %v5245_v32, %v5245_v32  ;;  %vm5213_vm3 = vcmp.eq.s32.totalorder %v10619_v16, 1 }
 0x263   : > { %v5291_v30 = vadd.f32 %v5290_v3, %v5244_v0  ;;  %v5345_v45 = vmul.f32 %v5244_v0, %v5244_v0  ;;  %v8405_v1 = vadd.f32 %v8033_v46, %v10543_v5  ;;  %v4447_v63 = vpop.f32.mrb[5].mxu0  ;;  %v10631_v5 = vpop.permute.xlu1 %5114 }
 0x264   : > { %v8406_v12 = vadd.f32 %v4447_v63, %v10545_v41 }
 0x265   : > { %v5392_v19 = vadd.f32 %v5391_v62, %v5345_v45  ;;  %4863 = vst [vmem:[%s10612_s29 + $0x28] sm:$0xff] %v8405_v1  ;;  %v5292_v31 = vadd.f32 %v5291_v30, %v5245_v32  ;;  %v5247_v40 = vsel %vm5199_vm5, %v8405_v1, 0.0  ;;  %vm5215_vm5 = vcmp.eq.s32.totalorder %v10631_v5, 1 }
 0x266   : > { %4862 = vst [vmem:[%s10612_s29 + $0x20] sm:$0xff] %v8406_v12  ;;  %v5246_v20 = vsel %vm5198_vm4, %v8406_v12, 0.0  ;;  %v8036_v29 = vpop.f32.mrb[6].mxu0  ;;  %v5348_v33 = vmul.f32 %v5247_v40, %v5247_v40  ;;  %vm5214_vm4 = vcmp.eq.s32.totalorder %v10627_v60, 1 }
 0x267   : > { %v5293_v47 = vadd.f32 %v5292_v31, %v5246_v20  ;;  %v5347_v38 = vmul.f32 %v5246_v20, %v5246_v20  ;;  %v5393_v56 = vadd.f32 %v5392_v19, %v5346_v57  ;;  %v8407_v41 = vadd.f32 %v8036_v29, %v10549_v51  ;;  %v4457_v8 = vpop.f32.mrb[7].mxu0  ;;  %v10645_v62 = vpop.permute.xlu1 %5120 }
 0x268   : > { %v8408_v44 = vadd.f32 %v4457_v8, %v10551_v15  ;;  %v10653_v57 = vpop.permute.xlu0 %5123 }
 0x269   : > { %v5394_v27 = vadd.f32 %v5393_v56, %v5347_v38  ;;  %4865 = vst [vmem:[%s10612_s29 + $0x38] sm:$0xff] %v8407_v41  ;;  %v5294_v58 = vadd.f32 %v5293_v47, %v5247_v40  ;;  %v5249_v50 = vsel %vm5201_vm7, %v8407_v41, 0.0  ;;  %vm5217_vm7 = vcmp.eq.s32.totalorder %v10645_v62, 1 }
 0x26a   : > { %4864 = vst [vmem:[%s10612_s29 + $0x30] sm:$0xff] %v8408_v44  ;;  %v5248_v3 = vsel %vm5200_vm6, %v8408_v44, 0.0  ;;  %v8039_v4 = vpop.f32.mrb[8].mxu0  ;;  %v5350_v32 = vmul.f32 %v5249_v50, %v5249_v50  ;;  %vm5216_vm6 = vcmp.eq.s32.totalorder %v10639_v53, 1 }
 0x26b   : > { %v5295_v51 = vadd.f32 %v5294_v58, %v5248_v3  ;;  %v5349_v34 = vmul.f32 %v5248_v3, %v5248_v3  ;;  %v5395_v55 = vadd.f32 %v5394_v27, %v5348_v33  ;;  %v8409_v52 = vadd.f32 %v8039_v4, %v10555_v24  ;;  %v4467_v15 = vpop.f32.mrb[9].mxu0 }
 0x26c   : > { %v8410_v36 = vadd.f32 %v4467_v15, %v10557_v10  ;;  %v10665_v3 = vpop.permute.xlu0 %5129 }
 0x26d   : > { %v5396_v0 = vadd.f32 %v5395_v55, %v5349_v34  ;;  %4867 = vst [vmem:[%s10612_s29 + $0x48] sm:$0xff] %v8409_v52  ;;  %v5296_v46 = vadd.f32 %v5295_v51, %v5249_v50  ;;  %v5251_v30 = vsel %vm5203_vm9, %v8409_v52, 0.0 }
 0x26e   : > { %4866 = vst [vmem:[%s10612_s29 + $0x40] sm:$0xff] %v8410_v36  ;;  %v5250_v45 = vsel %vm5202_vm8, %v8410_v36, 0.0  ;;  %v8042_v1 = vpop.f32.mrb[10].mxu0  ;;  %v5352_v19 = vmul.f32 %v5251_v30, %v5251_v30  ;;  %vm5218_vm8 = vcmp.eq.s32.totalorder %v10653_v57, 1 }
 0x26f   : > { %v5297_v24 = vadd.f32 %v5296_v46, %v5250_v45  ;;  %v5351_v63 = vmul.f32 %v5250_v45, %v5250_v45  ;;  %v5397_v12 = vadd.f32 %v5396_v0, %v5350_v32  ;;  %v8411_v39 = vadd.f32 %v8042_v1, %v10563_v13  ;;  %v4477_v10 = vpop.f32.mrb[11].mxu0  ;;  %v10657_v13 = vpop.permute.xlu1 %5126 }
 0x270   : > { %v8412_v61 = vadd.f32 %v4477_v10, %v10565_v14  ;;  %v10679_v45 = vpop.permute.xlu0 %5135  ;;  %vm5219_vm9 = vcmp.eq.s32.totalorder %v10657_v13, 1 }
 0x271   : > { %v5398_v31 = vadd.f32 %v5397_v12, %v5351_v63  ;;  %4869 = vst [vmem:[%s10612_s29 + $0x58] sm:$0xff] %v8411_v39  ;;  %v5298_v40 = vadd.f32 %v5297_v24, %v5251_v30  ;;  %v5253_v20 = vsel %vm5205_vm11, %v8411_v39, 0.0 }
 0x272   : > { %4868 = vst [vmem:[%s10612_s29 + $0x50] sm:$0xff] %v8412_v61  ;;  %v5252_v29 = vsel %vm5204_vm10, %v8412_v61, 0.0  ;;  %v8045_v47 = vpop.f32.mrb[12].mxu0  ;;  %v5354_v8 = vmul.f32 %v5253_v20, %v5253_v20  ;;  %vm5220_vm10 = vcmp.eq.s32.totalorder %v10665_v3, 1 }
 0x273   : > { %v5299_v38 = vadd.f32 %v5298_v40, %v5252_v29  ;;  %v5353_v17 = vmul.f32 %v5252_v29, %v5252_v29  ;;  %v5399_v56 = vadd.f32 %v5398_v31, %v5352_v19  ;;  %v8413_v14 = vadd.f32 %v8045_v47, %v10569_v42  ;;  %v4487_v25 = vpop.f32.mrb[13].mxu0  ;;  %v10671_v34 = vpop.permute.xlu1 %5132 }
 0x274   : > { %v8414_v41 = vadd.f32 %v4487_v25, %v10571_v37  ;;  %vm5221_vm11 = vcmp.eq.s32.totalorder %v10671_v34, 1 }
 0x275   : > { %v5400_v44 = vadd.f32 %v5399_v56, %v5353_v17  ;;  %4871 = vst [vmem:[%s10612_s29 + $0x68] sm:$0xff] %v8413_v14  ;;  %v5300_v33 = vadd.f32 %v5299_v38, %v5253_v20  ;;  %v5255_v27 = vsel %vm5207_vm13, %v8413_v14, 0.0  ;;  %v10691_v56 = vpop.permute.xlu0 %5141 }
 0x276   : > { %4870 = vst [vmem:[%s10612_s29 + $0x60] sm:$0xff] %v8414_v41  ;;  %v5254_v58 = vsel %vm5206_vm12, %v8414_v41, 0.0  ;;  %v8048_v50 = vpop.f32.mrb[14].mxu0  ;;  %v5356_v55 = vmul.f32 %v5255_v27, %v5255_v27  ;;  %vm5222_vm12 = vcmp.eq.s32.totalorder %v10679_v45, 1 }
 0x277   : > { %v5301_v42 = vadd.f32 %v5300_v33, %v5254_v58  ;;  %v5355_v4 = vmul.f32 %v5254_v58, %v5254_v58  ;;  %v5401_v51 = vadd.f32 %v5400_v44, %v5354_v8  ;;  %v8415_v59 = vadd.f32 %v8048_v50, %v10575_v28  ;;  %v4497_v37 = vpop.f32.mrb[15].mxu0 }
 0x278   : > { %v8416_v43 = vadd.f32 %v4497_v37, %v10577_v48 }
 0x279   : > { %v5402_v52 = vadd.f32 %v5401_v51, %v5355_v4  ;;  %4873 = vst [vmem:[%s10612_s29 + $0x78] sm:$0xff] %v8415_v59  ;;  %v5302_v15 = vadd.f32 %v5301_v42, %v5255_v27  ;;  %v5257_v36 = vsel %vm5209_vm15, %v8415_v59, 0.0  ;;  %v10705_v51 = vpop.permute.xlu0 %5147 }
 0x27a   : > { %4872 = vst [vmem:[%s10612_s29 + $0x70] sm:$0xff] %v8416_v43  ;;  %v5256_v32 = vsel %vm5208_vm14, %v8416_v43, 0.0  ;;  %v8051_v0 = vpop.f32.mrb[16].mxu0  ;;  %v5358_v1 = vmul.f32 %v5257_v36, %v5257_v36  ;;  %vm5224_vm14 = vcmp.eq.s32.totalorder %v10691_v56, 1 }
 0x27b   : > { %v5303_v28 = vadd.f32 %v5302_v15, %v5256_v32  ;;  %v5357_v46 = vmul.f32 %v5256_v32, %v5256_v32  ;;  %v5403_v30 = vadd.f32 %v5402_v52, %v5356_v55  ;;  %v8417_v6 = vadd.f32 %v8051_v0, %v10583_v54  ;;  %v4507_v48 = vpop.f32.mrb[17].mxu0  ;;  %v10683_v54 = vpop.permute.xlu1 %5138 }
 0x27c   : > { %v8418_v9 = vadd.f32 %v4507_v48, %v10585_v26  ;;  %vm5223_vm13 = vcmp.eq.s32.totalorder %v10683_v54, 1 }
 0x27d   : > { %v5404_v24 = vadd.f32 %v5403_v30, %v5357_v46  ;;  %4875 = vst [vmem:[%s10612_s29 + $0x88] sm:$0xff] %v8417_v6  ;;  %v5304_v63 = vadd.f32 %v5303_v28, %v5257_v36  ;;  %v5259_v12 = vsel %vm5211_vm1, %v8417_v6, 0.0 }
 0x27e   : > { %4874 = vst [vmem:[%s10612_s29 + $0x80] sm:$0xff] %v8418_v9  ;;  %v5258_v39 = vsel %vm5210_vm0, %v8418_v9, 0.0  ;;  %v8054_v10 = vpop.f32.mrb[18].mxu0  ;;  %v5360_v40 = vmul.f32 %v5259_v12, %v5259_v12  ;;  %vm5226_vm0 = vcmp.eq.s32.totalorder %v10705_v51, 1 }
 0x27f   : > { %v5305_v61 = vadd.f32 %v5304_v63, %v5258_v39  ;;  %v5359_v11 = vmul.f32 %v5258_v39, %v5258_v39  ;;  %v5405_v19 = vadd.f32 %v5404_v24, %v5358_v1  ;;  %v8419_v26 = vadd.f32 %v8054_v10, %v10589_v22  ;;  %v4517_v49 = vpop.f32.mrb[19].mxu0  ;;  %v10697_v41 = vpop.permute.xlu1 %5144 }
 0x280   : > { %v8420_v31 = vadd.f32 %v4517_v49, %v10591_v2  ;;  %v10715_v39 = vpop.permute.xlu0 %5153  ;;  %vm5225_vm15 = vcmp.eq.s32.totalorder %v10697_v41, 1 }
 0x281   : > { %v5406_v20 = vadd.f32 %v5405_v19, %v5359_v11  ;;  %4877 = vst [vmem:[%s10612_s29 + $0x98] sm:$0xff] %v8419_v26  ;;  %v5306_v29 = vadd.f32 %v5305_v61, %v5259_v12  ;;  %v5261_v47 = vsel %vm5213_vm3, %v8419_v26, 0.0 }
 0x282   : > { %4876 = vst [vmem:[%s10612_s29 + $0x90] sm:$0xff] %v8420_v31  ;;  %v5260_v38 = vsel %vm5212_vm2, %v8420_v31, 0.0  ;;  %v8057_v17 = vpop.f32.mrb[20].mxu0  ;;  %v5362_v8 = vmul.f32 %v5261_v47, %v5261_v47  ;;  %vm5228_vm2 = vcmp.eq.s32.totalorder %v10715_v39, 1 }
 0x283   : > { %v5307_v22 = vadd.f32 %v5306_v29, %v5260_v38  ;;  %v5361_v14 = vmul.f32 %v5260_v38, %v5260_v38  ;;  %v5407_v25 = vadd.f32 %v5406_v20, %v5360_v40  ;;  %v8421_v21 = vadd.f32 %v8057_v17, %v10595_v7  ;;  %v4527_v2 = vpop.f32.mrb[21].mxu0  ;;  %v10709_v32 = vpop.permute.xlu1 %5150 }
 0x284   : > { %v8422_v16 = vadd.f32 %v4527_v2, %v10597_v23  ;;  %v10725_v2 = vpop.permute.xlu0 %5159  ;;  %vm5227_vm1 = vcmp.eq.s32.totalorder %v10709_v32, 1 }
 0x285   : > { %v5408_v44 = vadd.f32 %v5407_v25, %v5361_v14  ;;  %4879 = vst [vmem:[%s10612_s29 + $0xa8] sm:$0xff] %v8421_v21  ;;  %v5308_v33 = vadd.f32 %v5307_v22, %v5261_v47  ;;  %v5263_v27 = vsel %vm5215_vm5, %v8421_v21, 0.0 }
 0x286   : > { %4878 = vst [vmem:[%s10612_s29 + $0xa0] sm:$0xff] %v8422_v16  ;;  %v5262_v58 = vsel %vm5214_vm4, %v8422_v16, 0.0  ;;  %v8060_v50 = vpop.f32.mrb[22].mxu0  ;;  %v5364_v59 = vmul.f32 %v5263_v27, %v5263_v27  ;;  %vm5230_vm4 = vcmp.eq.s32.totalorder %v10725_v2, 1 }
 0x287   : > { %v5309_v7 = vadd.f32 %v5308_v33, %v5262_v58  ;;  %v5363_v42 = vmul.f32 %v5262_v58, %v5262_v58  ;;  %v5409_v4 = vadd.f32 %v5408_v44, %v5362_v8  ;;  %v8423_v60 = vadd.f32 %v8060_v50, %v10604_v18  ;;  %v4537_v23 = vpop.f32.mrb[23].mxu0  ;;  %v10719_v26 = vpop.permute.xlu1 %5156 }
 0x288   : > { %v8424_v5 = vadd.f32 %v4537_v23, %v10606_v35  ;;  %vm5229_vm3 = vcmp.eq.s32.totalorder %v10719_v26, 1 }
 0x289   : > { %v5410_v37 = vadd.f32 %v5409_v4, %v5363_v42  ;;  %4881 = vst [vmem:[%s10612_s29 + $0xb8] sm:$0xff] %v8423_v60  ;;  %v5310_v43 = vadd.f32 %v5309_v7, %v5263_v27  ;;  %v7647_v55 = vpop.f32.mrb[24].mxu1  ;;  %v5265_v52 = vsel %vm5217_vm7, %v8423_v60, 0.0 }
 0x28a   : > { %4880 = vst [vmem:[%s10612_s29 + $0xb0] sm:$0xff] %v8424_v5  ;;  %v5264_v15 = vsel %vm5216_vm6, %v8424_v5, 0.0  ;;  %v8063_v36 = vpop.f32.mrb[24].mxu0  ;;  %v2483_v18 = vpop.f32.mrb[25].mxu1  ;;  %v5366_v30 = vmul.f32 %v5265_v52, %v5265_v52 }
 0x28b   : > { %v5311_v53 = vadd.f32 %v5310_v43, %v5264_v15  ;;  %v5365_v35 = vmul.f32 %v5264_v15, %v5264_v15  ;;  %v5411_v0 = vadd.f32 %v5410_v37, %v5364_v59  ;;  %v8425_v62 = vadd.f32 %v8063_v36, %v7647_v55  ;;  %v4547_v28 = vpop.f32.mrb[25].mxu0  ;;  %v10729_v42 = vpop.permute.xlu1 %5162 }
 0x28c   : > { %v8426_v46 = vadd.f32 %v4547_v28, %v2483_v18  ;;  %vm5231_vm5 = vcmp.eq.s32.totalorder %v10729_v42, 1 }
 0x28d   : > { %v5412_v6 = vadd.f32 %v5411_v0, %v5365_v35  ;;  %4883 = vst [vmem:[%s10612_s29 + $0xc8] sm:$0xff] %v8425_v62  ;;  %v5312_v48 = vadd.f32 %v5311_v53, %v5265_v52  ;;  %v7650_v9 = vpop.f32.mrb[26].mxu1  ;;  %v5267_v1 = vsel %vm5219_vm9, %v8425_v62, 0.0  ;;  %v10735_v53 = vpop.permute.xlu0 %5165 }
 0x28e   : > { %4882 = vst [vmem:[%s10612_s29 + $0xc0] sm:$0xff] %v8426_v46  ;;  %v5266_v24 = vsel %vm5218_vm8, %v8426_v46, 0.0  ;;  %v8066_v63 = vpop.f32.mrb[26].mxu0  ;;  %v2493_v12 = vpop.f32.mrb[27].mxu1  ;;  %v5368_v49 = vmul.f32 %v5267_v1, %v5267_v1  ;;  %vm5232_vm6 = vcmp.eq.s32.totalorder %v10735_v53, 1 }
 0x28f   : > { %v5313_v10 = vadd.f32 %v5312_v48, %v5266_v24  ;;  %v5367_v61 = vmul.f32 %v5266_v24, %v5266_v24  ;;  %v5413_v57 = vadd.f32 %v5412_v6, %v5366_v30  ;;  %v8427_v11 = vadd.f32 %v8066_v63, %v7650_v9  ;;  %v4557_v19 = vpop.f32.mrb[27].mxu0  ;;  %v10739_v46 = vpop.permute.xlu1 %5168 }
 0x290   : > { %v8428_v13 = vadd.f32 %v4557_v19, %v2493_v12  ;;  %vm5233_vm7 = vcmp.eq.s32.totalorder %v10739_v46, 1 }
 0x291   : > { %v5414_v31 = vadd.f32 %v5413_v57, %v5367_v61  ;;  %4885 = vst [vmem:[%s10612_s29 + $0xd8] sm:$0xff] %v8427_v11  ;;  %v5314_v40 = vadd.f32 %v5313_v10, %v5267_v1  ;;  %v7653_v20 = vpop.f32.mrb[28].mxu1  ;;  %v5269_v29 = vsel %vm5221_vm11, %v8427_v11, 0.0  ;;  %v10745_v19 = vpop.permute.xlu0 %5171 }
 0x292   : > { %4884 = vst [vmem:[%s10612_s29 + $0xd0] sm:$0xff] %v8428_v13  ;;  %v5268_v47 = vsel %vm5220_vm10, %v8428_v13, 0.0  ;;  %v8069_v38 = vpop.f32.mrb[28].mxu0  ;;  %v2503_v17 = vpop.f32.mrb[29].mxu1  ;;  %v5370_v16 = vmul.f32 %v5269_v29, %v5269_v29  ;;  %vm5234_vm8 = vcmp.eq.s32.totalorder %v10745_v19, 1 }
 0x293   : > { %v5315_v22 = vadd.f32 %v5314_v40, %v5268_v47  ;;  %v5369_v14 = vmul.f32 %v5268_v47, %v5268_v47  ;;  %v5415_v3 = vadd.f32 %v5414_v31, %v5368_v49  ;;  %v8429_v25 = vadd.f32 %v8069_v38, %v7653_v20  ;;  %v4567_v21 = vpop.f32.mrb[29].mxu0 }
 0x294   : > { %v8430_v34 = vadd.f32 %v4567_v21, %v2503_v17  ;;  %v5175_v17 = vpop.permute.xlu1 %5174 }
 0x295   : > { %v5416_v8 = vadd.f32 %v5415_v3, %v5369_v14  ;;  %4887 = vst [vmem:[%s10612_s29 + $0xe8] sm:$0xff] %v8429_v25  ;;  %v5316_v44 = vadd.f32 %v5315_v22, %v5269_v29  ;;  %v7656_v33 = vpop.f32.mrb[30].mxu1  ;;  %v5271_v27 = vsel %vm5223_vm13, %v8429_v25, 0.0  ;;  %vm5235_vm9 = vcmp.eq.s32.totalorder %v5175_v17, 1 }
 0x296   : > { %4886 = vst [vmem:[%s10612_s29 + $0xe0] sm:$0xff] %v8430_v34  ;;  %v5270_v58 = vsel %vm5222_vm12, %v8430_v34, 0.0  ;;  %v8072_v50 = vpop.f32.mrb[30].mxu0  ;;  %v2513_v7 = vpop.f32.mrb[31].mxu1  ;;  %v5372_v59 = vmul.f32 %v5271_v27, %v5271_v27 }
 0x297   : > { %v5317_v45 = vadd.f32 %v5316_v44, %v5270_v58  ;;  %v5371_v4 = vmul.f32 %v5270_v58, %v5270_v58  ;;  %v5417_v60 = vadd.f32 %v5416_v8, %v5370_v16  ;;  %v8431_v54 = vadd.f32 %v8072_v50, %v7656_v33  ;;  %v4577_v23 = vpop.f32.mrb[31].mxu0  ;;  %v5178_v50 = vpop.permute.xlu0 %5177 }
 0x298   : > { %v8432_v5 = vadd.f32 %v4577_v23, %v2513_v7  ;;  %vm5236_vm10 = vcmp.eq.s32.totalorder %v5178_v50, 1 }
 0x299   : > { %v5418_v37 = vadd.f32 %v5417_v60, %v5371_v4  ;;  %4889 = vst [vmem:[%s10612_s29 + $0xf8] sm:$0xff] %v8431_v54  ;;  %v5318_v43 = vadd.f32 %v5317_v45, %v5271_v27  ;;  %v7659_v55 = vpop.f32.mrb[32].mxu1  ;;  %v5273_v52 = vsel %vm5225_vm15, %v8431_v54, 0.0  ;;  %v5181_v54 = vpop.permute.xlu1 %5180 }
 0x29a   : > { %4888 = vst [vmem:[%s10612_s29 + $0xf0] sm:$0xff] %v8432_v5  ;;  %v5272_v15 = vsel %vm5224_vm14, %v8432_v5, 0.0  ;;  %v8075_v36 = vpop.f32.mrb[32].mxu0  ;;  %v2523_v18 = vpop.f32.mrb[33].mxu1  ;;  %v5374_v30 = vmul.f32 %v5273_v52, %v5273_v52  ;;  %vm5237_vm11 = vcmp.eq.s32.totalorder %v5181_v54, 1 }
 0x29b   : > { %v5319_v35 = vadd.f32 %v5318_v43, %v5272_v15  ;;  %v5373_v0 = vmul.f32 %v5272_v15, %v5272_v15  ;;  %v5419_v56 = vadd.f32 %v5418_v37, %v5372_v59  ;;  %v8433_v62 = vadd.f32 %v8075_v36, %v7659_v55  ;;  %v4587_v28 = vpop.f32.mrb[33].mxu0 }
 0x29c   : > { %v8434_v41 = vadd.f32 %v4587_v28, %v2523_v18 }
 0x29d   : > { %v5420_v6 = vadd.f32 %v5419_v56, %v5373_v0  ;;  %4891 = vst [vmem:[%s10612_s29 + $0x108] sm:$0xff] %v8433_v62  ;;  %v5320_v48 = vadd.f32 %v5319_v35, %v5273_v52  ;;  %v7662_v9 = vpop.f32.mrb[34].mxu1  ;;  %v5275_v1 = vsel %vm5227_vm1, %v8433_v62, 0.0  ;;  %v5184_v62 = vpop.permute.xlu0 %5183  ;;  %vm5446_vm1 = vcmask 1041408  }
 0x29e   : > { %4890 = vst [vmem:[%s10612_s29 + $0x100] sm:$0xff] %v8434_v41  ;;  %v5274_v24 = vsel %vm5226_vm0, %v8434_v41, 0.0  ;;  %v8078_v63 = vpop.f32.mrb[34].mxu0  ;;  %v2533_v12 = vpop.f32.mrb[35].mxu1  ;;  %v5376_v13 = vmul.f32 %v5275_v1, %v5275_v1  ;;  %vm5238_vm12 = vcmp.eq.s32.totalorder %v5184_v62, 1  ;;  %vm5444_vm0 = vcmask 1040384  }
 0x29f   : > { %v5321_v10 = vadd.f32 %v5320_v48, %v5274_v24  ;;  %v5375_v61 = vmul.f32 %v5274_v24, %v5274_v24  ;;  %v5421_v51 = vadd.f32 %v5420_v6, %v5374_v30  ;;  %v8435_v57 = vadd.f32 %v8078_v63, %v7662_v9  ;;  %v4597_v11 = vpop.f32.mrb[35].mxu0  ;;  %v5187_v24 = vpop.permute.xlu1 %5186 }
 0x2a0   : > { %v8436_v32 = vadd.f32 %v4597_v11, %v2533_v12  ;;  %vm5239_vm13 = vcmp.eq.s32.totalorder %v5187_v24, 1 }
 0x2a1   : > { %v5422_v49 = vadd.f32 %v5421_v51, %v5375_v61  ;;  %4893 = vst [vmem:[%s10612_s29 + $0x118] sm:$0xff] %v8435_v57  ;;  %v5322_v31 = vadd.f32 %v5321_v10, %v5275_v1  ;;  %v7665_v40 = vpop.f32.mrb[36].mxu1  ;;  %v5277_v20 = vsel %vm5229_vm3, %v8435_v57, 0.0 }
 0x2a2   : > { %4892 = vst [vmem:[%s10612_s29 + $0x110] sm:$0xff] %v8436_v32  ;;  %v5276_v29 = vsel %vm5228_vm2, %v8436_v32, 0.0  ;;  %v8081_v47 = vpop.f32.mrb[36].mxu0  ;;  %v2543_v38 = vpop.f32.mrb[37].mxu1  ;;  %v5378_v21 = vmul.f32 %v5277_v20, %v5277_v20 }
 0x2a3   : > { %v5323_v22 = vadd.f32 %v5322_v31, %v5276_v29  ;;  %v5377_v39 = vmul.f32 %v5276_v29, %v5276_v29  ;;  %v5423_v14 = vadd.f32 %v5422_v49, %v5376_v13  ;;  %v8437_v3 = vadd.f32 %v8081_v47, %v7665_v40  ;;  %v4607_v26 = vpop.f32.mrb[37].mxu0 }
 0x2a4   : > { %v8438_v25 = vadd.f32 %v4607_v26, %v2543_v38 }
 0x2a5   : > { %v5424_v34 = vadd.f32 %v5423_v14, %v5377_v39  ;;  %4895 = vst [vmem:[%s10612_s29 + $0x128] sm:$0xff] %v8437_v3  ;;  %v5324_v16 = vadd.f32 %v5323_v22, %v5277_v20  ;;  %v7668_v8 = vpop.f32.mrb[38].mxu1  ;;  %v5279_v44 = vsel %vm5231_vm5, %v8437_v3, 0.0  ;;  %v5190_v39 = vpop.permute.xlu0 %5189 }
 0x2a6   : > { %4894 = vst [vmem:[%s10612_s29 + $0x120] sm:$0xff] %v8438_v25  ;;  %v5278_v33 = vsel %vm5230_vm4, %v8438_v25, 0.0  ;;  %v8084_v27 = vpop.f32.mrb[38].mxu0  ;;  %v2553_v58 = vpop.f32.mrb[39].mxu1  ;;  %v5380_v23 = vmul.f32 %v5279_v44, %v5279_v44  ;;  %vm5240_vm14 = vcmp.eq.s32.totalorder %v5190_v39, 1 }
 0x2a7   : > { %v5325_v7 = vadd.f32 %v5324_v16, %v5278_v33  ;;  %v5379_v45 = vmul.f32 %v5278_v33, %v5278_v33  ;;  %v5425_v4 = vadd.f32 %v5424_v34, %v5378_v21  ;;  %v8439_v2 = vadd.f32 %v8084_v27, %v7668_v8  ;;  %v4617_v60 = vpop.f32.mrb[39].mxu0  ;;  %v5193_v3 = vpop.permute.xlu1 %5192 }
 0x2a8   : > { %v8440_v42 = vadd.f32 %v4617_v60, %v2553_v58  ;;  %vm5241_vm15 = vcmp.eq.s32.totalorder %v5193_v3, 1 }
 0x2a9   : > { %v5426_v5 = vadd.f32 %v5425_v4, %v5379_v45  ;;  %4897 = vst [vmem:[%s10612_s29 + $0x138] sm:$0xff] %v8439_v2  ;;  %v5326_v59 = vadd.f32 %v5325_v7, %v5279_v44  ;;  %v7671_v37 = vpop.f32.mrb[40].mxu1  ;;  %v5281_v43 = vsel %vm5233_vm7, %v8439_v2, 0.0 }
 0x2aa   : > { %4896 = vst [vmem:[%s10612_s29 + $0x130] sm:$0xff] %v8440_v42  ;;  %v5280_v55 = vsel %vm5232_vm6, %v8440_v42, 0.0  ;;  %v8087_v52 = vpop.f32.mrb[40].mxu0  ;;  %v2563_v15 = vpop.f32.mrb[41].mxu1  ;;  %v5382_v28 = vmul.f32 %v5281_v43, %v5281_v43 }
 0x2ab   : > { %v5327_v36 = vadd.f32 %v5326_v59, %v5280_v55  ;;  %v5381_v18 = vmul.f32 %v5280_v55, %v5280_v55  ;;  %v5427_v35 = vadd.f32 %v5426_v5, %v5380_v23  ;;  %v8441_v53 = vadd.f32 %v8087_v52, %v7671_v37  ;;  %v4627_v0 = vpop.f32.mrb[41].mxu0 }
 0x2ac   : > { %v8442_v56 = vadd.f32 %v4627_v0, %v2563_v15 }
 0x2ad   : > { %v5428_v41 = vadd.f32 %v5427_v35, %v5381_v18  ;;  %4899 = vst [vmem:[%s10612_s29 + $0x148] sm:$0xff] %v8441_v53  ;;  %v5328_v46 = vadd.f32 %v5327_v36, %v5281_v43  ;;  %v7674_v30 = vpop.f32.mrb[42].mxu1  ;;  %v5283_v6 = vsel %vm5235_vm9, %v8441_v53, 0.0 }
 0x2ae   : > { %4898 = vst [vmem:[%s10612_s29 + $0x140] sm:$0xff] %v8442_v56  ;;  %v5282_v48 = vsel %vm5234_vm8, %v8442_v56, 0.0  ;;  %v8090_v9 = vpop.f32.mrb[42].mxu0  ;;  %v2573_v1 = vpop.f32.mrb[43].mxu1  ;;  %v5384_v11 = vmul.f32 %v5283_v6, %v5283_v6 }
 0x2af   : > { %v5329_v63 = vadd.f32 %v5328_v46, %v5282_v48  ;;  %v5383_v12 = vmul.f32 %v5282_v48, %v5282_v48  ;;  %v5429_v10 = vadd.f32 %v5428_v41, %v5382_v28  ;;  %v8443_v61 = vadd.f32 %v8090_v9, %v7674_v30  ;;  %v4637_v51 = vpop.f32.mrb[43].mxu0 }
 0x2b0   : > { %v8444_v57 = vadd.f32 %v4637_v51, %v2573_v1 }
 0x2b1   : > { %v5430_v32 = vadd.f32 %v5429_v10, %v5383_v12  ;;  %4901 = vst [vmem:[%s10612_s29 + $0x158] sm:$0xff] %v8443_v61  ;;  %v5330_v19 = vadd.f32 %v5329_v63, %v5283_v6  ;;  %v7677_v13 = vpop.f32.mrb[44].mxu1  ;;  %v5285_v49 = vsel %vm5237_vm11, %v8443_v61, 0.0 }
 0x2b2   : > { %4900 = vst [vmem:[%s10612_s29 + $0x150] sm:$0xff] %v8444_v57  ;;  %v5284_v31 = vsel %vm5236_vm10, %v8444_v57, 0.0  ;;  %v8093_v40 = vpop.f32.mrb[44].mxu0  ;;  %v2583_v20 = vpop.f32.mrb[45].mxu1  ;;  %v5386_v26 = vmul.f32 %v5285_v49, %v5285_v49 }
 0x2b3   : > { %v5331_v29 = vadd.f32 %v5330_v19, %v5284_v31  ;;  %v5385_v47 = vmul.f32 %v5284_v31, %v5284_v31  ;;  %v5431_v38 = vadd.f32 %v5430_v32, %v5384_v11  ;;  %v8445_v17 = vadd.f32 %v8093_v40, %v7677_v13  ;;  %v4647_v22 = vpop.f32.mrb[45].mxu0 }
 0x2b4   : > { %v8446_v14 = vadd.f32 %v4647_v22, %v2583_v20 }
 0x2b5   : > { %v5432_v25 = vadd.f32 %v5431_v38, %v5385_v47  ;;  %4903 = vst [vmem:[%s10612_s29 + $0x168] sm:$0xff] %v8445_v17  ;;  %v5332_v21 = vadd.f32 %v5331_v29, %v5285_v49  ;;  %v7680_v34 = vpop.f32.mrb[46].mxu1  ;;  %v5287_v16 = vsel %vm5239_vm13, %v8445_v17, 0.0 }
 0x2b6   : > { %4902 = vst [vmem:[%s10612_s29 + $0x160] sm:$0xff] %v8446_v14  ;;  %v5286_v8 = vsel %vm5238_vm12, %v8446_v14, 0.0  ;;  %v8096_v44 = vpop.f32.mrb[46].mxu0  ;;  %v2593_v33 = vpop.f32.mrb[47].mxu1  ;;  %v5388_v2 = vmul.f32 %v5287_v16, %v5287_v16 }
 0x2b7   : > { %v5333_v27 = vadd.f32 %v5332_v21, %v5286_v8  ;;  %v5387_v58 = vmul.f32 %v5286_v8, %v5286_v8  ;;  %v5433_v50 = vadd.f32 %v5432_v25, %v5386_v26  ;;  %v8447_v7 = vadd.f32 %v8096_v44, %v7680_v34  ;;  %v4657_v45 = vpop.f32.mrb[47].mxu0 }
 0x2b8   : > { %v8448_v4 = vadd.f32 %v4657_v45, %v2593_v33 }
 0x2b9   : > { %v5434_v60 = vadd.f32 %v5433_v50, %v5387_v58  ;;  %4905 = vst [vmem:[%s10612_s29 + $0x178] sm:$0xff] %v8447_v7  ;;  %v5334_v42 = vadd.f32 %v5333_v27, %v5287_v16  ;;  %v5289_v54 = vsel %vm5241_vm15, %v8447_v7, 0.0 }
 0x2ba   : > { %4904 = vst [vmem:[%s10612_s29 + $0x170] sm:$0xff] %v8448_v4  ;;  %v5288_v23 = vsel %vm5240_vm14, %v8448_v4, 0.0  ;;  %v5390_v43 = vmul.f32 %v5289_v54, %v5289_v54 }
 0x2bb   : > { %v5335_v5 = vadd.f32 %v5334_v42, %v5288_v23  ;;  %v5389_v59 = vmul.f32 %v5288_v23, %v5288_v23  ;;  %v5435_v37 = vadd.f32 %v5434_v60, %v5388_v2 }
 0x2bd   : > { %v5336_v55 = vadd.f32 %v5335_v5, %v5289_v54  ;;  %v5436_v52 = vadd.f32 %v5435_v37, %v5389_v59 }
 0x2bf   : > { %v5337_v15 = vrot.slane %v5336_v55, 4  ;;  %v5437_v36 = vadd.f32 %v5436_v52, %v5390_v43 }
 0x2c1   : > { %v5338_v18 = vadd.f32 %v5337_v15, %v5336_v55  ;;  %v5438_v35 = vrot.slane %v5437_v36, 4 }
 0x2c3   : > { %v5339_v53 = vrot.slane %v5338_v18, 2  ;;  %v5439_v0 = vadd.f32 %v5438_v35, %v5437_v36 }
 0x2c5   : > { %v5340_v56 = vadd.f32 %v5339_v53, %v5338_v18  ;;  %v5440_v62 = vrot.slane %v5439_v0, 2 }
 0x2c7   : > { %v5341_v28 = vrot.slane %v5340_v56, 1  ;;  %v5441_v41 = vadd.f32 %v5440_v62, %v5439_v0 }
 0x2c9   : > { %v5442_v46 = vrot.slane %v5441_v41, 1  ;;  %v5342_v30 = vadd.f32 %v5341_v28, %v5340_v56  ;;  %5462 = sbr.rel (!%p8984_p3) target bundleno = 745 (0x2e9), region = 36 }
 0x2cb   : > { %v5443_v6 = vadd.f32 %v5442_v46, %v5441_v41 }
 0x2cd   : > { %v5445_v48 = vsel %vm5444_vm0, %v5342_v30, %v5443_v6 }
 0x2ce   : > { %v5447_v9 = vsel %vm5446_vm1, %v5445_v48, 0.0 }
 0x2cf   : > { %5448 = vst [vmem:[%s261_s6] sm:$0xff] %v5447_v9 }
 0x2d0 LB: >> { %v5634_v1 = vld [vmem:[%s10612_s29] sm:$0xff]  ;;  %v5636_v24 = vld [vmem:[%s10612_s29 + $0x8] sm:$0xff]  ;;  %v5638_v63 = vld [vmem:[%s10612_s29 + $0x10] sm:$0xff]  ;;  %s5628_s12 = sadd.s32 1, %s8924_s12   ;;  %s8924_s12 = sphi %s10783_s12, %s5628_s12   ;;  %s8920_s11 = sphi %s11064_s11, %s11065_s11  }
 0x2d1   : >> { %5635 = vst [vmem:[%s8920_s11] sm:$0xff] %v5634_v1  ;;  %5637 = vst [vmem:[%s8920_s11 + $0x8] sm:$0xff] %v5636_v24  ;;  %v5640_v12 = vld [vmem:[%s10612_s29 + $0x18] sm:$0xff]  ;;  %v5642_v10 = vld [vmem:[%s10612_s29 + $0x20] sm:$0xff]  ;;  %p5627_p9 = scmp.ge.s32.totalorder %s5628_s12, 1 }
 0x2d2   : >> { %5639 = vst [vmem:[%s8920_s11 + $0x10] sm:$0xff] %v5638_v63  ;;  %v5644_v61 = vld [vmem:[%s10612_s29 + $0x28] sm:$0xff]  ;;  %5641 = vst [vmem:[%s8920_s11 + $0x18] sm:$0xff] %v5640_v12  ;;  %v5646_v51 = vld [vmem:[%s10612_s29 + $0x30] sm:$0xff] }
 0x2d3   : >> { %5643 = vst [vmem:[%s8920_s11 + $0x20] sm:$0xff] %v5642_v10  ;;  %5645 = vst [vmem:[%s8920_s11 + $0x28] sm:$0xff] %v5644_v61  ;;  %v5648_v57 = vld [vmem:[%s10612_s29 + $0x38] sm:$0xff]  ;;  %v5650_v11 = vld [vmem:[%s10612_s29 + $0x40] sm:$0xff] }
 0x2d4   : >> { %5647 = vst [vmem:[%s8920_s11 + $0x30] sm:$0xff] %v5646_v51  ;;  %5649 = vst [vmem:[%s8920_s11 + $0x38] sm:$0xff] %v5648_v57  ;;  %v5652_v32 = vld [vmem:[%s10612_s29 + $0x48] sm:$0xff]  ;;  %v5654_v19 = vld [vmem:[%s10612_s29 + $0x50] sm:$0xff] }
 0x2d5   : >> { %5651 = vst [vmem:[%s8920_s11 + $0x40] sm:$0xff] %v5650_v11  ;;  %v5656_v13 = vld [vmem:[%s10612_s29 + $0x58] sm:$0xff]  ;;  %5653 = vst [vmem:[%s8920_s11 + $0x48] sm:$0xff] %v5652_v32  ;;  %v5658_v49 = vld [vmem:[%s10612_s29 + $0x60] sm:$0xff] }
 0x2d6   : >> { %5655 = vst [vmem:[%s8920_s11 + $0x50] sm:$0xff] %v5654_v19  ;;  %5657 = vst [vmem:[%s8920_s11 + $0x58] sm:$0xff] %v5656_v13  ;;  %v5660_v31 = vld [vmem:[%s10612_s29 + $0x68] sm:$0xff]  ;;  %v5662_v40 = vld [vmem:[%s10612_s29 + $0x70] sm:$0xff] }
 0x2d7   : >> { %5659 = vst [vmem:[%s8920_s11 + $0x60] sm:$0xff] %v5658_v49  ;;  %5661 = vst [vmem:[%s8920_s11 + $0x68] sm:$0xff] %v5660_v31  ;;  %v5664_v20 = vld [vmem:[%s10612_s29 + $0x78] sm:$0xff]  ;;  %v5666_v29 = vld [vmem:[%s10612_s29 + $0x80] sm:$0xff] }
 0x2d8   : >> { %5663 = vst [vmem:[%s8920_s11 + $0x70] sm:$0xff] %v5662_v40  ;;  %v5668_v47 = vld [vmem:[%s10612_s29 + $0x88] sm:$0xff]  ;;  %5665 = vst [vmem:[%s8920_s11 + $0x78] sm:$0xff] %v5664_v20  ;;  %v5670_v38 = vld [vmem:[%s10612_s29 + $0x90] sm:$0xff] }
 0x2d9   : >> { %5667 = vst [vmem:[%s8920_s11 + $0x80] sm:$0xff] %v5666_v29  ;;  %5669 = vst [vmem:[%s8920_s11 + $0x88] sm:$0xff] %v5668_v47  ;;  %v5672_v17 = vld [vmem:[%s10612_s29 + $0x98] sm:$0xff]  ;;  %v5674_v22 = vld [vmem:[%s10612_s29 + $0xa0] sm:$0xff] }
 0x2da   : >> { %5671 = vst [vmem:[%s8920_s11 + $0x90] sm:$0xff] %v5670_v38  ;;  %5673 = vst [vmem:[%s8920_s11 + $0x98] sm:$0xff] %v5672_v17  ;;  %v5676_v39 = vld [vmem:[%s10612_s29 + $0xa8] sm:$0xff]  ;;  %v5678_v14 = vld [vmem:[%s10612_s29 + $0xb0] sm:$0xff] }
 0x2db   : >> { %5675 = vst [vmem:[%s8920_s11 + $0xa0] sm:$0xff] %v5674_v22  ;;  %v5680_v3 = vld [vmem:[%s10612_s29 + $0xb8] sm:$0xff]  ;;  %5677 = vst [vmem:[%s8920_s11 + $0xa8] sm:$0xff] %v5676_v39  ;;  %v5682_v26 = vld [vmem:[%s10612_s29 + $0xc0] sm:$0xff] }
 0x2dc   : >> { %5679 = vst [vmem:[%s8920_s11 + $0xb0] sm:$0xff] %v5678_v14  ;;  %5681 = vst [vmem:[%s8920_s11 + $0xb8] sm:$0xff] %v5680_v3  ;;  %v5684_v25 = vld [vmem:[%s10612_s29 + $0xc8] sm:$0xff]  ;;  %v5686_v21 = vld [vmem:[%s10612_s29 + $0xd0] sm:$0xff] }
 0x2dd   : >> { %5683 = vst [vmem:[%s8920_s11 + $0xc0] sm:$0xff] %v5682_v26  ;;  %5685 = vst [vmem:[%s8920_s11 + $0xc8] sm:$0xff] %v5684_v25  ;;  %v5688_v34 = vld [vmem:[%s10612_s29 + $0xd8] sm:$0xff]  ;;  %v5690_v16 = vld [vmem:[%s10612_s29 + $0xe0] sm:$0xff] }
 0x2de   : >> { %5687 = vst [vmem:[%s8920_s11 + $0xd0] sm:$0xff] %v5686_v21  ;;  %v5692_v8 = vld [vmem:[%s10612_s29 + $0xe8] sm:$0xff]  ;;  %5689 = vst [vmem:[%s8920_s11 + $0xd8] sm:$0xff] %v5688_v34  ;;  %v5694_v44 = vld [vmem:[%s10612_s29 + $0xf0] sm:$0xff] }
 0x2df   : >> { %5691 = vst [vmem:[%s8920_s11 + $0xe0] sm:$0xff] %v5690_v16  ;;  %5693 = vst [vmem:[%s8920_s11 + $0xe8] sm:$0xff] %v5692_v8  ;;  %v5696_v33 = vld [vmem:[%s10612_s29 + $0xf8] sm:$0xff]  ;;  %v5698_v27 = vld [vmem:[%s10612_s29 + $0x100] sm:$0xff] }
 0x2e0   : >> { %5695 = vst [vmem:[%s8920_s11 + $0xf0] sm:$0xff] %v5694_v44  ;;  %5697 = vst [vmem:[%s8920_s11 + $0xf8] sm:$0xff] %v5696_v33  ;;  %v5700_v58 = vld [vmem:[%s10612_s29 + $0x108] sm:$0xff]  ;;  %v5702_v50 = vld [vmem:[%s10612_s29 + $0x110] sm:$0xff] }
 0x2e1   : >> { %5699 = vst [vmem:[%s8920_s11 + $0x100] sm:$0xff] %v5698_v27  ;;  %v5704_v7 = vld [vmem:[%s10612_s29 + $0x118] sm:$0xff]  ;;  %5701 = vst [vmem:[%s8920_s11 + $0x108] sm:$0xff] %v5700_v58  ;;  %v5706_v45 = vld [vmem:[%s10612_s29 + $0x120] sm:$0xff] }
 0x2e2   : >> { %5703 = vst [vmem:[%s8920_s11 + $0x110] sm:$0xff] %v5702_v50  ;;  %5705 = vst [vmem:[%s8920_s11 + $0x118] sm:$0xff] %v5704_v7  ;;  %v5708_v4 = vld [vmem:[%s10612_s29 + $0x128] sm:$0xff]  ;;  %v5710_v2 = vld [vmem:[%s10612_s29 + $0x130] sm:$0xff]  ;;  %5630 = sbr.rel (!%p5627_p9) target bundleno = 720 (0x2d0), region = 154 }
 0x2e3   : >> { %5707 = vst [vmem:[%s8920_s11 + $0x120] sm:$0xff] %v5706_v45  ;;  %5709 = vst [vmem:[%s8920_s11 + $0x128] sm:$0xff] %v5708_v4  ;;  %v5712_v60 = vld [vmem:[%s10612_s29 + $0x138] sm:$0xff]  ;;  %v5714_v42 = vld [vmem:[%s10612_s29 + $0x140] sm:$0xff] }
 0x2e4   : >> { %5711 = vst [vmem:[%s8920_s11 + $0x130] sm:$0xff] %v5710_v2  ;;  %v5716_v54 = vld [vmem:[%s10612_s29 + $0x148] sm:$0xff]  ;;  %5713 = vst [vmem:[%s8920_s11 + $0x138] sm:$0xff] %v5712_v60  ;;  %v5718_v23 = vld [vmem:[%s10612_s29 + $0x150] sm:$0xff] }
 0x2e5   : >> { %5715 = vst [vmem:[%s8920_s11 + $0x140] sm:$0xff] %v5714_v42  ;;  %5717 = vst [vmem:[%s8920_s11 + $0x148] sm:$0xff] %v5716_v54  ;;  %v5720_v5 = vld [vmem:[%s10612_s29 + $0x158] sm:$0xff]  ;;  %v5722_v59 = vld [vmem:[%s10612_s29 + $0x160] sm:$0xff] }
 0x2e6   : >> { %5719 = vst [vmem:[%s8920_s11 + $0x150] sm:$0xff] %v5718_v23  ;;  %5721 = vst [vmem:[%s8920_s11 + $0x158] sm:$0xff] %v5720_v5  ;;  %v5724_v37 = vld [vmem:[%s10612_s29 + $0x168] sm:$0xff]  ;;  %v5726_v43 = vld [vmem:[%s10612_s29 + $0x170] sm:$0xff] }
 0x2e7   : >> { %5723 = vst [vmem:[%s8920_s11 + $0x160] sm:$0xff] %v5722_v59  ;;  %v5728_v55 = vld [vmem:[%s10612_s29 + $0x178] sm:$0xff]  ;;  %5725 = vst [vmem:[%s8920_s11 + $0x168] sm:$0xff] %v5724_v37 }
 0x2e8   : >> { %5727 = vst [vmem:[%s8920_s11 + $0x170] sm:$0xff] %v5726_v43  ;;  %5729 = vst [vmem:[%s8920_s11 + $0x178] sm:$0xff] %v5728_v55  ;;  %s11065_s11 = smov %s5847_s10 }
 0x2e9 PF: > { %s15_s19 = sadd.s32 1, %s8916_s19   ;;  %s11066_s15 = smov %s8904_s16 }
 0x2ea   : > { %p12_p10 = scmp.ge.s32.totalorder %s15_s19, 4   ;;  %s11067_s16 = smov %s8993_s25 }
 0x2eb   : > { %s11068_s17 = smov %s8912_s18  ;;  %s11069_s18 = smov %s11071_s21 }
 0x2ec   :  { %14 = sbr.rel (!%p12_p10) target bundleno = 3 (0x3), region = 176 }

// kernel: residual_forward.4
= control target key start
LH: loop header
LB: loop body
LE: loop exit
PB: predicated region body
PF: predicated region fallthrough
CT: control target
= control target key end

     0   :  { %s9758_s15 = smov 0   ;;  %s9760_s16 = smov 0   ;;  %s11735_s0 = inlined_call_operand.vmem [shape: f32[1152,1], index: 0, kind: input, shape index: {}]   ;;  %s11736_s1 = inlined_call_operand.vmem [shape: f32[2,1160,4], index: 1, kind: input, shape index: {}]   ;;  %s11737_s2 = inlined_call_operand.vmem [shape: f32[9,4,128], index: 2, kind: input, shape index: {}]   ;;  %s11738_s3 = inlined_call_operand.vmem [shape: f32[2,1160,128], index: 3, kind: output, shape index: {0}]   ;;  %s11739_s4 = inlined_call_operand.vmem [shape: f32[2,8,128], index: 4, kind: output, shape index: {1}]  }
   0x1   :  { %s9762_s17 = smov 0   ;;  %s9764_s18 = smov 0  }
   0x2   :  { %s9766_s19 = smov 0  }
   0x3 LB: > { %s7148_s20 = sadd.s32 4294967295, %s9722_s19   ;;  %s27_s21 = sadd.s32 1, %s9718_s18  ;;  %s9722_s19 = sphi %s9766_s19, %s15_s19   ;;  %s9718_s18 = sphi %s9764_s18, %s11899_s18   ;;  %s9714_s17 = sphi %s9762_s17, %s11898_s17   ;;  %s9710_s16 = sphi %s9760_s16, %s11897_s16   ;;  %s9706_s15 = sphi %s9758_s15, %s11896_s15  }
   0x4   : > { %p29_p0 = scmp.ge.s32.totalorder %s27_s21, 2  ;;  %s113_s22 = sadd.s32 1, %s9710_s16 }
   0x5   : > { %p123_p1 = scmp.ne.s32.totalorder %s9710_s16, %s9706_s15  ;;  %p124_p2 = scmp.eq.s32.totalorder %s7148_s20, 1 }
   0x6   : > { %s11901_s21 = smov (%p29_p0, %s27_s21), 0  ;;  %p7153_p4 = scmp.ge.s32.totalorder %s9722_s19, 1 }
   0x7   : > { %p9790_p3 = por %p124_p2, %p123_p1  ;;  %s108_s24 = ssub.s32 %s9718_s18, %s11901_s21 }
   0x8   : > { %p198_p5 = scmp.lt.s32.totalorder %s9722_s19, 3  ;;  %p111_p6 = scmp.eq.s32.totalorder %s108_s24, 0 }
   0xa   : > { %p199_p7 = pnand %p7153_p4, %p198_p5 }
   0xb   : > { %s9799_s25 = scalar_select %p111_p6, %s9710_s16, %s113_s22  }
   0xc   : > { %202 = sbr.rel (%p199_p7) target bundleno = 719 (0x2cf), region = 32 }
  0x13   : > { %v313_v0 = vld [vmem:[%s11737_s2] sm:$0xf]  ;;  %vm459_vm0 = vcmask 1043456   ;;  %v9807_v1 = vld [vmem:[%s11737_s2 + $0x10] sm:$0xf]  ;;  %p244_p8 = scmp.lt.s32.totalorder %s9714_s17, 1 }
  0x14   : > { %8537 = vmatprep.subr.msk.mxu1 %vm459_vm0, %v313_v0  ;;  %8833 = vmatprep.subr.msk.mxu0 %vm459_vm0, %v9807_v1  ;;  %v7301_v2 = vld [vmem:[%s11737_s2 + $0x4] sm:$0xf]  ;;  %v7693_v3 = vld [vmem:[%s11737_s2 + $0x14] sm:$0xf]  ;;  %vm314_vm1 = vcmask 31744   ;;  %s8085_s14 = smul.u32 (%p9790_p3), 1160, %s9714_s17 }
  0x15   : > { %8538 = vmatpush3.msk.msra.mxu1 %vm459_vm0, %v313_v0  ;;  %8834 = vmatpush3.msk.msra.mxu0 %vm459_vm0, %v9807_v1  ;;  %s9823_s8 = scalar_select %p244_p8, %s9714_s17, 1  ;;  %v9854_v10 = vld [vmem:[%s11737_s2 + $0x18] sm:$0xf]  ;;  %v9859_v11 = vld [vmem:[%s11737_s2 + $0x8] sm:$0xf] }
  0x16   : > { %8611 = vmatprep.subr.msk.mxu1 %vm459_vm0, %v7301_v2  ;;  %8907 = vmatprep.subr.msk.mxu0 %vm459_vm0, %v7693_v3  ;;  %v10096_v60 = vld [vmem:[%s11737_s2 + $0x1c] sm:$0xf]  ;;  %s11609_s27 = smov (%p9790_p3), 0  }
  0x17   : > { %s9590_s9 = smul.u32 1160, %s9823_s8 }
  0x19   : > { %s9831_s12 = scalar_lea.vmem %s11736_s1, %s9590_s9  ;;  %s7155_s9 = sshll.u32 %s9823_s8, 3 }
  0x1a   : > { %v7156_v4 = vld [vmem:[%s9831_s12 + $0x167] sm:$0xff]  ;;  %v7157_v6 = vld [vmem:[%s9831_s12 + $0x16f] sm:$0xff]  ;;  %v7158_v8 = vld [vmem:[%s9831_s12 + $0x177] sm:$0xff]  ;;  %s261_s13 = scalar_lea.vmem %s11739_s4, %s7155_s9  ;;  %s11602_s8 = scalar_lea.vmem (%p9790_p3), %s11738_s3, %s8085_s14 }
  0x1b   : > { %v9835_v5 = vld [vmem:[%s9831_s12 + $0x180] sm:$0xff]  ;;  %8539 = vmatprep.mubr.msk.f32.mxu1 %vm314_vm1, %v7156_v4  ;;  %v9842_v7 = vld [vmem:[%s9831_s12 + $0x188] sm:$0xff]  ;;  %v9846_v9 = vld [vmem:[%s9831_s12 + $0x190] sm:$0xff]  ;;  %s7037_s24 = scalar_lea.vmem (%p9790_p3), %s11602_s8, 384  }
  0x1c   : > { %8835 = vmatprep.mubr.msk.f32.mxu0 %vm314_vm1, %v9835_v5  ;;  %8540 = vmatmul.mubr.msk.f32.vlgmr.msra.gmra.mrb[0].mxu1 %vm314_vm1, %v7157_v6  ;;  %v7159_v12 = vld [vmem:[%s9831_s12 + $0x17f] sm:$0xff]  ;;  %v7160_v14 = vld [vmem:[%s9831_s12 + $0x187] sm:$0xff]  ;;  %v7161_v16 = vld [vmem:[%s9831_s12 + $0x18f] sm:$0xff]  ;;  %s11894_s26 = smov (%p9790_p3), %s7037_s24 }
  0x1d   : > { %8836 = vmatmul.mubr.msk.f32.vlgmr.msra.gmra.mrb[0].mxu0 %vm314_vm1, %v9842_v7  ;;  %8612 = vmatpush3.msk.msra.mxu1 %vm459_vm0, %v7301_v2  ;;  %v9865_v13 = vld [vmem:[%s9831_s12 + $0x198] sm:$0xff]  ;;  %v9872_v15 = vld [vmem:[%s9831_s12 + $0x1a0] sm:$0xff]  ;;  %v9886_v17 = vld [vmem:[%s9831_s12 + $0x1a8] sm:$0xff] }
  0x1e   : > { %8908 = vmatpush3.msk.msra.mxu0 %vm459_vm0, %v7693_v3  ;;  %8542 = vmatprep.mubr.msk.f32.mxu1 %vm314_vm1, %v7158_v8  ;;  %v9889_v18 = vld [vmem:[%s9831_s12 + $0x197] sm:$0xff]  ;;  %v9902_v20 = vld [vmem:[%s9831_s12 + $0x19f] sm:$0xff]  ;;  %v9908_v22 = vld [vmem:[%s9831_s12 + $0x1a7] sm:$0xff] }
  0x1f   : > { %8838 = vmatprep.mubr.msk.f32.mxu0 %vm314_vm1, %v9846_v9  ;;  %8981 = vmatprep.subr.msk.mxu0 %vm459_vm0, %v9854_v10  ;;  %v9892_v19 = vld [vmem:[%s9831_s12 + $0x1b0] sm:$0xff]  ;;  %v9905_v21 = vld [vmem:[%s9831_s12 + $0x1b8] sm:$0xff]  ;;  %v9911_v23 = vld [vmem:[%s9831_s12 + $0x1c0] sm:$0xff] }
  0x20   : > { %8685 = vmatprep.subr.msk.mxu1 %vm459_vm0, %v9859_v11  ;;  %8543 = vmatmul.mubr.msk.f32.gmra.mrb[2].mxu1 %vm314_vm1, %v7159_v12  ;;  %v9922_v24 = vld [vmem:[%s9831_s12 + $0x1af] sm:$0xff]  ;;  %v9928_v26 = vld [vmem:[%s9831_s12 + $0x1b7] sm:$0xff]  ;;  %v9942_v28 = vld [vmem:[%s9831_s12 + $0x1bf] sm:$0xff] }
  0x21   : > { %8839 = vmatmul.mubr.msk.f32.gmra.mrb[2].mxu0 %vm314_vm1, %v9865_v13  ;;  %8545 = vmatprep.mubr.msk.f32.mxu1 %vm314_vm1, %v7160_v14  ;;  %v9925_v25 = vld [vmem:[%s9831_s12 + $0x1c8] sm:$0xff]  ;;  %v9931_v27 = vld [vmem:[%s9831_s12 + $0x1d0] sm:$0xff]  ;;  %v9945_v29 = vld [vmem:[%s9831_s12 + $0x1d8] sm:$0xff] }
  0x22   : > { %8841 = vmatprep.mubr.msk.f32.mxu0 %vm314_vm1, %v9872_v15  ;;  %v9948_v30 = vld [vmem:[%s9831_s12 + $0x1c7] sm:$0xff]  ;;  %v9962_v32 = vld [vmem:[%s9831_s12 + $0x1cf] sm:$0xff]  ;;  %v9968_v34 = vld [vmem:[%s9831_s12 + $0x1d7] sm:$0xff] }
  0x23   : > { %v9951_v31 = vld [vmem:[%s9831_s12 + $0x1e0] sm:$0xff]  ;;  %v9965_v33 = vld [vmem:[%s9831_s12 + $0x1e8] sm:$0xff]  ;;  %v9971_v35 = vld [vmem:[%s9831_s12 + $0x1f0] sm:$0xff] }
  0x24   : > { %8546 = vmatmul.mubr.msk.f32.gmra.mrb[4].mxu1 %vm314_vm1, %v7161_v16  ;;  %v9982_v36 = vld [vmem:[%s9831_s12 + $0x1df] sm:$0xff]  ;;  %v9988_v38 = vld [vmem:[%s9831_s12 + $0x1e7] sm:$0xff]  ;;  %v10002_v40 = vld [vmem:[%s9831_s12 + $0x1ef] sm:$0xff] }
  0x25   : > { %8842 = vmatmul.mubr.msk.f32.gmra.mrb[4].mxu0 %vm314_vm1, %v9886_v17  ;;  %8548 = vmatprep.mubr.msk.f32.mxu1 %vm314_vm1, %v9889_v18  ;;  %v9985_v37 = vld [vmem:[%s9831_s12 + $0x1f8] sm:$0xff]  ;;  %v9991_v39 = vld [vmem:[%s9831_s12 + $0x200] sm:$0xff]  ;;  %v10005_v41 = vld [vmem:[%s9831_s12 + $0x208] sm:$0xff] }
  0x26   : > { %8844 = vmatprep.mubr.msk.f32.mxu0 %vm314_vm1, %v9892_v19  ;;  %11792 = vst [vmem:[#allocation4_spill] sm:$0xff] %v9985_v37  ;;  %v10008_v42 = vld [vmem:[%s9831_s12 + $0x1f7] sm:$0xff]  ;;  %v10022_v44 = vld [vmem:[%s9831_s12 + $0x1ff] sm:$0xff]  ;;  %v10028_v46 = vld [vmem:[%s9831_s12 + $0x207] sm:$0xff] }
  0x27   : > { %v10011_v43 = vld [vmem:[%s9831_s12 + $0x210] sm:$0xff]  ;;  %v10025_v45 = vld [vmem:[%s9831_s12 + $0x218] sm:$0xff]  ;;  %v10031_v47 = vld [vmem:[%s9831_s12 + $0x220] sm:$0xff] }
  0x28   : > { %8549 = vmatmul.mubr.msk.f32.gmra.mrb[6].mxu1 %vm314_vm1, %v9902_v20  ;;  %v10042_v48 = vld [vmem:[%s9831_s12 + $0x20f] sm:$0xff]  ;;  %v10048_v50 = vld [vmem:[%s9831_s12 + $0x217] sm:$0xff]  ;;  %v10062_v52 = vld [vmem:[%s9831_s12 + $0x21f] sm:$0xff] }
  0x29   : > { %8845 = vmatmul.mubr.msk.f32.gmra.mrb[6].mxu0 %vm314_vm1, %v9905_v21  ;;  %8551 = vmatprep.mubr.msk.f32.mxu1 %vm314_vm1, %v9908_v22  ;;  %v10045_v49 = vld [vmem:[%s9831_s12 + $0x228] sm:$0xff]  ;;  %v10051_v51 = vld [vmem:[%s9831_s12 + $0x230] sm:$0xff]  ;;  %v10065_v53 = vld [vmem:[%s9831_s12 + $0x238] sm:$0xff] }
  0x2a   : > { %8847 = vmatprep.mubr.msk.f32.mxu0 %vm314_vm1, %v9911_v23  ;;  %v10068_v54 = vld [vmem:[%s9831_s12 + $0x227] sm:$0xff]  ;;  %v10082_v56 = vld [vmem:[%s9831_s12 + $0x22f] sm:$0xff]  ;;  %v10088_v58 = vld [vmem:[%s9831_s12 + $0x237] sm:$0xff] }
  0x2b   : > { %v10071_v55 = vld [vmem:[%s9831_s12 + $0x181] sm:$0xff]  ;;  %v10085_v57 = vld [vmem:[%s9831_s12 + $0x189] sm:$0xff]  ;;  %v10091_v59 = vld [vmem:[%s9831_s12 + $0x191] sm:$0xff] }
  0x2c   : > { %8552 = vmatmul.mubr.msk.f32.gmra.mrb[8].mxu1 %vm314_vm1, %v9922_v24  ;;  %11793 = vst [vmem:[#allocation5_spill] sm:$0xff] %v10085_v57  ;;  %11794 = vst [vmem:[#allocation6_spill] sm:$0xff] %v10091_v59  ;;  %v10107_v61 = vld [vmem:[%s9831_s12 + $0x23f] sm:$0xff]  ;;  %v10115_v63 = vld [vmem:[%s9831_s12 + $0x247] sm:$0xff] }
  0x2d   : > { %8848 = vmatmul.mubr.msk.f32.gmra.mrb[8].mxu0 %vm314_vm1, %v9925_v25  ;;  %8554 = vmatprep.mubr.msk.f32.mxu1 %vm314_vm1, %v9928_v26  ;;  %v10110_v62 = vld [vmem:[%s9831_s12 + $0x199] sm:$0xff]  ;;  %v10118_v0 = vld [vmem:[%s9831_s12 + $0x1a1] sm:$0xff]  ;;  %v10131_v2 = vld [vmem:[%s9831_s12 + $0x24f] sm:$0xff] }
  0x2e   : > { %8850 = vmatprep.mubr.msk.f32.mxu0 %vm314_vm1, %v9931_v27  ;;  %11795 = vst [vmem:[#allocation7_spill] sm:$0xff] %v10110_v62  ;;  %11796 = vst [vmem:[#allocation8_spill] sm:$0xff] %v10118_v0  ;;  %v10134_v3 = vld [vmem:[%s9831_s12 + $0x1a9] sm:$0xff]  ;;  %v10137_v4 = vld [vmem:[%s9831_s12 + $0x257] sm:$0xff] }
  0x2f   : > { %11797 = vst [vmem:[#allocation9_spill] sm:$0xff] %v10134_v3  ;;  %v10140_v6 = vld [vmem:[%s9831_s12 + $0x1b1] sm:$0xff]  ;;  %v10151_v8 = vld [vmem:[%s9831_s12 + $0x25f] sm:$0xff]  ;;  %v10157_v12 = vld [vmem:[%s9831_s12 + $0x267] sm:$0xff] }
  0x30   : > { %8555 = vmatmul.mubr.msk.f32.gmra.mrb[10].mxu1 %vm314_vm1, %v9942_v28  ;;  %11798 = vst [vmem:[#allocation10_spill] sm:$0xff] %v10140_v6  ;;  %v10160_v14 = vld [vmem:[%s9831_s12 + $0x1c1] sm:$0xff]  ;;  %v10171_v16 = vld [vmem:[%s9831_s12 + $0x26f] sm:$0xff] }
  0x31   : > { %8851 = vmatmul.mubr.msk.f32.gmra.mrb[10].mxu0 %vm314_vm1, %v9945_v29  ;;  %8557 = vmatprep.mubr.msk.f32.mxu1 %vm314_vm1, %v9948_v30  ;;  %11800 = vst [vmem:[#allocation12_spill] sm:$0xff] %v10160_v14 }
  0x32   : > { %8853 = vmatprep.mubr.msk.f32.mxu0 %vm314_vm1, %v9951_v31 }
  0x34   : > { %8558 = vmatmul.mubr.msk.f32.gmra.mrb[12].mxu1 %vm314_vm1, %v9962_v32 }
  0x35   : > { %8854 = vmatmul.mubr.msk.f32.gmra.mrb[12].mxu0 %vm314_vm1, %v9965_v33  ;;  %8560 = vmatprep.mubr.msk.f32.mxu1 %vm314_vm1, %v9968_v34 }
  0x36   : > { %8856 = vmatprep.mubr.msk.f32.mxu0 %vm314_vm1, %v9971_v35 }
  0x38   : > { %8561 = vmatmul.mubr.msk.f32.gmra.mrb[14].mxu1 %vm314_vm1, %v9982_v36 }
  0x39   : > { %8857 = vmatmul.mubr.msk.f32.gmra.mrb[14].mxu0 %vm314_vm1, %v9985_v37  ;;  %8563 = vmatprep.mubr.msk.f32.mxu1 %vm314_vm1, %v9988_v38 }
  0x3a   : > { %8859 = vmatprep.mubr.msk.f32.mxu0 %vm314_vm1, %v9991_v39 }
  0x3c   : > { %8564 = vmatmul.mubr.msk.f32.gmra.mrb[16].mxu1 %vm314_vm1, %v10002_v40 }
  0x3d   : > { %8860 = vmatmul.mubr.msk.f32.gmra.mrb[16].mxu0 %vm314_vm1, %v10005_v41  ;;  %8566 = vmatprep.mubr.msk.f32.mxu1 %vm314_vm1, %v10008_v42 }
  0x3e   : > { %8862 = vmatprep.mubr.msk.f32.mxu0 %vm314_vm1, %v10011_v43 }
  0x40   : > { %8567 = vmatmul.mubr.msk.f32.gmra.mrb[18].mxu1 %vm314_vm1, %v10022_v44 }
  0x41   : > { %8863 = vmatmul.mubr.msk.f32.gmra.mrb[18].mxu0 %vm314_vm1, %v10025_v45  ;;  %8569 = vmatprep.mubr.msk.f32.mxu1 %vm314_vm1, %v10028_v46 }
  0x42   : > { %8865 = vmatprep.mubr.msk.f32.mxu0 %vm314_vm1, %v10031_v47 }
  0x44   : > { %8570 = vmatmul.mubr.msk.f32.gmra.mrb[20].mxu1 %vm314_vm1, %v10042_v48 }
  0x45   : > { %8866 = vmatmul.mubr.msk.f32.gmra.mrb[20].mxu0 %vm314_vm1, %v10045_v49  ;;  %8572 = vmatprep.mubr.msk.f32.mxu1 %vm314_vm1, %v10048_v50 }
  0x46   : > { %8868 = vmatprep.mubr.msk.f32.mxu0 %vm314_vm1, %v10051_v51 }
  0x48   : > { %8573 = vmatmul.mubr.msk.f32.gmra.mrb[22].mxu1 %vm314_vm1, %v10062_v52 }
  0x49   : > { %8869 = vmatmul.mubr.msk.f32.gmra.mrb[22].mxu0 %vm314_vm1, %v10065_v53  ;;  %8575 = vmatprep.mubr.msk.f32.mxu1 %vm314_vm1, %v10068_v54 }
  0x4a   : > { %8909 = vmatprep.mubr.msk.f32.mxu0 %vm314_vm1, %v10071_v55 }
  0x4c   : > { %8576 = vmatmul.mubr.msk.f32.gmra.mrb[24].mxu1 %vm314_vm1, %v10082_v56 }
  0x4d   : > { %8910 = vmatmul.mubr.msk.f32.vlgmr.msra.gmra.mrb[0].mxu0 %vm314_vm1, %v10085_v57  ;;  %8578 = vmatprep.mubr.msk.f32.mxu1 %vm314_vm1, %v10088_v58  ;;  %v10220_v57 = vld [vmem:[%s9831_s12 + $0x1f1] sm:$0xff] }
  0x4e   : > { %8982 = vmatpush3.msk.msra.mxu0 %vm459_vm0, %v9854_v10  ;;  %8912 = vmatprep.mubr.msk.f32.mxu0 %vm314_vm1, %v10091_v59  ;;  %v10154_v10 = vld [vmem:[%s9831_s12 + $0x1b9] sm:$0xff]  ;;  %v10200_v59 = vld [vmem:[%s9831_s12 + $0x1e1] sm:$0xff]  ;;  %11811 = vst [vmem:[#allocation23_spill] sm:$0xff] %v10220_v57 }
  0x4f   : > { %9055 = vmatprep.subr.msk.mxu0 %vm459_vm0, %v10096_v60  ;;  %11799 = vst [vmem:[#allocation11_spill] sm:$0xff] %v10154_v10  ;;  %11807 = vst [vmem:[#allocation19_spill] sm:$0xff] %v10200_v59 }
  0x50   : > { %8579 = vmatmul.mubr.msk.f32.gmra.mrb[26].mxu1 %vm314_vm1, %v10107_v61 }
  0x51   : > { %8913 = vmatmul.mubr.msk.f32.gmra.mrb[2].mxu0 %vm314_vm1, %v10110_v62  ;;  %8581 = vmatprep.mubr.msk.f32.mxu1 %vm314_vm1, %v10115_v63  ;;  %v10197_v62 = vld [vmem:[%s9831_s12 + $0x287] sm:$0xff] }
  0x52   : > { %8915 = vmatprep.mubr.msk.f32.mxu0 %vm314_vm1, %v10118_v0  ;;  %v10180_v0 = vld [vmem:[%s9831_s12 + $0x1d1] sm:$0xff]  ;;  %11806 = vst [vmem:[#allocation18_spill] sm:$0xff] %v10197_v62 }
  0x53   : > { %11803 = vst [vmem:[#allocation15_spill] sm:$0xff] %v10180_v0 }
  0x54   : > { %8582 = vmatmul.mubr.msk.f32.gmra.mrb[28].mxu1 %vm314_vm1, %v10131_v2 }
  0x55   : > { %8916 = vmatmul.mubr.msk.f32.gmra.mrb[4].mxu0 %vm314_vm1, %v10134_v3  ;;  %8584 = vmatprep.mubr.msk.f32.mxu1 %vm314_vm1, %v10137_v4  ;;  %v10177_v3 = vld [vmem:[%s9831_s12 + $0x277] sm:$0xff] }
  0x56   : > { %8918 = vmatprep.mubr.msk.f32.mxu0 %vm314_vm1, %v10140_v6  ;;  %v10174_v6 = vld [vmem:[%s9831_s12 + $0x1c9] sm:$0xff]  ;;  %11802 = vst [vmem:[#allocation14_spill] sm:$0xff] %v10177_v3 }
  0x57   : > { %11801 = vst [vmem:[#allocation13_spill] sm:$0xff] %v10174_v6 }
  0x58   : > { %8585 = vmatmul.mubr.msk.f32.gmra.mrb[30].mxu1 %vm314_vm1, %v10151_v8 }
  0x59   : > { %8919 = vmatmul.mubr.msk.f32.gmra.mrb[6].mxu0 %vm314_vm1, %v10154_v10  ;;  %8587 = vmatprep.mubr.msk.f32.mxu1 %vm314_vm1, %v10157_v12  ;;  %v10194_v10 = vld [vmem:[%s9831_s12 + $0x1d9] sm:$0xff] }
  0x5a   : > { %8921 = vmatprep.mubr.msk.f32.mxu0 %vm314_vm1, %v10160_v14  ;;  %v10191_v14 = vld [vmem:[%s9831_s12 + $0x27f] sm:$0xff]  ;;  %11805 = vst [vmem:[#allocation17_spill] sm:$0xff] %v10194_v10 }
  0x5b   : > { %11804 = vst [vmem:[#allocation16_spill] sm:$0xff] %v10191_v14 }
  0x5c   : > { %8588 = vmatmul.mubr.msk.f32.gmra.mrb[32].mxu1 %vm314_vm1, %v10171_v16 }
  0x5d   : > { %8922 = vmatmul.mubr.msk.f32.gmra.mrb[8].mxu0 %vm314_vm1, %v10174_v6  ;;  %8590 = vmatprep.mubr.msk.f32.mxu1 %vm314_vm1, %v10177_v3  ;;  %v10214_v6 = vld [vmem:[%s9831_s12 + $0x1e9] sm:$0xff]  ;;  %v10217_v3 = vld [vmem:[%s9831_s12 + $0x297] sm:$0xff] }
  0x5e   : > { %8924 = vmatprep.mubr.msk.f32.mxu0 %vm314_vm1, %v10180_v0  ;;  %v10211_v0 = vld [vmem:[%s9831_s12 + $0x28f] sm:$0xff]  ;;  %11809 = vst [vmem:[#allocation21_spill] sm:$0xff] %v10214_v6  ;;  %11810 = vst [vmem:[#allocation22_spill] sm:$0xff] %v10217_v3 }
  0x5f   : > { %11808 = vst [vmem:[#allocation20_spill] sm:$0xff] %v10211_v0 }
  0x60   : > { %8591 = vmatmul.mubr.msk.f32.gmra.mrb[34].mxu1 %vm314_vm1, %v10191_v14  ;;  %v10240_v14 = vld [vmem:[%s9831_s12 + $0x201] sm:$0xff] }
  0x61   : > { %8925 = vmatmul.mubr.msk.f32.gmra.mrb[10].mxu0 %vm314_vm1, %v10194_v10  ;;  %8593 = vmatprep.mubr.msk.f32.mxu1 %vm314_vm1, %v10197_v62  ;;  %v10234_v10 = vld [vmem:[%s9831_s12 + $0x1f9] sm:$0xff]  ;;  %v10237_v62 = vld [vmem:[%s9831_s12 + $0x2a7] sm:$0xff]  ;;  %11815 = vst [vmem:[#allocation27_spill] sm:$0xff] %v10240_v14 }
  0x62   : > { %8927 = vmatprep.mubr.msk.f32.mxu0 %vm314_vm1, %v10200_v59  ;;  %v10231_v59 = vld [vmem:[%s9831_s12 + $0x29f] sm:$0xff]  ;;  %11813 = vst [vmem:[#allocation25_spill] sm:$0xff] %v10234_v10  ;;  %11814 = vst [vmem:[#allocation26_spill] sm:$0xff] %v10237_v62 }
  0x63   : > { %11812 = vst [vmem:[#allocation24_spill] sm:$0xff] %v10231_v59 }
  0x64   : > { %8594 = vmatmul.mubr.msk.f32.gmra.mrb[36].mxu1 %vm314_vm1, %v10211_v0  ;;  %v10260_v0 = vld [vmem:[%s9831_s12 + $0x211] sm:$0xff] }
  0x65   : > { %8928 = vmatmul.mubr.msk.f32.gmra.mrb[12].mxu0 %vm314_vm1, %v10214_v6  ;;  %8596 = vmatprep.mubr.msk.f32.mxu1 %vm314_vm1, %v10217_v3  ;;  %v10254_v6 = vld [vmem:[%s9831_s12 + $0x209] sm:$0xff]  ;;  %v10257_v3 = vld [vmem:[%s9831_s12 + $0x2b7] sm:$0xff]  ;;  %11819 = vst [vmem:[#allocation31_spill] sm:$0xff] %v10260_v0 }
  0x66   : > { %8930 = vmatprep.mubr.msk.f32.mxu0 %vm314_vm1, %v10220_v57  ;;  %v10251_v57 = vld [vmem:[%s9831_s12 + $0x2af] sm:$0xff]  ;;  %11817 = vst [vmem:[#allocation29_spill] sm:$0xff] %v10254_v6  ;;  %11818 = vst [vmem:[#allocation30_spill] sm:$0xff] %v10257_v3 }
  0x67   : > { %11816 = vst [vmem:[#allocation28_spill] sm:$0xff] %v10251_v57 }
  0x68   : > { %8597 = vmatmul.mubr.msk.f32.gmra.mrb[38].mxu1 %vm314_vm1, %v10231_v59  ;;  %v10280_v59 = vld [vmem:[%s9831_s12 + $0x221] sm:$0xff] }
  0x69   : > { %8931 = vmatmul.mubr.msk.f32.gmra.mrb[14].mxu0 %vm314_vm1, %v10234_v10  ;;  %8599 = vmatprep.mubr.msk.f32.mxu1 %vm314_vm1, %v10237_v62  ;;  %v10274_v10 = vld [vmem:[%s9831_s12 + $0x219] sm:$0xff]  ;;  %v10277_v62 = vld [vmem:[%s9831_s12 + $0x2c7] sm:$0xff]  ;;  %11823 = vst [vmem:[#allocation35_spill] sm:$0xff] %v10280_v59 }
  0x6a   : > { %8933 = vmatprep.mubr.msk.f32.mxu0 %vm314_vm1, %v10240_v14  ;;  %v10271_v14 = vld [vmem:[%s9831_s12 + $0x2bf] sm:$0xff]  ;;  %11821 = vst [vmem:[#allocation33_spill] sm:$0xff] %v10274_v10  ;;  %11822 = vst [vmem:[#allocation34_spill] sm:$0xff] %v10277_v62 }
  0x6b   : > { %11820 = vst [vmem:[#allocation32_spill] sm:$0xff] %v10271_v14 }
  0x6c   : > { %8600 = vmatmul.mubr.msk.f32.gmra.mrb[40].mxu1 %vm314_vm1, %v10251_v57  ;;  %v10300_v57 = vld [vmem:[%s9831_s12 + $0x231] sm:$0xff] }
  0x6d   : > { %8934 = vmatmul.mubr.msk.f32.gmra.mrb[16].mxu0 %vm314_vm1, %v10254_v6  ;;  %8602 = vmatprep.mubr.msk.f32.mxu1 %vm314_vm1, %v10257_v3  ;;  %v10294_v6 = vld [vmem:[%s9831_s12 + $0x229] sm:$0xff]  ;;  %v10297_v3 = vld [vmem:[%s9831_s12 + $0x2d7] sm:$0xff]  ;;  %11827 = vst [vmem:[#allocation39_spill] sm:$0xff] %v10300_v57 }
  0x6e   : > { %8936 = vmatprep.mubr.msk.f32.mxu0 %vm314_vm1, %v10260_v0  ;;  %v10291_v0 = vld [vmem:[%s9831_s12 + $0x2cf] sm:$0xff]  ;;  %11825 = vst [vmem:[#allocation37_spill] sm:$0xff] %v10294_v6  ;;  %11826 = vst [vmem:[#allocation38_spill] sm:$0xff] %v10297_v3 }
  0x6f   : > { %11824 = vst [vmem:[#allocation36_spill] sm:$0xff] %v10291_v0 }
  0x70   : > { %8603 = vmatmul.mubr.msk.f32.gmra.mrb[42].mxu1 %vm314_vm1, %v10271_v14  ;;  %v10318_v14 = vld [vmem:[%s9831_s12 + $0x241] sm:$0xff] }
  0x71   : > { %8937 = vmatmul.mubr.msk.f32.gmra.mrb[18].mxu0 %vm314_vm1, %v10274_v10  ;;  %8605 = vmatprep.mubr.msk.f32.mxu1 %vm314_vm1, %v10277_v62  ;;  %v10314_v10 = vld [vmem:[%s9831_s12 + $0x239] sm:$0xff]  ;;  %v7253_v62 = vld [vmem:[%s9831_s12 + $0x168] sm:$0xff]  ;;  %11829 = vst [vmem:[#allocation41_spill] sm:$0xff] %v10318_v14 }
  0x72   : > { %8939 = vmatprep.mubr.msk.f32.mxu0 %vm314_vm1, %v10280_v59  ;;  %v10311_v59 = vld [vmem:[%s9831_s12 + $0x2df] sm:$0xff] }
  0x73   : > { %11828 = vst [vmem:[#allocation40_spill] sm:$0xff] %v10311_v59 }
  0x74   : > { %8606 = vmatmul.mubr.msk.f32.gmra.mrb[44].mxu1 %vm314_vm1, %v10291_v0  ;;  %v10333_v0 = vld [vmem:[%s9831_s12 + $0x251] sm:$0xff] }
  0x75   : > { %8940 = vmatmul.mubr.msk.f32.gmra.mrb[20].mxu0 %vm314_vm1, %v10294_v6  ;;  %8608 = vmatprep.mubr.msk.f32.mxu1 %vm314_vm1, %v10297_v3  ;;  %v10329_v6 = vld [vmem:[%s9831_s12 + $0x249] sm:$0xff]  ;;  %v7255_v3 = vld [vmem:[%s9831_s12 + $0x178] sm:$0xff] }
  0x76   : > { %8942 = vmatprep.mubr.msk.f32.mxu0 %vm314_vm1, %v10300_v57  ;;  %v7254_v57 = vld [vmem:[%s9831_s12 + $0x170] sm:$0xff] }
  0x78   : > { %8609 = vmatmul.mubr.msk.f32.gmra.mrb[46].mxu1 %vm314_vm1, %v10311_v59  ;;  %v10338_v59 = vld [vmem:[%s11737_s2 + $0xc] sm:$0xf] }
  0x79   : > { %8943 = vmatmul.mubr.msk.f32.gmra.mrb[22].mxu0 %vm314_vm1, %v10314_v10  ;;  %8613 = vmatprep.mubr.msk.f32.mxu1 %vm314_vm1, %v7253_v62  ;;  %v10347_v62 = vld [vmem:[%s9831_s12 + $0x259] sm:$0xff] }
  0x7a   : > { %8945 = vmatprep.mubr.msk.f32.mxu0 %vm314_vm1, %v10318_v14  ;;  %v10352_v14 = vld [vmem:[%s9831_s12 + $0x261] sm:$0xff] }
  0x7c   : > { %8614 = vmatmul.mubr.msk.f32.vlgmr.msra.gmra.mrb[0].mxu1 %vm314_vm1, %v7254_v57  ;;  %v10368_v57 = vld [vmem:[%s9831_s12 + $0x271] sm:$0xff] }
  0x7d   : > { %8946 = vmatmul.mubr.msk.f32.gmra.mrb[24].mxu0 %vm314_vm1, %v10329_v6  ;;  %8686 = vmatpush3.msk.msra.mxu1 %vm459_vm0, %v9859_v11  ;;  %v10365_v11 = vld [vmem:[%s9831_s12 + $0x269] sm:$0xff] }
  0x7e   : > { %8616 = vmatprep.mubr.msk.f32.mxu1 %vm314_vm1, %v7255_v3  ;;  %8948 = vmatprep.mubr.msk.f32.mxu0 %vm314_vm1, %v10333_v0  ;;  %v10396_v3 = vld [vmem:[%s9831_s12 + $0x291] sm:$0xff] }
  0x7f   : > { %8759 = vmatprep.subr.msk.mxu1 %vm459_vm0, %v10338_v59  ;;  %11833 = vst [vmem:[#allocation45_spill] sm:$0xff] %v10396_v3 }
  0x80   : > { %8617 = vmatmul.mubr.msk.f32.gmra.mrb[2].mxu1 %vm314_vm1, %v9835_v5  ;;  %v10379_v5 = vld [vmem:[%s9831_s12 + $0x279] sm:$0xff] }
  0x81   : > { %8949 = vmatmul.mubr.msk.f32.gmra.mrb[26].mxu0 %vm314_vm1, %v10347_v62  ;;  %8619 = vmatprep.mubr.msk.f32.mxu1 %vm314_vm1, %v9842_v7  ;;  %11830 = vst [vmem:[#allocation42_spill] sm:$0xff] %v10379_v5  ;;  %v10382_v7 = vld [vmem:[%s9831_s12 + $0x281] sm:$0xff] }
  0x82   : > { %8951 = vmatprep.mubr.msk.f32.mxu0 %vm314_vm1, %v10352_v14  ;;  %11831 = vst [vmem:[#allocation43_spill] sm:$0xff] %v10382_v7 }
  0x84   : > { %8620 = vmatmul.mubr.msk.f32.gmra.mrb[4].mxu1 %vm314_vm1, %v9846_v9  ;;  %v10393_v9 = vld [vmem:[%s9831_s12 + $0x289] sm:$0xff] }
  0x85   : > { %8952 = vmatmul.mubr.msk.f32.gmra.mrb[28].mxu0 %vm314_vm1, %v10365_v11  ;;  %8622 = vmatprep.mubr.msk.f32.mxu1 %vm314_vm1, %v9865_v13  ;;  %11832 = vst [vmem:[#allocation44_spill] sm:$0xff] %v10393_v9 }
  0x86   : > { %8954 = vmatprep.mubr.msk.f32.mxu0 %vm314_vm1, %v10368_v57 }
  0x88   : > { %8623 = vmatmul.mubr.msk.f32.gmra.mrb[6].mxu1 %vm314_vm1, %v9872_v15 }
  0x89   : > { %8955 = vmatmul.mubr.msk.f32.gmra.mrb[30].mxu0 %vm314_vm1, %v10379_v5  ;;  %8625 = vmatprep.mubr.msk.f32.mxu1 %vm314_vm1, %v9886_v17  ;;  %v10407_v5 = vld [vmem:[%s9831_s12 + $0x299] sm:$0xff] }
  0x8a   : > { %8957 = vmatprep.mubr.msk.f32.mxu0 %vm314_vm1, %v10382_v7  ;;  %11834 = vst [vmem:[#allocation46_spill] sm:$0xff] %v10407_v5  ;;  %v10410_v7 = vld [vmem:[%s9831_s12 + $0x2a1] sm:$0xff] }
  0x8b   : > { %11835 = vst [vmem:[#allocation47_spill] sm:$0xff] %v10410_v7 }
  0x8c   : > { %8626 = vmatmul.mubr.msk.f32.gmra.mrb[8].mxu1 %vm314_vm1, %v9892_v19 }
  0x8d   : > { %8958 = vmatmul.mubr.msk.f32.gmra.mrb[32].mxu0 %vm314_vm1, %v10393_v9  ;;  %8628 = vmatprep.mubr.msk.f32.mxu1 %vm314_vm1, %v9905_v21  ;;  %v10421_v9 = vld [vmem:[%s9831_s12 + $0x2a9] sm:$0xff] }
  0x8e   : > { %8960 = vmatprep.mubr.msk.f32.mxu0 %vm314_vm1, %v10396_v3  ;;  %11836 = vst [vmem:[#allocation48_spill] sm:$0xff] %v10421_v9  ;;  %v10424_v3 = vld [vmem:[%s9831_s12 + $0x2b1] sm:$0xff] }
  0x8f   : > { %11837 = vst [vmem:[#allocation49_spill] sm:$0xff] %v10424_v3 }
  0x90   : > { %8629 = vmatmul.mubr.msk.f32.gmra.mrb[10].mxu1 %vm314_vm1, %v9911_v23 }
  0x91   : > { %8961 = vmatmul.mubr.msk.f32.gmra.mrb[34].mxu0 %vm314_vm1, %v10407_v5  ;;  %8631 = vmatprep.mubr.msk.f32.mxu1 %vm314_vm1, %v9925_v25  ;;  %v10435_v5 = vld [vmem:[%s9831_s12 + $0x2b9] sm:$0xff] }
  0x92   : > { %8963 = vmatprep.mubr.msk.f32.mxu0 %vm314_vm1, %v10410_v7  ;;  %11838 = vst [vmem:[#allocation50_spill] sm:$0xff] %v10435_v5  ;;  %v10438_v7 = vld [vmem:[%s9831_s12 + $0x2c1] sm:$0xff] }
  0x93   : > { %11839 = vst [vmem:[#allocation51_spill] sm:$0xff] %v10438_v7 }
  0x94   : > { %8632 = vmatmul.mubr.msk.f32.gmra.mrb[12].mxu1 %vm314_vm1, %v9931_v27 }
  0x95   : > { %8964 = vmatmul.mubr.msk.f32.gmra.mrb[36].mxu0 %vm314_vm1, %v10421_v9  ;;  %8634 = vmatprep.mubr.msk.f32.mxu1 %vm314_vm1, %v9945_v29  ;;  %v10449_v9 = vld [vmem:[%s9831_s12 + $0x2c9] sm:$0xff] }
  0x96   : > { %8966 = vmatprep.mubr.msk.f32.mxu0 %vm314_vm1, %v10424_v3  ;;  %11840 = vst [vmem:[#allocation52_spill] sm:$0xff] %v10449_v9  ;;  %v10452_v3 = vld [vmem:[%s9831_s12 + $0x2d1] sm:$0xff] }
  0x98   : > { %8635 = vmatmul.mubr.msk.f32.gmra.mrb[14].mxu1 %vm314_vm1, %v9951_v31 }
  0x99   : > { %8967 = vmatmul.mubr.msk.f32.gmra.mrb[38].mxu0 %vm314_vm1, %v10435_v5  ;;  %8637 = vmatprep.mubr.msk.f32.mxu1 %vm314_vm1, %v9965_v33  ;;  %v10463_v5 = vld [vmem:[%s9831_s12 + $0x2d9] sm:$0xff] }
  0x9a   : > { %8969 = vmatprep.mubr.msk.f32.mxu0 %vm314_vm1, %v10438_v7  ;;  %11841 = vst [vmem:[#allocation53_spill] sm:$0xff] %v10463_v5  ;;  %v10466_v7 = vld [vmem:[%s9831_s12 + $0x2e1] sm:$0xff] }
  0x9c   : > { %8638 = vmatmul.mubr.msk.f32.gmra.mrb[16].mxu1 %vm314_vm1, %v9971_v35 }
  0x9d   : > { %8970 = vmatmul.mubr.msk.f32.gmra.mrb[40].mxu0 %vm314_vm1, %v10449_v9  ;;  %8640 = vmatprep.mubr.msk.f32.mxu1 %vm314_vm1, %v9985_v37  ;;  %v7690_v9 = vld [vmem:[%s9831_s12 + $0x2e9] sm:$0xff]  ;;  %v7691_v37 = vld [vmem:[%s9831_s12 + $0x2f1] sm:$0xff] }
  0x9e   : > { %8972 = vmatprep.mubr.msk.f32.mxu0 %vm314_vm1, %v10452_v3 }
  0xa0   : > { %8641 = vmatmul.mubr.msk.f32.gmra.mrb[18].mxu1 %vm314_vm1, %v9991_v39 }
  0xa1   : > { %8973 = vmatmul.mubr.msk.f32.gmra.mrb[42].mxu0 %vm314_vm1, %v10463_v5  ;;  %8643 = vmatprep.mubr.msk.f32.mxu1 %vm314_vm1, %v10005_v41  ;;  %v7692_v5 = vld [vmem:[%s9831_s12 + $0x2f9] sm:$0xff] }
  0xa2   : > { %8975 = vmatprep.mubr.msk.f32.mxu0 %vm314_vm1, %v10466_v7 }
  0xa4   : > { %8644 = vmatmul.mubr.msk.f32.gmra.mrb[20].mxu1 %vm314_vm1, %v10011_v43 }
  0xa5   : > { %8976 = vmatmul.mubr.msk.f32.gmra.mrb[44].mxu0 %vm314_vm1, %v7690_v9  ;;  %8646 = vmatprep.mubr.msk.f32.mxu1 %vm314_vm1, %v10025_v45  ;;  %v10495_v9 = vld [vmem:[%s11737_s2 + $0x20] sm:$0xf] }
  0xa6   : > { %8978 = vmatprep.mubr.msk.f32.mxu0 %vm314_vm1, %v7691_v37  ;;  %v10511_v37 = vld [vmem:[%s9831_s12 + $0x248] sm:$0xff] }
  0xa8   : > { %8647 = vmatmul.mubr.msk.f32.gmra.mrb[22].mxu1 %vm314_vm1, %v10031_v47 }
  0xa9   : > { %8979 = vmatmul.mubr.msk.f32.gmra.mrb[46].mxu0 %vm314_vm1, %v7692_v5  ;;  %8649 = vmatprep.mubr.msk.f32.mxu1 %vm314_vm1, %v10045_v49  ;;  %v8038_v5 = vld [vmem:[%s11735_s0 + $0x188] sm:$0xff] }
  0xaa   : > { %8983 = vmatprep.mubr.msk.f32.mxu0 %vm314_vm1, %v9889_v18  ;;  %v10506_v18 = vld [vmem:[%s9831_s12 + $0x240] sm:$0xff]  ;;  %vm6145_vm4 = vcmp.gt.f32.partialorder %v8038_v5, 0.0  ;;  %v11854_v5 = vld [vmem:[#allocation11_spill] sm:$0xff] }
  0xac   : > { %8650 = vmatmul.mubr.msk.f32.gmra.mrb[24].mxu1 %vm314_vm1, %v10051_v51  ;;  %v10636_v51 = vld [vmem:[%s9831_s12 + $0x2d0] sm:$0xff] }
  0xad   : > { %8984 = vmatmul.mubr.msk.f32.vlgmr.msra.gmra.mrb[0].mxu0 %vm314_vm1, %v9902_v20  ;;  %8652 = vmatprep.mubr.msk.f32.mxu1 %vm314_vm1, %v10065_v53  ;;  %v10524_v20 = vld [vmem:[%s9831_s12 + $0x250] sm:$0xff] }
  0xae   : > { %9056 = vmatpush3.msk.msra.mxu0 %vm459_vm0, %v10096_v60  ;;  %8986 = vmatprep.mubr.msk.f32.mxu0 %vm314_vm1, %v9908_v22  ;;  %v10527_v22 = vld [vmem:[%s9831_s12 + $0x258] sm:$0xff] }
  0xaf   : > { %9129 = vmatprep.subr.msk.mxu0 %vm459_vm0, %v10495_v9  ;;  %v7353_v60 = vld [vmem:[%s9831_s12 + $0x179] sm:$0xff] }
  0xb0   : > { %8653 = vmatmul.mubr.msk.f32.gmra.mrb[26].mxu1 %vm314_vm1, %v10506_v18 }
  0xb1   : > { %8987 = vmatmul.mubr.msk.f32.gmra.mrb[2].mxu0 %vm314_vm1, %v9922_v24  ;;  %8655 = vmatprep.mubr.msk.f32.mxu1 %vm314_vm1, %v10511_v37  ;;  %v10538_v24 = vld [vmem:[%s9831_s12 + $0x260] sm:$0xff] }
  0xb2   : > { %8989 = vmatprep.mubr.msk.f32.mxu0 %vm314_vm1, %v9928_v26  ;;  %v10541_v26 = vld [vmem:[%s9831_s12 + $0x268] sm:$0xff] }
  0xb4   : > { %8656 = vmatmul.mubr.msk.f32.gmra.mrb[28].mxu1 %vm314_vm1, %v10524_v20 }
  0xb5   : > { %8990 = vmatmul.mubr.msk.f32.gmra.mrb[4].mxu0 %vm314_vm1, %v9942_v28  ;;  %8658 = vmatprep.mubr.msk.f32.mxu1 %vm314_vm1, %v10527_v22  ;;  %v10552_v28 = vld [vmem:[%s9831_s12 + $0x270] sm:$0xff] }
  0xb6   : > { %8992 = vmatprep.mubr.msk.f32.mxu0 %vm314_vm1, %v9948_v30  ;;  %v10555_v30 = vld [vmem:[%s9831_s12 + $0x278] sm:$0xff] }
  0xb8   : > { %8659 = vmatmul.mubr.msk.f32.gmra.mrb[30].mxu1 %vm314_vm1, %v10538_v24 }
  0xb9   : > { %8993 = vmatmul.mubr.msk.f32.gmra.mrb[6].mxu0 %vm314_vm1, %v9962_v32  ;;  %8661 = vmatprep.mubr.msk.f32.mxu1 %vm314_vm1, %v10541_v26  ;;  %v10566_v32 = vld [vmem:[%s9831_s12 + $0x280] sm:$0xff] }
  0xba   : > { %8995 = vmatprep.mubr.msk.f32.mxu0 %vm314_vm1, %v9968_v34  ;;  %v10569_v34 = vld [vmem:[%s9831_s12 + $0x288] sm:$0xff] }
  0xbc   : > { %8662 = vmatmul.mubr.msk.f32.gmra.mrb[32].mxu1 %vm314_vm1, %v10552_v28 }
  0xbd   : > { %8996 = vmatmul.mubr.msk.f32.gmra.mrb[8].mxu0 %vm314_vm1, %v9982_v36  ;;  %8664 = vmatprep.mubr.msk.f32.mxu1 %vm314_vm1, %v10555_v30  ;;  %v10580_v36 = vld [vmem:[%s9831_s12 + $0x290] sm:$0xff] }
  0xbe   : > { %8998 = vmatprep.mubr.msk.f32.mxu0 %vm314_vm1, %v9988_v38  ;;  %v10583_v38 = vld [vmem:[%s9831_s12 + $0x298] sm:$0xff] }
  0xc0   : > { %8665 = vmatmul.mubr.msk.f32.gmra.mrb[34].mxu1 %vm314_vm1, %v10566_v32 }
  0xc1   : > { %8999 = vmatmul.mubr.msk.f32.gmra.mrb[10].mxu0 %vm314_vm1, %v10002_v40  ;;  %8667 = vmatprep.mubr.msk.f32.mxu1 %vm314_vm1, %v10569_v34  ;;  %v10594_v40 = vld [vmem:[%s9831_s12 + $0x2a0] sm:$0xff] }
  0xc2   : > { %9001 = vmatprep.mubr.msk.f32.mxu0 %vm314_vm1, %v10008_v42  ;;  %v10597_v42 = vld [vmem:[%s9831_s12 + $0x2a8] sm:$0xff] }
  0xc4   : > { %8668 = vmatmul.mubr.msk.f32.gmra.mrb[36].mxu1 %vm314_vm1, %v10580_v36 }
  0xc5   : > { %9002 = vmatmul.mubr.msk.f32.gmra.mrb[12].mxu0 %vm314_vm1, %v10022_v44  ;;  %8670 = vmatprep.mubr.msk.f32.mxu1 %vm314_vm1, %v10583_v38  ;;  %v10608_v44 = vld [vmem:[%s9831_s12 + $0x2b0] sm:$0xff] }
  0xc6   : > { %9004 = vmatprep.mubr.msk.f32.mxu0 %vm314_vm1, %v10028_v46  ;;  %v10611_v46 = vld [vmem:[%s9831_s12 + $0x2b8] sm:$0xff] }
  0xc8   : > { %8671 = vmatmul.mubr.msk.f32.gmra.mrb[38].mxu1 %vm314_vm1, %v10594_v40 }
  0xc9   : > { %9005 = vmatmul.mubr.msk.f32.gmra.mrb[14].mxu0 %vm314_vm1, %v10042_v48  ;;  %8673 = vmatprep.mubr.msk.f32.mxu1 %vm314_vm1, %v10597_v42  ;;  %v10622_v48 = vld [vmem:[%s9831_s12 + $0x2c0] sm:$0xff] }
  0xca   : > { %9007 = vmatprep.mubr.msk.f32.mxu0 %vm314_vm1, %v10048_v50  ;;  %v10625_v50 = vld [vmem:[%s9831_s12 + $0x2c8] sm:$0xff] }
  0xcc   : > { %8674 = vmatmul.mubr.msk.f32.gmra.mrb[40].mxu1 %vm314_vm1, %v10608_v44 }
  0xcd   : > { %9008 = vmatmul.mubr.msk.f32.gmra.mrb[16].mxu0 %vm314_vm1, %v10062_v52  ;;  %8676 = vmatprep.mubr.msk.f32.mxu1 %vm314_vm1, %v10611_v46  ;;  %v10639_v52 = vld [vmem:[%s9831_s12 + $0x2d8] sm:$0xff] }
  0xce   : > { %9010 = vmatprep.mubr.msk.f32.mxu0 %vm314_vm1, %v10068_v54  ;;  %v10650_v54 = vld [vmem:[%s9831_s12 + $0x2e0] sm:$0xff] }
  0xd0   : > { %8677 = vmatmul.mubr.msk.f32.gmra.mrb[42].mxu1 %vm314_vm1, %v10622_v48 }
  0xd1   : > { %9011 = vmatmul.mubr.msk.f32.gmra.mrb[18].mxu0 %vm314_vm1, %v10082_v56  ;;  %8679 = vmatprep.mubr.msk.f32.mxu1 %vm314_vm1, %v10625_v50  ;;  %v7351_v56 = vld [vmem:[%s9831_s12 + $0x169] sm:$0xff] }
  0xd2   : > { %9013 = vmatprep.mubr.msk.f32.mxu0 %vm314_vm1, %v10088_v58  ;;  %v7352_v58 = vld [vmem:[%s9831_s12 + $0x171] sm:$0xff] }
  0xd4   : > { %8680 = vmatmul.mubr.msk.f32.gmra.mrb[44].mxu1 %vm314_vm1, %v10636_v51 }
  0xd5   : > { %9014 = vmatmul.mubr.msk.f32.gmra.mrb[20].mxu0 %vm314_vm1, %v10107_v61  ;;  %8682 = vmatprep.mubr.msk.f32.mxu1 %vm314_vm1, %v10639_v52  ;;  %v11842_v61 = vld [vmem:[#allocation5_spill] sm:$0xff] }
  0xd6   : > { %9016 = vmatprep.mubr.msk.f32.mxu0 %vm314_vm1, %v10115_v63  ;;  %v11843_v63 = vld [vmem:[#allocation14_spill] sm:$0xff] }
  0xd8   : > { %8683 = vmatmul.mubr.msk.f32.gmra.mrb[46].mxu1 %vm314_vm1, %v10650_v54 }
  0xd9   : > { %9017 = vmatmul.mubr.msk.f32.gmra.mrb[22].mxu0 %vm314_vm1, %v10131_v2  ;;  %8687 = vmatprep.mubr.msk.f32.mxu1 %vm314_vm1, %v7351_v56  ;;  %v9732_v2 = vmov 0  }
  0xda   : > { %9019 = vmatprep.mubr.msk.f32.mxu0 %vm314_vm1, %v10137_v4  ;;  %9664 = vset.pattern.permute.xlu0 %v9732_v2  ;;  %v11845_v4 = vld [vmem:[#allocation16_spill] sm:$0xff] }
  0xdb   : > { %9665 = vset.pattern.permute.xlu1 %v9732_v2 }
  0xdc   : > { %8688 = vmatmul.mubr.msk.f32.vlgmr.msra.gmra.mrb[0].mxu1 %vm314_vm1, %v7352_v58  ;;  %v6193_v58 = vsel %vm6145_vm4, 1, %v9732_v2 }
  0xdd   : > { %9020 = vmatmul.mubr.msk.f32.gmra.mrb[24].mxu0 %vm314_vm1, %v10151_v8  ;;  %8760 = vmatpush3.msk.msra.mxu1 %vm459_vm0, %v10338_v59  ;;  %v8037_v59 = vld [vmem:[%s11735_s0 + $0x180] sm:$0xff]  ;;  %v11846_v8 = vld [vmem:[#allocation7_spill] sm:$0xff] }
  0xde   : > { %8690 = vmatprep.mubr.msk.f32.mxu1 %vm314_vm1, %v7353_v60  ;;  %9022 = vmatprep.mubr.msk.f32.mxu0 %vm314_vm1, %v10157_v12  ;;  %vm6144_vm2 = vcmp.gt.f32.partialorder %v8037_v59, 0.0  ;;  %v11847_v12 = vld [vmem:[#allocation18_spill] sm:$0xff]  ;;  %v11848_v60 = vld [vmem:[#allocation8_spill] sm:$0xff] }
  0xdf   : > { %9203 = vmatprep.subr.msk.mxu1 %vm459_vm0, %v9807_v1  ;;  %v6192_v1 = vsel %vm6144_vm2, 1, %v9732_v2  ;;  %v11851_v59 = vld [vmem:[#allocation22_spill] sm:$0xff] }
  0xe0   : > { %8691 = vmatmul.mubr.msk.f32.gmra.mrb[2].mxu1 %vm314_vm1, %v10071_v55  ;;  %v11844_v55 = vld [vmem:[#allocation6_spill] sm:$0xff]  ;;  %6241 = vperm.xlu0 %9664, %v6192_v1   ;;  %v8040_v1 = vld [vmem:[%s11735_s0 + $0x198] sm:$0xff] }
  0xe1   : > { %9023 = vmatmul.mubr.msk.f32.gmra.mrb[26].mxu0 %vm314_vm1, %v10171_v16  ;;  %8693 = vmatprep.mubr.msk.f32.mxu1 %vm314_vm1, %v11842_v61  ;;  %v8039_v16 = vld [vmem:[%s11735_s0 + $0x190] sm:$0xff]  ;;  %v11849_v61 = vld [vmem:[#allocation20_spill] sm:$0xff]  ;;  %vm6147_vm5 = vcmp.gt.f32.partialorder %v8040_v1, 0.0 }
  0xe2   : > { %9025 = vmatprep.mubr.msk.f32.mxu0 %vm314_vm1, %v11843_v63  ;;  %vm6146_vm3 = vcmp.gt.f32.partialorder %v8039_v16, 0.0  ;;  %v11850_v63 = vld [vmem:[#allocation9_spill] sm:$0xff]  ;;  %v11853_v16 = vld [vmem:[#allocation24_spill] sm:$0xff] }
  0xe3   : > { %v6194_v56 = vsel %vm6146_vm3, 1, %v9732_v2  ;;  %v11857_v1 = vld [vmem:[#allocation28_spill] sm:$0xff] }
  0xe4   : > { %8694 = vmatmul.mubr.msk.f32.gmra.mrb[4].mxu1 %vm314_vm1, %v11844_v55  ;;  %v8041_v55 = vld [vmem:[%s11735_s0 + $0x1a0] sm:$0xff]  ;;  %6247 = vperm.xlu1 %9665, %v6194_v56   ;;  %v8042_v56 = vld [vmem:[%s11735_s0 + $0x1a8] sm:$0xff] }
  0xe5   : > { %9026 = vmatmul.mubr.msk.f32.gmra.mrb[28].mxu0 %vm314_vm1, %v11845_v4  ;;  %8696 = vmatprep.mubr.msk.f32.mxu1 %vm314_vm1, %v11846_v8  ;;  %vm6148_vm6 = vcmp.gt.f32.partialorder %v8041_v55, 0.0  ;;  %v6195_v4 = vsel %vm6147_vm5, 1, %v9732_v2  ;;  %vm6149_vm7 = vcmp.gt.f32.partialorder %v8042_v56, 0.0  ;;  %v11858_v55 = vld [vmem:[#allocation13_spill] sm:$0xff]  ;;  %v11861_v56 = vld [vmem:[#allocation32_spill] sm:$0xff] }
  0xe6   : > { %9028 = vmatprep.mubr.msk.f32.mxu0 %vm314_vm1, %v11847_v12  ;;  %6244 = vperm.xlu0 %9664, %v6193_v58   ;;  %v6196_v8 = vsel %vm6148_vm6, 1, %v9732_v2  ;;  %v11852_v12 = vld [vmem:[#allocation10_spill] sm:$0xff] }
  0xe7   : > { %v8043_v58 = vld [vmem:[%s11735_s0 + $0x1b0] sm:$0xff] }
  0xe8   : > { %8697 = vmatmul.mubr.msk.f32.gmra.mrb[6].mxu1 %vm314_vm1, %v11848_v60  ;;  %v11855_v60 = vld [vmem:[#allocation26_spill] sm:$0xff]  ;;  %6250 = vperm.xlu1 %9665, %v6195_v4   ;;  %vm6150_vm8 = vcmp.gt.f32.partialorder %v8043_v58, 0.0  ;;  %v8044_v4 = vld [vmem:[%s11735_s0 + $0x1b8] sm:$0xff]  ;;  %v11862_v58 = vld [vmem:[#allocation17_spill] sm:$0xff] }
  0xe9   : > { %9029 = vmatmul.mubr.msk.f32.gmra.mrb[30].mxu0 %vm314_vm1, %v11849_v61  ;;  %8699 = vmatprep.mubr.msk.f32.mxu1 %vm314_vm1, %v11850_v63  ;;  %v6197_v61 = vsel %vm6149_vm7, 1, %v9732_v2  ;;  %v6198_v63 = vsel %vm6150_vm8, 1, %v9732_v2  ;;  %vm6151_vm9 = vcmp.gt.f32.partialorder %v8044_v4, 0.0  ;;  %v11865_v4 = vld [vmem:[#allocation36_spill] sm:$0xff] }
  0xea   : > { %9031 = vmatprep.mubr.msk.f32.mxu0 %vm314_vm1, %v11851_v59  ;;  %6253 = vperm.xlu0 %9664, %v6196_v8   ;;  %v11856_v59 = vld [vmem:[#allocation12_spill] sm:$0xff] }
  0xeb   : > { %v8045_v8 = vld [vmem:[%s11735_s0 + $0x1c0] sm:$0xff] }
  0xec   : > { %8700 = vmatmul.mubr.msk.f32.gmra.mrb[8].mxu1 %vm314_vm1, %v11852_v12  ;;  %v11859_v12 = vld [vmem:[#allocation30_spill] sm:$0xff]  ;;  %6256 = vperm.xlu1 %9665, %v6197_v61   ;;  %vm6152_vm10 = vcmp.gt.f32.partialorder %v8045_v8, 0.0  ;;  %v8046_v61 = vld [vmem:[%s11735_s0 + $0x1c8] sm:$0xff] }
  0xed   : > { %9032 = vmatmul.mubr.msk.f32.gmra.mrb[32].mxu0 %vm314_vm1, %v11853_v16  ;;  %8702 = vmatprep.mubr.msk.f32.mxu1 %vm314_vm1, %v11854_v5  ;;  %v6199_v16 = vsel %vm6151_vm9, 1, %v9732_v2  ;;  %v6200_v5 = vsel %vm6152_vm10, 1, %v9732_v2  ;;  %vm6153_vm11 = vcmp.gt.f32.partialorder %v8046_v61, 0.0  ;;  %v11866_v8 = vld [vmem:[#allocation21_spill] sm:$0xff]  ;;  %v11868_v61 = vld [vmem:[#allocation23_spill] sm:$0xff] }
  0xee   : > { %9034 = vmatprep.mubr.msk.f32.mxu0 %vm314_vm1, %v11855_v60  ;;  %6259 = vperm.xlu0 %9664, %v6198_v63   ;;  %v11860_v60 = vld [vmem:[#allocation15_spill] sm:$0xff]  ;;  %v8047_v63 = vld [vmem:[%s11735_s0 + $0x1d0] sm:$0xff] }
  0xef   : > { %vm6154_vm12 = vcmp.gt.f32.partialorder %v8047_v63, 0.0  ;;  %v11869_v63 = vld [vmem:[#allocation40_spill] sm:$0xff] }
  0xf0   : > { %8703 = vmatmul.mubr.msk.f32.gmra.mrb[10].mxu1 %vm314_vm1, %v11856_v59  ;;  %v11863_v59 = vld [vmem:[#allocation34_spill] sm:$0xff]  ;;  %6262 = vperm.xlu1 %9665, %v6199_v16   ;;  %v8048_v16 = vld [vmem:[%s11735_s0 + $0x1d8] sm:$0xff] }
  0xf1   : > { %9035 = vmatmul.mubr.msk.f32.gmra.mrb[34].mxu0 %vm314_vm1, %v11857_v1  ;;  %8705 = vmatprep.mubr.msk.f32.mxu1 %vm314_vm1, %v11858_v55  ;;  %v6201_v1 = vsel %vm6153_vm11, 1, %v9732_v2  ;;  %v6202_v55 = vsel %vm6154_vm12, 1, %v9732_v2  ;;  %vm6155_vm13 = vcmp.gt.f32.partialorder %v8048_v16, 0.0 }
  0xf2   : > { %9037 = vmatprep.mubr.msk.f32.mxu0 %vm314_vm1, %v11859_v12  ;;  %6265 = vperm.xlu0 %9664, %v6200_v5   ;;  %v11864_v12 = vld [vmem:[#allocation19_spill] sm:$0xff]  ;;  %v8049_v5 = vld [vmem:[%s11735_s0 + $0x1e0] sm:$0xff] }
  0xf3   : > { %vm6156_vm14 = vcmp.gt.f32.partialorder %v8049_v5, 0.0  ;;  %v11872_v5 = vld [vmem:[#allocation27_spill] sm:$0xff] }
  0xf4   : > { %8706 = vmatmul.mubr.msk.f32.gmra.mrb[12].mxu1 %vm314_vm1, %v11860_v60  ;;  %v11867_v60 = vld [vmem:[#allocation38_spill] sm:$0xff]  ;;  %6268 = vperm.xlu1 %9665, %v6201_v1  }
  0xf5   : > { %9038 = vmatmul.mubr.msk.f32.gmra.mrb[36].mxu0 %vm314_vm1, %v11861_v56  ;;  %8708 = vmatprep.mubr.msk.f32.mxu1 %vm314_vm1, %v11862_v58  ;;  %v10781_v56 = vld [vmem:[%s9831_s12 + $0x2e7] sm:$0xff]  ;;  %v6203_v58 = vsel %vm6155_vm13, 1, %v9732_v2  ;;  %v10794_v1 = vld [vmem:[%s9831_s12 + $0x2ef] sm:$0xff] }
  0xf6   : > { %9040 = vmatprep.mubr.msk.f32.mxu0 %vm314_vm1, %v11863_v59  ;;  %6271 = vperm.xlu0 %9664, %v6202_v55   ;;  %v6204_v59 = vsel %vm6156_vm14, 1, %v9732_v2  ;;  %v8050_v55 = vld [vmem:[%s11735_s0 + $0x1e8] sm:$0xff] }
  0xf7   : > { %vm6157_vm15 = vcmp.gt.f32.partialorder %v8050_v55, 0.0 }
  0xf8   : > { %8709 = vmatmul.mubr.msk.f32.gmra.mrb[14].mxu1 %vm314_vm1, %v11864_v12  ;;  %v11870_v12 = vld [vmem:[#allocation25_spill] sm:$0xff]  ;;  %6274 = vperm.xlu1 %9665, %v6203_v58   ;;  %v7788_v58 = vld [vmem:[%s9831_s12 + $0x2ff] sm:$0xff] }
  0xf9   : > { %9041 = vmatmul.mubr.msk.f32.gmra.mrb[38].mxu0 %vm314_vm1, %v11865_v4  ;;  %8711 = vmatprep.mubr.msk.f32.mxu1 %vm314_vm1, %v11866_v8  ;;  %v8051_v4 = vld [vmem:[%s11735_s0 + $0x1f0] sm:$0xff] }
  0xfa   : > { %9043 = vmatprep.mubr.msk.f32.mxu0 %vm314_vm1, %v11867_v60  ;;  %v10803_v8 = vld [vmem:[%s9831_s12 + $0x2f7] sm:$0xff]  ;;  %6277 = vperm.xlu0 %9664, %v6204_v59   ;;  %vm6158_vm2 = vcmp.gt.f32.partialorder %v8051_v4, 0.0  ;;  %v6205_v60 = vsel %vm6157_vm15, 1, %v9732_v2 }
  0xfb   : > { %11871 = vst [vmem:[#allocation5_spill] sm:$0xff] %v10803_v8  ;;  %v6206_v16 = vsel %vm6158_vm2, 1, %v9732_v2  ;;  %v8052_v59 = vld [vmem:[%s11735_s0 + $0x1f8] sm:$0xff] }
  0xfc   : > { %8712 = vmatmul.mubr.msk.f32.gmra.mrb[16].mxu1 %vm314_vm1, %v11868_v61  ;;  %v11873_v61 = vld [vmem:[#allocation29_spill] sm:$0xff]  ;;  %6280 = vperm.xlu1 %9665, %v6205_v60   ;;  %vm6159_vm3 = vcmp.gt.f32.partialorder %v8052_v59, 0.0 }
  0xfd   : > { %9044 = vmatmul.mubr.msk.f32.gmra.mrb[40].mxu0 %vm314_vm1, %v11869_v63  ;;  %8714 = vmatprep.mubr.msk.f32.mxu1 %vm314_vm1, %v11870_v12  ;;  %v8053_v63 = vld [vmem:[%s11735_s0 + $0x200] sm:$0xff]  ;;  %v6207_v55 = vsel %vm6159_vm3, 1, %v9732_v2  ;;  %v8054_v60 = vld [vmem:[%s11735_s0 + $0x208] sm:$0xff] }
  0xfe   : > { %9046 = vmatprep.mubr.msk.f32.mxu0 %vm314_vm1, %v10781_v56  ;;  %v7789_v12 = vld [vmem:[%s9831_s12 + $0x307] sm:$0xff]  ;;  %6283 = vperm.xlu0 %9664, %v6206_v16   ;;  %vm6160_vm4 = vcmp.gt.f32.partialorder %v8053_v63, 0.0  ;;  %v8055_v16 = vld [vmem:[%s11735_s0 + $0x210] sm:$0xff]  ;;  %vm6161_vm5 = vcmp.gt.f32.partialorder %v8054_v60, 0.0  ;;  %v11876_v63 = vld [vmem:[#allocation35_spill] sm:$0xff] }
  0xff   : > { %v6208_v4 = vsel %vm6160_vm4, 1, %v9732_v2  ;;  %vm6162_vm6 = vcmp.gt.f32.partialorder %v8055_v16, 0.0  ;;  %v8059_v60 = vld [vmem:[%s11735_s0 + $0x230] sm:$0xff]  ;;  %v8061_v16 = vld [vmem:[%s11735_s0 + $0x240] sm:$0xff] }
 0x100   : > { %8715 = vmatmul.mubr.msk.f32.gmra.mrb[18].mxu1 %vm314_vm1, %v11872_v5  ;;  %v11874_v5 = vld [vmem:[#allocation31_spill] sm:$0xff]  ;;  %6286 = vperm.xlu1 %9665, %v6207_v55   ;;  %v6210_v59 = vsel %vm6162_vm6, 1, %v9732_v2  ;;  %vm6166_vm10 = vcmp.gt.f32.partialorder %v8059_v60, 0.0  ;;  %vm6168_vm12 = vcmp.gt.f32.partialorder %v8061_v16, 0.0  ;;  %v8071_v60 = vld [vmem:[%s11735_s0 + $0x290] sm:$0xff]  ;;  %v11888_v16 = vld [vmem:[#allocation49_spill] sm:$0xff] }
 0x101   : > { %9047 = vmatmul.mubr.msk.f32.gmra.mrb[42].mxu0 %vm314_vm1, %v10794_v1  ;;  %8717 = vmatprep.mubr.msk.f32.mxu1 %vm314_vm1, %v11873_v61  ;;  %v11875_v61 = vld [vmem:[#allocation33_spill] sm:$0xff]  ;;  %v8056_v55 = vld [vmem:[%s11735_s0 + $0x218] sm:$0xff] }
 0x102   : > { %9049 = vmatprep.mubr.msk.f32.mxu0 %vm314_vm1, %v10803_v8  ;;  %v7790_v8 = vld [vmem:[%s9831_s12 + $0x30f] sm:$0xff]  ;;  %6289 = vperm.xlu0 %9664, %v6208_v4   ;;  %v8057_v4 = vld [vmem:[%s11735_s0 + $0x220] sm:$0xff]  ;;  %vm6163_vm7 = vcmp.gt.f32.partialorder %v8056_v55, 0.0  ;;  %v8068_v55 = vld [vmem:[%s11735_s0 + $0x278] sm:$0xff] }
 0x103   : > { %vm6164_vm8 = vcmp.gt.f32.partialorder %v8057_v4, 0.0  ;;  %v8069_v4 = vld [vmem:[%s11735_s0 + $0x280] sm:$0xff] }
 0x104   : > { %8718 = vmatmul.mubr.msk.f32.gmra.mrb[20].mxu1 %vm314_vm1, %v11874_v5  ;;  %v11878_v5 = vld [vmem:[#allocation39_spill] sm:$0xff]  ;;  %vm6176_vm6 = vcmp.gt.f32.partialorder %v8069_v4, 0.0 }
 0x105   : > { %9050 = vmatmul.mubr.msk.f32.gmra.mrb[44].mxu0 %vm314_vm1, %v7788_v58  ;;  %8720 = vmatprep.mubr.msk.f32.mxu1 %vm314_vm1, %v11875_v61  ;;  %v6209_v58 = vsel %vm6161_vm5, 1, %v9732_v2  ;;  %v8058_v61 = vld [vmem:[%s11735_s0 + $0x228] sm:$0xff]  ;;  %vm6175_vm5 = vcmp.gt.f32.partialorder %v8068_v55, 0.0  ;;  %v7453_v55 = vld [vmem:[%s9831_s12 + $0x19f] sm:$0xff] }
 0x106   : > { %9052 = vmatprep.mubr.msk.f32.mxu0 %vm314_vm1, %v7789_v12  ;;  %v11877_v12 = vld [vmem:[#allocation37_spill] sm:$0xff]  ;;  %6292 = vperm.xlu1 %9665, %v6209_v58   ;;  %vm6165_vm9 = vcmp.gt.f32.partialorder %v8058_v61, 0.0  ;;  %v8063_v58 = vld [vmem:[%s11735_s0 + $0x250] sm:$0xff] }
 0x107   : > { %6295 = vperm.xlu0 %9664, %v6210_v59   ;;  %vm6170_vm14 = vcmp.gt.f32.partialorder %v8063_v58, 0.0  ;;  %v8067_v59 = vld [vmem:[%s11735_s0 + $0x270] sm:$0xff]  ;;  %v8070_v61 = vld [vmem:[%s11735_s0 + $0x288] sm:$0xff]  ;;  %v11890_v58 = vld [vmem:[#allocation51_spill] sm:$0xff] }
 0x108   : > { %8721 = vmatmul.mubr.msk.f32.gmra.mrb[22].mxu1 %vm314_vm1, %v11876_v63  ;;  %vm6174_vm4 = vcmp.gt.f32.partialorder %v8067_v59, 0.0  ;;  %v11882_v63 = vld [vmem:[#allocation44_spill] sm:$0xff] }
 0x109   : > { %9053 = vmatmul.mubr.msk.f32.gmra.mrb[46].mxu0 %vm314_vm1, %v7790_v8  ;;  %8723 = vmatprep.mubr.msk.f32.mxu1 %vm314_vm1, %v11877_v12  ;;  %v6211_v8 = vsel %vm6163_vm7, 1, %v9732_v2  ;;  %v11883_v12 = vld [vmem:[#allocation4_spill] sm:$0xff]  ;;  %vm6177_vm7 = vcmp.gt.f32.partialorder %v8070_v61, 0.0 }
 0x10a   : > { %9057 = vmatprep.mubr.msk.f32.mxu0 %vm314_vm1, %v9865_v13  ;;  %v6212_v13 = vsel %vm6164_vm8, 1, %v9732_v2  ;;  %6298 = vperm.xlu1 %9665, %v6211_v8   ;;  %v11884_v8 = vld [vmem:[#allocation45_spill] sm:$0xff]  ;;  %vm6178_vm8 = vcmp.gt.f32.partialorder %v8071_v60, 0.0  ;;  %v7469_v61 = vld [vmem:[%s9831_s12 + $0x21f] sm:$0xff] }
 0x10b   : > { %6301 = vperm.xlu0 %9664, %v6212_v13   ;;  %v11885_v13 = vld [vmem:[#allocation46_spill] sm:$0xff]  ;;  %v7450_v59 = vld [vmem:[%s9831_s12 + $0x187] sm:$0xff]  ;;  %v11146_v60 = vld [vmem:[%s9831_s12 + $0x2f8] sm:$0xff] }
 0x10c   : > { %8724 = vmatmul.mubr.msk.f32.gmra.mrb[24].mxu1 %vm314_vm1, %v11878_v5  ;;  %v6224_v5 = vsel %vm6176_vm6, 1, %v9732_v2 }
 0x10d   : > { %9058 = vmatmul.mubr.msk.f32.vlgmr.msra.gmra.mrb[0].mxu0 %vm314_vm1, %v9872_v15  ;;  %8726 = vmatprep.mubr.msk.f32.mxu1 %vm314_vm1, %v10314_v10  ;;  %v6213_v15 = vsel %vm6165_vm9, 1, %v9732_v2  ;;  %v6214_v10 = vsel %vm6166_vm10, 1, %v9732_v2 }
 0x10e   : > { %9130 = vmatpush3.msk.msra.mxu0 %vm459_vm0, %v10495_v9  ;;  %9060 = vmatprep.mubr.msk.f32.mxu0 %vm314_vm1, %v9886_v17  ;;  %v11879_v9 = vld [vmem:[#allocation41_spill] sm:$0xff]  ;;  %v8060_v17 = vld [vmem:[%s11735_s0 + $0x238] sm:$0xff] }
 0x10f   : > { %6304 = vperm.xlu1 %9665, %v6213_v15   ;;  %vm6167_vm11 = vcmp.gt.f32.partialorder %v8060_v17, 0.0  ;;  %6307 = vperm.xlu0 %9664, %v6214_v10   ;;  %v11886_v15 = vld [vmem:[#allocation47_spill] sm:$0xff]  ;;  %v8073_v17 = vld [vmem:[%s11735_s0 + $0x2a0] sm:$0xff] }
 0x110   : > { %8727 = vmatmul.mubr.msk.f32.gmra.mrb[26].mxu1 %vm314_vm1, %v11879_v9  ;;  %v11887_v9 = vld [vmem:[#allocation48_spill] sm:$0xff]  ;;  %v8072_v10 = vld [vmem:[%s11735_s0 + $0x298] sm:$0xff]  ;;  %vm6180_vm10 = vcmp.gt.f32.partialorder %v8073_v17, 0.0 }
 0x111   : > { %9061 = vmatmul.mubr.msk.f32.gmra.mrb[2].mxu0 %vm314_vm1, %v9892_v19  ;;  %8729 = vmatprep.mubr.msk.f32.mxu1 %vm314_vm1, %v10329_v6  ;;  %v6215_v19 = vsel %vm6167_vm11, 1, %v9732_v2  ;;  %v8062_v6 = vld [vmem:[%s11735_s0 + $0x248] sm:$0xff]  ;;  %vm6179_vm9 = vcmp.gt.f32.partialorder %v8072_v10, 0.0  ;;  %v7888_v10 = vld [vmem:[%s9831_s12 + $0x310] sm:$0xff]  ;;  %v7473_v17 = vld [vmem:[%s9831_s12 + $0x23f] sm:$0xff] }
 0x112   : > { %9063 = vmatprep.mubr.msk.f32.mxu0 %vm314_vm1, %v9905_v21  ;;  %v6216_v21 = vsel %vm6168_vm12, 1, %v9732_v2  ;;  %vm6169_vm13 = vcmp.gt.f32.partialorder %v8062_v6, 0.0  ;;  %v8075_v6 = vld [vmem:[%s11735_s0 + $0x2b0] sm:$0xff] }
 0x113   : > { %6310 = vperm.xlu1 %9665, %v6215_v19   ;;  %6313 = vperm.xlu0 %9664, %v6216_v21   ;;  %v11889_v19 = vld [vmem:[#allocation50_spill] sm:$0xff]  ;;  %v8074_v21 = vld [vmem:[%s11735_s0 + $0x2a8] sm:$0xff]  ;;  %vm6182_vm12 = vcmp.gt.f32.partialorder %v8075_v6, 0.0 }
 0x114   : > { %8730 = vmatmul.mubr.msk.f32.gmra.mrb[28].mxu1 %vm314_vm1, %v10333_v0  ;;  %v8064_v0 = vld [vmem:[%s11735_s0 + $0x258] sm:$0xff]  ;;  %vm6181_vm11 = vcmp.gt.f32.partialorder %v8074_v21, 0.0  ;;  %v7941_v21 = vld [vmem:[%s9831_s12 + $0x1a9] sm:$0xff] }
 0x115   : > { %9064 = vmatmul.mubr.msk.f32.gmra.mrb[4].mxu0 %vm314_vm1, %v9911_v23  ;;  %8732 = vmatprep.mubr.msk.f32.mxu1 %vm314_vm1, %v10347_v62  ;;  %v6217_v23 = vsel %vm6169_vm13, 1, %v9732_v2  ;;  %v8065_v62 = vld [vmem:[%s11735_s0 + $0x260] sm:$0xff]  ;;  %vm6171_vm15 = vcmp.gt.f32.partialorder %v8064_v0, 0.0  ;;  %v8076_v0 = vld [vmem:[%s11735_s0 + $0x2b8] sm:$0xff] }
 0x116   : > { %9066 = vmatprep.mubr.msk.f32.mxu0 %vm314_vm1, %v9925_v25  ;;  %v6218_v25 = vsel %vm6170_vm14, 1, %v9732_v2  ;;  %vm6172_vm2 = vcmp.gt.f32.partialorder %v8065_v62, 0.0  ;;  %v8077_v62 = vld [vmem:[%s11735_s0 + $0x2c0] sm:$0xff]  ;;  %vm6183_vm13 = vcmp.gt.f32.partialorder %v8076_v0, 0.0  ;;  %v7476_v6 = vld [vmem:[%s9831_s12 + $0x257] sm:$0xff]  ;;  %v7479_v0 = vld [vmem:[%s9831_s12 + $0x26f] sm:$0xff] }
 0x117   : > { %6316 = vperm.xlu1 %9665, %v6217_v23   ;;  %6319 = vperm.xlu0 %9664, %v6218_v25   ;;  %v9666_v23 = vld [vmem:[%s9831_s12 + $0x230] sm:$0xff]  ;;  %v11891_v25 = vld [vmem:[#allocation52_spill] sm:$0xff]  ;;  %vm6184_vm14 = vcmp.gt.f32.partialorder %v8077_v62, 0.0 }
 0x118   : > { %8733 = vmatmul.mubr.msk.f32.gmra.mrb[30].mxu1 %vm314_vm1, %v10352_v14  ;;  %v11880_v14 = vld [vmem:[#allocation42_spill] sm:$0xff] }
 0x119   : > { %9067 = vmatmul.mubr.msk.f32.gmra.mrb[6].mxu0 %vm314_vm1, %v9931_v27  ;;  %8735 = vmatprep.mubr.msk.f32.mxu1 %vm314_vm1, %v10365_v11  ;;  %v6219_v27 = vsel %vm6171_vm15, 1, %v9732_v2  ;;  %v8066_v11 = vld [vmem:[%s11735_s0 + $0x268] sm:$0xff] }
 0x11a   : > { %9069 = vmatprep.mubr.msk.f32.mxu0 %vm314_vm1, %v9945_v29  ;;  %v6220_v29 = vsel %vm6172_vm2, 1, %v9732_v2  ;;  %vm6173_vm3 = vcmp.gt.f32.partialorder %v8066_v11, 0.0  ;;  %v7449_v11 = vld [vmem:[%s9831_s12 + $0x17f] sm:$0xff]  ;;  %v7945_v62 = vld [vmem:[%s9831_s12 + $0x1c9] sm:$0xff] }
 0x11b   : > { %6322 = vperm.xlu1 %9665, %v6219_v27   ;;  %6325 = vperm.xlu0 %9664, %v6220_v29   ;;  %v6231_v27 = vsel %vm6183_vm13, 1, %v9732_v2  ;;  %v11892_v29 = vld [vmem:[#allocation53_spill] sm:$0xff] }
 0x11c   : > { %8736 = vmatmul.mubr.msk.f32.gmra.mrb[32].mxu1 %vm314_vm1, %v10368_v57  ;;  %v11881_v57 = vld [vmem:[#allocation43_spill] sm:$0xff] }
 0x11d   : > { %9070 = vmatmul.mubr.msk.f32.gmra.mrb[8].mxu0 %vm314_vm1, %v9951_v31  ;;  %8738 = vmatprep.mubr.msk.f32.mxu1 %vm314_vm1, %v11880_v14  ;;  %v6221_v31 = vsel %vm6173_vm3, 1, %v9732_v2  ;;  %v8078_v14 = vld [vmem:[%s11735_s0 + $0x2c8] sm:$0xff] }
 0x11e   : > { %9072 = vmatprep.mubr.msk.f32.mxu0 %vm314_vm1, %v9965_v33  ;;  %v6222_v33 = vsel %vm6174_vm4, 1, %v9732_v2  ;;  %vm6185_vm15 = vcmp.gt.f32.partialorder %v8078_v14, 0.0  ;;  %v7947_v14 = vld [vmem:[%s9831_s12 + $0x1d9] sm:$0xff] }
 0x11f   : > { %6328 = vperm.xlu1 %9665, %v6221_v31   ;;  %6331 = vperm.xlu0 %9664, %v6222_v33   ;;  %v8080_v31 = vld [vmem:[%s11735_s0 + $0x2d8] sm:$0xff]  ;;  %v9667_v33 = vld [vmem:[%s11737_s2 + $0x10] sm:$0xf] }
 0x120   : > { %8739 = vmatmul.mubr.msk.f32.gmra.mrb[34].mxu1 %vm314_vm1, %v11881_v57  ;;  %v7451_v57 = vld [vmem:[%s9831_s12 + $0x18f] sm:$0xff]  ;;  %vm6187_vm3 = vcmp.gt.f32.partialorder %v8080_v31, 0.0 }
 0x121   : > { %9073 = vmatmul.mubr.msk.f32.gmra.mrb[10].mxu0 %vm314_vm1, %v9971_v35  ;;  %8741 = vmatprep.mubr.msk.f32.mxu1 %vm314_vm1, %v11882_v63  ;;  %v6223_v35 = vsel %vm6175_vm5, 1, %v9732_v2  ;;  %v7452_v63 = vld [vmem:[%s9831_s12 + $0x197] sm:$0xff] }
 0x122   : > { %9075 = vmatprep.mubr.msk.f32.mxu0 %vm314_vm1, %v11883_v12  ;;  %v8082_v12 = vld [vmem:[%s11735_s0 + $0x2e8] sm:$0xff]  ;;  %v7950_v31 = vld [vmem:[%s9831_s12 + $0x1f1] sm:$0xff] }
 0x123   : > { %6334 = vperm.xlu1 %9665, %v6223_v35   ;;  %6337 = vperm.xlu0 %9664, %v6224_v5   ;;  %vm6189_vm5 = vcmp.gt.f32.partialorder %v8082_v12, 0.0  ;;  %v7455_v5 = vld [vmem:[%s9831_s12 + $0x1af] sm:$0xff]  ;;  %v7488_v12 = vld [vmem:[%s9831_s12 + $0x2b7] sm:$0xff] }
 0x124   : > { %8742 = vmatmul.mubr.msk.f32.gmra.mrb[36].mxu1 %vm314_vm1, %v11884_v8  ;;  %v6237_v4 = vsel %vm6189_vm5, 1, %v9732_v2  ;;  %v8084_v8 = vld [vmem:[%s11735_s0 + $0x2f8] sm:$0xff] }
 0x125   : > { %9076 = vmatmul.mubr.msk.f32.gmra.mrb[12].mxu0 %vm314_vm1, %v9991_v39  ;;  %8744 = vmatprep.mubr.msk.f32.mxu1 %vm314_vm1, %v11885_v13  ;;  %v6225_v39 = vsel %vm6177_vm7, 1, %v9732_v2  ;;  %vm6191_vm6 = vcmp.gt.f32.partialorder %v8084_v8, 0.0  ;;  %v7457_v13 = vld [vmem:[%s9831_s12 + $0x1bf] sm:$0xff]  ;;  %v7491_v8 = vld [vmem:[%s9831_s12 + $0x2cf] sm:$0xff] }
 0x126   : > { %9078 = vmatprep.mubr.msk.f32.mxu0 %vm314_vm1, %v10005_v41  ;;  %v6226_v41 = vsel %vm6178_vm8, 1, %v9732_v2 }
 0x127   : > { %6340 = vperm.xlu1 %9665, %v6225_v39   ;;  %6343 = vperm.xlu0 %9664, %v6226_v41   ;;  %v7886_v39 = vld [vmem:[%s9831_s12 + $0x300] sm:$0xff]  ;;  %v7887_v41 = vld [vmem:[%s9831_s12 + $0x308] sm:$0xff] }
 0x128   : > { %8745 = vmatmul.mubr.msk.f32.gmra.mrb[38].mxu1 %vm314_vm1, %v11886_v15  ;;  %v7471_v15 = vld [vmem:[%s9831_s12 + $0x22f] sm:$0xff] }
 0x129   : > { %9079 = vmatmul.mubr.msk.f32.gmra.mrb[14].mxu0 %vm314_vm1, %v10011_v43  ;;  %8747 = vmatprep.mubr.msk.f32.mxu1 %vm314_vm1, %v11887_v9  ;;  %v6227_v43 = vsel %vm6179_vm9, 1, %v9732_v2  ;;  %v7472_v9 = vld [vmem:[%s9831_s12 + $0x237] sm:$0xff] }
 0x12a   : > { %9081 = vmatprep.mubr.msk.f32.mxu0 %vm314_vm1, %v10025_v45  ;;  %v6228_v45 = vsel %vm6180_vm10, 1, %v9732_v2 }
 0x12b   : > { %6346 = vperm.xlu1 %9665, %v6227_v43   ;;  %6349 = vperm.xlu0 %9664, %v6228_v45   ;;  %v7939_v43 = vld [vmem:[%s9831_s12 + $0x199] sm:$0xff]  ;;  %v7940_v45 = vld [vmem:[%s9831_s12 + $0x1a1] sm:$0xff] }
 0x12c   : > { %8748 = vmatmul.mubr.msk.f32.gmra.mrb[40].mxu1 %vm314_vm1, %v11888_v16  ;;  %v7474_v16 = vld [vmem:[%s9831_s12 + $0x247] sm:$0xff] }
 0x12d   : > { %9082 = vmatmul.mubr.msk.f32.gmra.mrb[16].mxu0 %vm314_vm1, %v10031_v47  ;;  %8750 = vmatprep.mubr.msk.f32.mxu1 %vm314_vm1, %v11889_v19  ;;  %v6229_v47 = vsel %vm6181_vm11, 1, %v9732_v2  ;;  %v7475_v19 = vld [vmem:[%s9831_s12 + $0x24f] sm:$0xff] }
 0x12e   : > { %9084 = vmatprep.mubr.msk.f32.mxu0 %vm314_vm1, %v10045_v49  ;;  %v6230_v49 = vsel %vm6182_vm12, 1, %v9732_v2 }
 0x12f   : > { %6352 = vperm.xlu1 %9665, %v6229_v47   ;;  %6355 = vperm.xlu0 %9664, %v6230_v49   ;;  %v7942_v47 = vld [vmem:[%s9831_s12 + $0x1b1] sm:$0xff]  ;;  %v7478_v49 = vld [vmem:[%s9831_s12 + $0x267] sm:$0xff] }
 0x130   : > { %8751 = vmatmul.mubr.msk.f32.gmra.mrb[42].mxu1 %vm314_vm1, %v11890_v58  ;;  %v7477_v58 = vld [vmem:[%s9831_s12 + $0x25f] sm:$0xff] }
 0x131   : > { %9085 = vmatmul.mubr.msk.f32.gmra.mrb[18].mxu0 %vm314_vm1, %v9666_v23  ;;  %8753 = vmatprep.mubr.msk.f32.mxu1 %vm314_vm1, %v11891_v25  ;;  %v7943_v23 = vld [vmem:[%s9831_s12 + $0x1b9] sm:$0xff]  ;;  %v7944_v25 = vld [vmem:[%s9831_s12 + $0x1c1] sm:$0xff] }
 0x132   : > { %9087 = vmatprep.mubr.msk.f32.mxu0 %vm314_vm1, %v10065_v53  ;;  %v6232_v53 = vsel %vm6184_vm14, 1, %v9732_v2 }
 0x133   : > { %6358 = vperm.xlu1 %9665, %v6231_v27   ;;  %6361 = vperm.xlu0 %9664, %v6232_v53   ;;  %v7480_v27 = vld [vmem:[%s9831_s12 + $0x277] sm:$0xff] }
 0x134   : > { %8754 = vmatmul.mubr.msk.f32.gmra.mrb[44].mxu1 %vm314_vm1, %v10452_v3  ;;  %v8079_v3 = vld [vmem:[%s11735_s0 + $0x2d0] sm:$0xff] }
 0x135   : > { %9088 = vmatmul.mubr.msk.f32.gmra.mrb[20].mxu0 %vm314_vm1, %v10506_v18  ;;  %8756 = vmatprep.mubr.msk.f32.mxu1 %vm314_vm1, %v11892_v29  ;;  %vm6186_vm2 = vcmp.gt.f32.partialorder %v8079_v3, 0.0  ;;  %v6233_v18 = vsel %vm6185_vm15, 1, %v9732_v2  ;;  %v7946_v53 = vld [vmem:[%s9831_s12 + $0x1d1] sm:$0xff]  ;;  %v7481_v29 = vld [vmem:[%s9831_s12 + $0x27f] sm:$0xff]  ;;  %v7482_v3 = vld [vmem:[%s9831_s12 + $0x287] sm:$0xff] }
 0x136   : > { %9090 = vmatprep.mubr.msk.f32.mxu0 %vm314_vm1, %v10511_v37  ;;  %v6234_v37 = vsel %vm6186_vm2, 1, %v9732_v2 }
 0x137   : > { %6364 = vperm.xlu1 %9665, %v6233_v18   ;;  %6367 = vperm.xlu0 %9664, %v6234_v37   ;;  %v7483_v18 = vld [vmem:[%s9831_s12 + $0x28f] sm:$0xff] }
 0x138   : > { %8757 = vmatmul.mubr.msk.f32.gmra.mrb[46].mxu1 %vm314_vm1, %v10466_v7  ;;  %v8081_v7 = vld [vmem:[%s11735_s0 + $0x2e0] sm:$0xff]  ;;  %v7949_v37 = vld [vmem:[%s9831_s12 + $0x1e9] sm:$0xff] }
 0x139   : > { %9091 = vmatmul.mubr.msk.f32.gmra.mrb[22].mxu0 %vm314_vm1, %v10524_v20  ;;  %8761 = vmatprep.mubr.msk.f32.mxu1 %vm314_vm1, %v7449_v11  ;;  %vm6188_vm4 = vcmp.gt.f32.partialorder %v8081_v7, 0.0  ;;  %v6235_v20 = vsel %vm6187_vm3, 1, %v9732_v2  ;;  %v7948_v11 = vld [vmem:[%s9831_s12 + $0x1e1] sm:$0xff] }
 0x13a   : > { %9093 = vmatprep.mubr.msk.f32.mxu0 %vm314_vm1, %v10527_v22  ;;  %v6236_v22 = vsel %vm6188_vm4, 1, %v9732_v2  ;;  %v7485_v7 = vld [vmem:[%s9831_s12 + $0x29f] sm:$0xff] }
 0x13b   : > { %6370 = vperm.xlu1 %9665, %v6235_v20   ;;  %6373 = vperm.xlu0 %9664, %v6236_v22   ;;  %v7486_v20 = vld [vmem:[%s9831_s12 + $0x2a7] sm:$0xff] }
 0x13c   : > { %8762 = vmatmul.mubr.msk.f32.vlgmr.msra.gmra.mrb[0].mxu1 %vm314_vm1, %v7450_v59  ;;  %v7484_v59 = vld [vmem:[%s9831_s12 + $0x297] sm:$0xff]  ;;  %v7952_v22 = vld [vmem:[%s9831_s12 + $0x201] sm:$0xff] }
 0x13d   : > { %9094 = vmatmul.mubr.msk.f32.gmra.mrb[24].mxu0 %vm314_vm1, %v10538_v24  ;;  %9204 = vmatpush3.msk.msra.mxu1 %vm459_vm0, %v9667_v33  ;;  %v8083_v24 = vld [vmem:[%s11735_s0 + $0x2f0] sm:$0xff] }
 0x13e   : > { %8764 = vmatprep.mubr.msk.f32.mxu1 %vm314_vm1, %v7451_v57  ;;  %9096 = vmatprep.mubr.msk.f32.mxu0 %vm314_vm1, %v10541_v26  ;;  %vm6190_vm0 = vcmp.gt.f32.partialorder %v8083_v24, 0.0  ;;  %v7454_v26 = vld [vmem:[%s9831_s12 + $0x1a7] sm:$0xff]  ;;  %v7951_v57 = vld [vmem:[%s9831_s12 + $0x1f9] sm:$0xff]  ;;  %v7487_v33 = vld [vmem:[%s9831_s12 + $0x2af] sm:$0xff] }
 0x13f   : > { %v6238_v35 = vsel %vm6190_vm0, 1, %v9732_v2  ;;  %6376 = vperm.xlu1 %9665, %v6237_v4   ;;  %v7954_v24 = vld [vmem:[%s9831_s12 + $0x211] sm:$0xff]  ;;  %v7955_v4 = vld [vmem:[%s9831_s12 + $0x219] sm:$0xff] }
 0x140   : > { %8765 = vmatmul.mubr.msk.f32.gmra.mrb[2].mxu1 %vm314_vm1, %v7452_v63  ;;  %6379 = vperm.xlu0 %9664, %v6238_v35   ;;  %v7953_v63 = vld [vmem:[%s9831_s12 + $0x209] sm:$0xff] }
 0x141   : > { %9097 = vmatmul.mubr.msk.f32.gmra.mrb[26].mxu0 %vm314_vm1, %v10552_v28  ;;  %8767 = vmatprep.mubr.msk.f32.mxu1 %vm314_vm1, %v7453_v55  ;;  %v6239_v28 = vsel %vm6191_vm6, 1, %v9732_v2  ;;  %v7459_v2 = vld [vmem:[%s9831_s12 + $0x1cf] sm:$0xff]  ;;  %v7489_v55 = vld [vmem:[%s9831_s12 + $0x2bf] sm:$0xff]  ;;  %v7490_v35 = vld [vmem:[%s9831_s12 + $0x2c7] sm:$0xff] }
 0x142   : > { %9099 = vmatprep.mubr.msk.f32.mxu0 %vm314_vm1, %v10555_v30  ;;  %v7456_v30 = vld [vmem:[%s9831_s12 + $0x1b7] sm:$0xff] }
 0x143   : > { %6382 = vperm.xlu1 %9665, %v6239_v28   ;;  %v7492_v28 = vld [vmem:[%s9831_s12 + $0x2d7] sm:$0xff] }
 0x144   : > { %8768 = vmatmul.mubr.msk.f32.gmra.mrb[4].mxu1 %vm314_vm1, %v7454_v26  ;;  %v7956_v26 = vld [vmem:[%s9831_s12 + $0x221] sm:$0xff] }
 0x145   : > { %9100 = vmatmul.mubr.msk.f32.gmra.mrb[28].mxu0 %vm314_vm1, %v10566_v32  ;;  %8770 = vmatprep.mubr.msk.f32.mxu1 %vm314_vm1, %v7455_v5  ;;  %v7458_v32 = vld [vmem:[%s9831_s12 + $0x1c7] sm:$0xff] }
 0x146   : > { %9102 = vmatprep.mubr.msk.f32.mxu0 %vm314_vm1, %v10569_v34  ;;  %v7460_v34 = vld [vmem:[%s9831_s12 + $0x1d7] sm:$0xff]  ;;  %v7957_v5 = vld [vmem:[%s9831_s12 + $0x229] sm:$0xff] }
 0x148   : > { %8771 = vmatmul.mubr.msk.f32.gmra.mrb[6].mxu1 %vm314_vm1, %v7456_v30  ;;  %v7958_v30 = vld [vmem:[%s9831_s12 + $0x231] sm:$0xff] }
 0x149   : > { %9103 = vmatmul.mubr.msk.f32.gmra.mrb[30].mxu0 %vm314_vm1, %v10580_v36  ;;  %8773 = vmatprep.mubr.msk.f32.mxu1 %vm314_vm1, %v7457_v13  ;;  %v7461_v36 = vld [vmem:[%s9831_s12 + $0x1df] sm:$0xff] }
 0x14a   : > { %9105 = vmatprep.mubr.msk.f32.mxu0 %vm314_vm1, %v10583_v38  ;;  %v7462_v38 = vld [vmem:[%s9831_s12 + $0x1e7] sm:$0xff]  ;;  %v7493_v13 = vld [vmem:[%s9831_s12 + $0x2df] sm:$0xff] }
 0x14c   : > { %8774 = vmatmul.mubr.msk.f32.gmra.mrb[8].mxu1 %vm314_vm1, %v7458_v32  ;;  %v7959_v32 = vld [vmem:[%s9831_s12 + $0x239] sm:$0xff] }
 0x14d   : > { %9106 = vmatmul.mubr.msk.f32.gmra.mrb[32].mxu0 %vm314_vm1, %v10594_v40  ;;  %8776 = vmatprep.mubr.msk.f32.mxu1 %vm314_vm1, %v7459_v2  ;;  %v7463_v40 = vld [vmem:[%s9831_s12 + $0x1ef] sm:$0xff]  ;;  %v7960_v2 = vld [vmem:[%s9831_s12 + $0x241] sm:$0xff] }
 0x14e   : > { %9108 = vmatprep.mubr.msk.f32.mxu0 %vm314_vm1, %v10597_v42  ;;  %v7464_v42 = vld [vmem:[%s9831_s12 + $0x1f7] sm:$0xff] }
 0x150   : > { %8777 = vmatmul.mubr.msk.f32.gmra.mrb[10].mxu1 %vm314_vm1, %v7460_v34  ;;  %v7961_v34 = vld [vmem:[%s9831_s12 + $0x249] sm:$0xff] }
 0x151   : > { %9109 = vmatmul.mubr.msk.f32.gmra.mrb[34].mxu0 %vm314_vm1, %v10608_v44  ;;  %8779 = vmatprep.mubr.msk.f32.mxu1 %vm314_vm1, %v7461_v36  ;;  %v7465_v44 = vld [vmem:[%s9831_s12 + $0x1ff] sm:$0xff]  ;;  %v7962_v36 = vld [vmem:[%s9831_s12 + $0x251] sm:$0xff] }
 0x152   : > { %9111 = vmatprep.mubr.msk.f32.mxu0 %vm314_vm1, %v10611_v46  ;;  %v7466_v46 = vld [vmem:[%s9831_s12 + $0x207] sm:$0xff] }
 0x154   : > { %8780 = vmatmul.mubr.msk.f32.gmra.mrb[12].mxu1 %vm314_vm1, %v7462_v38  ;;  %v7571_v38 = vld [vmem:[%s9831_s12 + $0x240] sm:$0xff] }
 0x155   : > { %9112 = vmatmul.mubr.msk.f32.gmra.mrb[36].mxu0 %vm314_vm1, %v10622_v48  ;;  %8782 = vmatprep.mubr.msk.f32.mxu1 %vm314_vm1, %v7463_v40  ;;  %v7467_v48 = vld [vmem:[%s9831_s12 + $0x20f] sm:$0xff]  ;;  %v7963_v40 = vld [vmem:[%s9831_s12 + $0x259] sm:$0xff] }
 0x156   : > { %9114 = vmatprep.mubr.msk.f32.mxu0 %vm314_vm1, %v10625_v50  ;;  %v11132_v50 = vld [vmem:[%s9831_s12 + $0x2e8] sm:$0xff] }
 0x158   : > { %8783 = vmatmul.mubr.msk.f32.gmra.mrb[14].mxu1 %vm314_vm1, %v7464_v42  ;;  %v11893_v42 = vld [vmem:[#allocation5_spill] sm:$0xff] }
 0x159   : > { %9115 = vmatmul.mubr.msk.f32.gmra.mrb[38].mxu0 %vm314_vm1, %v10636_v51  ;;  %8785 = vmatprep.mubr.msk.f32.mxu1 %vm314_vm1, %v7465_v44  ;;  %v7468_v51 = vld [vmem:[%s9831_s12 + $0x217] sm:$0xff] }
 0x15a   : > { %9117 = vmatprep.mubr.msk.f32.mxu0 %vm314_vm1, %v10639_v52  ;;  %v11142_v52 = vld [vmem:[%s9831_s12 + $0x2f0] sm:$0xff] }
 0x15b   : > { %v7573_v44 = vld [vmem:[%s9831_s12 + $0x250] sm:$0xff] }
 0x15c   : > { %8786 = vmatmul.mubr.msk.f32.gmra.mrb[16].mxu1 %vm314_vm1, %v7466_v46  ;;  %v7965_v46 = vld [vmem:[%s9831_s12 + $0x269] sm:$0xff] }
 0x15d   : > { %9118 = vmatmul.mubr.msk.f32.gmra.mrb[40].mxu0 %vm314_vm1, %v10650_v54  ;;  %8788 = vmatprep.mubr.msk.f32.mxu1 %vm314_vm1, %v7467_v48  ;;  %v7470_v54 = vld [vmem:[%s9831_s12 + $0x227] sm:$0xff]  ;;  %v7574_v48 = vld [vmem:[%s9831_s12 + $0x258] sm:$0xff] }
 0x15e   : > { %9120 = vmatprep.mubr.msk.f32.mxu0 %vm314_vm1, %v11132_v50 }
 0x160   : > { %8789 = vmatmul.mubr.msk.f32.gmra.mrb[18].mxu1 %vm314_vm1, %v7468_v51  ;;  %v7966_v51 = vld [vmem:[%s9831_s12 + $0x271] sm:$0xff] }
 0x161   : > { %9121 = vmatmul.mubr.msk.f32.gmra.mrb[42].mxu0 %vm314_vm1, %v11142_v52  ;;  %8791 = vmatprep.mubr.msk.f32.mxu1 %vm314_vm1, %v7469_v61  ;;  %v7575_v61 = vld [vmem:[%s9831_s12 + $0x260] sm:$0xff] }
 0x162   : > { %9123 = vmatprep.mubr.msk.f32.mxu0 %vm314_vm1, %v11146_v60 }
 0x164   : > { %8792 = vmatmul.mubr.msk.f32.gmra.mrb[20].mxu1 %vm314_vm1, %v7470_v54  ;;  %v7967_v54 = vld [vmem:[%s9831_s12 + $0x279] sm:$0xff] }
 0x165   : > { %9124 = vmatmul.mubr.msk.f32.gmra.mrb[44].mxu0 %vm314_vm1, %v7886_v39  ;;  %8794 = vmatprep.mubr.msk.f32.mxu1 %vm314_vm1, %v7471_v15  ;;  %v7576_v39 = vld [vmem:[%s9831_s12 + $0x268] sm:$0xff] }
 0x166   : > { %9126 = vmatprep.mubr.msk.f32.mxu0 %vm314_vm1, %v7887_v41  ;;  %v7968_v15 = vld [vmem:[%s9831_s12 + $0x281] sm:$0xff]  ;;  %v7577_v41 = vld [vmem:[%s9831_s12 + $0x270] sm:$0xff] }
 0x168   : > { %8795 = vmatmul.mubr.msk.f32.gmra.mrb[22].mxu1 %vm314_vm1, %v7472_v9  ;;  %v7969_v9 = vld [vmem:[%s9831_s12 + $0x289] sm:$0xff] }
 0x169   : > { %9127 = vmatmul.mubr.msk.f32.gmra.mrb[46].mxu0 %vm314_vm1, %v7888_v10  ;;  %8797 = vmatprep.mubr.msk.f32.mxu1 %vm314_vm1, %v7473_v17  ;;  %v7578_v10 = vld [vmem:[%s9831_s12 + $0x278] sm:$0xff] }
 0x16a   : > { %9131 = vmatprep.mubr.msk.f32.mxu0 %vm314_vm1, %v7939_v43  ;;  %v7970_v17 = vld [vmem:[%s9831_s12 + $0x291] sm:$0xff]  ;;  %v7579_v43 = vld [vmem:[%s9831_s12 + $0x280] sm:$0xff] }
 0x16c   : > { %8798 = vmatmul.mubr.msk.f32.gmra.mrb[24].mxu1 %vm314_vm1, %v7474_v16  ;;  %v7971_v16 = vld [vmem:[%s9831_s12 + $0x299] sm:$0xff] }
 0x16d   : > { %9132 = vmatmul.mubr.msk.f32.vlgmr.msra.gmra.mrb[0].mxu0 %vm314_vm1, %v7940_v45  ;;  %8800 = vmatprep.mubr.msk.f32.mxu1 %vm314_vm1, %v7475_v19  ;;  %v7580_v45 = vld [vmem:[%s9831_s12 + $0x288] sm:$0xff] }
 0x16e   : > { %9134 = vmatprep.mubr.msk.f32.mxu0 %vm314_vm1, %v7941_v21  ;;  %v7972_v19 = vld [vmem:[%s9831_s12 + $0x2a1] sm:$0xff]  ;;  %v7581_v21 = vld [vmem:[%s9831_s12 + $0x290] sm:$0xff] }
 0x170   : > { %8801 = vmatmul.mubr.msk.f32.gmra.mrb[26].mxu1 %vm314_vm1, %v7476_v6  ;;  %v7973_v6 = vld [vmem:[%s9831_s12 + $0x2a9] sm:$0xff] }
 0x171   : > { %9135 = vmatmul.mubr.msk.f32.gmra.mrb[2].mxu0 %vm314_vm1, %v7942_v47  ;;  %8803 = vmatprep.mubr.msk.f32.mxu1 %vm314_vm1, %v7477_v58  ;;  %v7582_v47 = vld [vmem:[%s9831_s12 + $0x298] sm:$0xff] }
 0x172   : > { %9137 = vmatprep.mubr.msk.f32.mxu0 %vm314_vm1, %v7943_v23  ;;  %v7974_v58 = vld [vmem:[%s9831_s12 + $0x2b1] sm:$0xff]  ;;  %v7583_v23 = vld [vmem:[%s9831_s12 + $0x2a0] sm:$0xff] }
 0x174   : > { %8804 = vmatmul.mubr.msk.f32.gmra.mrb[28].mxu1 %vm314_vm1, %v7478_v49  ;;  %v7975_v49 = vld [vmem:[%s9831_s12 + $0x2b9] sm:$0xff] }
 0x175   : > { %9138 = vmatmul.mubr.msk.f32.gmra.mrb[4].mxu0 %vm314_vm1, %v7944_v25  ;;  %8806 = vmatprep.mubr.msk.f32.mxu1 %vm314_vm1, %v7479_v0  ;;  %v7584_v25 = vld [vmem:[%s9831_s12 + $0x2a8] sm:$0xff] }
 0x176   : > { %9140 = vmatprep.mubr.msk.f32.mxu0 %vm314_vm1, %v7945_v62  ;;  %v7976_v0 = vld [vmem:[%s9831_s12 + $0x2c1] sm:$0xff]  ;;  %v7585_v62 = vld [vmem:[%s9831_s12 + $0x2b0] sm:$0xff] }
 0x178   : > { %8807 = vmatmul.mubr.msk.f32.gmra.mrb[30].mxu1 %vm314_vm1, %v7480_v27  ;;  %v7977_v27 = vld [vmem:[%s9831_s12 + $0x2c9] sm:$0xff] }
 0x179   : > { %9141 = vmatmul.mubr.msk.f32.gmra.mrb[6].mxu0 %vm314_vm1, %v7946_v53  ;;  %8809 = vmatprep.mubr.msk.f32.mxu1 %vm314_vm1, %v7481_v29  ;;  %v7586_v53 = vld [vmem:[%s9831_s12 + $0x2b8] sm:$0xff] }
 0x17a   : > { %9143 = vmatprep.mubr.msk.f32.mxu0 %vm314_vm1, %v7947_v14  ;;  %v7978_v29 = vld [vmem:[%s9831_s12 + $0x2d1] sm:$0xff]  ;;  %v7587_v14 = vld [vmem:[%s9831_s12 + $0x2c0] sm:$0xff] }
 0x17c   : > { %8810 = vmatmul.mubr.msk.f32.gmra.mrb[32].mxu1 %vm314_vm1, %v7482_v3  ;;  %v7979_v3 = vld [vmem:[%s9831_s12 + $0x2d9] sm:$0xff] }
 0x17d   : > { %9144 = vmatmul.mubr.msk.f32.gmra.mrb[8].mxu0 %vm314_vm1, %v7948_v11  ;;  %8812 = vmatprep.mubr.msk.f32.mxu1 %vm314_vm1, %v7483_v18  ;;  %v7588_v11 = vld [vmem:[%s9831_s12 + $0x2c8] sm:$0xff] }
 0x17e   : > { %9146 = vmatprep.mubr.msk.f32.mxu0 %vm314_vm1, %v7949_v37  ;;  %v7980_v18 = vld [vmem:[%s9831_s12 + $0x2e1] sm:$0xff]  ;;  %v7589_v37 = vld [vmem:[%s9831_s12 + $0x2d0] sm:$0xff] }
 0x180   : > { %8813 = vmatmul.mubr.msk.f32.gmra.mrb[34].mxu1 %vm314_vm1, %v7484_v59  ;;  %v7981_v59 = vld [vmem:[%s9831_s12 + $0x2e9] sm:$0xff] }
 0x181   : > { %9147 = vmatmul.mubr.msk.f32.gmra.mrb[10].mxu0 %vm314_vm1, %v7950_v31  ;;  %8815 = vmatprep.mubr.msk.f32.mxu1 %vm314_vm1, %v7485_v7  ;;  %v7590_v31 = vld [vmem:[%s9831_s12 + $0x2d8] sm:$0xff] }
 0x182   : > { %9149 = vmatprep.mubr.msk.f32.mxu0 %vm314_vm1, %v7951_v57  ;;  %v7982_v7 = vld [vmem:[%s9831_s12 + $0x2f1] sm:$0xff]  ;;  %v7591_v57 = vld [vmem:[%s9831_s12 + $0x2e0] sm:$0xff] }
 0x184   : > { %8816 = vmatmul.mubr.msk.f32.gmra.mrb[36].mxu1 %vm314_vm1, %v7486_v20  ;;  %v7983_v20 = vld [vmem:[%s9831_s12 + $0x2f9] sm:$0xff] }
 0x185   : > { %9150 = vmatmul.mubr.msk.f32.gmra.mrb[12].mxu0 %vm314_vm1, %v7952_v22  ;;  %8818 = vmatprep.mubr.msk.f32.mxu1 %vm314_vm1, %v7487_v33  ;;  %v7984_v22 = vld [vmem:[%s9831_s12 + $0x301] sm:$0xff]  ;;  %v7985_v33 = vld [vmem:[%s9831_s12 + $0x309] sm:$0xff] }
 0x186   : > { %9152 = vmatprep.mubr.msk.f32.mxu0 %vm314_vm1, %v7953_v63  ;;  %v7986_v63 = vld [vmem:[%s9831_s12 + $0x311] sm:$0xff] }
 0x188   : > { %8819 = vmatmul.mubr.msk.f32.gmra.mrb[38].mxu1 %vm314_vm1, %v7488_v12  ;;  %v6242_v12 = vpop.permute.xlu0 %6241 }
 0x189   : > { %9153 = vmatmul.mubr.msk.f32.gmra.mrb[14].mxu0 %vm314_vm1, %v7954_v24  ;;  %8821 = vmatprep.mubr.msk.f32.mxu1 %vm314_vm1, %v7489_v55  ;;  %v11358_v24 = vpop.permute.xlu1 %6247  ;;  %vm6384_vm7 = vcmp.eq.s32.totalorder %v6242_v12, 1 }
 0x18a   : > { %9155 = vmatprep.mubr.msk.f32.mxu0 %vm314_vm1, %v7955_v4  ;;  %vm6386_vm9 = vcmp.eq.s32.totalorder %v11358_v24, 1 }
 0x18c   : > { %8822 = vmatmul.mubr.msk.f32.gmra.mrb[40].mxu1 %vm314_vm1, %v7490_v35  ;;  %v6245_v55 = vpop.permute.xlu0 %6244 }
 0x18d   : > { %9156 = vmatmul.mubr.msk.f32.gmra.mrb[16].mxu0 %vm314_vm1, %v7956_v26  ;;  %8824 = vmatprep.mubr.msk.f32.mxu1 %vm314_vm1, %v7491_v8  ;;  %v11360_v4 = vpop.permute.xlu1 %6250 }
 0x18e   : > { %9158 = vmatprep.mubr.msk.f32.mxu0 %vm314_vm1, %v7957_v5  ;;  %vm6387_vm8 = vcmp.eq.s32.totalorder %v11360_v4, 1 }
 0x190   : > { %8825 = vmatmul.mubr.msk.f32.gmra.mrb[42].mxu1 %vm314_vm1, %v7492_v28  ;;  %v11362_v26 = vpop.permute.xlu0 %6253 }
 0x191   : > { %9159 = vmatmul.mubr.msk.f32.gmra.mrb[18].mxu0 %vm314_vm1, %v7958_v30  ;;  %8827 = vmatprep.mubr.msk.f32.mxu1 %vm314_vm1, %v7493_v13  ;;  %v11364_v8 = vpop.permute.xlu1 %6256  ;;  %vm6388_vm10 = vcmp.eq.s32.totalorder %v11362_v26, 1 }
 0x192   : > { %9161 = vmatprep.mubr.msk.f32.mxu0 %vm314_vm1, %v7959_v32  ;;  %vm6389_vm11 = vcmp.eq.s32.totalorder %v11364_v8, 1 }
 0x194   : > { %8828 = vmatmul.mubr.msk.f32.gmra.mrb[44].mxu1 %vm314_vm1, %v10781_v56  ;;  %v7572_v56 = vld [vmem:[%s9831_s12 + $0x248] sm:$0xff]  ;;  %v11366_v28 = vpop.permute.xlu0 %6259 }
 0x195   : > { %9162 = vmatmul.mubr.msk.f32.gmra.mrb[20].mxu0 %vm314_vm1, %v7960_v2  ;;  %8830 = vmatprep.mubr.msk.f32.mxu1 %vm314_vm1, %v10794_v1  ;;  %v7964_v1 = vld [vmem:[%s9831_s12 + $0x261] sm:$0xff]  ;;  %s224_s12 = sand.u32 1, %s9706_s15   ;;  %vm6390_vm12 = vcmp.eq.s32.totalorder %v11366_v28, 1 }
 0x196   : > { %9164 = vmatprep.mubr.msk.f32.mxu0 %vm314_vm1, %v7961_v34  ;;  %s9589_s7 = smul.u32 384, %s224_s12 }
 0x198   : > { %8831 = vmatmul.mubr.msk.f32.gmra.mrb[46].mxu1 %vm314_vm1, %v11893_v42  ;;  %v11378_v34 = vpop.permute.xlu0 %6265  ;;  %s11439_s15 = scalar_lea.vmem [#allocation3], %s9589_s7  }
 0x199   : > { %9165 = vmatmul.mubr.msk.f32.gmra.mrb[22].mxu0 %vm314_vm1, %v7962_v36  ;;  %8871 = vmatprep.mubr.msk.f32.mxu1 %vm314_vm1, %v7571_v38  ;;  %vm6392_vm14 = vcmp.eq.s32.totalorder %v11378_v34, 1 }
 0x19a   : > { %9167 = vmatprep.mubr.msk.f32.mxu0 %vm314_vm1, %v7963_v40 }
 0x19c   : > { %8872 = vmatmul.mubr.msk.f32.vlgmr.msra.gmra.mrb[24].mxu1 %vm314_vm1, %v7572_v56  ;;  %v11386_v42 = vpop.permute.xlu0 %6271 }
 0x19d   : > { %9168 = vmatmul.mubr.msk.f32.gmra.mrb[24].mxu0 %vm314_vm1, %v7964_v1  ;;  %8874 = vmatprep.mubr.msk.f32.mxu1 %vm314_vm1, %v7573_v44  ;;  %vm6394_vm2 = vcmp.eq.s32.totalorder %v11386_v42, 1 }
 0x19e   : > { %9170 = vmatprep.mubr.msk.f32.mxu0 %vm314_vm1, %v7965_v46 }
 0x1a0   : > { %8875 = vmatmul.mubr.msk.f32.gmra.mrb[26].mxu1 %vm314_vm1, %v7574_v48 }
 0x1a1   : > { %9171 = vmatmul.mubr.msk.f32.gmra.mrb[26].mxu0 %vm314_vm1, %v7966_v51  ;;  %8877 = vmatprep.mubr.msk.f32.mxu1 %vm314_vm1, %v7575_v61  ;;  %v11398_v51 = vpop.permute.xlu0 %6277 }
 0x1a2   : > { %9173 = vmatprep.mubr.msk.f32.mxu0 %vm314_vm1, %v7967_v54  ;;  %vm6396_vm4 = vcmp.eq.s32.totalorder %v11398_v51, 1 }
 0x1a4   : > { %8878 = vmatmul.mubr.msk.f32.gmra.mrb[28].mxu1 %vm314_vm1, %v7576_v39 }
 0x1a5   : > { %9174 = vmatmul.mubr.msk.f32.gmra.mrb[28].mxu0 %vm314_vm1, %v7968_v15  ;;  %8880 = vmatprep.mubr.msk.f32.mxu1 %vm314_vm1, %v7577_v41  ;;  %v11406_v15 = vpop.permute.xlu0 %6283 }
 0x1a6   : > { %9176 = vmatprep.mubr.msk.f32.mxu0 %vm314_vm1, %v7969_v9  ;;  %vm6398_vm0 = vcmp.eq.s32.totalorder %v11406_v15, 1 }
 0x1a8   : > { %8881 = vmatmul.mubr.msk.f32.gmra.mrb[30].mxu1 %vm314_vm1, %v7578_v10 }
 0x1a9   : > { %9177 = vmatmul.mubr.msk.f32.gmra.mrb[30].mxu0 %vm314_vm1, %v7970_v17  ;;  %8883 = vmatprep.mubr.msk.f32.mxu1 %vm314_vm1, %v7579_v43 }
 0x1aa   : > { %9179 = vmatprep.mubr.msk.f32.mxu0 %vm314_vm1, %v7971_v16  ;;  %v11418_v16 = vpop.permute.xlu0 %6289 }
 0x1ac   : > { %8884 = vmatmul.mubr.msk.f32.gmra.mrb[32].mxu1 %vm314_vm1, %v7580_v45 }
 0x1ad   : > { %9180 = vmatmul.mubr.msk.f32.gmra.mrb[32].mxu0 %vm314_vm1, %v7972_v19  ;;  %8886 = vmatprep.mubr.msk.f32.mxu1 %vm314_vm1, %v7581_v21 }
 0x1ae   : > { %9182 = vmatprep.mubr.msk.f32.mxu0 %vm314_vm1, %v7973_v6  ;;  %v11427_v6 = vpop.permute.xlu0 %6295 }
 0x1b0   : > { %8887 = vmatmul.mubr.msk.f32.gmra.mrb[34].mxu1 %vm314_vm1, %v7582_v47 }
 0x1b1   : > { %9183 = vmatmul.mubr.msk.f32.gmra.mrb[34].mxu0 %vm314_vm1, %v7974_v58  ;;  %8889 = vmatprep.mubr.msk.f32.mxu1 %vm314_vm1, %v7583_v23 }
 0x1b2   : > { %9185 = vmatprep.mubr.msk.f32.mxu0 %vm314_vm1, %v7975_v49 }
 0x1b4   : > { %8890 = vmatmul.mubr.msk.f32.gmra.mrb[36].mxu1 %vm314_vm1, %v7584_v25 }
 0x1b5   : > { %9186 = vmatmul.mubr.msk.f32.gmra.mrb[36].mxu0 %vm314_vm1, %v7976_v0  ;;  %8892 = vmatprep.mubr.msk.f32.mxu1 %vm314_vm1, %v7585_v62  ;;  %v11435_v62 = vpop.permute.xlu0 %6301 }
 0x1b6   : > { %9188 = vmatprep.mubr.msk.f32.mxu0 %vm314_vm1, %v7977_v27 }
 0x1b8   : > { %8893 = vmatmul.mubr.msk.f32.gmra.mrb[38].mxu1 %vm314_vm1, %v7586_v53 }
 0x1b9   : > { %9189 = vmatmul.mubr.msk.f32.gmra.mrb[38].mxu0 %vm314_vm1, %v7978_v29  ;;  %8895 = vmatprep.mubr.msk.f32.mxu1 %vm314_vm1, %v7587_v14 }
 0x1ba   : > { %9191 = vmatprep.mubr.msk.f32.mxu0 %vm314_vm1, %v7979_v3 }
 0x1bc   : > { %8896 = vmatmul.mubr.msk.f32.gmra.mrb[40].mxu1 %vm314_vm1, %v7588_v11 }
 0x1bd   : > { %9192 = vmatmul.mubr.msk.f32.gmra.mrb[40].mxu0 %vm314_vm1, %v7980_v18  ;;  %8898 = vmatprep.mubr.msk.f32.mxu1 %vm314_vm1, %v7589_v37 }
 0x1be   : > { %9194 = vmatprep.mubr.msk.f32.mxu0 %vm314_vm1, %v7981_v59 }
 0x1c0   : > { %8899 = vmatmul.mubr.msk.f32.gmra.mrb[42].mxu1 %vm314_vm1, %v7590_v31 }
 0x1c1   : > { %9195 = vmatmul.mubr.msk.f32.gmra.mrb[42].mxu0 %vm314_vm1, %v7982_v7  ;;  %8901 = vmatprep.mubr.msk.f32.mxu1 %vm314_vm1, %v7591_v57 }
 0x1c2   : > { %9197 = vmatprep.mubr.msk.f32.mxu0 %vm314_vm1, %v7983_v20  ;;  %v11446_v20 = vpop.permute.xlu0 %6307 }
 0x1c4   : > { %8902 = vmatmul.mubr.msk.f32.gmra.mrb[44].mxu1 %vm314_vm1, %v11132_v50 }
 0x1c5   : > { %9198 = vmatmul.mubr.msk.f32.gmra.mrb[44].mxu0 %vm314_vm1, %v7984_v22  ;;  %8904 = vmatprep.mubr.msk.f32.mxu1 %vm314_vm1, %v11142_v52 }
 0x1c6   : > { %9200 = vmatprep.mubr.msk.f32.mxu0 %vm314_vm1, %v7985_v33 }
 0x1c8   : > { %8905 = vmatmul.mubr.msk.f32.gmra.mrb[46].mxu1 %vm314_vm1, %v11146_v60  ;;  %v11370_v60 = vpop.permute.xlu1 %6262 }
 0x1c9   : > { %9201 = vmatmul.mubr.msk.f32.gmra.mrb[46].mxu0 %vm314_vm1, %v7986_v63  ;;  %vm6385_vm1 = vcmp.eq.s32.totalorder %v6245_v55, 1  ;;  %vm6391_vm13 = vcmp.eq.s32.totalorder %v11370_v60, 1 }
 0x1cc   : > { %v11380_v36 = vpop.permute.xlu1 %6268 }
 0x1cd   : > { %vm6393_vm15 = vcmp.eq.s32.totalorder %v11380_v36, 1 }
 0x1d0   : > { %v11390_v1 = vpop.permute.xlu1 %6274 }
 0x1d1   : > { %vm6395_vm3 = vcmp.eq.s32.totalorder %v11390_v1, 1 }
 0x1d4   : > { %v11400_v61 = vpop.permute.xlu1 %6280 }
 0x1d5   : > { %vm6397_vm5 = vcmp.eq.s32.totalorder %v11400_v61, 1 }
 0x1d8   : > { %v11410_v9 = vpop.permute.xlu1 %6286 }
 0x1d9   : > { %vm6399_vm6 = vcmp.eq.s32.totalorder %v11410_v9, 1 }
 0x1dc   : > { %v11420_v45 = vpop.permute.xlu1 %6292 }
 0x1e0   : > { %v11431_v58 = vpop.permute.xlu1 %6298 }
 0x1e4   : > { %v11437_v53 = vpop.permute.xlu1 %6304 }
 0x1e8   : > { %v11449_v12 = vpop.permute.xlu1 %6310 }
 0x20f   : > { %v8763_v50 = vpop.f32.mrb[0].mxu1 }
 0x210   : > { %v2377_v35 = vpop.f32.mrb[1].mxu1 }
 0x213   : > { %v8766_v52 = vpop.f32.mrb[2].mxu1 }
 0x214   : > { %v2387_v5 = vpop.f32.mrb[3].mxu1 }
 0x217   : > { %v11368_v30 = vpop.f32.mrb[4].mxu1 }
 0x218   : > { %v11372_v13 = vpop.f32.mrb[5].mxu1 }
 0x21b   : > { %v11374_v32 = vpop.f32.mrb[6].mxu1 }
 0x21c   : > { %v11376_v2 = vpop.f32.mrb[7].mxu1 }
 0x21f   : > { %v11382_v38 = vpop.f32.mrb[8].mxu1 }
 0x220   : > { %v11384_v40 = vpop.f32.mrb[9].mxu1 }
 0x223   : > { %v11388_v56 = vpop.f32.mrb[10].mxu1 }
 0x224   : > { %v11392_v44 = vpop.f32.mrb[11].mxu1 }
 0x227   : > { %v11394_v46 = vpop.f32.mrb[12].mxu1 }
 0x228   : > { %v11396_v48 = vpop.f32.mrb[13].mxu1 }
 0x22b   : > { %v11402_v54 = vpop.f32.mrb[14].mxu1 }
 0x22c   : > { %v11404_v39 = vpop.f32.mrb[15].mxu1 }
 0x22f   : > { %v11408_v41 = vpop.f32.mrb[16].mxu1 }
 0x230   : > { %v11412_v10 = vpop.f32.mrb[17].mxu1 }
 0x233   : > { %v11414_v17 = vpop.f32.mrb[18].mxu1 }
 0x234   : > { %v11416_v43 = vpop.f32.mrb[19].mxu1 }
 0x237   : > { %v11422_v19 = vpop.f32.mrb[20].mxu1 }
 0x238   : > { %v11424_v21 = vpop.f32.mrb[21].mxu1 }
 0x23b   : > { %v11429_v47 = vpop.f32.mrb[22].mxu1 }
 0x23c   : > { %v11433_v23 = vpop.f32.mrb[23].mxu1 }
 0x240   : > { %v9133_v49 = vpop.f32.mrb[0].mxu0 }
 0x241   : > { %v9205_v25 = vadd.f32 %v9133_v49, %v8763_v50  ;;  %v5617_v0 = vpop.f32.mrb[1].mxu0 }
 0x242   : > { %v9206_v27 = vadd.f32 %v5617_v0, %v2377_v35 }
 0x243   : > { %6049 = vst [vmem:[%s11439_s15 + $0x8] sm:$0xff] %v9205_v25  ;;  %v6433_v29 = vsel %vm6385_vm1, %v9205_v25, 0.0  ;;  %vm6400_vm1 = vcmp.eq.s32.totalorder %v11418_v16, 1 }
 0x244   : > { %v6534_v14 = vmul.f32 %v6433_v29, %v6433_v29  ;;  %6048 = vst [vmem:[%s11439_s15] sm:$0xff] %v9206_v27  ;;  %v6432_v3 = vsel %vm6384_vm7, %v9206_v27, 0.0  ;;  %v9136_v11 = vpop.f32.mrb[2].mxu0  ;;  %vm6401_vm7 = vcmp.eq.s32.totalorder %v11420_v45, 1 }
 0x245   : > { %v6480_v18 = vadd.f32 %v6433_v29, %v6432_v3  ;;  %v6533_v37 = vmul.f32 %v6432_v3, %v6432_v3  ;;  %v9207_v59 = vadd.f32 %v9136_v11, %v8766_v52  ;;  %v5627_v31 = vpop.f32.mrb[3].mxu0  ;;  %v11463_v11 = vpop.permute.xlu1 %6316 }
 0x246   : > { %v9208_v7 = vadd.f32 %v5627_v31, %v2387_v5 }
 0x247   : > { %v6581_v57 = vadd.f32 %v6534_v14, %v6533_v37  ;;  %6051 = vst [vmem:[%s11439_s15 + $0x18] sm:$0xff] %v9207_v59  ;;  %v6435_v22 = vsel %vm6387_vm8, %v9207_v59, 0.0  ;;  %vm6402_vm8 = vcmp.eq.s32.totalorder %v11427_v6, 1 }
 0x248   : > { %6050 = vst [vmem:[%s11439_s15 + $0x10] sm:$0xff] %v9208_v7  ;;  %v6434_v33 = vsel %vm6386_vm9, %v9208_v7, 0.0  ;;  %v9139_v63 = vpop.f32.mrb[4].mxu0  ;;  %v6536_v52 = vmul.f32 %v6435_v22, %v6435_v22  ;;  %vm6403_vm9 = vcmp.eq.s32.totalorder %v11431_v58, 1 }
 0x249   : > { %v6481_v55 = vadd.f32 %v6480_v18, %v6434_v33  ;;  %v6535_v4 = vmul.f32 %v6434_v33, %v6434_v33  ;;  %v9209_v50 = vadd.f32 %v9139_v63, %v11368_v30  ;;  %v5637_v35 = vpop.f32.mrb[5].mxu0 }
 0x24a   : > { %v9210_v24 = vadd.f32 %v5637_v35, %v11372_v13  ;;  %v11459_v13 = vpop.permute.xlu0 %6313 }
 0x24b   : > { %v6582_v5 = vadd.f32 %v6581_v57, %v6535_v4  ;;  %6053 = vst [vmem:[%s11439_s15 + $0x28] sm:$0xff] %v9209_v50  ;;  %v6482_v49 = vadd.f32 %v6481_v55, %v6435_v22  ;;  %v6437_v25 = vsel %vm6389_vm11, %v9209_v50, 0.0  ;;  %vm6405_vm11 = vcmp.eq.s32.totalorder %v11437_v53, 1 }
 0x24c   : > { %6052 = vst [vmem:[%s11439_s15 + $0x20] sm:$0xff] %v9210_v24  ;;  %v6436_v0 = vsel %vm6388_vm10, %v9210_v24, 0.0  ;;  %v9142_v27 = vpop.f32.mrb[6].mxu0  ;;  %v6538_v18 = vmul.f32 %v6437_v25, %v6437_v25  ;;  %vm6404_vm10 = vcmp.eq.s32.totalorder %v11435_v62, 1 }
 0x24d   : > { %v6483_v29 = vadd.f32 %v6482_v49, %v6436_v0  ;;  %v6537_v14 = vmul.f32 %v6436_v0, %v6436_v0  ;;  %v6583_v30 = vadd.f32 %v6582_v5, %v6536_v52  ;;  %v9211_v3 = vadd.f32 %v9142_v27, %v11374_v32  ;;  %v5647_v26 = vpop.f32.mrb[7].mxu0 }
 0x24e   : > { %v9212_v8 = vadd.f32 %v5647_v26, %v11376_v2  ;;  %v11472_v50 = vpop.permute.xlu0 %6319 }
 0x24f   : > { %v6584_v37 = vadd.f32 %v6583_v30, %v6537_v14  ;;  %6055 = vst [vmem:[%s11439_s15 + $0x38] sm:$0xff] %v9211_v3  ;;  %v6484_v59 = vadd.f32 %v6483_v29, %v6437_v25  ;;  %v6439_v31 = vsel %vm6391_vm13, %v9211_v3, 0.0  ;;  %vm6407_vm13 = vcmp.eq.s32.totalorder %v11449_v12, 1 }
 0x250   : > { %6054 = vst [vmem:[%s11439_s15 + $0x30] sm:$0xff] %v9212_v8  ;;  %v6438_v7 = vsel %vm6390_vm12, %v9212_v8, 0.0  ;;  %v9145_v32 = vpop.f32.mrb[8].mxu0  ;;  %v6540_v63 = vmul.f32 %v6439_v31, %v6439_v31  ;;  %vm6406_vm12 = vcmp.eq.s32.totalorder %v11446_v20, 1 }
 0x251   : > { %v6485_v57 = vadd.f32 %v6484_v59, %v6438_v7  ;;  %v6539_v28 = vmul.f32 %v6438_v7, %v6438_v7  ;;  %v6585_v22 = vadd.f32 %v6584_v37, %v6538_v18  ;;  %v9213_v33 = vadd.f32 %v9145_v32, %v11382_v38  ;;  %v5657_v2 = vpop.f32.mrb[9].mxu0  ;;  %v11475_v38 = vpop.permute.xlu1 %6322 }
 0x252   : > { %v9214_v60 = vadd.f32 %v5657_v2, %v11384_v40 }
 0x253   : > { %v6586_v55 = vadd.f32 %v6585_v22, %v6539_v28  ;;  %6057 = vst [vmem:[%s11439_s15 + $0x48] sm:$0xff] %v9213_v33  ;;  %v6486_v4 = vadd.f32 %v6485_v57, %v6439_v31  ;;  %v6441_v35 = vsel %vm6393_vm15, %v9213_v33, 0.0  ;;  %vm6409_vm15 = vcmp.eq.s32.totalorder %v11463_v11, 1 }
 0x254   : > { %6056 = vst [vmem:[%s11439_s15 + $0x40] sm:$0xff] %v9214_v60  ;;  %v6440_v24 = vsel %vm6392_vm14, %v9214_v60, 0.0  ;;  %v9148_v52 = vpop.f32.mrb[10].mxu0  ;;  %v6542_v0 = vmul.f32 %v6441_v35, %v6441_v35  ;;  %vm6408_vm14 = vcmp.eq.s32.totalorder %v11459_v13, 1 }
 0x255   : > { %v6487_v5 = vadd.f32 %v6486_v4, %v6440_v24  ;;  %v6541_v34 = vmul.f32 %v6440_v24, %v6440_v24  ;;  %v6587_v49 = vadd.f32 %v6586_v55, %v6540_v63  ;;  %v9215_v40 = vadd.f32 %v9148_v52, %v11388_v56  ;;  %v5667_v36 = vpop.f32.mrb[11].mxu0  ;;  %v11489_v37 = vpop.permute.xlu1 %6328 }
 0x256   : > { %v9216_v25 = vadd.f32 %v5667_v36, %v11392_v44  ;;  %v11485_v44 = vpop.permute.xlu0 %6325 }
 0x257   : > { %v6588_v27 = vadd.f32 %v6587_v49, %v6541_v34  ;;  %6059 = vst [vmem:[%s11439_s15 + $0x58] sm:$0xff] %v9215_v40  ;;  %v6488_v29 = vadd.f32 %v6487_v5, %v6441_v35  ;;  %v6443_v14 = vsel %vm6395_vm3, %v9215_v40, 0.0  ;;  %vm6411_vm3 = vcmp.eq.s32.totalorder %v11475_v38, 1 }
 0x258   : > { %6058 = vst [vmem:[%s11439_s15 + $0x50] sm:$0xff] %v9216_v25  ;;  %v6442_v30 = vsel %vm6394_vm2, %v9216_v25, 0.0  ;;  %v9151_v3 = vpop.f32.mrb[12].mxu0  ;;  %v6544_v59 = vmul.f32 %v6443_v14, %v6443_v14  ;;  %vm6410_vm2 = vcmp.eq.s32.totalorder %v11472_v50, 1 }
 0x259   : > { %v6489_v26 = vadd.f32 %v6488_v29, %v6442_v30  ;;  %v6543_v8 = vmul.f32 %v6442_v30, %v6442_v30  ;;  %v6589_v56 = vadd.f32 %v6588_v27, %v6542_v0  ;;  %v9217_v18 = vadd.f32 %v9151_v3, %v11394_v46  ;;  %v5677_v42 = vpop.f32.mrb[13].mxu0 }
 0x25a   : > { %v9218_v1 = vadd.f32 %v5677_v42, %v11396_v48  ;;  %v11498_v55 = vpop.permute.xlu0 %6331 }
 0x25b   : > { %v6590_v31 = vadd.f32 %v6589_v56, %v6543_v8  ;;  %6061 = vst [vmem:[%s11439_s15 + $0x68] sm:$0xff] %v9217_v18  ;;  %v6490_v7 = vadd.f32 %v6489_v26, %v6443_v14  ;;  %v6445_v32 = vsel %vm6397_vm5, %v9217_v18, 0.0  ;;  %vm6413_vm5 = vcmp.eq.s32.totalorder %v11489_v37, 1 }
 0x25c   : > { %6060 = vst [vmem:[%s11439_s15 + $0x60] sm:$0xff] %v9218_v1  ;;  %v6444_v57 = vsel %vm6396_vm4, %v9218_v1, 0.0  ;;  %v9154_v46 = vpop.f32.mrb[14].mxu0  ;;  %v6546_v2 = vmul.f32 %v6445_v32, %v6445_v32  ;;  %vm6412_vm4 = vcmp.eq.s32.totalorder %v11485_v44, 1 }
 0x25d   : > { %v6491_v28 = vadd.f32 %v6490_v7, %v6444_v57  ;;  %v6545_v51 = vmul.f32 %v6444_v57, %v6444_v57  ;;  %v6591_v22 = vadd.f32 %v6590_v31, %v6544_v59  ;;  %v9219_v33 = vadd.f32 %v9154_v46, %v11402_v54  ;;  %v5687_v48 = vpop.f32.mrb[15].mxu0  ;;  %v11501_v54 = vpop.permute.xlu1 %6334 }
 0x25e   : > { %v9220_v61 = vadd.f32 %v5687_v48, %v11404_v39 }
 0x25f   : > { %v6592_v60 = vadd.f32 %v6591_v22, %v6545_v51  ;;  %6063 = vst [vmem:[%s11439_s15 + $0x78] sm:$0xff] %v9219_v33  ;;  %v6492_v63 = vadd.f32 %v6491_v28, %v6445_v32  ;;  %v6447_v4 = vsel %vm6399_vm6, %v9219_v33, 0.0  ;;  %vm6415_vm6 = vcmp.eq.s32.totalorder %v11501_v54, 1 }
 0x260   : > { %6062 = vst [vmem:[%s11439_s15 + $0x70] sm:$0xff] %v9220_v61  ;;  %v6446_v35 = vsel %vm6398_vm0, %v9220_v61, 0.0  ;;  %v9157_v24 = vpop.f32.mrb[16].mxu0  ;;  %v6548_v49 = vmul.f32 %v6447_v4, %v6447_v4  ;;  %vm6414_vm0 = vcmp.eq.s32.totalorder %v11498_v55, 1 }
 0x261   : > { %v6493_v52 = vadd.f32 %v6492_v63, %v6446_v35  ;;  %v6547_v15 = vmul.f32 %v6446_v35, %v6446_v35  ;;  %v6593_v5 = vadd.f32 %v6592_v60, %v6546_v2  ;;  %v9221_v39 = vadd.f32 %v9157_v24, %v11408_v41  ;;  %v5697_v9 = vpop.f32.mrb[17].mxu0  ;;  %v11515_v3 = vpop.permute.xlu1 %6340 }
 0x262   : > { %v9222_v34 = vadd.f32 %v5697_v9, %v11412_v10  ;;  %v11511_v10 = vpop.permute.xlu0 %6337 }
 0x263   : > { %v6594_v40 = vadd.f32 %v6593_v5, %v6547_v15  ;;  %6065 = vst [vmem:[%s11439_s15 + $0x88] sm:$0xff] %v9221_v39  ;;  %v6494_v36 = vadd.f32 %v6493_v52, %v6447_v4  ;;  %v6449_v25 = vsel %vm6401_vm7, %v9221_v39, 0.0  ;;  %vm6417_vm7 = vcmp.eq.s32.totalorder %v11515_v3, 1 }
 0x264   : > { %6064 = vst [vmem:[%s11439_s15 + $0x80] sm:$0xff] %v9222_v34  ;;  %v6448_v0 = vsel %vm6400_vm1, %v9222_v34, 0.0  ;;  %v9160_v27 = vpop.f32.mrb[18].mxu0  ;;  %v6550_v26 = vmul.f32 %v6449_v25, %v6449_v25  ;;  %vm6416_vm1 = vcmp.eq.s32.totalorder %v11511_v10, 1 }
 0x265   : > { %v6495_v29 = vadd.f32 %v6494_v36, %v6448_v0  ;;  %v6549_v14 = vmul.f32 %v6448_v0, %v6448_v0  ;;  %v6595_v41 = vadd.f32 %v6594_v40, %v6548_v49  ;;  %v9223_v30 = vadd.f32 %v9160_v27, %v11414_v17  ;;  %v5707_v16 = vpop.f32.mrb[19].mxu0 }
 0x266   : > { %v9224_v45 = vadd.f32 %v5707_v16, %v11416_v43  ;;  %v11524_v46 = vpop.permute.xlu0 %6343 }
 0x267   : > { %v6596_v8 = vadd.f32 %v6595_v41, %v6549_v14  ;;  %6067 = vst [vmem:[%s11439_s15 + $0x98] sm:$0xff] %v9223_v30  ;;  %v6496_v56 = vadd.f32 %v6495_v29, %v6449_v25  ;;  %v6451_v18 = vsel %vm6403_vm9, %v9223_v30, 0.0 }
 0x268   : > { %6066 = vst [vmem:[%s11439_s15 + $0x90] sm:$0xff] %v9224_v45  ;;  %v6450_v42 = vsel %vm6402_vm8, %v9224_v45, 0.0  ;;  %v9163_v17 = vpop.f32.mrb[20].mxu0  ;;  %v6552_v7 = vmul.f32 %v6451_v18, %v6451_v18  ;;  %vm6418_vm8 = vcmp.eq.s32.totalorder %v11524_v46, 1 }
 0x269   : > { %v6497_v1 = vadd.f32 %v6496_v56, %v6450_v42  ;;  %v6551_v6 = vmul.f32 %v6450_v42, %v6450_v42  ;;  %v6597_v59 = vadd.f32 %v6596_v8, %v6550_v26  ;;  %v9225_v31 = vadd.f32 %v9163_v17, %v11422_v19  ;;  %v5717_v43 = vpop.f32.mrb[21].mxu0  ;;  %v11527_v19 = vpop.permute.xlu1 %6346 }
 0x26a   : > { %v9226_v58 = vadd.f32 %v5717_v43, %v11424_v21  ;;  %v11537_v12 = vpop.permute.xlu0 %6349  ;;  %vm6419_vm9 = vcmp.eq.s32.totalorder %v11527_v19, 1 }
 0x26b   : > { %v6598_v32 = vadd.f32 %v6597_v59, %v6551_v6  ;;  %6069 = vst [vmem:[%s11439_s15 + $0xa8] sm:$0xff] %v9225_v31  ;;  %v6498_v57 = vadd.f32 %v6497_v1, %v6451_v18  ;;  %v6453_v28 = vsel %vm6405_vm11, %v9225_v31, 0.0 }
 0x26c   : > { %6068 = vst [vmem:[%s11439_s15 + $0xa0] sm:$0xff] %v9226_v58  ;;  %v6452_v51 = vsel %vm6404_vm10, %v9226_v58, 0.0  ;;  %v9166_v22 = vpop.f32.mrb[22].mxu0  ;;  %v6554_v2 = vmul.f32 %v6453_v28, %v6453_v28  ;;  %vm6420_vm10 = vcmp.eq.s32.totalorder %v11537_v12, 1 }
 0x26d   : > { %v6499_v33 = vadd.f32 %v6498_v57, %v6452_v51  ;;  %v6553_v62 = vmul.f32 %v6452_v51, %v6452_v51  ;;  %v6599_v48 = vadd.f32 %v6598_v32, %v6552_v7  ;;  %v9227_v21 = vadd.f32 %v9166_v22, %v11429_v47  ;;  %v5727_v53 = vpop.f32.mrb[23].mxu0  ;;  %v11539_v34 = vpop.permute.xlu1 %6352 }
 0x26e   : > { %v9228_v61 = vadd.f32 %v5727_v53, %v11433_v23  ;;  %v11549_v7 = vpop.permute.xlu0 %6355  ;;  %vm6421_vm11 = vcmp.eq.s32.totalorder %v11539_v34, 1 }
 0x26f   : > { %v6600_v60 = vadd.f32 %v6599_v48, %v6553_v62  ;;  %6071 = vst [vmem:[%s11439_s15 + $0xb8] sm:$0xff] %v9227_v21  ;;  %v6500_v63 = vadd.f32 %v6499_v33, %v6453_v28  ;;  %v6455_v4 = vsel %vm6407_vm13, %v9227_v21, 0.0  ;;  %v8873_v24 = vpop.f32.mrb[24].mxu1 }
 0x270   : > { %6070 = vst [vmem:[%s11439_s15 + $0xb0] sm:$0xff] %v9228_v61  ;;  %v6454_v35 = vsel %vm6406_vm12, %v9228_v61, 0.0  ;;  %v9169_v52 = vpop.f32.mrb[24].mxu0  ;;  %v3145_v20 = vpop.f32.mrb[25].mxu1  ;;  %v6556_v49 = vmul.f32 %v6455_v4, %v6455_v4  ;;  %vm6422_vm12 = vcmp.eq.s32.totalorder %v11549_v7, 1 }
 0x271   : > { %v6501_v15 = vadd.f32 %v6500_v63, %v6454_v35  ;;  %v6555_v47 = vmul.f32 %v6454_v35, %v6454_v35  ;;  %v6601_v5 = vadd.f32 %v6600_v60, %v6554_v2  ;;  %v9229_v39 = vadd.f32 %v9169_v52, %v8873_v24  ;;  %v5737_v9 = vpop.f32.mrb[25].mxu0  ;;  %v11551_v32 = vpop.permute.xlu1 %6358 }
 0x272   : > { %v9230_v23 = vadd.f32 %v5737_v9, %v3145_v20  ;;  %vm6423_vm13 = vcmp.eq.s32.totalorder %v11551_v32, 1 }
 0x273   : > { %v6602_v40 = vadd.f32 %v6601_v5, %v6555_v47  ;;  %6073 = vst [vmem:[%s11439_s15 + $0xc8] sm:$0xff] %v9229_v39  ;;  %v6502_v36 = vadd.f32 %v6501_v15, %v6455_v4  ;;  %v6457_v25 = vsel %vm6409_vm15, %v9229_v39, 0.0  ;;  %v8876_v27 = vpop.f32.mrb[26].mxu1 }
 0x274   : > { %6072 = vst [vmem:[%s11439_s15 + $0xc0] sm:$0xff] %v9230_v23  ;;  %v6456_v0 = vsel %vm6408_vm14, %v9230_v23, 0.0  ;;  %v9172_v29 = vpop.f32.mrb[26].mxu0  ;;  %v3155_v11 = vpop.f32.mrb[27].mxu1  ;;  %v6558_v26 = vmul.f32 %v6457_v25, %v6457_v25 }
 0x275   : > { %v6503_v14 = vadd.f32 %v6502_v36, %v6456_v0  ;;  %v6557_v13 = vmul.f32 %v6456_v0, %v6456_v0  ;;  %v6603_v41 = vadd.f32 %v6602_v40, %v6556_v49  ;;  %v9231_v30 = vadd.f32 %v9172_v29, %v8876_v27  ;;  %v5747_v16 = vpop.f32.mrb[27].mxu0  ;;  %v11561_v49 = vpop.permute.xlu0 %6361 }
 0x276   : > { %v9232_v45 = vadd.f32 %v5747_v16, %v3155_v11  ;;  %v11563_v40 = vpop.permute.xlu1 %6364  ;;  %vm6424_vm14 = vcmp.eq.s32.totalorder %v11561_v49, 1 }
 0x277   : > { %v6604_v8 = vadd.f32 %v6603_v41, %v6557_v13  ;;  %6075 = vst [vmem:[%s11439_s15 + $0xd8] sm:$0xff] %v9231_v30  ;;  %v6504_v56 = vadd.f32 %v6503_v14, %v6457_v25  ;;  %v6459_v18 = vsel %vm6411_vm3, %v9231_v30, 0.0  ;;  %v8879_v17 = vpop.f32.mrb[28].mxu1  ;;  %vm6425_vm15 = vcmp.eq.s32.totalorder %v11563_v40, 1 }
 0x278   : > { %6074 = vst [vmem:[%s11439_s15 + $0xd0] sm:$0xff] %v9232_v45  ;;  %v6458_v42 = vsel %vm6410_vm2, %v9232_v45, 0.0  ;;  %v9175_v1 = vpop.f32.mrb[28].mxu0  ;;  %v3165_v58 = vpop.f32.mrb[29].mxu1  ;;  %v6560_v57 = vmul.f32 %v6459_v18, %v6459_v18 }
 0x279   : > { %v6505_v6 = vadd.f32 %v6504_v56, %v6458_v42  ;;  %v6559_v59 = vmul.f32 %v6458_v42, %v6458_v42  ;;  %v6605_v31 = vadd.f32 %v6604_v8, %v6558_v26  ;;  %v9233_v43 = vadd.f32 %v9175_v1, %v8879_v17  ;;  %v5757_v50 = vpop.f32.mrb[29].mxu0 }
 0x27a   : > { %v9234_v38 = vadd.f32 %v5757_v50, %v3165_v58  ;;  %v11573_v50 = vpop.permute.xlu0 %6367 }
 0x27b   : > { %v6606_v28 = vadd.f32 %v6605_v31, %v6559_v59  ;;  %6077 = vst [vmem:[%s11439_s15 + $0xe8] sm:$0xff] %v9233_v43  ;;  %v6506_v51 = vadd.f32 %v6505_v6, %v6459_v18  ;;  %v6461_v22 = vsel %vm6413_vm5, %v9233_v43, 0.0  ;;  %v8882_v62 = vpop.f32.mrb[30].mxu1  ;;  %vm6426_vm2 = vcmp.eq.s32.totalorder %v11573_v50, 1 }
 0x27c   : > { %6076 = vst [vmem:[%s11439_s15 + $0xe0] sm:$0xff] %v9234_v38  ;;  %v6460_v33 = vsel %vm6412_vm4, %v9234_v38, 0.0  ;;  %v9178_v48 = vpop.f32.mrb[30].mxu0  ;;  %v3175_v37 = vpop.f32.mrb[31].mxu1  ;;  %v6562_v63 = vmul.f32 %v6461_v22, %v6461_v22 }
 0x27d   : > { %v6507_v21 = vadd.f32 %v6506_v51, %v6460_v33  ;;  %v6561_v44 = vmul.f32 %v6460_v33, %v6460_v33  ;;  %v6607_v53 = vadd.f32 %v6606_v28, %v6560_v57  ;;  %v9235_v61 = vadd.f32 %v9178_v48, %v8882_v62  ;;  %v5767_v2 = vpop.f32.mrb[31].mxu0  ;;  %v6371_v38 = vpop.permute.xlu1 %6370 }
 0x27e   : > { %v9236_v60 = vadd.f32 %v5767_v2, %v3175_v37  ;;  %vm6427_vm3 = vcmp.eq.s32.totalorder %v6371_v38, 1 }
 0x27f   : > { %v6608_v4 = vadd.f32 %v6607_v53, %v6561_v44  ;;  %6079 = vst [vmem:[%s11439_s15 + $0xf8] sm:$0xff] %v9235_v61  ;;  %v6508_v35 = vadd.f32 %v6507_v21, %v6461_v22  ;;  %v6463_v24 = vsel %vm6415_vm6, %v9235_v61, 0.0  ;;  %v8885_v15 = vpop.f32.mrb[32].mxu1 }
 0x280   : > { %6078 = vst [vmem:[%s11439_s15 + $0xf0] sm:$0xff] %v9236_v60  ;;  %v6462_v52 = vsel %vm6414_vm0, %v9236_v60, 0.0  ;;  %v9181_v47 = vpop.f32.mrb[32].mxu0  ;;  %v3185_v23 = vpop.f32.mrb[33].mxu1  ;;  %v6564_v36 = vmul.f32 %v6463_v24, %v6463_v24 }
 0x281   : > { %v6509_v5 = vadd.f32 %v6508_v35, %v6462_v52  ;;  %v6563_v39 = vmul.f32 %v6462_v52, %v6462_v52  ;;  %v6609_v20 = vadd.f32 %v6608_v4, %v6562_v63  ;;  %v9237_v9 = vadd.f32 %v9181_v47, %v8885_v15  ;;  %v5777_v55 = vpop.f32.mrb[33].mxu0 }
 0x282   : > { %v9238_v54 = vadd.f32 %v5777_v55, %v3185_v23  ;;  %v6377_v23 = vpop.permute.xlu1 %6376 }
 0x283   : > { %v6610_v25 = vadd.f32 %v6609_v20, %v6563_v39  ;;  %6081 = vst [vmem:[%s11439_s15 + $0x108] sm:$0xff] %v9237_v9  ;;  %v6510_v0 = vadd.f32 %v6509_v5, %v6463_v24  ;;  %v6465_v27 = vsel %vm6417_vm7, %v9237_v9, 0.0  ;;  %v8888_v14 = vpop.f32.mrb[34].mxu1  ;;  %v6374_v9 = vpop.permute.xlu0 %6373  ;;  %vm6429_vm5 = vcmp.eq.s32.totalorder %v6377_v23, 1 }
 0x284   : > { %6080 = vst [vmem:[%s11439_s15 + $0x100] sm:$0xff] %v9238_v54  ;;  %v6464_v29 = vsel %vm6416_vm1, %v9238_v54, 0.0  ;;  %v9184_v13 = vpop.f32.mrb[34].mxu0  ;;  %v3195_v3 = vpop.f32.mrb[35].mxu1  ;;  %v6566_v26 = vmul.f32 %v6465_v27, %v6465_v27  ;;  %vm6428_vm4 = vcmp.eq.s32.totalorder %v6374_v9, 1  ;;  %vm6634_vm1 = vcmask 1040384  }
 0x285   : > { %v6511_v41 = vadd.f32 %v6510_v0, %v6464_v29  ;;  %v6565_v10 = vmul.f32 %v6464_v29, %v6464_v29  ;;  %v6611_v30 = vadd.f32 %v6610_v25, %v6564_v36  ;;  %v9239_v11 = vadd.f32 %v9184_v13, %v8888_v14  ;;  %v5787_v16 = vpop.f32.mrb[35].mxu0 }
 0x286   : > { %v9240_v45 = vadd.f32 %v5787_v16, %v3195_v3  ;;  %vm6636_vm7 = vcmask 1041408  }
 0x287   : > { %v6612_v8 = vadd.f32 %v6611_v30, %v6565_v10  ;;  %6083 = vst [vmem:[%s11439_s15 + $0x118] sm:$0xff] %v9239_v11  ;;  %v6512_v56 = vadd.f32 %v6511_v41, %v6465_v27  ;;  %v6467_v18 = vsel %vm6419_vm9, %v9239_v11, 0.0  ;;  %v8891_v17 = vpop.f32.mrb[36].mxu1 }
 0x288   : > { %6082 = vst [vmem:[%s11439_s15 + $0x110] sm:$0xff] %v9240_v45  ;;  %v6466_v42 = vsel %vm6418_vm8, %v9240_v45, 0.0  ;;  %v9187_v1 = vpop.f32.mrb[36].mxu0  ;;  %v3205_v58 = vpop.f32.mrb[37].mxu1  ;;  %v6568_v57 = vmul.f32 %v6467_v18, %v6467_v18 }
 0x289   : > { %v6513_v6 = vadd.f32 %v6512_v56, %v6466_v42  ;;  %v6567_v59 = vmul.f32 %v6466_v42, %v6466_v42  ;;  %v6613_v31 = vadd.f32 %v6612_v8, %v6566_v26  ;;  %v9241_v43 = vadd.f32 %v9187_v1, %v8891_v17  ;;  %v5797_v46 = vpop.f32.mrb[37].mxu0 }
 0x28a   : > { %v9242_v19 = vadd.f32 %v5797_v46, %v3205_v58  ;;  %v6383_v58 = vpop.permute.xlu1 %6382 }
 0x28b   : > { %v6614_v28 = vadd.f32 %v6613_v31, %v6567_v59  ;;  %6085 = vst [vmem:[%s11439_s15 + $0x128] sm:$0xff] %v9241_v43  ;;  %v6514_v51 = vadd.f32 %v6513_v6, %v6467_v18  ;;  %v6469_v22 = vsel %vm6421_vm11, %v9241_v43, 0.0  ;;  %v8894_v62 = vpop.f32.mrb[38].mxu1  ;;  %v6380_v43 = vpop.permute.xlu0 %6379  ;;  %vm6431_vm6 = vcmp.eq.s32.totalorder %v6383_v58, 1 }
 0x28c   : > { %6084 = vst [vmem:[%s11439_s15 + $0x120] sm:$0xff] %v9242_v19  ;;  %v6468_v33 = vsel %vm6420_vm10, %v9242_v19, 0.0  ;;  %v9190_v48 = vpop.f32.mrb[38].mxu0  ;;  %v3215_v61 = vpop.f32.mrb[39].mxu1  ;;  %v6570_v2 = vmul.f32 %v6469_v22, %v6469_v22  ;;  %vm6430_vm0 = vcmp.eq.s32.totalorder %v6380_v43, 1 }
 0x28d   : > { %v6515_v21 = vadd.f32 %v6514_v51, %v6468_v33  ;;  %v6569_v44 = vmul.f32 %v6468_v33, %v6468_v33  ;;  %v6615_v12 = vadd.f32 %v6614_v28, %v6568_v57  ;;  %v9243_v53 = vadd.f32 %v9190_v48, %v8894_v62  ;;  %v5807_v34 = vpop.f32.mrb[39].mxu0 }
 0x28e   : > { %v9244_v37 = vadd.f32 %v5807_v34, %v3215_v61 }
 0x28f   : > { %v6616_v60 = vadd.f32 %v6615_v12, %v6569_v44  ;;  %6087 = vst [vmem:[%s11439_s15 + $0x138] sm:$0xff] %v9243_v53  ;;  %v6516_v63 = vadd.f32 %v6515_v21, %v6469_v22  ;;  %v6471_v4 = vsel %vm6423_vm13, %v9243_v53, 0.0  ;;  %v8897_v24 = vpop.f32.mrb[40].mxu1 }
 0x290   : > { %6086 = vst [vmem:[%s11439_s15 + $0x130] sm:$0xff] %v9244_v37  ;;  %v6470_v35 = vsel %vm6422_vm12, %v9244_v37, 0.0  ;;  %v9193_v52 = vpop.f32.mrb[40].mxu0  ;;  %v3225_v20 = vpop.f32.mrb[41].mxu1  ;;  %v6572_v55 = vmul.f32 %v6471_v4, %v6471_v4 }
 0x291   : > { %v6517_v15 = vadd.f32 %v6516_v63, %v6470_v35  ;;  %v6571_v47 = vmul.f32 %v6470_v35, %v6470_v35  ;;  %v6617_v5 = vadd.f32 %v6616_v60, %v6570_v2  ;;  %v9245_v39 = vadd.f32 %v9193_v52, %v8897_v24  ;;  %v5817_v7 = vpop.f32.mrb[41].mxu0 }
 0x292   : > { %v9246_v32 = vadd.f32 %v5817_v7, %v3225_v20 }
 0x293   : > { %v6618_v54 = vadd.f32 %v6617_v5, %v6571_v47  ;;  %6089 = vst [vmem:[%s11439_s15 + $0x148] sm:$0xff] %v9245_v39  ;;  %v6518_v36 = vadd.f32 %v6517_v15, %v6471_v4  ;;  %v6473_v25 = vsel %vm6425_vm15, %v9245_v39, 0.0  ;;  %v8900_v27 = vpop.f32.mrb[42].mxu1 }
 0x294   : > { %6088 = vst [vmem:[%s11439_s15 + $0x140] sm:$0xff] %v9246_v32  ;;  %v6472_v0 = vsel %vm6424_vm14, %v9246_v32, 0.0  ;;  %v9196_v29 = vpop.f32.mrb[42].mxu0  ;;  %v3235_v10 = vpop.f32.mrb[43].mxu1  ;;  %v6574_v11 = vmul.f32 %v6473_v25, %v6473_v25 }
 0x295   : > { %v6519_v14 = vadd.f32 %v6518_v36, %v6472_v0  ;;  %v6573_v13 = vmul.f32 %v6472_v0, %v6472_v0  ;;  %v6619_v41 = vadd.f32 %v6618_v54, %v6572_v55  ;;  %v9247_v49 = vadd.f32 %v9196_v29, %v8900_v27  ;;  %v5827_v30 = vpop.f32.mrb[43].mxu0 }
 0x296   : > { %v9248_v40 = vadd.f32 %v5827_v30, %v3235_v10 }
 0x297   : > { %v6620_v3 = vadd.f32 %v6619_v41, %v6573_v13  ;;  %6091 = vst [vmem:[%s11439_s15 + $0x158] sm:$0xff] %v9247_v49  ;;  %v6520_v16 = vadd.f32 %v6519_v14, %v6473_v25  ;;  %v6475_v45 = vsel %vm6427_vm3, %v9247_v49, 0.0  ;;  %v8903_v8 = vpop.f32.mrb[44].mxu1 }
 0x298   : > { %6090 = vst [vmem:[%s11439_s15 + $0x150] sm:$0xff] %v9248_v40  ;;  %v6474_v26 = vsel %vm6426_vm2, %v9248_v40, 0.0  ;;  %v9199_v56 = vpop.f32.mrb[44].mxu0  ;;  %v3245_v6 = vpop.f32.mrb[45].mxu1  ;;  %v6576_v46 = vmul.f32 %v6475_v45, %v6475_v45 }
 0x299   : > { %v6521_v18 = vadd.f32 %v6520_v16, %v6474_v26  ;;  %v6575_v42 = vmul.f32 %v6474_v26, %v6474_v26  ;;  %v6621_v17 = vadd.f32 %v6620_v3, %v6574_v11  ;;  %v9249_v1 = vadd.f32 %v9199_v56, %v8903_v8  ;;  %v5837_v59 = vpop.f32.mrb[45].mxu0 }
 0x29a   : > { %v9250_v31 = vadd.f32 %v5837_v59, %v3245_v6 }
 0x29b   : > { %v6622_v19 = vadd.f32 %v6621_v17, %v6575_v42  ;;  %6093 = vst [vmem:[%s11439_s15 + $0x168] sm:$0xff] %v9249_v1  ;;  %v6522_v50 = vadd.f32 %v6521_v18, %v6475_v45  ;;  %v6477_v38 = vsel %vm6429_vm5, %v9249_v1, 0.0  ;;  %v8906_v28 = vpop.f32.mrb[46].mxu1 }
 0x29c   : > { %6092 = vst [vmem:[%s11439_s15 + $0x160] sm:$0xff] %v9250_v31  ;;  %v6476_v57 = vsel %vm6428_vm4, %v9250_v31, 0.0  ;;  %v9202_v51 = vpop.f32.mrb[46].mxu0  ;;  %v3255_v21 = vpop.f32.mrb[47].mxu1  ;;  %v6578_v53 = vmul.f32 %v6477_v38, %v6477_v38 }
 0x29d   : > { %v6523_v22 = vadd.f32 %v6522_v50, %v6476_v57  ;;  %v6577_v33 = vmul.f32 %v6476_v57, %v6476_v57  ;;  %v6623_v62 = vadd.f32 %v6622_v19, %v6576_v46  ;;  %v9251_v48 = vadd.f32 %v9202_v51, %v8906_v28  ;;  %v5847_v44 = vpop.f32.mrb[47].mxu0 }
 0x29e   : > { %v9252_v12 = vadd.f32 %v5847_v44, %v3255_v21 }
 0x29f   : > { %v6624_v61 = vadd.f32 %v6623_v62, %v6577_v33  ;;  %6095 = vst [vmem:[%s11439_s15 + $0x178] sm:$0xff] %v9251_v48  ;;  %v6524_v34 = vadd.f32 %v6523_v22, %v6477_v38  ;;  %v6479_v37 = vsel %vm6431_vm6, %v9251_v48, 0.0 }
 0x2a0   : > { %6094 = vst [vmem:[%s11439_s15 + $0x170] sm:$0xff] %v9252_v12  ;;  %v6478_v2 = vsel %vm6430_vm0, %v9252_v12, 0.0  ;;  %v6580_v35 = vmul.f32 %v6479_v37, %v6479_v37 }
 0x2a1   : > { %v6525_v60 = vadd.f32 %v6524_v34, %v6478_v2  ;;  %v6579_v63 = vmul.f32 %v6478_v2, %v6478_v2  ;;  %v6625_v4 = vadd.f32 %v6624_v61, %v6578_v53 }
 0x2a3   : > { %v6526_v24 = vadd.f32 %v6525_v60, %v6479_v37  ;;  %v6626_v52 = vadd.f32 %v6625_v4, %v6579_v63 }
 0x2a5   : > { %v6527_v15 = vrot.slane %v6526_v24, 4  ;;  %v6627_v47 = vadd.f32 %v6626_v52, %v6580_v35 }
 0x2a7   : > { %v6528_v5 = vadd.f32 %v6527_v15, %v6526_v24  ;;  %v6628_v39 = vrot.slane %v6627_v47, 4 }
 0x2a9   : > { %v6529_v20 = vrot.slane %v6528_v5, 2  ;;  %v6629_v7 = vadd.f32 %v6628_v39, %v6627_v47 }
 0x2ab   : > { %v6530_v32 = vadd.f32 %v6529_v20, %v6528_v5  ;;  %v6630_v9 = vrot.slane %v6629_v7, 2 }
 0x2ad   : > { %v6531_v23 = vrot.slane %v6530_v32, 1  ;;  %v6631_v55 = vadd.f32 %v6630_v9, %v6629_v7 }
 0x2af   : > { %v6632_v54 = vrot.slane %v6631_v55, 1  ;;  %v6532_v36 = vadd.f32 %v6531_v23, %v6530_v32  ;;  %6652 = sbr.rel (!%p9790_p3) target bundleno = 719 (0x2cf), region = 36 }
 0x2b1   : > { %v6633_v25 = vadd.f32 %v6632_v54, %v6631_v55 }
 0x2b3   : > { %v6635_v0 = vsel %vm6634_vm1, %v6532_v36, %v6633_v25 }
 0x2b4   : > { %v6637_v27 = vsel %vm6636_vm7, %v6635_v0, 0.0 }
 0x2b5   : > { %6638 = vst [vmem:[%s261_s13] sm:$0xff] %v6637_v27 }
 0x2b6 LB: >> { %v6824_v29 = vld [vmem:[%s11439_s15] sm:$0xff]  ;;  %v6826_v14 = vld [vmem:[%s11439_s15 + $0x8] sm:$0xff]  ;;  %v6828_v13 = vld [vmem:[%s11439_s15 + $0x10] sm:$0xff]  ;;  %s6818_s27 = sadd.s32 1, %s9730_s27   ;;  %s9730_s27 = sphi %s11609_s27, %s6818_s27   ;;  %s9726_s26 = sphi %s11894_s26, %s11895_s26  }
 0x2b7   : >> { %6825 = vst [vmem:[%s9726_s26] sm:$0xff] %v6824_v29  ;;  %6827 = vst [vmem:[%s9726_s26 + $0x8] sm:$0xff] %v6826_v14  ;;  %v6830_v41 = vld [vmem:[%s11439_s15 + $0x18] sm:$0xff]  ;;  %v6832_v49 = vld [vmem:[%s11439_s15 + $0x20] sm:$0xff]  ;;  %p6817_p9 = scmp.ge.s32.totalorder %s6818_s27, 1 }
 0x2b8   : >> { %6829 = vst [vmem:[%s9726_s26 + $0x10] sm:$0xff] %v6828_v13  ;;  %v6834_v10 = vld [vmem:[%s11439_s15 + $0x28] sm:$0xff]  ;;  %6831 = vst [vmem:[%s9726_s26 + $0x18] sm:$0xff] %v6830_v41  ;;  %v6836_v30 = vld [vmem:[%s11439_s15 + $0x30] sm:$0xff] }
 0x2b9   : >> { %6833 = vst [vmem:[%s9726_s26 + $0x20] sm:$0xff] %v6832_v49  ;;  %6835 = vst [vmem:[%s9726_s26 + $0x28] sm:$0xff] %v6834_v10  ;;  %v6838_v40 = vld [vmem:[%s11439_s15 + $0x38] sm:$0xff]  ;;  %v6840_v11 = vld [vmem:[%s11439_s15 + $0x40] sm:$0xff] }
 0x2ba   : >> { %6837 = vst [vmem:[%s9726_s26 + $0x30] sm:$0xff] %v6836_v30  ;;  %6839 = vst [vmem:[%s9726_s26 + $0x38] sm:$0xff] %v6838_v40  ;;  %v6842_v3 = vld [vmem:[%s11439_s15 + $0x48] sm:$0xff]  ;;  %v6844_v16 = vld [vmem:[%s11439_s15 + $0x50] sm:$0xff] }
 0x2bb   : >> { %6841 = vst [vmem:[%s9726_s26 + $0x40] sm:$0xff] %v6840_v11  ;;  %v6846_v45 = vld [vmem:[%s11439_s15 + $0x58] sm:$0xff]  ;;  %6843 = vst [vmem:[%s9726_s26 + $0x48] sm:$0xff] %v6842_v3  ;;  %v6848_v26 = vld [vmem:[%s11439_s15 + $0x60] sm:$0xff] }
 0x2bc   : >> { %6845 = vst [vmem:[%s9726_s26 + $0x50] sm:$0xff] %v6844_v16  ;;  %6847 = vst [vmem:[%s9726_s26 + $0x58] sm:$0xff] %v6846_v45  ;;  %v6850_v8 = vld [vmem:[%s11439_s15 + $0x68] sm:$0xff]  ;;  %v6852_v56 = vld [vmem:[%s11439_s15 + $0x70] sm:$0xff] }
 0x2bd   : >> { %6849 = vst [vmem:[%s9726_s26 + $0x60] sm:$0xff] %v6848_v26  ;;  %6851 = vst [vmem:[%s9726_s26 + $0x68] sm:$0xff] %v6850_v8  ;;  %v6854_v18 = vld [vmem:[%s11439_s15 + $0x78] sm:$0xff]  ;;  %v6856_v42 = vld [vmem:[%s11439_s15 + $0x80] sm:$0xff] }
 0x2be   : >> { %6853 = vst [vmem:[%s9726_s26 + $0x70] sm:$0xff] %v6852_v56  ;;  %v6858_v17 = vld [vmem:[%s11439_s15 + $0x88] sm:$0xff]  ;;  %6855 = vst [vmem:[%s9726_s26 + $0x78] sm:$0xff] %v6854_v18  ;;  %v6860_v1 = vld [vmem:[%s11439_s15 + $0x90] sm:$0xff] }
 0x2bf   : >> { %6857 = vst [vmem:[%s9726_s26 + $0x80] sm:$0xff] %v6856_v42  ;;  %6859 = vst [vmem:[%s9726_s26 + $0x88] sm:$0xff] %v6858_v17  ;;  %v6862_v6 = vld [vmem:[%s11439_s15 + $0x98] sm:$0xff]  ;;  %v6864_v59 = vld [vmem:[%s11439_s15 + $0xa0] sm:$0xff] }
 0x2c0   : >> { %6861 = vst [vmem:[%s9726_s26 + $0x90] sm:$0xff] %v6860_v1  ;;  %6863 = vst [vmem:[%s9726_s26 + $0x98] sm:$0xff] %v6862_v6  ;;  %v6866_v31 = vld [vmem:[%s11439_s15 + $0xa8] sm:$0xff]  ;;  %v6868_v43 = vld [vmem:[%s11439_s15 + $0xb0] sm:$0xff] }
 0x2c1   : >> { %6865 = vst [vmem:[%s9726_s26 + $0xa0] sm:$0xff] %v6864_v59  ;;  %v6870_v58 = vld [vmem:[%s11439_s15 + $0xb8] sm:$0xff]  ;;  %6867 = vst [vmem:[%s9726_s26 + $0xa8] sm:$0xff] %v6866_v31  ;;  %v6872_v46 = vld [vmem:[%s11439_s15 + $0xc0] sm:$0xff] }
 0x2c2   : >> { %6869 = vst [vmem:[%s9726_s26 + $0xb0] sm:$0xff] %v6868_v43  ;;  %6871 = vst [vmem:[%s9726_s26 + $0xb8] sm:$0xff] %v6870_v58  ;;  %v6874_v19 = vld [vmem:[%s11439_s15 + $0xc8] sm:$0xff]  ;;  %v6876_v50 = vld [vmem:[%s11439_s15 + $0xd0] sm:$0xff] }
 0x2c3   : >> { %6873 = vst [vmem:[%s9726_s26 + $0xc0] sm:$0xff] %v6872_v46  ;;  %6875 = vst [vmem:[%s9726_s26 + $0xc8] sm:$0xff] %v6874_v19  ;;  %v6878_v38 = vld [vmem:[%s11439_s15 + $0xd8] sm:$0xff]  ;;  %v6880_v57 = vld [vmem:[%s11439_s15 + $0xe0] sm:$0xff] }
 0x2c4   : >> { %6877 = vst [vmem:[%s9726_s26 + $0xd0] sm:$0xff] %v6876_v50  ;;  %v6882_v28 = vld [vmem:[%s11439_s15 + $0xe8] sm:$0xff]  ;;  %6879 = vst [vmem:[%s9726_s26 + $0xd8] sm:$0xff] %v6878_v38  ;;  %v6884_v51 = vld [vmem:[%s11439_s15 + $0xf0] sm:$0xff] }
 0x2c5   : >> { %6881 = vst [vmem:[%s9726_s26 + $0xe0] sm:$0xff] %v6880_v57  ;;  %6883 = vst [vmem:[%s9726_s26 + $0xe8] sm:$0xff] %v6882_v28  ;;  %v6886_v22 = vld [vmem:[%s11439_s15 + $0xf8] sm:$0xff]  ;;  %v6888_v33 = vld [vmem:[%s11439_s15 + $0x100] sm:$0xff] }
 0x2c6   : >> { %6885 = vst [vmem:[%s9726_s26 + $0xf0] sm:$0xff] %v6884_v51  ;;  %6887 = vst [vmem:[%s9726_s26 + $0xf8] sm:$0xff] %v6886_v22  ;;  %v6890_v62 = vld [vmem:[%s11439_s15 + $0x108] sm:$0xff]  ;;  %v6892_v48 = vld [vmem:[%s11439_s15 + $0x110] sm:$0xff] }
 0x2c7   : >> { %6889 = vst [vmem:[%s9726_s26 + $0x100] sm:$0xff] %v6888_v33  ;;  %v6894_v21 = vld [vmem:[%s11439_s15 + $0x118] sm:$0xff]  ;;  %6891 = vst [vmem:[%s9726_s26 + $0x108] sm:$0xff] %v6890_v62  ;;  %v6896_v44 = vld [vmem:[%s11439_s15 + $0x120] sm:$0xff] }
 0x2c8   : >> { %6893 = vst [vmem:[%s9726_s26 + $0x110] sm:$0xff] %v6892_v48  ;;  %6895 = vst [vmem:[%s9726_s26 + $0x118] sm:$0xff] %v6894_v21  ;;  %v6898_v12 = vld [vmem:[%s11439_s15 + $0x128] sm:$0xff]  ;;  %v6900_v53 = vld [vmem:[%s11439_s15 + $0x130] sm:$0xff]  ;;  %6820 = sbr.rel (!%p6817_p9) target bundleno = 694 (0x2b6), region = 154 }
 0x2c9   : >> { %6897 = vst [vmem:[%s9726_s26 + $0x120] sm:$0xff] %v6896_v44  ;;  %6899 = vst [vmem:[%s9726_s26 + $0x128] sm:$0xff] %v6898_v12  ;;  %v6902_v61 = vld [vmem:[%s11439_s15 + $0x138] sm:$0xff]  ;;  %v6904_v34 = vld [vmem:[%s11439_s15 + $0x140] sm:$0xff] }
 0x2ca   : >> { %6901 = vst [vmem:[%s9726_s26 + $0x130] sm:$0xff] %v6900_v53  ;;  %v6906_v37 = vld [vmem:[%s11439_s15 + $0x148] sm:$0xff]  ;;  %6903 = vst [vmem:[%s9726_s26 + $0x138] sm:$0xff] %v6902_v61  ;;  %v6908_v2 = vld [vmem:[%s11439_s15 + $0x150] sm:$0xff] }
 0x2cb   : >> { %6905 = vst [vmem:[%s9726_s26 + $0x140] sm:$0xff] %v6904_v34  ;;  %6907 = vst [vmem:[%s9726_s26 + $0x148] sm:$0xff] %v6906_v37  ;;  %v6910_v60 = vld [vmem:[%s11439_s15 + $0x158] sm:$0xff]  ;;  %v6912_v63 = vld [vmem:[%s11439_s15 + $0x160] sm:$0xff] }
 0x2cc   : >> { %6909 = vst [vmem:[%s9726_s26 + $0x150] sm:$0xff] %v6908_v2  ;;  %6911 = vst [vmem:[%s9726_s26 + $0x158] sm:$0xff] %v6910_v60  ;;  %v6914_v4 = vld [vmem:[%s11439_s15 + $0x168] sm:$0xff]  ;;  %v6916_v35 = vld [vmem:[%s11439_s15 + $0x170] sm:$0xff] }
 0x2cd   : >> { %6913 = vst [vmem:[%s9726_s26 + $0x160] sm:$0xff] %v6912_v63  ;;  %v6918_v24 = vld [vmem:[%s11439_s15 + $0x178] sm:$0xff]  ;;  %6915 = vst [vmem:[%s9726_s26 + $0x168] sm:$0xff] %v6914_v4 }
 0x2ce   : >> { %6917 = vst [vmem:[%s9726_s26 + $0x170] sm:$0xff] %v6916_v35  ;;  %6919 = vst [vmem:[%s9726_s26 + $0x178] sm:$0xff] %v6918_v24  ;;  %s11895_s26 = smov %s7037_s24 }
 0x2cf PF: > { %s15_s19 = sadd.s32 1, %s9722_s19   ;;  %s11896_s15 = smov %s9710_s16 }
 0x2d0   : > { %p12_p10 = scmp.ge.s32.totalorder %s15_s19, 4   ;;  %s11897_s16 = smov %s9799_s25 }
 0x2d1   : > { %s11898_s17 = smov %s9718_s18  ;;  %s11899_s18 = smov %s11901_s21 }
 0x2d2   :  { %14 = sbr.rel (!%p12_p10) target bundleno = 3 (0x3), region = 176 }

</bundles_post_ra>
